<compile_context>
chip_gen: v5e
topology: v5e:2x2
jax: 0.10.0
libtpu: 0.0.40
codegen_flags: <defaults>
</compile_context>

<pallas_src>
import functools

import numpy as np
import jax
import jax.numpy as jnp
from jax.experimental import pallas as pl
from jax.experimental.pallas import tpu as pltpu

# ----------------------------- small config ---------------------------------
B = 2
N_EVENTS = 4                 # original: 16
N_SAMPLES = 4096             # original: 32768
RESONANCE_SIZE = 4096        # original: 32768
IMPULSE_SIZE = 2048          # original: 16384
SAMPLERATE = 22050
CONTEXT_DIM = 16
LATENT_DIM = 64              # original: 256
UNET_CHANNELS = 128          # original: 1024
ENC_CHANNELS = 512           # original: 4096
STFT_WIN = 256               # original: 2048
STFT_HOP = 128               # original: 256
N_FRAMES = N_SAMPLES // STFT_HOP        # 32 (original: 128)
N_ATOMS = 128                # original: 2048
N_PIECEWISE = 4
RES_FRAMES = RESONANCE_SIZE // 256      # 16 (original: 128)
COARSE_COEFFS = 257
IMP_FRAMES = IMPULSE_SIZE // 256        # 8
NOISE_WIN = 128
NOISE_STEP = 64
N_NOISE_FRAMES = IMPULSE_SIZE // NOISE_STEP   # 32
NOISE_COEFFS = NOISE_WIN // 2 + 1             # 65
BN_SCALE = 1.0 / np.sqrt(1.0 + 1e-5)          # eval-mode BatchNorm (running stats 0/1)


def _round_up(x, m):
    return ((x + m - 1) // m) * m


IMP_FILT_N = N_NOISE_FRAMES * NOISE_COEFFS          # 2080
IMP_FILT_NP = _round_up(IMP_FILT_N, 512)            # 2560 (lane-dense, tn=512)
RES_FILT_N = RES_FRAMES * COARSE_COEFFS             # 4112
RES_FILT_NP = _round_up(RES_FILT_N, 512)            # 4608


# ============================ Pallas kernels =================================

def _matmul_epilogue_kernel(x_ref, w_ref, aux_ref, o_ref, *, act):
    """out = act(x @ w + bias) * scale + shift  (aux rows: [bias, scale, shift])."""
    x = x_ref[...].astype(jnp.bfloat16)           # bf16 MXU operands, f32 accumulate
    acc = jnp.dot(x, w_ref[...], preferred_element_type=jnp.float32)
    aux = aux_ref[...]
    acc = acc + aux[0:1, :]
    if act == "leaky":
        acc = jnp.where(acc >= 0.0, acc, 0.2 * acc)
    elif act == "sigmoid":
        acc = 0.5 * (jnp.tanh(0.5 * acc) + 1.0)   # numerically stable sigmoid
    elif act == "abs":
        acc = jnp.abs(acc)
    acc = acc * aux[1:2, :] + aux[2:3, :]
    o_ref[...] = acc


def pallas_linear(x, w, aux, *, act="none"):
    """Fused linear; grid tiles the output (N) axis when it is wide enough."""
    M, K = x.shape
    K2, N = w.shape
    assert K == K2 and aux.shape == (3, N)
    tn = N
    for cand in (512, 256, 128):
        if N % cand == 0 and N // cand >= 2:      # >=2 tiles so v7x's 2 TCs both work
            tn = cand
            break
    grid = (N // tn,)
    return pl.pallas_call(
        functools.partial(_matmul_epilogue_kernel, act=act),
        out_shape=jax.ShapeDtypeStruct((M, N), jnp.float32),
        grid_spec=pltpu.PrefetchScalarGridSpec(
            num_scalar_prefetch=0,
            grid=grid,
            in_specs=[
                pl.BlockSpec((M, K), lambda j: (0, 0)),
                pl.BlockSpec((K, tn), lambda j: (0, j)),
                pl.BlockSpec((3, tn), lambda j: (0, j)),
            ],
            out_specs=pl.BlockSpec((M, tn), lambda j: (0, j)),
        ),
        compiler_params=pltpu.CompilerParams(dimension_semantics=("parallel",)),
    )(x, w, aux)


def pallas_matmul_pair(x_pair, w_pair, aux, *, act="leaky"):
    """Two matmuls (e.g. conv-transpose even/odd phases) as one call, grid=(2,)."""
    G, M, K = x_pair.shape
    G2, K2, N = w_pair.shape
    assert G == G2 and K == K2 and aux.shape == (3, N)
    return pl.pallas_call(
        functools.partial(_matmul_epilogue_kernel, act=act),
        out_shape=jax.ShapeDtypeStruct((G, M, N), jnp.float32),
        grid_spec=pltpu.PrefetchScalarGridSpec(
            num_scalar_prefetch=0,
            grid=(G,),
            in_specs=[
                pl.BlockSpec((None, M, K), lambda g: (g, 0, 0)),
                pl.BlockSpec((None, K, N), lambda g: (g, 0, 0)),
                pl.BlockSpec((3, N), lambda g: (0, 0)),
            ],
            out_specs=pl.BlockSpec((None, M, N), lambda g: (g, 0, 0)),
        ),
        compiler_params=pltpu.CompilerParams(dimension_semantics=("parallel",)),
    )(x_pair, w_pair, aux)


def _res_select_kernel(lat_ref, wsel_ref, bsel_ref, atoms_ref, decay_ref, o_ref):
    """latent @ sel_w -> softmax -> @ atoms -> * decay   (one piecewise branch)."""
    lat = lat_ref[...].astype(jnp.bfloat16)
    logits = jnp.dot(lat, wsel_ref[...], preferred_element_type=jnp.float32)
    logits = logits + bsel_ref[...]
    m = jnp.max(logits, axis=-1, keepdims=True)
    e = jnp.exp(logits - m)
    sel = e / jnp.sum(e, axis=-1, keepdims=True)          # denom >= 1, safe
    res = jnp.dot(sel.astype(jnp.bfloat16), atoms_ref[...],
                  preferred_element_type=jnp.float32)
    o_ref[...] = res * decay_ref[...]


def pallas_select_resonance(lat, w_sel, b_sel, atoms, decay):
    BK, L = lat.shape
    P, L2, A = w_sel.shape
    A2, RES = atoms.shape
    assert L == L2 and A == A2 and decay.shape == (BK, RES)
    return pl.pallas_call(
        _res_select_kernel,
        out_shape=jax.ShapeDtypeStruct((P, BK, RES), jnp.float32),
        grid_spec=pltpu.PrefetchScalarGridSpec(
            num_scalar_prefetch=0,
            grid=(P,),
            in_specs=[
                pl.BlockSpec((BK, L), lambda p_: (0, 0)),
                pl.BlockSpec((None, L, A), lambda p_: (p_, 0, 0)),
                pl.BlockSpec((None, 1, A), lambda p_: (p_, 0, 0)),
                pl.BlockSpec((A, RES), lambda p_: (0, 0)),
                pl.BlockSpec((BK, RES), lambda p_: (0, 0)),
            ],
            out_specs=pl.BlockSpec((None, BK, RES), lambda p_: (p_, 0, 0)),
        ),
        compiler_params=pltpu.CompilerParams(dimension_semantics=("parallel",)),
    )(lat, w_sel, b_sel, atoms, decay)


def _unit_norm_kernel(x_ref, o_ref):
    x = x_ref[...]
    s = jnp.sum(x * x, axis=-1, keepdims=True)
    o_ref[...] = x * jax.lax.rsqrt(jnp.maximum(s, 1e-12))


def pallas_unit_norm(x):
    # Call sites are already aligned: (128, 512) and (8, 4096).
    M, N = x.shape
    return pl.pallas_call(
        _unit_norm_kernel, out_shape=jax.ShapeDtypeStruct((M, N), jnp.float32)
    )(x.astype(jnp.float32))


# =============================== JAX glue ====================================
# TODO(synk): FFT ops (stft / fft_convolve / rfft-domain filtering) have no
# Pallas equivalent on TPU; they stay in plain JAX.

def stft_mag(audio, win, hop):
    # TODO(synk): original `stft` helper not provided; assuming hann + |rfft|.
    Bn, n = audio.shape
    a = jnp.pad(audio, ((0, 0), (0, win)))
    n_frames = n // hop
    idx = jnp.arange(n_frames)[:, None] * hop + jnp.arange(win)[None, :]
    frames = a[:, idx] * jnp.hanning(win).astype(jnp.float32)
    # NOTE: like the PyTorch reference ([..., :1024] of 1025 bins) we drop the
    # Nyquist bin by slicing [:UNET_CHANNELS] downstream.
    return jnp.abs(jnp.fft.rfft(frames, axis=-1)).astype(jnp.float32)


def fft_convolve(a, b):
    n = a.shape[-1]
    pad_a = [(0, 0)] * (a.ndim - 1) + [(0, n)]
    pad_b = [(0, 0)] * (b.ndim - 1) + [(0, n)]
    spec = jnp.fft.rfft(jnp.pad(a, pad_a), axis=-1) * jnp.fft.rfft(jnp.pad(b, pad_b), axis=-1)
    return jnp.fft.irfft(spec, axis=-1)[..., :n].astype(jnp.float32)


def linear_interp(x, out_size):
    in_size = x.shape[-1]
    pos = (jnp.arange(out_size) + 0.5) * (in_size / out_size) - 0.5
    pos = jnp.clip(pos, 0.0, in_size - 1)
    lo = jnp.floor(pos).astype(jnp.int32)
    hi = jnp.minimum(lo + 1, in_size - 1)
    w = (pos - lo).astype(jnp.float32)
    return x[..., lo] * (1.0 - w) + x[..., hi] * w


def windowed_audio(x, win, step):
    n = x.shape[-1]
    xp = jnp.pad(x, [(0, 0)] * (x.ndim - 1) + [(0, win)])
    n_frames = n // step
    idx = jnp.arange(n_frames)[:, None] * step + jnp.arange(win)[None, :]
    return xp[..., idx] * jnp.hanning(win).astype(jnp.float32)


def overlap_add(frames, step):
    *lead, nf, win = frames.shape
    out_len = nf * step + win
    idx = jnp.arange(nf)[:, None] * step + jnp.arange(win)[None, :]
    out = jnp.zeros(tuple(lead) + (out_len,), frames.dtype)
    return out.at[..., idx].add(frames)


def sparsify2(encoded, n_to_keep):
    # TODO(synk): `sparsify2` source not provided; top-k over all (time, channel)
    # positions, returning (sparse map, per-event time impulses, channel one-hots).
    Bn, T, C = encoded.shape
    flat = encoded.reshape(Bn, T * C)
    vals, idx = jax.lax.top_k(flat, n_to_keep)
    t_idx = idx // C
    c_idx = idx % C
    one_hot = jax.nn.one_hot(c_idx, C, dtype=jnp.float32)
    packed = vals[..., None] * jax.nn.one_hot(t_idx, T, dtype=jnp.float32)
    sparse = jnp.zeros_like(flat).at[jnp.arange(Bn)[:, None], idx].set(vals)
    return sparse.reshape(Bn, T, C), packed, one_hot


def make_waves(n_samples, f0s, samplerate):
    f0s = np.asarray(f0s, np.float64) / (samplerate // 2)
    rps = f0s * np.pi
    radians = np.linspace(0.0, 1.0, n_samples)[None, :] * (rps[:, None] * n_samples)
    phase = radians / (2.0 * np.pi)
    saw = 2.0 * (phase - np.floor(phase + 0.5))
    sq = np.where((phase - np.floor(phase)) < 0.5, 1.0, -1.0)
    tri = 2.0 * np.abs(saw) - 1.0
    sin = np.sin(radians)
    waves = np.concatenate([saw, sq, tri, sin], axis=0).astype(np.float32)
    return jnp.asarray(waves)


# ============================ parameter init =================================

def _lin(key, fan_in, fan_out):
    kw, kb = jax.random.split(key)
    bound = 1.0 / np.sqrt(fan_in)
    w = jax.random.uniform(kw, (fan_in, fan_out), minval=-bound, maxval=bound)
    b = jax.random.uniform(kb, (fan_out,), minval=-bound, maxval=bound)
    return w.astype(jnp.float32), b.astype(jnp.float32)


def _make_aux(bias, n_cols, scale=1.0):
    """Pack [bias; scale; shift] into one (3, n_cols) operand (built once at init)."""
    a = jnp.zeros((3, n_cols), jnp.float32)
    a = a.at[0, : bias.shape[0]].set(bias.astype(jnp.float32))
    a = a.at[1, :].set(jnp.float32(scale))
    return a


def _pad_w(w, n_cols):
    k, n = w.shape
    return jnp.zeros((k, n_cols), jnp.bfloat16).at[:, :n].set(w.astype(jnp.bfloat16))


def init_params(key):
    keys = iter(jax.random.split(key, 64))
    p = {}
    C = UNET_CHANNELS
    # ---- UNet (Pallas weights: bf16, aux packed) ----
    w, b = _lin(next(keys), C, C)
    p["embed_spec_w"] = w.astype(jnp.bfloat16)
    p["embed_spec_aux"] = _make_aux(b, C)
    p["pos"] = jax.random.uniform(next(keys), (1, N_FRAMES, C), minval=-0.01, maxval=0.01)
    p["down_w"], p["down_aux"] = [], []
    for _ in range(5):
        w, b = _lin(next(keys), 3 * C, C)
        p["down_w"].append(w.astype(jnp.bfloat16))
        p["down_aux"].append(_make_aux(b, C, scale=BN_SCALE))
    p["up_w"], p["up_aux"] = [], []
    for _ in range(5):
        we, b = _lin(next(keys), 2 * C, C)
        wo, _ = _lin(next(keys), 2 * C, C)
        p["up_w"].append(jnp.stack([we, wo], axis=0).astype(jnp.bfloat16))   # (2, 2C, C)
        p["up_aux"].append(_make_aux(b, C, scale=BN_SCALE))
    w, b = _lin(next(keys), C, ENC_CHANNELS)
    p["proj_w"] = w.astype(jnp.bfloat16)
    p["proj_aux"] = _make_aux(b, ENC_CHANNELS)
    # ---- tiny heads (plain jnp.dot; XLA fuses them) ----
    p["ctx_mean_w"], p["ctx_mean_b"] = _lin(next(keys), ENC_CHANNELS, CONTEXT_DIM)
    p["ctx_std_w"], p["ctx_std_b"] = _lin(next(keys), ENC_CHANNELS, CONTEXT_DIM)
    p["from_ctx_w"], p["from_ctx_b"] = _lin(next(keys), CONTEXT_DIM, LATENT_DIM)
    p["embed_oh_w"], p["embed_oh_b"] = _lin(next(keys), ENC_CHANNELS, LATENT_DIM)
    p["amp_w"], p["amp_b"] = _lin(next(keys), LATENT_DIM, 1)
    # ---- GenerateImpulse ----
    p["imp_env_w"], p["imp_env_b"] = _lin(next(keys), LATENT_DIM, IMP_FRAMES)
    w, b = _lin(next(keys), LATENT_DIM, IMP_FILT_N)
    p["imp_filt_w"] = _pad_w(w, IMP_FILT_NP)          # padded once, lane-dense tiles
    p["imp_filt_aux"] = _make_aux(b, IMP_FILT_NP)
    # ---- ResonanceModel2 ----
    f0s = np.linspace(40, 4000, N_ATOMS // 4)
    p["atoms"] = make_waves(RESONANCE_SIZE, f0s, int(SAMPLERATE)).astype(jnp.bfloat16)
    p["res_decay_w"], p["res_decay_b"] = _lin(next(keys), LATENT_DIM, RES_FRAMES)
    w, b = _lin(next(keys), LATENT_DIM, RES_FILT_N)
    p["res_filt_w"] = _pad_w(w, RES_FILT_NP)
    p["res_filt_aux"] = _make_aux(b, RES_FILT_NP)
    p["res_mix_w"], p["res_mix_b"] = _lin(next(keys), LATENT_DIM, N_PIECEWISE * RES_FRAMES)
    sel_w, sel_b = [], []
    for _ in range(N_PIECEWISE):
        w, b = _lin(next(keys), LATENT_DIM, N_ATOMS)
        sel_w.append(w); sel_b.append(b)
    p["res_sel_w"] = jnp.stack(sel_w, axis=0).astype(jnp.bfloat16)     # (P, L, A)
    p["res_sel_b"] = jnp.stack(sel_b, axis=0)[:, None, :]              # (P, 1, A)
    p["res_fmix_w"], p["res_fmix_b"] = _lin(next(keys), LATENT_DIM, 2)
    # ---- ReverbGenerator (simplified) ----
    p["verb_ln_g"] = jnp.ones((CONTEXT_DIM,), jnp.float32)
    p["verb_ln_b"] = jnp.zeros((CONTEXT_DIM,), jnp.float32)
    p["verb_mix_w"], p["verb_mix_b"] = _lin(next(keys), CONTEXT_DIM, 2)
    p["verb_decay_w"], p["verb_decay_b"] = _lin(next(keys), CONTEXT_DIM, 1)
    p["verb_noise"] = jax.random.uniform(next(keys), (1, N_SAMPLES), minval=-1.0, maxval=1.0)
    return p


# ============================ model pieces ===================================

def down_layer(h, w, aux):
    # Conv1d(C, C, k=3, s=2, p=1) + LeakyReLU(0.2) + BatchNorm(eval) as im2col matmul.
    # TODO(synk): Dropout(0.1) treated as identity (eval mode).
    Bn, T, C = h.shape
    T_out = T // 2
    hp = jnp.pad(h, ((0, 0), (1, 1), (0, 0)))
    # im2col (3 strided slices); 3C = 384 is lane-aligned so no padding needed.
    cols = jnp.concatenate([hp[:, k:k + 2 * T_out:2, :] for k in range(3)], axis=-1)
    out = pallas_linear(cols.reshape(Bn * T_out, 3 * C), w, aux, act="leaky")
    return out.reshape(Bn, T_out, C)


def up_layer(h, w_pair, aux):
    # ConvTranspose1d(C, C, k=4, s=2, p=1) + LeakyReLU(0.2) + BatchNorm(eval):
    # even/odd output phases merged into ONE pallas_call with grid=(2,).
    Bn, T, C = h.shape
    x_prev = jnp.pad(h, ((0, 0), (1, 0), (0, 0)))[:, :T]
    x_next = jnp.pad(h, ((0, 0), (0, 1), (0, 0)))[:, 1:]
    even_in = jnp.concatenate([h, x_prev], axis=-1).reshape(Bn * T, 2 * C)
    odd_in = jnp.concatenate([x_next, h], axis=-1).reshape(Bn * T, 2 * C)
    pair = jnp.stack([even_in, odd_in], axis=0)                 # (2, B*T, 2C)
    out = pallas_matmul_pair(pair, w_pair, aux, act="leaky")    # (2, B*T, C)
    even = out[0].reshape(Bn, T, C)
    odd = out[1].reshape(Bn, T, C)
    return jnp.stack([even, odd], axis=2).reshape(Bn, 2 * T, C)


def unet_forward(p, spec):
    Bn, T, C = spec.shape
    h = pallas_linear(spec.reshape(Bn * T, C), p["embed_spec_w"], p["embed_spec_aux"])
    h = h.reshape(Bn, T, C) + p["pos"]
    context = {}
    for i in range(5):
        h = down_layer(h, p["down_w"][i], p["down_aux"][i])
        context[h.shape[1]] = h
    for i in range(5):
        h = up_layer(h, p["up_w"][i], p["up_aux"][i])
        if h.shape[1] in context:
            h = h + context[h.shape[1]]
    T_out = h.shape[1]
    enc = pallas_linear(h.reshape(Bn * T_out, C), p["proj_w"], p["proj_aux"])
    return enc.reshape(Bn, T_out, ENC_CHANNELS)


def generate_impulse(p, emb, key):
    # TODO(synk): original ConvUpsample / NoiseModel sources not provided; simplified
    # to a latent-conditioned filtered-noise generator (same env * noise structure).
    Bn, K, L = emb.shape
    lat = emb.reshape(Bn * K, L)
    env = (jnp.dot(lat, p["imp_env_w"]) + p["imp_env_b"]) ** 2            # tiny head -> jnp
    env = linear_interp(env, IMPULSE_SIZE)
    coeffs = pallas_linear(lat, p["imp_filt_w"], p["imp_filt_aux"], act="sigmoid")
    coeffs = coeffs[:, :IMP_FILT_N].reshape(Bn * K, N_NOISE_FRAMES, NOISE_COEFFS) ** 2
    noise = jax.random.uniform(key, (Bn * K, N_NOISE_FRAMES, NOISE_WIN), minval=-1.0, maxval=1.0)
    frames = jnp.fft.irfft(jnp.fft.rfft(noise, axis=-1) * coeffs, axis=-1)
    imp = overlap_add(frames.astype(jnp.float32), NOISE_STEP)[..., :IMPULSE_SIZE]
    imp = imp * env
    return imp.reshape(Bn, K, IMPULSE_SIZE)


def resonance_forward(p, emb, imp):
    Bn, K, L = emb.shape
    BK = Bn * K
    lat = emb.reshape(BK, L)
    imp_pad = jnp.pad(imp, ((0, 0), (0, 0), (0, RESONANCE_SIZE - imp.shape[-1])))
    imp_pad = imp_pad.reshape(BK, RESONANCE_SIZE)

    # decay chain (8x16 elements) stays in JAX: sigmoid -> affine -> log -> cumsum -> exp
    base = 0.02
    factor = (1.0 - base) * 0.99
    d = jax.nn.sigmoid(jnp.dot(lat, p["res_decay_w"]) + p["res_decay_b"])
    d = base + d * factor
    decay = jnp.exp(jnp.cumsum(jnp.log(1e-12 + d), axis=-1))
    decay = linear_interp(decay, RESONANCE_SIZE)                       # (BK, RES)

    # TODO(synk): `to_filter`/`to_mixture` are ConvUpsample stacks in the original;
    # replaced with direct latent->frames linears (same shapes / nonlinearities).
    filt = pallas_linear(lat, p["res_filt_w"], p["res_filt_aux"], act="sigmoid")
    filt = filt[:, :RES_FILT_N].reshape(BK, RES_FRAMES, COARSE_COEFFS)

    # Fused: selections -> softmax -> atoms matmul -> decay envelope (grid over P).
    res_all = pallas_select_resonance(lat, p["res_sel_w"], p["res_sel_b"],
                                      p["atoms"], decay)               # (P, BK, RES)
    convs = fft_convolve(res_all, imp_pad[None, :, :])                 # (P, BK, RES)

    mx = (jnp.dot(lat, p["res_mix_w"]) + p["res_mix_b"]).reshape(BK, N_PIECEWISE, RES_FRAMES)
    mx = linear_interp(mx, RESONANCE_SIZE)
    mx = jax.nn.softmax(mx, axis=1)
    final_convs = jnp.sum(mx * jnp.transpose(convs, (1, 0, 2)), axis=1)   # (BK, RES)

    win = windowed_audio(final_convs, 512, 256)                        # (BK, RES/256, 512)
    wshape = win.shape
    win = pallas_unit_norm(win.reshape(-1, 512)).reshape(wshape)
    spec = jnp.fft.rfft(win, axis=-1) * filt
    win2 = jnp.fft.irfft(spec, axis=-1).astype(jnp.float32)
    final_convs = overlap_add(win2, 256)[..., :RESONANCE_SIZE]

    fmx = jax.nn.softmax(jnp.dot(lat, p["res_fmix_w"]) + p["res_fmix_b"], axis=-1)
    final = final_convs * fmx[:, 0:1] + imp_pad * fmx[:, 1:2]
    return final.reshape(Bn, K, RESONANCE_SIZE)


def reverb_forward(p, dense, dry):
    # TODO(synk): ReverbGenerator source not provided; simplified to a context-conditioned
    # exponentially-decaying-noise impulse response with a learned dry/wet mix.
    mu = jnp.mean(dense, axis=-1, keepdims=True)
    var = jnp.var(dense, axis=-1, keepdims=True)
    ln = (dense - mu) / jnp.sqrt(var + 1e-5) * p["verb_ln_g"] + p["verb_ln_b"]
    mix = jax.nn.softmax(jnp.dot(ln, p["verb_mix_w"]) + p["verb_mix_b"], axis=-1)
    rate = jax.nn.softplus(jnp.dot(ln, p["verb_decay_w"]) + p["verb_decay_b"]) + 1.0
    t = jnp.arange(N_SAMPLES, dtype=jnp.float32) / SAMPLERATE
    ir = p["verb_noise"] * jnp.exp(-t[None, :] * rate)                 # (B, n_samples)
    wet = fft_convolve(dry, ir[:, None, :])
    return dry * mix[:, None, 0:1] + wet * mix[:, None, 1:2]


def generate(p, encoded, one_hot, packed, dense, key):
    Bn, K, ENC = one_hot.shape
    proj = jnp.dot(dense, p["from_ctx_w"]) + p["from_ctx_b"]
    oh = jnp.dot(one_hot.reshape(Bn * K, ENC), p["embed_oh_w"]) + p["embed_oh_b"]
    emb = proj[:, None, :] + oh.reshape(Bn, K, LATENT_DIM)

    imp = generate_impulse(p, emb, key)
    mixed = resonance_forward(p, emb, imp)
    mixed = pallas_unit_norm(mixed.reshape(Bn * K, RESONANCE_SIZE)).reshape(Bn, K, RESONANCE_SIZE)
    amps = jnp.abs(jnp.dot(emb.reshape(Bn * K, LATENT_DIM), p["amp_w"]) + p["amp_b"])
    mixed = mixed * amps.reshape(Bn, K, 1)

    final = jnp.pad(mixed, ((0, 0), (0, 0), (0, N_SAMPLES - RESONANCE_SIZE)))
    stride = N_SAMPLES // packed.shape[-1]
    up = jnp.zeros((Bn, K, N_SAMPLES), jnp.float32).at[:, :, ::stride].set(packed)
    final = fft_convolve(final, up)[..., :N_SAMPLES]
    final = reverb_forward(p, dense, final)
    return final, imp


def model_forward(p, audio, key):
    k_noise, k_imp = jax.random.split(key, 2)
    spec = stft_mag(audio[:, 0, :], STFT_WIN, STFT_HOP)[:, :, :UNET_CHANNELS]   # (B, T, C)
    encoded = unet_forward(p, spec)                                             # (B, T, ENC)
    dense_feat = jnp.mean(encoded, axis=1)                                      # mean over time
    mean = jnp.dot(dense_feat, p["ctx_mean_w"]) + p["ctx_mean_b"]
    std = jnp.dot(dense_feat, p["ctx_std_w"]) + p["ctx_std_b"]
    dense = mean + jax.random.normal(k_noise, mean.shape) * std
    encoded = jnp.maximum(encoded, 0.0)
    enc_sparse, packed, one_hot = sparsify2(encoded, N_EVENTS)
    final, imp = generate(p, enc_sparse, one_hot, packed, dense, k_imp)
    return final, enc_sparse, imp


# ================================= main ======================================

if __name__ == "__main__":
    root = jax.random.PRNGKey(0)
    k_params, k_audio, k_fwd = jax.random.split(root, 3)
    params = init_params(k_params)
    x = 0.1 * jax.random.normal(k_audio, (B, 1, N_SAMPLES), dtype=jnp.float32)

    fwd = jax.jit(model_forward)
    final, encoded, imp = fwd(params, x, k_fwd)
    jax.block_until_ready((final, encoded, imp))

    assert final.shape == (B, N_EVENTS, N_SAMPLES)
    assert encoded.shape == (B, N_FRAMES, ENC_CHANNELS)
    assert imp.shape == (B, N_EVENTS, IMPULSE_SIZE)
    assert bool(jnp.all(jnp.isfinite(final)))
    print("KERNEL_OK")
</pallas_src>

<mosaic_0001>
module attributes {stable_mosaic.version = 11 : i64} {
  func.func @_matmul_epilogue_kernel(%arg0: i32, %arg1: memref<64x128xf32, #tpu.memory_space<vmem>>, %arg2: memref<128x128xbf16, #tpu.memory_space<vmem>>, %arg3: memref<3x128xf32, #tpu.memory_space<vmem>>, %arg4: memref<64x128xf32, #tpu.memory_space<vmem>>) attributes {dimension_semantics = [#tpu.dimension_semantics<parallel>], iteration_bounds = array<i64: 1>, scalar_prefetch = 0 : i64, scratch_operands = 0 : i64, tpu.core_type = #tpu.core_type<tc>, window_params = [{pipeline_mode = #tpu.pipeline_mode<synchronous>, transform_indices = @transform_0, window_bounds = array<i64: 64, 128>}, {transform_indices = @transform_1, window_bounds = array<i64: 128, 128>}, {transform_indices = @transform_2, window_bounds = array<i64: 3, 128>}, {transform_indices = @transform_3, window_bounds = array<i64: 64, 128>}]} {
    %c0 = arith.constant 0 : index
    %c0_0 = arith.constant 0 : index
    %0 = vector.load %arg1[%c0, %c0_0] : memref<64x128xf32, #tpu.memory_space<vmem>>, vector<64x128xf32>
    %1 = arith.truncf %0 : vector<64x128xf32> to vector<64x128xbf16>
    %c0_1 = arith.constant 0 : index
    %c0_2 = arith.constant 0 : index
    %2 = vector.load %arg2[%c0_1, %c0_2] : memref<128x128xbf16, #tpu.memory_space<vmem>>, vector<128x128xbf16>
    %cst = arith.constant dense<0.000000e+00> : vector<64x128xf32>
    %3 = tpu.matmul %1, %2, %cst {dimension_numbers = #tpu.dot_dimension_numbers<[1], [0], [0], [1], [0, 0, 1, 1], [], []>} : vector<64x128xbf16>, vector<128x128xbf16>, vector<64x128xf32> -> vector<64x128xf32>
    %c0_3 = arith.constant 0 : index
    %c0_4 = arith.constant 0 : index
    %4 = vector.load %arg3[%c0_3, %c0_4] : memref<3x128xf32, #tpu.memory_space<vmem>>, vector<3x128xf32>
    %5 = vector.extract_strided_slice %4 {offsets = [0, 0], sizes = [1, 128], strides = [1, 1]} : vector<3x128xf32> to vector<1x128xf32>
    %6 = vector.broadcast %5 : vector<1x128xf32> to vector<64x128xf32>
    %7 = arith.addf %3, %6 : vector<64x128xf32>
    %8 = vector.extract_strided_slice %4 {offsets = [1, 0], sizes = [1, 128], strides = [1, 1]} : vector<3x128xf32> to vector<1x128xf32>
    %9 = vector.broadcast %8 : vector<1x128xf32> to vector<64x128xf32>
    %10 = arith.mulf %7, %9 : vector<64x128xf32>
    %11 = vector.extract_strided_slice %4 {offsets = [2, 0], sizes = [1, 128], strides = [1, 1]} : vector<3x128xf32> to vector<1x128xf32>
    %12 = vector.broadcast %11 : vector<1x128xf32> to vector<64x128xf32>
    %13 = arith.addf %10, %12 : vector<64x128xf32>
    %c0_5 = arith.constant 0 : index
    %c0_6 = arith.constant 0 : index
    %14 = vector.load %arg4[%c0_5, %c0_6] : memref<64x128xf32, #tpu.memory_space<vmem>>, vector<64x128xf32>
    tpu.vector_store %arg4[%c0_5, %c0_6], %13 {strides = array<i32>} : memref<64x128xf32, #tpu.memory_space<vmem>>, vector<64x128xf32>,
    return
  }
  func.func @transform_0(%arg0: i32) -> (i32, i32) {
    %c0_i32 = arith.constant 0 : i32
    %c0_i32_0 = arith.constant 0 : i32
    %c0_i32_1 = arith.constant 0 : i32
    return %c0_i32, %c0_i32_0 : i32, i32
  }
  func.func @transform_1(%arg0: i32) -> (i32, i32) {
    %c0_i32 = arith.constant 0 : i32
    %c0_i32_0 = arith.constant 0 : i32
    return %c0_i32, %arg0 : i32, i32
  }
  func.func @transform_2(%arg0: i32) -> (i32, i32) {
    %c0_i32 = arith.constant 0 : i32
    %c0_i32_0 = arith.constant 0 : i32
    return %c0_i32, %arg0 : i32, i32
  }
  func.func @transform_3(%arg0: i32) -> (i32, i32) {
    %c0_i32 = arith.constant 0 : i32
    %c0_i32_0 = arith.constant 0 : i32
    return %c0_i32, %arg0 : i32, i32
  }
}

module attributes {stable_mosaic.version = 11 : i64} {
  func.func @_matmul_epilogue_kernel(%arg0: i32, %arg1: memref<32x384xf32, #tpu.memory_space<vmem>>, %arg2: memref<384x128xbf16, #tpu.memory_space<vmem>>, %arg3: memref<3x128xf32, #tpu.memory_space<vmem>>, %arg4: memref<32x128xf32, #tpu.memory_space<vmem>>) attributes {dimension_semantics = [#tpu.dimension_semantics<parallel>], iteration_bounds = array<i64: 1>, scalar_prefetch = 0 : i64, scratch_operands = 0 : i64, tpu.core_type = #tpu.core_type<tc>, window_params = [{pipeline_mode = #tpu.pipeline_mode<synchronous>, transform_indices = @transform_0, window_bounds = array<i64: 32, 384>}, {transform_indices = @transform_1, window_bounds = array<i64: 384, 128>}, {transform_indices = @transform_2, window_bounds = array<i64: 3, 128>}, {transform_indices = @transform_3, window_bounds = array<i64: 32, 128>}]} {
    %c0 = arith.constant 0 : index
    %c0_0 = arith.constant 0 : index
    %0 = vector.load %arg1[%c0, %c0_0] : memref<32x384xf32, #tpu.memory_space<vmem>>, vector<32x384xf32>
    %1 = arith.truncf %0 : vector<32x384xf32> to vector<32x384xbf16>
    %c0_1 = arith.constant 0 : index
    %c0_2 = arith.constant 0 : index
    %2 = vector.load %arg2[%c0_1, %c0_2] : memref<384x128xbf16, #tpu.memory_space<vmem>>, vector<384x128xbf16>
    %cst = arith.constant dense<0.000000e+00> : vector<32x128xf32>
    %3 = tpu.matmul %1, %2, %cst {dimension_numbers = #tpu.dot_dimension_numbers<[1], [0], [0], [1], [0, 0, 1, 1], [], []>} : vector<32x384xbf16>, vector<384x128xbf16>, vector<32x128xf32> -> vector<32x128xf32>
    %c0_3 = arith.constant 0 : index
    %c0_4 = arith.constant 0 : index
    %4 = vector.load %arg3[%c0_3, %c0_4] : memref<3x128xf32, #tpu.memory_space<vmem>>, vector<3x128xf32>
    %5 = vector.extract_strided_slice %4 {offsets = [0, 0], sizes = [1, 128], strides = [1, 1]} : vector<3x128xf32> to vector<1x128xf32>
    %6 = vector.broadcast %5 : vector<1x128xf32> to vector<32x128xf32>
    %7 = arith.addf %3, %6 : vector<32x128xf32>
    %cst_5 = arith.constant 0.000000e+00 : f32
    %8 = vector.broadcast %cst_5 : f32 to vector<32x128xf32>
    %9 = arith.cmpf oge, %7, %8 : vector<32x128xf32>
    %cst_6 = arith.constant 2.000000e-01 : f32
    %10 = vector.broadcast %cst_6 : f32 to vector<32x128xf32>
    %11 = arith.mulf %10, %7 : vector<32x128xf32>
    %12 = arith.select %9, %7, %11 : vector<32x128xi1>, vector<32x128xf32>
    %13 = vector.extract_strided_slice %4 {offsets = [1, 0], sizes = [1, 128], strides = [1, 1]} : vector<3x128xf32> to vector<1x128xf32>
    %14 = vector.broadcast %13 : vector<1x128xf32> to vector<32x128xf32>
    %15 = arith.mulf %12, %14 : vector<32x128xf32>
    %16 = vector.extract_strided_slice %4 {offsets = [2, 0], sizes = [1, 128], strides = [1, 1]} : vector<3x128xf32> to vector<1x128xf32>
    %17 = vector.broadcast %16 : vector<1x128xf32> to vector<32x128xf32>
    %18 = arith.addf %15, %17 : vector<32x128xf32>
    %c0_7 = arith.constant 0 : index
    %c0_8 = arith.constant 0 : index
    %19 = vector.load %arg4[%c0_7, %c0_8] : memref<32x128xf32, #tpu.memory_space<vmem>>, vector<32x128xf32>
    tpu.vector_store %arg4[%c0_7, %c0_8], %18 {strides = array<i32>} : memref<32x128xf32, #tpu.memory_space<vmem>>, vector<32x128xf32>,
    return
  }
  func.func @transform_0(%arg0: i32) -> (i32, i32) {
    %c0_i32 = arith.constant 0 : i32
    %c0_i32_0 = arith.constant 0 : i32
    %c0_i32_1 = arith.constant 0 : i32
    return %c0_i32, %c0_i32_0 : i32, i32
  }
  func.func @transform_1(%arg0: i32) -> (i32, i32) {
    %c0_i32 = arith.constant 0 : i32
    %c0_i32_0 = arith.constant 0 : i32
    return %c0_i32, %arg0 : i32, i32
  }
  func.func @transform_2(%arg0: i32) -> (i32, i32) {
    %c0_i32 = arith.constant 0 : i32
    %c0_i32_0 = arith.constant 0 : i32
    return %c0_i32, %arg0 : i32, i32
  }
  func.func @transform_3(%arg0: i32) -> (i32, i32) {
    %c0_i32 = arith.constant 0 : i32
    %c0_i32_0 = arith.constant 0 : i32
    return %c0_i32, %arg0 : i32, i32
  }
}

module attributes {stable_mosaic.version = 11 : i64} {
  func.func @_matmul_epilogue_kernel(%arg0: i32, %arg1: memref<16x384xf32, #tpu.memory_space<vmem>>, %arg2: memref<384x128xbf16, #tpu.memory_space<vmem>>, %arg3: memref<3x128xf32, #tpu.memory_space<vmem>>, %arg4: memref<16x128xf32, #tpu.memory_space<vmem>>) attributes {dimension_semantics = [#tpu.dimension_semantics<parallel>], iteration_bounds = array<i64: 1>, scalar_prefetch = 0 : i64, scratch_operands = 0 : i64, tpu.core_type = #tpu.core_type<tc>, window_params = [{pipeline_mode = #tpu.pipeline_mode<synchronous>, transform_indices = @transform_0, window_bounds = array<i64: 16, 384>}, {transform_indices = @transform_1, window_bounds = array<i64: 384, 128>}, {transform_indices = @transform_2, window_bounds = array<i64: 3, 128>}, {transform_indices = @transform_3, window_bounds = array<i64: 16, 128>}]} {
    %c0 = arith.constant 0 : index
    %c0_0 = arith.constant 0 : index
    %0 = vector.load %arg1[%c0, %c0_0] : memref<16x384xf32, #tpu.memory_space<vmem>>, vector<16x384xf32>
    %1 = arith.truncf %0 : vector<16x384xf32> to vector<16x384xbf16>
    %c0_1 = arith.constant 0 : index
    %c0_2 = arith.constant 0 : index
    %2 = vector.load %arg2[%c0_1, %c0_2] : memref<384x128xbf16, #tpu.memory_space<vmem>>, vector<384x128xbf16>
    %cst = arith.constant dense<0.000000e+00> : vector<16x128xf32>
    %3 = tpu.matmul %1, %2, %cst {dimension_numbers = #tpu.dot_dimension_numbers<[1], [0], [0], [1], [0, 0, 1, 1], [], []>} : vector<16x384xbf16>, vector<384x128xbf16>, vector<16x128xf32> -> vector<16x128xf32>
    %c0_3 = arith.constant 0 : index
    %c0_4 = arith.constant 0 : index
    %4 = vector.load %arg3[%c0_3, %c0_4] : memref<3x128xf32, #tpu.memory_space<vmem>>, vector<3x128xf32>
    %5 = vector.extract_strided_slice %4 {offsets = [0, 0], sizes = [1, 128], strides = [1, 1]} : vector<3x128xf32> to vector<1x128xf32>
    %6 = vector.broadcast %5 : vector<1x128xf32> to vector<16x128xf32>
    %7 = arith.addf %3, %6 : vector<16x128xf32>
    %cst_5 = arith.constant 0.000000e+00 : f32
    %8 = vector.broadcast %cst_5 : f32 to vector<16x128xf32>
    %9 = arith.cmpf oge, %7, %8 : vector<16x128xf32>
    %cst_6 = arith.constant 2.000000e-01 : f32
    %10 = vector.broadcast %cst_6 : f32 to vector<16x128xf32>
    %11 = arith.mulf %10, %7 : vector<16x128xf32>
    %12 = arith.select %9, %7, %11 : vector<16x128xi1>, vector<16x128xf32>
    %13 = vector.extract_strided_slice %4 {offsets = [1, 0], sizes = [1, 128], strides = [1, 1]} : vector<3x128xf32> to vector<1x128xf32>
    %14 = vector.broadcast %13 : vector<1x128xf32> to vector<16x128xf32>
    %15 = arith.mulf %12, %14 : vector<16x128xf32>
    %16 = vector.extract_strided_slice %4 {offsets = [2, 0], sizes = [1, 128], strides = [1, 1]} : vector<3x128xf32> to vector<1x128xf32>
    %17 = vector.broadcast %16 : vector<1x128xf32> to vector<16x128xf32>
    %18 = arith.addf %15, %17 : vector<16x128xf32>
    %c0_7 = arith.constant 0 : index
    %c0_8 = arith.constant 0 : index
    %19 = vector.load %arg4[%c0_7, %c0_8] : memref<16x128xf32, #tpu.memory_space<vmem>>, vector<16x128xf32>
    tpu.vector_store %arg4[%c0_7, %c0_8], %18 {strides = array<i32>} : memref<16x128xf32, #tpu.memory_space<vmem>>, vector<16x128xf32>,
    return
  }
  func.func @transform_0(%arg0: i32) -> (i32, i32) {
    %c0_i32 = arith.constant 0 : i32
    %c0_i32_0 = arith.constant 0 : i32
    %c0_i32_1 = arith.constant 0 : i32
    return %c0_i32, %c0_i32_0 : i32, i32
  }
  func.func @transform_1(%arg0: i32) -> (i32, i32) {
    %c0_i32 = arith.constant 0 : i32
    %c0_i32_0 = arith.constant 0 : i32
    return %c0_i32, %arg0 : i32, i32
  }
  func.func @transform_2(%arg0: i32) -> (i32, i32) {
    %c0_i32 = arith.constant 0 : i32
    %c0_i32_0 = arith.constant 0 : i32
    return %c0_i32, %arg0 : i32, i32
  }
  func.func @transform_3(%arg0: i32) -> (i32, i32) {
    %c0_i32 = arith.constant 0 : i32
    %c0_i32_0 = arith.constant 0 : i32
    return %c0_i32, %arg0 : i32, i32
  }
}

module attributes {stable_mosaic.version = 11 : i64} {
  func.func @_matmul_epilogue_kernel(%arg0: i32, %arg1: memref<8x384xf32, #tpu.memory_space<vmem>>, %arg2: memref<384x128xbf16, #tpu.memory_space<vmem>>, %arg3: memref<3x128xf32, #tpu.memory_space<vmem>>, %arg4: memref<8x128xf32, #tpu.memory_space<vmem>>) attributes {dimension_semantics = [#tpu.dimension_semantics<parallel>], iteration_bounds = array<i64: 1>, scalar_prefetch = 0 : i64, scratch_operands = 0 : i64, tpu.core_type = #tpu.core_type<tc>, window_params = [{pipeline_mode = #tpu.pipeline_mode<synchronous>, transform_indices = @transform_0, window_bounds = array<i64: 8, 384>}, {transform_indices = @transform_1, window_bounds = array<i64: 384, 128>}, {transform_indices = @transform_2, window_bounds = array<i64: 3, 128>}, {transform_indices = @transform_3, window_bounds = array<i64: 8, 128>}]} {
    %c0 = arith.constant 0 : index
    %c0_0 = arith.constant 0 : index
    %0 = vector.load %arg1[%c0, %c0_0] : memref<8x384xf32, #tpu.memory_space<vmem>>, vector<8x384xf32>
    %1 = arith.truncf %0 : vector<8x384xf32> to vector<8x384xbf16>
    %c0_1 = arith.constant 0 : index
    %c0_2 = arith.constant 0 : index
    %2 = vector.load %arg2[%c0_1, %c0_2] : memref<384x128xbf16, #tpu.memory_space<vmem>>, vector<384x128xbf16>
    %cst = arith.constant dense<0.000000e+00> : vector<8x128xf32>
    %3 = tpu.matmul %1, %2, %cst {dimension_numbers = #tpu.dot_dimension_numbers<[1], [0], [0], [1], [0, 0, 1, 1], [], []>} : vector<8x384xbf16>, vector<384x128xbf16>, vector<8x128xf32> -> vector<8x128xf32>
    %c0_3 = arith.constant 0 : index
    %c0_4 = arith.constant 0 : index
    %4 = vector.load %arg3[%c0_3, %c0_4] : memref<3x128xf32, #tpu.memory_space<vmem>>, vector<3x128xf32>
    %5 = vector.extract_strided_slice %4 {offsets = [0, 0], sizes = [1, 128], strides = [1, 1]} : vector<3x128xf32> to vector<1x128xf32>
    %6 = vector.broadcast %5 : vector<1x128xf32> to vector<8x128xf32>
    %7 = arith.addf %3, %6 : vector<8x128xf32>
    %cst_5 = arith.constant 0.000000e+00 : f32
    %8 = vector.broadcast %cst_5 : f32 to vector<8x128xf32>
    %9 = arith.cmpf oge, %7, %8 : vector<8x128xf32>
    %cst_6 = arith.constant 2.000000e-01 : f32
    %10 = vector.broadcast %cst_6 : f32 to vector<8x128xf32>
    %11 = arith.mulf %10, %7 : vector<8x128xf32>
    %12 = arith.select %9, %7, %11 : vector<8x128xi1>, vector<8x128xf32>
    %13 = vector.extract_strided_slice %4 {offsets = [1, 0], sizes = [1, 128], strides = [1, 1]} : vector<3x128xf32> to vector<1x128xf32>
    %14 = vector.broadcast %13 : vector<1x128xf32> to vector<8x128xf32>
    %15 = arith.mulf %12, %14 : vector<8x128xf32>
    %16 = vector.extract_strided_slice %4 {offsets = [2, 0], sizes = [1, 128], strides = [1, 1]} : vector<3x128xf32> to vector<1x128xf32>
    %17 = vector.broadcast %16 : vector<1x128xf32> to vector<8x128xf32>
    %18 = arith.addf %15, %17 : vector<8x128xf32>
    %c0_7 = arith.constant 0 : index
    %c0_8 = arith.constant 0 : index
    %19 = vector.load %arg4[%c0_7, %c0_8] : memref<8x128xf32, #tpu.memory_space<vmem>>, vector<8x128xf32>
    tpu.vector_store %arg4[%c0_7, %c0_8], %18 {strides = array<i32>} : memref<8x128xf32, #tpu.memory_space<vmem>>, vector<8x128xf32>,
    return
  }
  func.func @transform_0(%arg0: i32) -> (i32, i32) {
    %c0_i32 = arith.constant 0 : i32
    %c0_i32_0 = arith.constant 0 : i32
    %c0_i32_1 = arith.constant 0 : i32
    return %c0_i32, %c0_i32_0 : i32, i32
  }
  func.func @transform_1(%arg0: i32) -> (i32, i32) {
    %c0_i32 = arith.constant 0 : i32
    %c0_i32_0 = arith.constant 0 : i32
    return %c0_i32, %arg0 : i32, i32
  }
  func.func @transform_2(%arg0: i32) -> (i32, i32) {
    %c0_i32 = arith.constant 0 : i32
    %c0_i32_0 = arith.constant 0 : i32
    return %c0_i32, %arg0 : i32, i32
  }
  func.func @transform_3(%arg0: i32) -> (i32, i32) {
    %c0_i32 = arith.constant 0 : i32
    %c0_i32_0 = arith.constant 0 : i32
    return %c0_i32, %arg0 : i32, i32
  }
}

module attributes {stable_mosaic.version = 11 : i64} {
  func.func @_matmul_epilogue_kernel(%arg0: i32, %arg1: memref<4x384xf32, #tpu.memory_space<vmem>>, %arg2: memref<384x128xbf16, #tpu.memory_space<vmem>>, %arg3: memref<3x128xf32, #tpu.memory_space<vmem>>, %arg4: memref<4x128xf32, #tpu.memory_space<vmem>>) attributes {dimension_semantics = [#tpu.dimension_semantics<parallel>], iteration_bounds = array<i64: 1>, scalar_prefetch = 0 : i64, scratch_operands = 0 : i64, tpu.core_type = #tpu.core_type<tc>, window_params = [{pipeline_mode = #tpu.pipeline_mode<synchronous>, transform_indices = @transform_0, window_bounds = array<i64: 4, 384>}, {transform_indices = @transform_1, window_bounds = array<i64: 384, 128>}, {transform_indices = @transform_2, window_bounds = array<i64: 3, 128>}, {transform_indices = @transform_3, window_bounds = array<i64: 4, 128>}]} {
    %c0 = arith.constant 0 : index
    %c0_0 = arith.constant 0 : index
    %0 = vector.load %arg1[%c0, %c0_0] : memref<4x384xf32, #tpu.memory_space<vmem>>, vector<4x384xf32>
    %1 = arith.truncf %0 : vector<4x384xf32> to vector<4x384xbf16>
    %c0_1 = arith.constant 0 : index
    %c0_2 = arith.constant 0 : index
    %2 = vector.load %arg2[%c0_1, %c0_2] : memref<384x128xbf16, #tpu.memory_space<vmem>>, vector<384x128xbf16>
    %cst = arith.constant dense<0.000000e+00> : vector<4x128xf32>
    %3 = tpu.matmul %1, %2, %cst {dimension_numbers = #tpu.dot_dimension_numbers<[1], [0], [0], [1], [0, 0, 1, 1], [], []>} : vector<4x384xbf16>, vector<384x128xbf16>, vector<4x128xf32> -> vector<4x128xf32>
    %c0_3 = arith.constant 0 : index
    %c0_4 = arith.constant 0 : index
    %4 = vector.load %arg3[%c0_3, %c0_4] : memref<3x128xf32, #tpu.memory_space<vmem>>, vector<3x128xf32>
    %5 = vector.extract_strided_slice %4 {offsets = [0, 0], sizes = [1, 128], strides = [1, 1]} : vector<3x128xf32> to vector<1x128xf32>
    %6 = vector.broadcast %5 : vector<1x128xf32> to vector<4x128xf32>
    %7 = arith.addf %3, %6 : vector<4x128xf32>
    %cst_5 = arith.constant 0.000000e+00 : f32
    %8 = vector.broadcast %cst_5 : f32 to vector<4x128xf32>
    %9 = arith.cmpf oge, %7, %8 : vector<4x128xf32>
    %cst_6 = arith.constant 2.000000e-01 : f32
    %10 = vector.broadcast %cst_6 : f32 to vector<4x128xf32>
    %11 = arith.mulf %10, %7 : vector<4x128xf32>
    %12 = arith.select %9, %7, %11 : vector<4x128xi1>, vector<4x128xf32>
    %13 = vector.extract_strided_slice %4 {offsets = [1, 0], sizes = [1, 128], strides = [1, 1]} : vector<3x128xf32> to vector<1x128xf32>
    %14 = vector.broadcast %13 : vector<1x128xf32> to vector<4x128xf32>
    %15 = arith.mulf %12, %14 : vector<4x128xf32>
    %16 = vector.extract_strided_slice %4 {offsets = [2, 0], sizes = [1, 128], strides = [1, 1]} : vector<3x128xf32> to vector<1x128xf32>
    %17 = vector.broadcast %16 : vector<1x128xf32> to vector<4x128xf32>
    %18 = arith.addf %15, %17 : vector<4x128xf32>
    %c0_7 = arith.constant 0 : index
    %c0_8 = arith.constant 0 : index
    %19 = vector.load %arg4[%c0_7, %c0_8] : memref<4x128xf32, #tpu.memory_space<vmem>>, vector<4x128xf32>
    tpu.vector_store %arg4[%c0_7, %c0_8], %18 {strides = array<i32>} : memref<4x128xf32, #tpu.memory_space<vmem>>, vector<4x128xf32>,
    return
  }
  func.func @transform_0(%arg0: i32) -> (i32, i32) {
    %c0_i32 = arith.constant 0 : i32
    %c0_i32_0 = arith.constant 0 : i32
    %c0_i32_1 = arith.constant 0 : i32
    return %c0_i32, %c0_i32_0 : i32, i32
  }
  func.func @transform_1(%arg0: i32) -> (i32, i32) {
    %c0_i32 = arith.constant 0 : i32
    %c0_i32_0 = arith.constant 0 : i32
    return %c0_i32, %arg0 : i32, i32
  }
  func.func @transform_2(%arg0: i32) -> (i32, i32) {
    %c0_i32 = arith.constant 0 : i32
    %c0_i32_0 = arith.constant 0 : i32
    return %c0_i32, %arg0 : i32, i32
  }
  func.func @transform_3(%arg0: i32) -> (i32, i32) {
    %c0_i32 = arith.constant 0 : i32
    %c0_i32_0 = arith.constant 0 : i32
    return %c0_i32, %arg0 : i32, i32
  }
}

module attributes {stable_mosaic.version = 11 : i64} {
  func.func @_matmul_epilogue_kernel(%arg0: i32, %arg1: memref<2x384xf32, #tpu.memory_space<vmem>>, %arg2: memref<384x128xbf16, #tpu.memory_space<vmem>>, %arg3: memref<3x128xf32, #tpu.memory_space<vmem>>, %arg4: memref<2x128xf32, #tpu.memory_space<vmem>>) attributes {dimension_semantics = [#tpu.dimension_semantics<parallel>], iteration_bounds = array<i64: 1>, scalar_prefetch = 0 : i64, scratch_operands = 0 : i64, tpu.core_type = #tpu.core_type<tc>, window_params = [{pipeline_mode = #tpu.pipeline_mode<synchronous>, transform_indices = @transform_0, window_bounds = array<i64: 2, 384>}, {transform_indices = @transform_1, window_bounds = array<i64: 384, 128>}, {transform_indices = @transform_2, window_bounds = array<i64: 3, 128>}, {transform_indices = @transform_3, window_bounds = array<i64: 2, 128>}]} {
    %c0 = arith.constant 0 : index
    %c0_0 = arith.constant 0 : index
    %0 = vector.load %arg1[%c0, %c0_0] : memref<2x384xf32, #tpu.memory_space<vmem>>, vector<2x384xf32>
    %1 = arith.truncf %0 : vector<2x384xf32> to vector<2x384xbf16>
    %c0_1 = arith.constant 0 : index
    %c0_2 = arith.constant 0 : index
    %2 = vector.load %arg2[%c0_1, %c0_2] : memref<384x128xbf16, #tpu.memory_space<vmem>>, vector<384x128xbf16>
    %cst = arith.constant dense<0.000000e+00> : vector<2x128xf32>
    %3 = tpu.matmul %1, %2, %cst {dimension_numbers = #tpu.dot_dimension_numbers<[1], [0], [0], [1], [0, 0, 1, 1], [], []>} : vector<2x384xbf16>, vector<384x128xbf16>, vector<2x128xf32> -> vector<2x128xf32>
    %c0_3 = arith.constant 0 : index
    %c0_4 = arith.constant 0 : index
    %4 = vector.load %arg3[%c0_3, %c0_4] : memref<3x128xf32, #tpu.memory_space<vmem>>, vector<3x128xf32>
    %5 = vector.extract_strided_slice %4 {offsets = [0, 0], sizes = [1, 128], strides = [1, 1]} : vector<3x128xf32> to vector<1x128xf32>
    %6 = vector.broadcast %5 : vector<1x128xf32> to vector<2x128xf32>
    %7 = arith.addf %3, %6 : vector<2x128xf32>
    %cst_5 = arith.constant 0.000000e+00 : f32
    %8 = vector.broadcast %cst_5 : f32 to vector<2x128xf32>
    %9 = arith.cmpf oge, %7, %8 : vector<2x128xf32>
    %cst_6 = arith.constant 2.000000e-01 : f32
    %10 = vector.broadcast %cst_6 : f32 to vector<2x128xf32>
    %11 = arith.mulf %10, %7 : vector<2x128xf32>
    %12 = arith.select %9, %7, %11 : vector<2x128xi1>, vector<2x128xf32>
    %13 = vector.extract_strided_slice %4 {offsets = [1, 0], sizes = [1, 128], strides = [1, 1]} : vector<3x128xf32> to vector<1x128xf32>
    %14 = vector.broadcast %13 : vector<1x128xf32> to vector<2x128xf32>
    %15 = arith.mulf %12, %14 : vector<2x128xf32>
    %16 = vector.extract_strided_slice %4 {offsets = [2, 0], sizes = [1, 128], strides = [1, 1]} : vector<3x128xf32> to vector<1x128xf32>
    %17 = vector.broadcast %16 : vector<1x128xf32> to vector<2x128xf32>
    %18 = arith.addf %15, %17 : vector<2x128xf32>
    %c0_7 = arith.constant 0 : index
    %c0_8 = arith.constant 0 : index
    %19 = vector.load %arg4[%c0_7, %c0_8] : memref<2x128xf32, #tpu.memory_space<vmem>>, vector<2x128xf32>
    tpu.vector_store %arg4[%c0_7, %c0_8], %18 {strides = array<i32>} : memref<2x128xf32, #tpu.memory_space<vmem>>, vector<2x128xf32>,
    return
  }
  func.func @transform_0(%arg0: i32) -> (i32, i32) {
    %c0_i32 = arith.constant 0 : i32
    %c0_i32_0 = arith.constant 0 : i32
    %c0_i32_1 = arith.constant 0 : i32
    return %c0_i32, %c0_i32_0 : i32, i32
  }
  func.func @transform_1(%arg0: i32) -> (i32, i32) {
    %c0_i32 = arith.constant 0 : i32
    %c0_i32_0 = arith.constant 0 : i32
    return %c0_i32, %arg0 : i32, i32
  }
  func.func @transform_2(%arg0: i32) -> (i32, i32) {
    %c0_i32 = arith.constant 0 : i32
    %c0_i32_0 = arith.constant 0 : i32
    return %c0_i32, %arg0 : i32, i32
  }
  func.func @transform_3(%arg0: i32) -> (i32, i32) {
    %c0_i32 = arith.constant 0 : i32
    %c0_i32_0 = arith.constant 0 : i32
    return %c0_i32, %arg0 : i32, i32
  }
}

module attributes {stable_mosaic.version = 11 : i64} {
  func.func @_matmul_epilogue_kernel(%arg0: i32, %arg1: memref<1x2x256xf32, #tpu.memory_space<vmem>>, %arg2: memref<1x256x128xbf16, #tpu.memory_space<vmem>>, %arg3: memref<3x128xf32, #tpu.memory_space<vmem>>, %arg4: memref<1x2x128xf32, #tpu.memory_space<vmem>>) attributes {dimension_semantics = [#tpu.dimension_semantics<parallel>], iteration_bounds = array<i64: 2>, scalar_prefetch = 0 : i64, scratch_operands = 0 : i64, tpu.core_type = #tpu.core_type<tc>, window_params = [{transform_indices = @transform_0, window_bounds = array<i64: 1, 2, 256>}, {transform_indices = @transform_1, window_bounds = array<i64: 1, 256, 128>}, {pipeline_mode = #tpu.pipeline_mode<synchronous>, transform_indices = @transform_2, window_bounds = array<i64: 3, 128>}, {transform_indices = @transform_3, window_bounds = array<i64: 1, 2, 128>}]} {
    %c0 = arith.constant 0 : index
    %c0_0 = arith.constant 0 : index
    %c0_1 = arith.constant 0 : index
    %0 = vector.load %arg1[%c0, %c0_0, %c0_1] : memref<1x2x256xf32, #tpu.memory_space<vmem>>, vector<1x2x256xf32>
    %1 = vector.shape_cast %0 : vector<1x2x256xf32> to vector<2x256xf32>
    %2 = arith.truncf %1 : vector<2x256xf32> to vector<2x256xbf16>
    %c0_2 = arith.constant 0 : index
    %c0_3 = arith.constant 0 : index
    %c0_4 = arith.constant 0 : index
    %3 = vector.load %arg2[%c0_2, %c0_3, %c0_4] : memref<1x256x128xbf16, #tpu.memory_space<vmem>>, vector<1x256x128xbf16>
    %4 = vector.shape_cast %3 : vector<1x256x128xbf16> to vector<256x128xbf16>
    %cst = arith.constant dense<0.000000e+00> : vector<2x128xf32>
    %5 = tpu.matmul %2, %4, %cst {dimension_numbers = #tpu.dot_dimension_numbers<[1], [0], [0], [1], [0, 0, 1, 1], [], []>} : vector<2x256xbf16>, vector<256x128xbf16>, vector<2x128xf32> -> vector<2x128xf32>
    %c0_5 = arith.constant 0 : index
    %c0_6 = arith.constant 0 : index
    %6 = vector.load %arg3[%c0_5, %c0_6] : memref<3x128xf32, #tpu.memory_space<vmem>>, vector<3x128xf32>
    %7 = vector.extract_strided_slice %6 {offsets = [0, 0], sizes = [1, 128], strides = [1, 1]} : vector<3x128xf32> to vector<1x128xf32>
    %8 = vector.broadcast %7 : vector<1x128xf32> to vector<2x128xf32>
    %9 = arith.addf %5, %8 : vector<2x128xf32>
    %cst_7 = arith.constant 0.000000e+00 : f32
    %10 = vector.broadcast %cst_7 : f32 to vector<2x128xf32>
    %11 = arith.cmpf oge, %9, %10 : vector<2x128xf32>
    %cst_8 = arith.constant 2.000000e-01 : f32
    %12 = vector.broadcast %cst_8 : f32 to vector<2x128xf32>
    %13 = arith.mulf %12, %9 : vector<2x128xf32>
    %14 = arith.select %11, %9, %13 : vector<2x128xi1>, vector<2x128xf32>
    %15 = vector.extract_strided_slice %6 {offsets = [1, 0], sizes = [1, 128], strides = [1, 1]} : vector<3x128xf32> to vector<1x128xf32>
    %16 = vector.broadcast %15 : vector<1x128xf32> to vector<2x128xf32>
    %17 = arith.mulf %14, %16 : vector<2x128xf32>
    %18 = vector.extract_strided_slice %6 {offsets = [2, 0], sizes = [1, 128], strides = [1, 1]} : vector<3x128xf32> to vector<1x128xf32>
    %19 = vector.broadcast %18 : vector<1x128xf32> to vector<2x128xf32>
    %20 = arith.addf %17, %19 : vector<2x128xf32>
    %c0_9 = arith.constant 0 : index
    %c0_10 = arith.constant 0 : index
    %c0_11 = arith.constant 0 : index
    %21 = vector.load %arg4[%c0_9, %c0_10, %c0_11] : memref<1x2x128xf32, #tpu.memory_space<vmem>>, vector<1x2x128xf32>
    %22 = vector.shape_cast %21 : vector<1x2x128xf32> to vector<2x128xf32>
    %23 = vector.shape_cast %20 : vector<2x128xf32> to vector<1x2x128xf32>
    tpu.vector_store %arg4[%c0_9, %c0_10, %c0_11], %23 {strides = array<i32>} : memref<1x2x128xf32, #tpu.memory_space<vmem>>, vector<1x2x128xf32>,
    return
  }
  func.func @transform_0(%arg0: i32) -> (i32, i32, i32) {
    %c0_i32 = arith.constant 0 : i32
    %c0_i32_0 = arith.constant 0 : i32
    %c0_i32_1 = arith.constant 0 : i32
    return %arg0, %c0_i32, %c0_i32_0 : i32, i32, i32
  }
  func.func @transform_1(%arg0: i32) -> (i32, i32, i32) {
    %c0_i32 = arith.constant 0 : i32
    %c0_i32_0 = arith.constant 0 : i32
    %c0_i32_1 = arith.constant 0 : i32
    return %arg0, %c0_i32, %c0_i32_0 : i32, i32, i32
  }
  func.func @transform_2(%arg0: i32) -> (i32, i32) {
    %c0_i32 = arith.constant 0 : i32
    %c0_i32_0 = arith.constant 0 : i32
    %c0_i32_1 = arith.constant 0 : i32
    return %c0_i32, %c0_i32_0 : i32, i32
  }
  func.func @transform_3(%arg0: i32) -> (i32, i32, i32) {
    %c0_i32 = arith.constant 0 : i32
    %c0_i32_0 = arith.constant 0 : i32
    %c0_i32_1 = arith.constant 0 : i32
    return %arg0, %c0_i32, %c0_i32_0 : i32, i32, i32
  }
}

module attributes {stable_mosaic.version = 11 : i64} {
  func.func @_matmul_epilogue_kernel(%arg0: i32, %arg1: memref<1x4x256xf32, #tpu.memory_space<vmem>>, %arg2: memref<1x256x128xbf16, #tpu.memory_space<vmem>>, %arg3: memref<3x128xf32, #tpu.memory_space<vmem>>, %arg4: memref<1x4x128xf32, #tpu.memory_space<vmem>>) attributes {dimension_semantics = [#tpu.dimension_semantics<parallel>], iteration_bounds = array<i64: 2>, scalar_prefetch = 0 : i64, scratch_operands = 0 : i64, tpu.core_type = #tpu.core_type<tc>, window_params = [{transform_indices = @transform_0, window_bounds = array<i64: 1, 4, 256>}, {transform_indices = @transform_1, window_bounds = array<i64: 1, 256, 128>}, {pipeline_mode = #tpu.pipeline_mode<synchronous>, transform_indices = @transform_2, window_bounds = array<i64: 3, 128>}, {transform_indices = @transform_3, window_bounds = array<i64: 1, 4, 128>}]} {
    %c0 = arith.constant 0 : index
    %c0_0 = arith.constant 0 : index
    %c0_1 = arith.constant 0 : index
    %0 = vector.load %arg1[%c0, %c0_0, %c0_1] : memref<1x4x256xf32, #tpu.memory_space<vmem>>, vector<1x4x256xf32>
    %1 = vector.shape_cast %0 : vector<1x4x256xf32> to vector<4x256xf32>
    %2 = arith.truncf %1 : vector<4x256xf32> to vector<4x256xbf16>
    %c0_2 = arith.constant 0 : index
    %c0_3 = arith.constant 0 : index
    %c0_4 = arith.constant 0 : index
    %3 = vector.load %arg2[%c0_2, %c0_3, %c0_4] : memref<1x256x128xbf16, #tpu.memory_space<vmem>>, vector<1x256x128xbf16>
    %4 = vector.shape_cast %3 : vector<1x256x128xbf16> to vector<256x128xbf16>
    %cst = arith.constant dense<0.000000e+00> : vector<4x128xf32>
    %5 = tpu.matmul %2, %4, %cst {dimension_numbers = #tpu.dot_dimension_numbers<[1], [0], [0], [1], [0, 0, 1, 1], [], []>} : vector<4x256xbf16>, vector<256x128xbf16>, vector<4x128xf32> -> vector<4x128xf32>
    %c0_5 = arith.constant 0 : index
    %c0_6 = arith.constant 0 : index
    %6 = vector.load %arg3[%c0_5, %c0_6] : memref<3x128xf32, #tpu.memory_space<vmem>>, vector<3x128xf32>
    %7 = vector.extract_strided_slice %6 {offsets = [0, 0], sizes = [1, 128], strides = [1, 1]} : vector<3x128xf32> to vector<1x128xf32>
    %8 = vector.broadcast %7 : vector<1x128xf32> to vector<4x128xf32>
    %9 = arith.addf %5, %8 : vector<4x128xf32>
    %cst_7 = arith.constant 0.000000e+00 : f32
    %10 = vector.broadcast %cst_7 : f32 to vector<4x128xf32>
    %11 = arith.cmpf oge, %9, %10 : vector<4x128xf32>
    %cst_8 = arith.constant 2.000000e-01 : f32
    %12 = vector.broadcast %cst_8 : f32 to vector<4x128xf32>
    %13 = arith.mulf %12, %9 : vector<4x128xf32>
    %14 = arith.select %11, %9, %13 : vector<4x128xi1>, vector<4x128xf32>
    %15 = vector.extract_strided_slice %6 {offsets = [1, 0], sizes = [1, 128], strides = [1, 1]} : vector<3x128xf32> to vector<1x128xf32>
    %16 = vector.broadcast %15 : vector<1x128xf32> to vector<4x128xf32>
    %17 = arith.mulf %14, %16 : vector<4x128xf32>
    %18 = vector.extract_strided_slice %6 {offsets = [2, 0], sizes = [1, 128], strides = [1, 1]} : vector<3x128xf32> to vector<1x128xf32>
    %19 = vector.broadcast %18 : vector<1x128xf32> to vector<4x128xf32>
    %20 = arith.addf %17, %19 : vector<4x128xf32>
    %c0_9 = arith.constant 0 : index
    %c0_10 = arith.constant 0 : index
    %c0_11 = arith.constant 0 : index
    %21 = vector.load %arg4[%c0_9, %c0_10, %c0_11] : memref<1x4x128xf32, #tpu.memory_space<vmem>>, vector<1x4x128xf32>
    %22 = vector.shape_cast %21 : vector<1x4x128xf32> to vector<4x128xf32>
    %23 = vector.shape_cast %20 : vector<4x128xf32> to vector<1x4x128xf32>
    tpu.vector_store %arg4[%c0_9, %c0_10, %c0_11], %23 {strides = array<i32>} : memref<1x4x128xf32, #tpu.memory_space<vmem>>, vector<1x4x128xf32>,
    return
  }
  func.func @transform_0(%arg0: i32) -> (i32, i32, i32) {
    %c0_i32 = arith.constant 0 : i32
    %c0_i32_0 = arith.constant 0 : i32
    %c0_i32_1 = arith.constant 0 : i32
    return %arg0, %c0_i32, %c0_i32_0 : i32, i32, i32
  }
  func.func @transform_1(%arg0: i32) -> (i32, i32, i32) {
    %c0_i32 = arith.constant 0 : i32
    %c0_i32_0 = arith.constant 0 : i32
    %c0_i32_1 = arith.constant 0 : i32
    return %arg0, %c0_i32, %c0_i32_0 : i32, i32, i32
  }
  func.func @transform_2(%arg0: i32) -> (i32, i32) {
    %c0_i32 = arith.constant 0 : i32
    %c0_i32_0 = arith.constant 0 : i32
    %c0_i32_1 = arith.constant 0 : i32
    return %c0_i32, %c0_i32_0 : i32, i32
  }
  func.func @transform_3(%arg0: i32) -> (i32, i32, i32) {
    %c0_i32 = arith.constant 0 : i32
    %c0_i32_0 = arith.constant 0 : i32
    %c0_i32_1 = arith.constant 0 : i32
    return %arg0, %c0_i32, %c0_i32_0 : i32, i32, i32
  }
}

module attributes {stable_mosaic.version = 11 : i64} {
  func.func @_matmul_epilogue_kernel(%arg0: i32, %arg1: memref<1x8x256xf32, #tpu.memory_space<vmem>>, %arg2: memref<1x256x128xbf16, #tpu.memory_space<vmem>>, %arg3: memref<3x128xf32, #tpu.memory_space<vmem>>, %arg4: memref<1x8x128xf32, #tpu.memory_space<vmem>>) attributes {dimension_semantics = [#tpu.dimension_semantics<parallel>], iteration_bounds = array<i64: 2>, scalar_prefetch = 0 : i64, scratch_operands = 0 : i64, tpu.core_type = #tpu.core_type<tc>, window_params = [{transform_indices = @transform_0, window_bounds = array<i64: 1, 8, 256>}, {transform_indices = @transform_1, window_bounds = array<i64: 1, 256, 128>}, {pipeline_mode = #tpu.pipeline_mode<synchronous>, transform_indices = @transform_2, window_bounds = array<i64: 3, 128>}, {transform_indices = @transform_3, window_bounds = array<i64: 1, 8, 128>}]} {
    %c0 = arith.constant 0 : index
    %c0_0 = arith.constant 0 : index
    %c0_1 = arith.constant 0 : index
    %0 = vector.load %arg1[%c0, %c0_0, %c0_1] : memref<1x8x256xf32, #tpu.memory_space<vmem>>, vector<1x8x256xf32>
    %1 = vector.shape_cast %0 : vector<1x8x256xf32> to vector<8x256xf32>
    %2 = arith.truncf %1 : vector<8x256xf32> to vector<8x256xbf16>
    %c0_2 = arith.constant 0 : index
    %c0_3 = arith.constant 0 : index
    %c0_4 = arith.constant 0 : index
    %3 = vector.load %arg2[%c0_2, %c0_3, %c0_4] : memref<1x256x128xbf16, #tpu.memory_space<vmem>>, vector<1x256x128xbf16>
    %4 = vector.shape_cast %3 : vector<1x256x128xbf16> to vector<256x128xbf16>
    %cst = arith.constant dense<0.000000e+00> : vector<8x128xf32>
    %5 = tpu.matmul %2, %4, %cst {dimension_numbers = #tpu.dot_dimension_numbers<[1], [0], [0], [1], [0, 0, 1, 1], [], []>} : vector<8x256xbf16>, vector<256x128xbf16>, vector<8x128xf32> -> vector<8x128xf32>
    %c0_5 = arith.constant 0 : index
    %c0_6 = arith.constant 0 : index
    %6 = vector.load %arg3[%c0_5, %c0_6] : memref<3x128xf32, #tpu.memory_space<vmem>>, vector<3x128xf32>
    %7 = vector.extract_strided_slice %6 {offsets = [0, 0], sizes = [1, 128], strides = [1, 1]} : vector<3x128xf32> to vector<1x128xf32>
    %8 = vector.broadcast %7 : vector<1x128xf32> to vector<8x128xf32>
    %9 = arith.addf %5, %8 : vector<8x128xf32>
    %cst_7 = arith.constant 0.000000e+00 : f32
    %10 = vector.broadcast %cst_7 : f32 to vector<8x128xf32>
    %11 = arith.cmpf oge, %9, %10 : vector<8x128xf32>
    %cst_8 = arith.constant 2.000000e-01 : f32
    %12 = vector.broadcast %cst_8 : f32 to vector<8x128xf32>
    %13 = arith.mulf %12, %9 : vector<8x128xf32>
    %14 = arith.select %11, %9, %13 : vector<8x128xi1>, vector<8x128xf32>
    %15 = vector.extract_strided_slice %6 {offsets = [1, 0], sizes = [1, 128], strides = [1, 1]} : vector<3x128xf32> to vector<1x128xf32>
    %16 = vector.broadcast %15 : vector<1x128xf32> to vector<8x128xf32>
    %17 = arith.mulf %14, %16 : vector<8x128xf32>
    %18 = vector.extract_strided_slice %6 {offsets = [2, 0], sizes = [1, 128], strides = [1, 1]} : vector<3x128xf32> to vector<1x128xf32>
    %19 = vector.broadcast %18 : vector<1x128xf32> to vector<8x128xf32>
    %20 = arith.addf %17, %19 : vector<8x128xf32>
    %c0_9 = arith.constant 0 : index
    %c0_10 = arith.constant 0 : index
    %c0_11 = arith.constant 0 : index
    %21 = vector.load %arg4[%c0_9, %c0_10, %c0_11] : memref<1x8x128xf32, #tpu.memory_space<vmem>>, vector<1x8x128xf32>
    %22 = vector.shape_cast %21 : vector<1x8x128xf32> to vector<8x128xf32>
    %23 = vector.shape_cast %20 : vector<8x128xf32> to vector<1x8x128xf32>
    tpu.vector_store %arg4[%c0_9, %c0_10, %c0_11], %23 {strides = array<i32>} : memref<1x8x128xf32, #tpu.memory_space<vmem>>, vector<1x8x128xf32>,
    return
  }
  func.func @transform_0(%arg0: i32) -> (i32, i32, i32) {
    %c0_i32 = arith.constant 0 : i32
    %c0_i32_0 = arith.constant 0 : i32
    %c0_i32_1 = arith.constant 0 : i32
    return %arg0, %c0_i32, %c0_i32_0 : i32, i32, i32
  }
  func.func @transform_1(%arg0: i32) -> (i32, i32, i32) {
    %c0_i32 = arith.constant 0 : i32
    %c0_i32_0 = arith.constant 0 : i32
    %c0_i32_1 = arith.constant 0 : i32
    return %arg0, %c0_i32, %c0_i32_0 : i32, i32, i32
  }
  func.func @transform_2(%arg0: i32) -> (i32, i32) {
    %c0_i32 = arith.constant 0 : i32
    %c0_i32_0 = arith.constant 0 : i32
    %c0_i32_1 = arith.constant 0 : i32
    return %c0_i32, %c0_i32_0 : i32, i32
  }
  func.func @transform_3(%arg0: i32) -> (i32, i32, i32) {
    %c0_i32 = arith.constant 0 : i32
    %c0_i32_0 = arith.constant 0 : i32
    %c0_i32_1 = arith.constant 0 : i32
    return %arg0, %c0_i32, %c0_i32_0 : i32, i32, i32
  }
}

module attributes {stable_mosaic.version = 11 : i64} {
  func.func @_matmul_epilogue_kernel(%arg0: i32, %arg1: memref<1x16x256xf32, #tpu.memory_space<vmem>>, %arg2: memref<1x256x128xbf16, #tpu.memory_space<vmem>>, %arg3: memref<3x128xf32, #tpu.memory_space<vmem>>, %arg4: memref<1x16x128xf32, #tpu.memory_space<vmem>>) attributes {dimension_semantics = [#tpu.dimension_semantics<parallel>], iteration_bounds = array<i64: 2>, scalar_prefetch = 0 : i64, scratch_operands = 0 : i64, tpu.core_type = #tpu.core_type<tc>, window_params = [{transform_indices = @transform_0, window_bounds = array<i64: 1, 16, 256>}, {transform_indices = @transform_1, window_bounds = array<i64: 1, 256, 128>}, {pipeline_mode = #tpu.pipeline_mode<synchronous>, transform_indices = @transform_2, window_bounds = array<i64: 3, 128>}, {transform_indices = @transform_3, window_bounds = array<i64: 1, 16, 128>}]} {
    %c0 = arith.constant 0 : index
    %c0_0 = arith.constant 0 : index
    %c0_1 = arith.constant 0 : index
    %0 = vector.load %arg1[%c0, %c0_0, %c0_1] : memref<1x16x256xf32, #tpu.memory_space<vmem>>, vector<1x16x256xf32>
    %1 = vector.shape_cast %0 : vector<1x16x256xf32> to vector<16x256xf32>
    %2 = arith.truncf %1 : vector<16x256xf32> to vector<16x256xbf16>
    %c0_2 = arith.constant 0 : index
    %c0_3 = arith.constant 0 : index
    %c0_4 = arith.constant 0 : index
    %3 = vector.load %arg2[%c0_2, %c0_3, %c0_4] : memref<1x256x128xbf16, #tpu.memory_space<vmem>>, vector<1x256x128xbf16>
    %4 = vector.shape_cast %3 : vector<1x256x128xbf16> to vector<256x128xbf16>
    %cst = arith.constant dense<0.000000e+00> : vector<16x128xf32>
    %5 = tpu.matmul %2, %4, %cst {dimension_numbers = #tpu.dot_dimension_numbers<[1], [0], [0], [1], [0, 0, 1, 1], [], []>} : vector<16x256xbf16>, vector<256x128xbf16>, vector<16x128xf32> -> vector<16x128xf32>
    %c0_5 = arith.constant 0 : index
    %c0_6 = arith.constant 0 : index
    %6 = vector.load %arg3[%c0_5, %c0_6] : memref<3x128xf32, #tpu.memory_space<vmem>>, vector<3x128xf32>
    %7 = vector.extract_strided_slice %6 {offsets = [0, 0], sizes = [1, 128], strides = [1, 1]} : vector<3x128xf32> to vector<1x128xf32>
    %8 = vector.broadcast %7 : vector<1x128xf32> to vector<16x128xf32>
    %9 = arith.addf %5, %8 : vector<16x128xf32>
    %cst_7 = arith.constant 0.000000e+00 : f32
    %10 = vector.broadcast %cst_7 : f32 to vector<16x128xf32>
    %11 = arith.cmpf oge, %9, %10 : vector<16x128xf32>
    %cst_8 = arith.constant 2.000000e-01 : f32
    %12 = vector.broadcast %cst_8 : f32 to vector<16x128xf32>
    %13 = arith.mulf %12, %9 : vector<16x128xf32>
    %14 = arith.select %11, %9, %13 : vector<16x128xi1>, vector<16x128xf32>
    %15 = vector.extract_strided_slice %6 {offsets = [1, 0], sizes = [1, 128], strides = [1, 1]} : vector<3x128xf32> to vector<1x128xf32>
    %16 = vector.broadcast %15 : vector<1x128xf32> to vector<16x128xf32>
    %17 = arith.mulf %14, %16 : vector<16x128xf32>
    %18 = vector.extract_strided_slice %6 {offsets = [2, 0], sizes = [1, 128], strides = [1, 1]} : vector<3x128xf32> to vector<1x128xf32>
    %19 = vector.broadcast %18 : vector<1x128xf32> to vector<16x128xf32>
    %20 = arith.addf %17, %19 : vector<16x128xf32>
    %c0_9 = arith.constant 0 : index
    %c0_10 = arith.constant 0 : index
    %c0_11 = arith.constant 0 : index
    %21 = vector.load %arg4[%c0_9, %c0_10, %c0_11] : memref<1x16x128xf32, #tpu.memory_space<vmem>>, vector<1x16x128xf32>
    %22 = vector.shape_cast %21 : vector<1x16x128xf32> to vector<16x128xf32>
    %23 = vector.shape_cast %20 : vector<16x128xf32> to vector<1x16x128xf32>
    tpu.vector_store %arg4[%c0_9, %c0_10, %c0_11], %23 {strides = array<i32>} : memref<1x16x128xf32, #tpu.memory_space<vmem>>, vector<1x16x128xf32>,
    return
  }
  func.func @transform_0(%arg0: i32) -> (i32, i32, i32) {
    %c0_i32 = arith.constant 0 : i32
    %c0_i32_0 = arith.constant 0 : i32
    %c0_i32_1 = arith.constant 0 : i32
    return %arg0, %c0_i32, %c0_i32_0 : i32, i32, i32
  }
  func.func @transform_1(%arg0: i32) -> (i32, i32, i32) {
    %c0_i32 = arith.constant 0 : i32
    %c0_i32_0 = arith.constant 0 : i32
    %c0_i32_1 = arith.constant 0 : i32
    return %arg0, %c0_i32, %c0_i32_0 : i32, i32, i32
  }
  func.func @transform_2(%arg0: i32) -> (i32, i32) {
    %c0_i32 = arith.constant 0 : i32
    %c0_i32_0 = arith.constant 0 : i32
    %c0_i32_1 = arith.constant 0 : i32
    return %c0_i32, %c0_i32_0 : i32, i32
  }
  func.func @transform_3(%arg0: i32) -> (i32, i32, i32) {
    %c0_i32 = arith.constant 0 : i32
    %c0_i32_0 = arith.constant 0 : i32
    %c0_i32_1 = arith.constant 0 : i32
    return %arg0, %c0_i32, %c0_i32_0 : i32, i32, i32
  }
}

module attributes {stable_mosaic.version = 11 : i64} {
  func.func @_matmul_epilogue_kernel(%arg0: i32, %arg1: memref<1x32x256xf32, #tpu.memory_space<vmem>>, %arg2: memref<1x256x128xbf16, #tpu.memory_space<vmem>>, %arg3: memref<3x128xf32, #tpu.memory_space<vmem>>, %arg4: memref<1x32x128xf32, #tpu.memory_space<vmem>>) attributes {dimension_semantics = [#tpu.dimension_semantics<parallel>], iteration_bounds = array<i64: 2>, scalar_prefetch = 0 : i64, scratch_operands = 0 : i64, tpu.core_type = #tpu.core_type<tc>, window_params = [{transform_indices = @transform_0, window_bounds = array<i64: 1, 32, 256>}, {transform_indices = @transform_1, window_bounds = array<i64: 1, 256, 128>}, {pipeline_mode = #tpu.pipeline_mode<synchronous>, transform_indices = @transform_2, window_bounds = array<i64: 3, 128>}, {transform_indices = @transform_3, window_bounds = array<i64: 1, 32, 128>}]} {
    %c0 = arith.constant 0 : index
    %c0_0 = arith.constant 0 : index
    %c0_1 = arith.constant 0 : index
    %0 = vector.load %arg1[%c0, %c0_0, %c0_1] : memref<1x32x256xf32, #tpu.memory_space<vmem>>, vector<1x32x256xf32>
    %1 = vector.shape_cast %0 : vector<1x32x256xf32> to vector<32x256xf32>
    %2 = arith.truncf %1 : vector<32x256xf32> to vector<32x256xbf16>
    %c0_2 = arith.constant 0 : index
    %c0_3 = arith.constant 0 : index
    %c0_4 = arith.constant 0 : index
    %3 = vector.load %arg2[%c0_2, %c0_3, %c0_4] : memref<1x256x128xbf16, #tpu.memory_space<vmem>>, vector<1x256x128xbf16>
    %4 = vector.shape_cast %3 : vector<1x256x128xbf16> to vector<256x128xbf16>
    %cst = arith.constant dense<0.000000e+00> : vector<32x128xf32>
    %5 = tpu.matmul %2, %4, %cst {dimension_numbers = #tpu.dot_dimension_numbers<[1], [0], [0], [1], [0, 0, 1, 1], [], []>} : vector<32x256xbf16>, vector<256x128xbf16>, vector<32x128xf32> -> vector<32x128xf32>
    %c0_5 = arith.constant 0 : index
    %c0_6 = arith.constant 0 : index
    %6 = vector.load %arg3[%c0_5, %c0_6] : memref<3x128xf32, #tpu.memory_space<vmem>>, vector<3x128xf32>
    %7 = vector.extract_strided_slice %6 {offsets = [0, 0], sizes = [1, 128], strides = [1, 1]} : vector<3x128xf32> to vector<1x128xf32>
    %8 = vector.broadcast %7 : vector<1x128xf32> to vector<32x128xf32>
    %9 = arith.addf %5, %8 : vector<32x128xf32>
    %cst_7 = arith.constant 0.000000e+00 : f32
    %10 = vector.broadcast %cst_7 : f32 to vector<32x128xf32>
    %11 = arith.cmpf oge, %9, %10 : vector<32x128xf32>
    %cst_8 = arith.constant 2.000000e-01 : f32
    %12 = vector.broadcast %cst_8 : f32 to vector<32x128xf32>
    %13 = arith.mulf %12, %9 : vector<32x128xf32>
    %14 = arith.select %11, %9, %13 : vector<32x128xi1>, vector<32x128xf32>
    %15 = vector.extract_strided_slice %6 {offsets = [1, 0], sizes = [1, 128], strides = [1, 1]} : vector<3x128xf32> to vector<1x128xf32>
    %16 = vector.broadcast %15 : vector<1x128xf32> to vector<32x128xf32>
    %17 = arith.mulf %14, %16 : vector<32x128xf32>
    %18 = vector.extract_strided_slice %6 {offsets = [2, 0], sizes = [1, 128], strides = [1, 1]} : vector<3x128xf32> to vector<1x128xf32>
    %19 = vector.broadcast %18 : vector<1x128xf32> to vector<32x128xf32>
    %20 = arith.addf %17, %19 : vector<32x128xf32>
    %c0_9 = arith.constant 0 : index
    %c0_10 = arith.constant 0 : index
    %c0_11 = arith.constant 0 : index
    %21 = vector.load %arg4[%c0_9, %c0_10, %c0_11] : memref<1x32x128xf32, #tpu.memory_space<vmem>>, vector<1x32x128xf32>
    %22 = vector.shape_cast %21 : vector<1x32x128xf32> to vector<32x128xf32>
    %23 = vector.shape_cast %20 : vector<32x128xf32> to vector<1x32x128xf32>
    tpu.vector_store %arg4[%c0_9, %c0_10, %c0_11], %23 {strides = array<i32>} : memref<1x32x128xf32, #tpu.memory_space<vmem>>, vector<1x32x128xf32>,
    return
  }
  func.func @transform_0(%arg0: i32) -> (i32, i32, i32) {
    %c0_i32 = arith.constant 0 : i32
    %c0_i32_0 = arith.constant 0 : i32
    %c0_i32_1 = arith.constant 0 : i32
    return %arg0, %c0_i32, %c0_i32_0 : i32, i32, i32
  }
  func.func @transform_1(%arg0: i32) -> (i32, i32, i32) {
    %c0_i32 = arith.constant 0 : i32
    %c0_i32_0 = arith.constant 0 : i32
    %c0_i32_1 = arith.constant 0 : i32
    return %arg0, %c0_i32, %c0_i32_0 : i32, i32, i32
  }
  func.func @transform_2(%arg0: i32) -> (i32, i32) {
    %c0_i32 = arith.constant 0 : i32
    %c0_i32_0 = arith.constant 0 : i32
    %c0_i32_1 = arith.constant 0 : i32
    return %c0_i32, %c0_i32_0 : i32, i32
  }
  func.func @transform_3(%arg0: i32) -> (i32, i32, i32) {
    %c0_i32 = arith.constant 0 : i32
    %c0_i32_0 = arith.constant 0 : i32
    %c0_i32_1 = arith.constant 0 : i32
    return %arg0, %c0_i32, %c0_i32_0 : i32, i32, i32
  }
}

module attributes {stable_mosaic.version = 11 : i64} {
  func.func @_matmul_epilogue_kernel(%arg0: i32, %arg1: memref<64x128xf32, #tpu.memory_space<vmem>>, %arg2: memref<128x256xbf16, #tpu.memory_space<vmem>>, %arg3: memref<3x256xf32, #tpu.memory_space<vmem>>, %arg4: memref<64x256xf32, #tpu.memory_space<vmem>>) attributes {dimension_semantics = [#tpu.dimension_semantics<parallel>], iteration_bounds = array<i64: 2>, scalar_prefetch = 0 : i64, scratch_operands = 0 : i64, tpu.core_type = #tpu.core_type<tc>, window_params = [{pipeline_mode = #tpu.pipeline_mode<synchronous>, transform_indices = @transform_0, window_bounds = array<i64: 64, 128>}, {transform_indices = @transform_1, window_bounds = array<i64: 128, 256>}, {transform_indices = @transform_2, window_bounds = array<i64: 3, 256>}, {transform_indices = @transform_3, window_bounds = array<i64: 64, 256>}]} {
    %c0 = arith.constant 0 : index
    %c0_0 = arith.constant 0 : index
    %0 = vector.load %arg1[%c0, %c0_0] : memref<64x128xf32, #tpu.memory_space<vmem>>, vector<64x128xf32>
    %1 = arith.truncf %0 : vector<64x128xf32> to vector<64x128xbf16>
    %c0_1 = arith.constant 0 : index
    %c0_2 = arith.constant 0 : index
    %2 = vector.load %arg2[%c0_1, %c0_2] : memref<128x256xbf16, #tpu.memory_space<vmem>>, vector<128x256xbf16>
    %cst = arith.constant dense<0.000000e+00> : vector<64x256xf32>
    %3 = tpu.matmul %1, %2, %cst {dimension_numbers = #tpu.dot_dimension_numbers<[1], [0], [0], [1], [0, 0, 1, 1], [], []>} : vector<64x128xbf16>, vector<128x256xbf16>, vector<64x256xf32> -> vector<64x256xf32>
    %c0_3 = arith.constant 0 : index
    %c0_4 = arith.constant 0 : index
    %4 = vector.load %arg3[%c0_3, %c0_4] : memref<3x256xf32, #tpu.memory_space<vmem>>, vector<3x256xf32>
    %5 = vector.extract_strided_slice %4 {offsets = [0, 0], sizes = [1, 256], strides = [1, 1]} : vector<3x256xf32> to vector<1x256xf32>
    %6 = vector.broadcast %5 : vector<1x256xf32> to vector<64x256xf32>
    %7 = arith.addf %3, %6 : vector<64x256xf32>
    %8 = vector.extract_strided_slice %4 {offsets = [1, 0], sizes = [1, 256], strides = [1, 1]} : vector<3x256xf32> to vector<1x256xf32>
    %9 = vector.broadcast %8 : vector<1x256xf32> to vector<64x256xf32>
    %10 = arith.mulf %7, %9 : vector<64x256xf32>
    %11 = vector.extract_strided_slice %4 {offsets = [2, 0], sizes = [1, 256], strides = [1, 1]} : vector<3x256xf32> to vector<1x256xf32>
    %12 = vector.broadcast %11 : vector<1x256xf32> to vector<64x256xf32>
    %13 = arith.addf %10, %12 : vector<64x256xf32>
    %c0_5 = arith.constant 0 : index
    %c0_6 = arith.constant 0 : index
    %14 = vector.load %arg4[%c0_5, %c0_6] : memref<64x256xf32, #tpu.memory_space<vmem>>, vector<64x256xf32>
    tpu.vector_store %arg4[%c0_5, %c0_6], %13 {strides = array<i32>} : memref<64x256xf32, #tpu.memory_space<vmem>>, vector<64x256xf32>,
    return
  }
  func.func @transform_0(%arg0: i32) -> (i32, i32) {
    %c0_i32 = arith.constant 0 : i32
    %c0_i32_0 = arith.constant 0 : i32
    %c0_i32_1 = arith.constant 0 : i32
    return %c0_i32, %c0_i32_0 : i32, i32
  }
  func.func @transform_1(%arg0: i32) -> (i32, i32) {
    %c0_i32 = arith.constant 0 : i32
    %c0_i32_0 = arith.constant 0 : i32
    return %c0_i32, %arg0 : i32, i32
  }
  func.func @transform_2(%arg0: i32) -> (i32, i32) {
    %c0_i32 = arith.constant 0 : i32
    %c0_i32_0 = arith.constant 0 : i32
    return %c0_i32, %arg0 : i32, i32
  }
  func.func @transform_3(%arg0: i32) -> (i32, i32) {
    %c0_i32 = arith.constant 0 : i32
    %c0_i32_0 = arith.constant 0 : i32
    return %c0_i32, %arg0 : i32, i32
  }
}

module attributes {stable_mosaic.version = 11 : i64} {
  func.func @_matmul_epilogue_kernel(%arg0: i32, %arg1: memref<8x64xf32, #tpu.memory_space<vmem>>, %arg2: memref<64x512xbf16, #tpu.memory_space<vmem>>, %arg3: memref<3x512xf32, #tpu.memory_space<vmem>>, %arg4: memref<8x512xf32, #tpu.memory_space<vmem>>) attributes {dimension_semantics = [#tpu.dimension_semantics<parallel>], iteration_bounds = array<i64: 5>, scalar_prefetch = 0 : i64, scratch_operands = 0 : i64, tpu.core_type = #tpu.core_type<tc>, window_params = [{pipeline_mode = #tpu.pipeline_mode<synchronous>, transform_indices = @transform_0, window_bounds = array<i64: 8, 64>}, {transform_indices = @transform_1, window_bounds = array<i64: 64, 512>}, {transform_indices = @transform_2, window_bounds = array<i64: 3, 512>}, {transform_indices = @transform_3, window_bounds = array<i64: 8, 512>}]} {
    %c0 = arith.constant 0 : index
    %c0_0 = arith.constant 0 : index
    %0 = vector.load %arg1[%c0, %c0_0] : memref<8x64xf32, #tpu.memory_space<vmem>>, vector<8x64xf32>
    %1 = arith.truncf %0 : vector<8x64xf32> to vector<8x64xbf16>
    %c0_1 = arith.constant 0 : index
    %c0_2 = arith.constant 0 : index
    %2 = vector.load %arg2[%c0_1, %c0_2] : memref<64x512xbf16, #tpu.memory_space<vmem>>, vector<64x512xbf16>
    %cst = arith.constant dense<0.000000e+00> : vector<8x512xf32>
    %3 = tpu.matmul %1, %2, %cst {dimension_numbers = #tpu.dot_dimension_numbers<[1], [0], [0], [1], [0, 0, 1, 1], [], []>} : vector<8x64xbf16>, vector<64x512xbf16>, vector<8x512xf32> -> vector<8x512xf32>
    %c0_3 = arith.constant 0 : index
    %c0_4 = arith.constant 0 : index
    %4 = vector.load %arg3[%c0_3, %c0_4] : memref<3x512xf32, #tpu.memory_space<vmem>>, vector<3x512xf32>
    %5 = vector.extract_strided_slice %4 {offsets = [0, 0], sizes = [1, 512], strides = [1, 1]} : vector<3x512xf32> to vector<1x512xf32>
    %6 = vector.broadcast %5 : vector<1x512xf32> to vector<8x512xf32>
    %7 = arith.addf %3, %6 : vector<8x512xf32>
    %cst_5 = arith.constant 5.000000e-01 : f32
    %8 = vector.broadcast %cst_5 : f32 to vector<8x512xf32>
    %9 = arith.mulf %8, %7 : vector<8x512xf32>
    %10 = math.tanh %9 : vector<8x512xf32>
    %cst_6 = arith.constant 1.000000e+00 : f32
    %11 = vector.broadcast %cst_6 : f32 to vector<8x512xf32>
    %12 = arith.addf %10, %11 : vector<8x512xf32>
    %cst_7 = arith.constant 5.000000e-01 : f32
    %13 = vector.broadcast %cst_7 : f32 to vector<8x512xf32>
    %14 = arith.mulf %13, %12 : vector<8x512xf32>
    %15 = vector.extract_strided_slice %4 {offsets = [1, 0], sizes = [1, 512], strides = [1, 1]} : vector<3x512xf32> to vector<1x512xf32>
    %16 = vector.broadcast %15 : vector<1x512xf32> to vector<8x512xf32>
    %17 = arith.mulf %14, %16 : vector<8x512xf32>
    %18 = vector.extract_strided_slice %4 {offsets = [2, 0], sizes = [1, 512], strides = [1, 1]} : vector<3x512xf32> to vector<1x512xf32>
    %19 = vector.broadcast %18 : vector<1x512xf32> to vector<8x512xf32>
    %20 = arith.addf %17, %19 : vector<8x512xf32>
    %c0_8 = arith.constant 0 : index
    %c0_9 = arith.constant 0 : index
    %21 = vector.load %arg4[%c0_8, %c0_9] : memref<8x512xf32, #tpu.memory_space<vmem>>, vector<8x512xf32>
    tpu.vector_store %arg4[%c0_8, %c0_9], %20 {strides = array<i32>} : memref<8x512xf32, #tpu.memory_space<vmem>>, vector<8x512xf32>,
    return
  }
  func.func @transform_0(%arg0: i32) -> (i32, i32) {
    %c0_i32 = arith.constant 0 : i32
    %c0_i32_0 = arith.constant 0 : i32
    %c0_i32_1 = arith.constant 0 : i32
    return %c0_i32, %c0_i32_0 : i32, i32
  }
  func.func @transform_1(%arg0: i32) -> (i32, i32) {
    %c0_i32 = arith.constant 0 : i32
    %c0_i32_0 = arith.constant 0 : i32
    return %c0_i32, %arg0 : i32, i32
  }
  func.func @transform_2(%arg0: i32) -> (i32, i32) {
    %c0_i32 = arith.constant 0 : i32
    %c0_i32_0 = arith.constant 0 : i32
    return %c0_i32, %arg0 : i32, i32
  }
  func.func @transform_3(%arg0: i32) -> (i32, i32) {
    %c0_i32 = arith.constant 0 : i32
    %c0_i32_0 = arith.constant 0 : i32
    return %c0_i32, %arg0 : i32, i32
  }
}

module attributes {stable_mosaic.version = 11 : i64} {
  func.func @_res_select_kernel(%arg0: i32, %arg1: memref<8x64xf32, #tpu.memory_space<vmem>>, %arg2: memref<1x64x128xbf16, #tpu.memory_space<vmem>>, %arg3: memref<1x1x128xf32, #tpu.memory_space<vmem>>, %arg4: memref<128x4096xbf16, #tpu.memory_space<vmem>>, %arg5: memref<8x4096xf32, #tpu.memory_space<vmem>>, %arg6: memref<1x8x4096xf32, #tpu.memory_space<vmem>>) attributes {dimension_semantics = [#tpu.dimension_semantics<parallel>], iteration_bounds = array<i64: 4>, scalar_prefetch = 0 : i64, scratch_operands = 0 : i64, tpu.core_type = #tpu.core_type<tc>, window_params = [{pipeline_mode = #tpu.pipeline_mode<synchronous>, transform_indices = @transform_0, window_bounds = array<i64: 8, 64>}, {transform_indices = @transform_1, window_bounds = array<i64: 1, 64, 128>}, {transform_indices = @transform_2, window_bounds = array<i64: 1, 1, 128>}, {pipeline_mode = #tpu.pipeline_mode<synchronous>, transform_indices = @transform_3, window_bounds = array<i64: 128, 4096>}, {pipeline_mode = #tpu.pipeline_mode<synchronous>, transform_indices = @transform_4, window_bounds = array<i64: 8, 4096>}, {transform_indices = @transform_5, window_bounds = array<i64: 1, 8, 4096>}]} {
    %c0 = arith.constant 0 : index
    %c0_0 = arith.constant 0 : index
    %0 = vector.load %arg1[%c0, %c0_0] : memref<8x64xf32, #tpu.memory_space<vmem>>, vector<8x64xf32>
    %1 = arith.truncf %0 : vector<8x64xf32> to vector<8x64xbf16>
    %c0_1 = arith.constant 0 : index
    %c0_2 = arith.constant 0 : index
    %c0_3 = arith.constant 0 : index
    %2 = vector.load %arg2[%c0_1, %c0_2, %c0_3] : memref<1x64x128xbf16, #tpu.memory_space<vmem>>, vector<1x64x128xbf16>
    %3 = vector.shape_cast %2 : vector<1x64x128xbf16> to vector<64x128xbf16>
    %cst = arith.constant dense<0.000000e+00> : vector<8x128xf32>
    %4 = tpu.matmul %1, %3, %cst {dimension_numbers = #tpu.dot_dimension_numbers<[1], [0], [0], [1], [0, 0, 1, 1], [], []>} : vector<8x64xbf16>, vector<64x128xbf16>, vector<8x128xf32> -> vector<8x128xf32>
    %c0_4 = arith.constant 0 : index
    %c0_5 = arith.constant 0 : index
    %c0_6 = arith.constant 0 : index
    %5 = vector.load %arg3[%c0_4, %c0_5, %c0_6] : memref<1x1x128xf32, #tpu.memory_space<vmem>>, vector<1x1x128xf32>
    %6 = vector.shape_cast %5 : vector<1x1x128xf32> to vector<1x128xf32>
    %7 = vector.broadcast %6 : vector<1x128xf32> to vector<8x128xf32>
    %8 = arith.addf %4, %7 : vector<8x128xf32>
    %cst_7 = arith.constant dense<0xFF800000> : vector<8xf32>
    %9 = vector.multi_reduction <maximumf>, %8, %cst_7 [1] : vector<8x128xf32> to vector<8xf32>
    %10 = vector.shape_cast %9 : vector<8xf32> to vector<8x1xf32>
    %11 = vector.broadcast %10 : vector<8x1xf32> to vector<8x128xf32>
    %12 = arith.subf %8, %11 : vector<8x128xf32>
    %13 = math.exp %12 : vector<8x128xf32>
    %cst_8 = arith.constant dense<0.000000e+00> : vector<8xf32>
    %14 = vector.multi_reduction <add>, %13, %cst_8 [1] : vector<8x128xf32> to vector<8xf32>
    %15 = vector.shape_cast %14 : vector<8xf32> to vector<8x1xf32>
    %16 = vector.broadcast %15 : vector<8x1xf32> to vector<8x128xf32>
    %17 = arith.divf %13, %16 : vector<8x128xf32>
    %18 = arith.truncf %17 : vector<8x128xf32> to vector<8x128xbf16>
    %c0_9 = arith.constant 0 : index
    %c0_10 = arith.constant 0 : index
    %19 = vector.load %arg4[%c0_9, %c0_10] : memref<128x4096xbf16, #tpu.memory_space<vmem>>, vector<128x4096xbf16>
    %cst_11 = arith.constant dense<0.000000e+00> : vector<8x4096xf32>
    %20 = tpu.matmul %18, %19, %cst_11 {dimension_numbers = #tpu.dot_dimension_numbers<[1], [0], [0], [1], [0, 0, 1, 1], [], []>} : vector<8x128xbf16>, vector<128x4096xbf16>, vector<8x4096xf32> -> vector<8x4096xf32>
    %c0_12 = arith.constant 0 : index
    %c0_13 = arith.constant 0 : index
    %21 = vector.load %arg5[%c0_12, %c0_13] : memref<8x4096xf32, #tpu.memory_space<vmem>>, vector<8x4096xf32>
    %22 = arith.mulf %20, %21 : vector<8x4096xf32>
    %c0_14 = arith.constant 0 : index
    %c0_15 = arith.constant 0 : index
    %c0_16 = arith.constant 0 : index
    %23 = vector.load %arg6[%c0_14, %c0_15, %c0_16] : memref<1x8x4096xf32, #tpu.memory_space<vmem>>, vector<1x8x4096xf32>
    %24 = vector.shape_cast %23 : vector<1x8x4096xf32> to vector<8x4096xf32>
    %25 = vector.shape_cast %22 : vector<8x4096xf32> to vector<1x8x4096xf32>
    tpu.vector_store %arg6[%c0_14, %c0_15, %c0_16], %25 {strides = array<i32>} : memref<1x8x4096xf32, #tpu.memory_space<vmem>>, vector<1x8x4096xf32>,
    return
  }
  func.func @transform_0(%arg0: i32) -> (i32, i32) {
    %c0_i32 = arith.constant 0 : i32
    %c0_i32_0 = arith.constant 0 : i32
    %c0_i32_1 = arith.constant 0 : i32
    return %c0_i32, %c0_i32_0 : i32, i32
  }
  func.func @transform_1(%arg0: i32) -> (i32, i32, i32) {
    %c0_i32 = arith.constant 0 : i32
    %c0_i32_0 = arith.constant 0 : i32
    %c0_i32_1 = arith.constant 0 : i32
    return %arg0, %c0_i32, %c0_i32_0 : i32, i32, i32
  }
  func.func @transform_2(%arg0: i32) -> (i32, i32, i32) {
    %c0_i32 = arith.constant 0 : i32
    %c0_i32_0 = arith.constant 0 : i32
    %c0_i32_1 = arith.constant 0 : i32
    return %arg0, %c0_i32, %c0_i32_0 : i32, i32, i32
  }
  func.func @transform_3(%arg0: i32) -> (i32, i32) {
    %c0_i32 = arith.constant 0 : i32
    %c0_i32_0 = arith.constant 0 : i32
    %c0_i32_1 = arith.constant 0 : i32
    return %c0_i32, %c0_i32_0 : i32, i32
  }
  func.func @transform_4(%arg0: i32) -> (i32, i32) {
    %c0_i32 = arith.constant 0 : i32
    %c0_i32_0 = arith.constant 0 : i32
    %c0_i32_1 = arith.constant 0 : i32
    return %c0_i32, %c0_i32_0 : i32, i32
  }
  func.func @transform_5(%arg0: i32) -> (i32, i32, i32) {
    %c0_i32 = arith.constant 0 : i32
    %c0_i32_0 = arith.constant 0 : i32
    %c0_i32_1 = arith.constant 0 : i32
    return %arg0, %c0_i32, %c0_i32_0 : i32, i32, i32
  }
}

module attributes {stable_mosaic.version = 11 : i64} {
  func.func @_unit_norm_kernel(%arg0: memref<128x512xf32, #tpu.memory_space<vmem>>, %arg1: memref<128x512xf32, #tpu.memory_space<vmem>>) attributes {dimension_semantics = [], scalar_prefetch = 0 : i64, scratch_operands = 0 : i64, tpu.core_type = #tpu.core_type<tc>} {
    %c0 = arith.constant 0 : index
    %c0_0 = arith.constant 0 : index
    %0 = vector.load %arg0[%c0, %c0_0] : memref<128x512xf32, #tpu.memory_space<vmem>>, vector<128x512xf32>
    %1 = arith.mulf %0, %0 : vector<128x512xf32>
    %cst = arith.constant dense<0.000000e+00> : vector<128xf32>
    %2 = vector.multi_reduction <add>, %1, %cst [1] : vector<128x512xf32> to vector<128xf32>
    %3 = vector.shape_cast %2 : vector<128xf32> to vector<128x1xf32>
    %cst_1 = arith.constant 9.99999996E-13 : f32
    %4 = vector.broadcast %cst_1 : f32 to vector<128x1xf32>
    %5 = arith.maximumf %3, %4 : vector<128x1xf32>
    %6 = math.rsqrt %5 : vector<128x1xf32>
    %7 = vector.broadcast %6 : vector<128x1xf32> to vector<128x512xf32>
    %8 = arith.mulf %0, %7 : vector<128x512xf32>
    %c0_2 = arith.constant 0 : index
    %c0_3 = arith.constant 0 : index
    %9 = vector.load %arg1[%c0_2, %c0_3] : memref<128x512xf32, #tpu.memory_space<vmem>>, vector<128x512xf32>
    tpu.vector_store %arg1[%c0_2, %c0_3], %8 {strides = array<i32>} : memref<128x512xf32, #tpu.memory_space<vmem>>, vector<128x512xf32>,
    return
  }
}

module attributes {stable_mosaic.version = 11 : i64} {
  func.func @_matmul_epilogue_kernel(%arg0: i32, %arg1: memref<8x64xf32, #tpu.memory_space<vmem>>, %arg2: memref<64x512xbf16, #tpu.memory_space<vmem>>, %arg3: memref<3x512xf32, #tpu.memory_space<vmem>>, %arg4: memref<8x512xf32, #tpu.memory_space<vmem>>) attributes {dimension_semantics = [#tpu.dimension_semantics<parallel>], iteration_bounds = array<i64: 9>, scalar_prefetch = 0 : i64, scratch_operands = 0 : i64, tpu.core_type = #tpu.core_type<tc>, window_params = [{pipeline_mode = #tpu.pipeline_mode<synchronous>, transform_indices = @transform_0, window_bounds = array<i64: 8, 64>}, {transform_indices = @transform_1, window_bounds = array<i64: 64, 512>}, {transform_indices = @transform_2, window_bounds = array<i64: 3, 512>}, {transform_indices = @transform_3, window_bounds = array<i64: 8, 512>}]} {
    %c0 = arith.constant 0 : index
    %c0_0 = arith.constant 0 : index
    %0 = vector.load %arg1[%c0, %c0_0] : memref<8x64xf32, #tpu.memory_space<vmem>>, vector<8x64xf32>
    %1 = arith.truncf %0 : vector<8x64xf32> to vector<8x64xbf16>
    %c0_1 = arith.constant 0 : index
    %c0_2 = arith.constant 0 : index
    %2 = vector.load %arg2[%c0_1, %c0_2] : memref<64x512xbf16, #tpu.memory_space<vmem>>, vector<64x512xbf16>
    %cst = arith.constant dense<0.000000e+00> : vector<8x512xf32>
    %3 = tpu.matmul %1, %2, %cst {dimension_numbers = #tpu.dot_dimension_numbers<[1], [0], [0], [1], [0, 0, 1, 1], [], []>} : vector<8x64xbf16>, vector<64x512xbf16>, vector<8x512xf32> -> vector<8x512xf32>
    %c0_3 = arith.constant 0 : index
    %c0_4 = arith.constant 0 : index
    %4 = vector.load %arg3[%c0_3, %c0_4] : memref<3x512xf32, #tpu.memory_space<vmem>>, vector<3x512xf32>
    %5 = vector.extract_strided_slice %4 {offsets = [0, 0], sizes = [1, 512], strides = [1, 1]} : vector<3x512xf32> to vector<1x512xf32>
    %6 = vector.broadcast %5 : vector<1x512xf32> to vector<8x512xf32>
    %7 = arith.addf %3, %6 : vector<8x512xf32>
    %cst_5 = arith.constant 5.000000e-01 : f32
    %8 = vector.broadcast %cst_5 : f32 to vector<8x512xf32>
    %9 = arith.mulf %8, %7 : vector<8x512xf32>
    %10 = math.tanh %9 : vector<8x512xf32>
    %cst_6 = arith.constant 1.000000e+00 : f32
    %11 = vector.broadcast %cst_6 : f32 to vector<8x512xf32>
    %12 = arith.addf %10, %11 : vector<8x512xf32>
    %cst_7 = arith.constant 5.000000e-01 : f32
    %13 = vector.broadcast %cst_7 : f32 to vector<8x512xf32>
    %14 = arith.mulf %13, %12 : vector<8x512xf32>
    %15 = vector.extract_strided_slice %4 {offsets = [1, 0], sizes = [1, 512], strides = [1, 1]} : vector<3x512xf32> to vector<1x512xf32>
    %16 = vector.broadcast %15 : vector<1x512xf32> to vector<8x512xf32>
    %17 = arith.mulf %14, %16 : vector<8x512xf32>
    %18 = vector.extract_strided_slice %4 {offsets = [2, 0], sizes = [1, 512], strides = [1, 1]} : vector<3x512xf32> to vector<1x512xf32>
    %19 = vector.broadcast %18 : vector<1x512xf32> to vector<8x512xf32>
    %20 = arith.addf %17, %19 : vector<8x512xf32>
    %c0_8 = arith.constant 0 : index
    %c0_9 = arith.constant 0 : index
    %21 = vector.load %arg4[%c0_8, %c0_9] : memref<8x512xf32, #tpu.memory_space<vmem>>, vector<8x512xf32>
    tpu.vector_store %arg4[%c0_8, %c0_9], %20 {strides = array<i32>} : memref<8x512xf32, #tpu.memory_space<vmem>>, vector<8x512xf32>,
    return
  }
  func.func @transform_0(%arg0: i32) -> (i32, i32) {
    %c0_i32 = arith.constant 0 : i32
    %c0_i32_0 = arith.constant 0 : i32
    %c0_i32_1 = arith.constant 0 : i32
    return %c0_i32, %c0_i32_0 : i32, i32
  }
  func.func @transform_1(%arg0: i32) -> (i32, i32) {
    %c0_i32 = arith.constant 0 : i32
    %c0_i32_0 = arith.constant 0 : i32
    return %c0_i32, %arg0 : i32, i32
  }
  func.func @transform_2(%arg0: i32) -> (i32, i32) {
    %c0_i32 = arith.constant 0 : i32
    %c0_i32_0 = arith.constant 0 : i32
    return %c0_i32, %arg0 : i32, i32
  }
  func.func @transform_3(%arg0: i32) -> (i32, i32) {
    %c0_i32 = arith.constant 0 : i32
    %c0_i32_0 = arith.constant 0 : i32
    return %c0_i32, %arg0 : i32, i32
  }
}

module attributes {stable_mosaic.version = 11 : i64} {
  func.func @_unit_norm_kernel(%arg0: memref<8x4096xf32, #tpu.memory_space<vmem>>, %arg1: memref<8x4096xf32, #tpu.memory_space<vmem>>) attributes {dimension_semantics = [], scalar_prefetch = 0 : i64, scratch_operands = 0 : i64, tpu.core_type = #tpu.core_type<tc>} {
    %c0 = arith.constant 0 : index
    %c0_0 = arith.constant 0 : index
    %0 = vector.load %arg0[%c0, %c0_0] : memref<8x4096xf32, #tpu.memory_space<vmem>>, vector<8x4096xf32>
    %1 = arith.mulf %0, %0 : vector<8x4096xf32>
    %cst = arith.constant dense<0.000000e+00> : vector<8xf32>
    %2 = vector.multi_reduction <add>, %1, %cst [1] : vector<8x4096xf32> to vector<8xf32>
    %3 = vector.shape_cast %2 : vector<8xf32> to vector<8x1xf32>
    %cst_1 = arith.constant 9.99999996E-13 : f32
    %4 = vector.broadcast %cst_1 : f32 to vector<8x1xf32>
    %5 = arith.maximumf %3, %4 : vector<8x1xf32>
    %6 = math.rsqrt %5 : vector<8x1xf32>
    %7 = vector.broadcast %6 : vector<8x1xf32> to vector<8x4096xf32>
    %8 = arith.mulf %0, %7 : vector<8x4096xf32>
    %c0_2 = arith.constant 0 : index
    %c0_3 = arith.constant 0 : index
    %9 = vector.load %arg1[%c0_2, %c0_3] : memref<8x4096xf32, #tpu.memory_space<vmem>>, vector<8x4096xf32>
    tpu.vector_store %arg1[%c0_2, %c0_3], %8 {strides = array<i32>} : memref<8x4096xf32, #tpu.memory_space<vmem>>, vector<8x4096xf32>,
    return
  }
}

</mosaic_0001>

<bundles_post_ra>
// kernel: model_forward.19
= control target key start
LH: loop header
LB: loop body
LE: loop exit
PB: predicated region body
PF: predicated region fallthrough
CT: control target
= control target key end

     0   :  { %s310_s1 = inlined_call_operand.vmem [shape: bf16[128,128], index: 1, kind: input, shape index: {}]   ;;  %s311_s0 = inlined_call_operand.vmem [shape: f32[64,128], index: 0, kind: input, shape index: {}]   ;;  %s312_s2 = inlined_call_operand.vmem [shape: f32[3,128], index: 2, kind: input, shape index: {}]   ;;  %s313_s3 = inlined_call_operand.vmem [shape: f32[64,128], index: 3, kind: output, shape index: {}]  }
   0x1   :  { %v190_v0 = vld [vmem:[%s310_s1 + $0x38] sm:$0xff]  ;;  %v189_v1 = vld [vmem:[%s310_s1 + $0x30] sm:$0xff]  ;;  %v188_v2 = vld [vmem:[%s310_s1 + $0x28] sm:$0xff] }
   0x2   :  { %92 = vmatpush.bf16.msra.mxu0 %v190_v0  ;;  %191 = vmatpush.bf16.msra.mxu1 %v190_v0  ;;  %v187_v3 = vld [vmem:[%s310_s1 + $0x20] sm:$0xff]  ;;  %v186_v4 = vld [vmem:[%s310_s1 + $0x18] sm:$0xff]  ;;  %v185_v5 = vld [vmem:[%s310_s1 + $0x10] sm:$0xff] }
   0x3   :  { %192 = vmatpush.bf16.msra.mxu2 %v190_v0  ;;  %193 = vmatpush.bf16.msra.mxu3 %v190_v0  ;;  %v184_v6 = vld [vmem:[%s310_s1 + $0x8] sm:$0xff]  ;;  %v183_v7 = vld [vmem:[%s310_s1] sm:$0xff]  ;;  %v16_v10 = vld [vmem:[%s311_s0 + $0x10] sm:$0xff] }
   0x4   :  { %v14_v8 = vld [vmem:[%s311_s0] sm:$0xff]  ;;  %v15_v9 = vld [vmem:[%s311_s0 + $0x8] sm:$0xff]  ;;  %v17_v11 = vld [vmem:[%s311_s0 + $0x18] sm:$0xff] }
   0x5   :  { %v18_v12 = vld [vmem:[%s311_s0 + $0x20] sm:$0xff]  ;;  %v19_v13 = vld [vmem:[%s311_s0 + $0x28] sm:$0xff]  ;;  %v20_v14 = vld [vmem:[%s311_s0 + $0x30] sm:$0xff]  ;;  %v22_v16 = vpack.c.bf16 %v15_v9, %v14_v8  ;;  %v23_v17 = vpack.c.bf16 %v17_v11, %v16_v10 }
   0x6   :  { %93 = vmatpush.bf16.msra.mxu0 %v189_v1  ;;  %194 = vmatpush.bf16.msra.mxu1 %v189_v1  ;;  %v21_v15 = vld [vmem:[%s311_s0 + $0x38] sm:$0xff]  ;;  %v24_v18 = vpack.c.bf16 %v19_v13, %v18_v12  ;;  %v42_v20 = vld [vmem:[%s312_s2] sm:$0x7] }
   0x7   :  { %195 = vmatpush.bf16.msra.mxu2 %v189_v1  ;;  %196 = vmatpush.bf16.msra.mxu3 %v189_v1  ;;  %v25_v19 = vpack.c.bf16 %v21_v15, %v20_v14  ;;  %v43_v21 = vperm.slane %v42_v20, 0  ;;  %v121_v22 = vperm.slane %v42_v20, 1  ;;  %v130_v26 = vperm.slane %v42_v20, 2 }
   0xa   :  { %94 = vmatpush.bf16.msra.mxu0 %v188_v2  ;;  %197 = vmatpush.bf16.msra.mxu1 %v188_v2 }
   0xb   :  { %198 = vmatpush.bf16.msra.mxu2 %v188_v2  ;;  %199 = vmatpush.bf16.msra.mxu3 %v188_v2 }
   0xe   :  { %95 = vmatpush.bf16.msra.mxu0 %v187_v3  ;;  %200 = vmatpush.bf16.msra.mxu1 %v187_v3 }
   0xf   :  { %201 = vmatpush.bf16.msra.mxu2 %v187_v3  ;;  %202 = vmatpush.bf16.msra.mxu3 %v187_v3 }
  0x12   :  { %96 = vmatpush.bf16.msra.mxu0 %v186_v4  ;;  %203 = vmatpush.bf16.msra.mxu1 %v186_v4 }
  0x13   :  { %204 = vmatpush.bf16.msra.mxu2 %v186_v4  ;;  %205 = vmatpush.bf16.msra.mxu3 %v186_v4 }
  0x16   :  { %97 = vmatpush.bf16.msra.mxu0 %v185_v5  ;;  %206 = vmatpush.bf16.msra.mxu1 %v185_v5 }
  0x17   :  { %207 = vmatpush.bf16.msra.mxu2 %v185_v5  ;;  %208 = vmatpush.bf16.msra.mxu3 %v185_v5 }
  0x1a   :  { %98 = vmatpush.bf16.msra.mxu0 %v184_v6  ;;  %209 = vmatpush.bf16.msra.mxu1 %v184_v6 }
  0x1b   :  { %210 = vmatpush.bf16.msra.mxu2 %v184_v6  ;;  %211 = vmatpush.bf16.msra.mxu3 %v184_v6 }
  0x1e   :  { %99 = vmatpush.bf16.msra.mxu0 %v183_v7  ;;  %212 = vmatpush.bf16.msra.mxu1 %v183_v7 }
  0x1f   :  { %213 = vmatpush.bf16.msra.mxu2 %v183_v7  ;;  %214 = vmatpush.bf16.msra.mxu3 %v183_v7 }
  0x21   :  { %100 = vmatmul.bf16.vlgmr.msra.gmra.mxu0 %v22_v16  ;;  %105 = vmatmul.bf16.vlgmr.msra.gmra.mxu1 %v23_v17 }
  0x22   :  { %110 = vmatmul.bf16.vlgmr.msra.gmra.mxu2 %v24_v18  ;;  %115 = vmatmul.bf16.vlgmr.msra.gmra.mxu3 %v25_v19 }
  0x9e   :  { %v101_v23 = vpop.f32.mrf.mxu0  ;;  %v106_v24 = vpop.f32.mrf.mxu1 }
  0x9f   :  { %v102_v25 = vadd.f32 %v101_v23, %v43_v21  ;;  %v107_v27 = vadd.f32 %v106_v24, %v43_v21 }
  0xa1   :  { %v122_v28 = vmul.f32 %v121_v22, %v102_v25  ;;  %v124_v29 = vmul.f32 %v121_v22, %v107_v27 }
  0xa3   :  { %v131_v30 = vadd.f32 %v130_v26, %v122_v28  ;;  %v133_v31 = vadd.f32 %v130_v26, %v124_v29 }
  0xa5   :  { %139 = vst [vmem:[%s313_s3] sm:$0xff] %v131_v30  ;;  %v111_v32 = vpop.f32.mrf.mxu2  ;;  %v116_v33 = vpop.f32.mrf.mxu3 }
  0xa6   :  { %141 = vst [vmem:[%s313_s3 + $0x10] sm:$0xff] %v133_v31  ;;  %v112_v34 = vadd.f32 %v111_v32, %v43_v21  ;;  %v117_v35 = vadd.f32 %v116_v33, %v43_v21  ;;  %v103_v36 = vpop.f32.mrf.mxu0  ;;  %v108_v37 = vpop.f32.mrf.mxu1 }
  0xa7   :  { %v104_v38 = vadd.f32 %v103_v36, %v43_v21  ;;  %v109_v39 = vadd.f32 %v108_v37, %v43_v21 }
  0xa8   :  { %v126_v40 = vmul.f32 %v121_v22, %v112_v34  ;;  %v128_v41 = vmul.f32 %v121_v22, %v117_v35 }
  0xa9   :  { %v123_v42 = vmul.f32 %v121_v22, %v104_v38  ;;  %v125_v43 = vmul.f32 %v121_v22, %v109_v39 }
  0xaa   :  { %v135_v44 = vadd.f32 %v130_v26, %v126_v40  ;;  %v137_v45 = vadd.f32 %v130_v26, %v128_v41 }
  0xab   :  { %v132_v46 = vadd.f32 %v130_v26, %v123_v42  ;;  %v134_v47 = vadd.f32 %v130_v26, %v125_v43 }
  0xac   :  { %143 = vst [vmem:[%s313_s3 + $0x20] sm:$0xff] %v135_v44 }
  0xad   :  { %145 = vst [vmem:[%s313_s3 + $0x30] sm:$0xff] %v137_v45  ;;  %v113_v48 = vpop.f32.mrf.mxu2  ;;  %v118_v49 = vpop.f32.mrf.mxu3 }
  0xae   :  { %140 = vst [vmem:[%s313_s3 + $0x8] sm:$0xff] %v132_v46  ;;  %v114_v50 = vadd.f32 %v113_v48, %v43_v21  ;;  %v119_v51 = vadd.f32 %v118_v49, %v43_v21 }
  0xaf   :  { %142 = vst [vmem:[%s313_s3 + $0x18] sm:$0xff] %v134_v47 }
  0xb0   :  { %v127_v52 = vmul.f32 %v121_v22, %v114_v50  ;;  %v129_v53 = vmul.f32 %v121_v22, %v119_v51 }
  0xb2   :  { %v136_v54 = vadd.f32 %v130_v26, %v127_v52  ;;  %v138_v55 = vadd.f32 %v130_v26, %v129_v53 }
  0xb4   :  { %144 = vst [vmem:[%s313_s3 + $0x28] sm:$0xff] %v136_v54 }
  0xb5   :  { %146 = vst [vmem:[%s313_s3 + $0x38] sm:$0xff] %v138_v55 }

// kernel: model_forward.20
= control target key start
LH: loop header
LB: loop body
LE: loop exit
PB: predicated region body
PF: predicated region fallthrough
CT: control target
= control target key end

     0   :  { %s584_s1 = inlined_call_operand.vmem [shape: bf16[384,128], index: 1, kind: input, shape index: {}]   ;;  %s585_s0 = inlined_call_operand.vmem [shape: f32[32,384], index: 0, kind: input, shape index: {}]   ;;  %s586_s2 = inlined_call_operand.vmem [shape: f32[3,128], index: 2, kind: input, shape index: {}]   ;;  %s587_s3 = inlined_call_operand.vmem [shape: f32[32,128], index: 3, kind: output, shape index: {}]  }
   0x1   :  { %v416_v0 = vld [vmem:[%s584_s1 + $0x38] sm:$0xff]  ;;  %v415_v3 = vld [vmem:[%s584_s1 + $0x30] sm:$0xff]  ;;  %v414_v6 = vld [vmem:[%s584_s1 + $0x28] sm:$0xff] }
   0x2   :  { %v424_v1 = vld [vmem:[%s584_s1 + $0x78] sm:$0xff]  ;;  %226 = vmatpush.bf16.msra.mxu0 %v416_v0  ;;  %v423_v4 = vld [vmem:[%s584_s1 + $0x70] sm:$0xff]  ;;  %433 = vmatpush.bf16.msra.mxu3 %v416_v0  ;;  %v422_v7 = vld [vmem:[%s584_s1 + $0x68] sm:$0xff] }
   0x3   :  { %v432_v2 = vld [vmem:[%s584_s1 + $0xb8] sm:$0xff]  ;;  %245 = vmatpush.bf16.msra.mxu1 %v424_v1  ;;  %v431_v5 = vld [vmem:[%s584_s1 + $0xb0] sm:$0xff]  ;;  %v430_v8 = vld [vmem:[%s584_s1 + $0xa8] sm:$0xff] }
   0x4   :  { %264 = vmatpush.bf16.msra.mxu2 %v432_v2  ;;  %v413_v9 = vld [vmem:[%s584_s1 + $0x20] sm:$0xff]  ;;  %v412_v12 = vld [vmem:[%s584_s1 + $0x18] sm:$0xff]  ;;  %v411_v15 = vld [vmem:[%s584_s1 + $0x10] sm:$0xff] }
   0x5   :  { %v421_v10 = vld [vmem:[%s584_s1 + $0x60] sm:$0xff]  ;;  %v420_v13 = vld [vmem:[%s584_s1 + $0x58] sm:$0xff]  ;;  %v419_v16 = vld [vmem:[%s584_s1 + $0x50] sm:$0xff] }
   0x6   :  { %227 = vmatpush.bf16.msra.mxu0 %v415_v3  ;;  %434 = vmatpush.bf16.msra.mxu3 %v415_v3  ;;  %v429_v11 = vld [vmem:[%s584_s1 + $0xa0] sm:$0xff]  ;;  %v428_v14 = vld [vmem:[%s584_s1 + $0x98] sm:$0xff]  ;;  %v427_v17 = vld [vmem:[%s584_s1 + $0x90] sm:$0xff] }
   0x7   :  { %246 = vmatpush.bf16.msra.mxu1 %v423_v4  ;;  %v410_v18 = vld [vmem:[%s584_s1 + $0x8] sm:$0xff]  ;;  %v409_v21 = vld [vmem:[%s584_s1] sm:$0xff]  ;;  %v17_v25 = vld [vmem:[%s585_s0 + $0x18] sm:$0xff] }
   0x8   :  { %265 = vmatpush.bf16.msra.mxu2 %v431_v5  ;;  %v418_v19 = vld [vmem:[%s584_s1 + $0x48] sm:$0xff]  ;;  %v417_v22 = vld [vmem:[%s584_s1 + $0x40] sm:$0xff]  ;;  %v16_v28 = vld [vmem:[%s585_s0 + $0x10] sm:$0xff] }
   0x9   :  { %v426_v20 = vld [vmem:[%s584_s1 + $0x88] sm:$0xff]  ;;  %v425_v23 = vld [vmem:[%s584_s1 + $0x80] sm:$0xff]  ;;  %v20_v30 = vld [vmem:[%s585_s0 + $0x30] sm:$0xff] }
   0xa   :  { %228 = vmatpush.bf16.msra.mxu0 %v414_v6  ;;  %435 = vmatpush.bf16.msra.mxu3 %v414_v6  ;;  %v14_v24 = vld [vmem:[%s585_s0] sm:$0xff]  ;;  %v15_v26 = vld [vmem:[%s585_s0 + $0x8] sm:$0xff]  ;;  %v21_v36 = vld [vmem:[%s585_s0 + $0x38] sm:$0xff] }
   0xb   :  { %247 = vmatpush.bf16.msra.mxu1 %v422_v7  ;;  %v18_v27 = vld [vmem:[%s585_s0 + $0x20] sm:$0xff]  ;;  %v19_v29 = vld [vmem:[%s585_s0 + $0x28] sm:$0xff]  ;;  %v26_v32 = vpack.c.bf16 %v17_v25, %v14_v24  ;;  %v24_v37 = vld [vmem:[%s585_s0 + $0x50] sm:$0xff] }
   0xc   :  { %266 = vmatpush.bf16.msra.mxu2 %v430_v8  ;;  %v23_v31 = vld [vmem:[%s585_s0 + $0x48] sm:$0xff]  ;;  %v27_v33 = vpack.c.bf16 %v18_v27, %v15_v26  ;;  %v28_v34 = vpack.c.bf16 %v19_v29, %v16_v28  ;;  %v22_v38 = vld [vmem:[%s585_s0 + $0x40] sm:$0xff]  ;;  %v25_v39 = vld [vmem:[%s585_s0 + $0x58] sm:$0xff]  ;;  %v30_v40 = vpack.c.bf16 %v24_v37, %v21_v36 }
   0xd   :  { %v29_v35 = vpack.c.bf16 %v23_v31, %v20_v30  ;;  %v31_v41 = vpack.c.bf16 %v25_v39, %v22_v38  ;;  %v80_v42 = vld [vmem:[%s586_s2] sm:$0x7] }
   0xe   :  { %229 = vmatpush.bf16.msra.mxu0 %v413_v9  ;;  %436 = vmatpush.bf16.msra.mxu3 %v413_v9  ;;  %v81_v43 = vperm.slane %v80_v42, 0  ;;  %v295_v52 = vperm.slane %v80_v42, 1  ;;  %v300_v55 = vperm.slane %v80_v42, 2 }
   0xf   :  { %248 = vmatpush.bf16.msra.mxu1 %v421_v10 }
  0x10   :  { %267 = vmatpush.bf16.msra.mxu2 %v429_v11 }
  0x12   :  { %230 = vmatpush.bf16.msra.mxu0 %v412_v12  ;;  %437 = vmatpush.bf16.msra.mxu3 %v412_v12 }
  0x13   :  { %249 = vmatpush.bf16.msra.mxu1 %v420_v13 }
  0x14   :  { %268 = vmatpush.bf16.msra.mxu2 %v428_v14 }
  0x16   :  { %231 = vmatpush.bf16.msra.mxu0 %v411_v15  ;;  %438 = vmatpush.bf16.msra.mxu3 %v411_v15 }
  0x17   :  { %250 = vmatpush.bf16.msra.mxu1 %v419_v16 }
  0x18   :  { %269 = vmatpush.bf16.msra.mxu2 %v427_v17 }
  0x1a   :  { %232 = vmatpush.bf16.msra.mxu0 %v410_v18  ;;  %439 = vmatpush.bf16.msra.mxu3 %v410_v18 }
  0x1b   :  { %251 = vmatpush.bf16.msra.mxu1 %v418_v19 }
  0x1c   :  { %270 = vmatpush.bf16.msra.mxu2 %v426_v20 }
  0x1e   :  { %233 = vmatpush.bf16.msra.mxu0 %v409_v21  ;;  %440 = vmatpush.bf16.msra.mxu3 %v409_v21 }
  0x1f   :  { %252 = vmatpush.bf16.msra.mxu1 %v417_v22 }
  0x20   :  { %271 = vmatpush.bf16.msra.mxu2 %v425_v23 }
  0x21   :  { %234 = vmatmul.bf16.vlgmr.msra.gmra.mxu0 %v26_v32  ;;  %239 = vmatmul.bf16.vlgmr.msra.gmra.mxu3 %v29_v35 }
  0x22   :  { %253 = vmatmul.bf16.vlgmr.msra.gmra.mxu1 %v27_v33 }
  0x23   :  { %272 = vmatmul.bf16.vlgmr.msra.gmra.mxu2 %v28_v34 }
  0x32   :  { %258 = vmatmul.bf16.gmra.mxu1 %v30_v40 }
  0x33   :  { %277 = vmatmul.bf16.gmra.mxu2 %v31_v41 }
  0x9e   :  { %v235_v44 = vpop.f32.mrf.mxu0 }
  0x9f   :  { %v254_v45 = vpop.f32.mrf.mxu1  ;;  %v236_v46 = vadd.f32 %v235_v44, %v81_v43 }
  0xa1   :  { %v255_v47 = vadd.f32 %v254_v45, %v236_v46 }
  0xa4   :  { %v240_v60 = vpop.f32.mrf.mxu3 }
  0xa5   :  { %v241_v62 = vadd.f32 %v240_v60, %v81_v43 }
  0xa6   :  { %v273_v48 = vpop.f32.mrf.mxu2  ;;  %v237_v50 = vpop.f32.mrf.mxu0 }
  0xa7   :  { %v274_v49 = vadd.f32 %v273_v48, %v255_v47  ;;  %v256_v51 = vpop.f32.mrf.mxu1  ;;  %v238_v54 = vadd.f32 %v237_v50, %v81_v43 }
  0xa9   :  { %vm283_vm0 = vcmp.ge.f32.partialorder %v274_v49, 0.0  ;;  %v287_v53 = vmul.f32 0.2, %v274_v49  ;;  %v257_v58 = vadd.f32 %v256_v51, %v238_v54 }
  0xab   :  { %v291_v56 = vsel %vm283_vm0, %v274_v49, %v287_v53 }
  0xac   :  { %v296_v57 = vmul.f32 %v295_v52, %v291_v56  ;;  %v242_v8 = vpop.f32.mrf.mxu3 }
  0xad   :  { %v243_v11 = vadd.f32 %v242_v8, %v81_v43 }
  0xae   :  { %v301_v59 = vadd.f32 %v300_v55, %v296_v57  ;;  %v275_v61 = vpop.f32.mrf.mxu2 }
  0xaf   :  { %v276_v63 = vadd.f32 %v275_v61, %v257_v58  ;;  %v259_v0 = vpop.f32.mrf.mxu1 }
  0xb0   :  { %305 = vst [vmem:[%s587_s3] sm:$0xff] %v301_v59  ;;  %v260_v3 = vadd.f32 %v259_v0, %v241_v62 }
  0xb1   :  { %vm284_vm1 = vcmp.ge.f32.partialorder %v276_v63, 0.0  ;;  %v288_v1 = vmul.f32 0.2, %v276_v63 }
  0xb3   :  { %v292_v2 = vsel %vm284_vm1, %v276_v63, %v288_v1 }
  0xb4   :  { %v297_v4 = vmul.f32 %v295_v52, %v292_v2 }
  0xb6   :  { %v302_v5 = vadd.f32 %v300_v55, %v297_v4  ;;  %v278_v6 = vpop.f32.mrf.mxu2 }
  0xb7   :  { %v279_v7 = vadd.f32 %v278_v6, %v260_v3  ;;  %v261_v10 = vpop.f32.mrf.mxu1 }
  0xb8   :  { %306 = vst [vmem:[%s587_s3 + $0x8] sm:$0xff] %v302_v5  ;;  %v262_v14 = vadd.f32 %v261_v10, %v243_v11 }
  0xb9   :  { %vm285_vm2 = vcmp.ge.f32.partialorder %v279_v7, 0.0  ;;  %v289_v9 = vmul.f32 0.2, %v279_v7 }
  0xbb   :  { %v293_v12 = vsel %vm285_vm2, %v279_v7, %v289_v9 }
  0xbc   :  { %v298_v13 = vmul.f32 %v295_v52, %v293_v12 }
  0xbe   :  { %v303_v15 = vadd.f32 %v300_v55, %v298_v13  ;;  %v280_v16 = vpop.f32.mrf.mxu2 }
  0xbf   :  { %v281_v17 = vadd.f32 %v280_v16, %v262_v14 }
  0xc0   :  { %307 = vst [vmem:[%s587_s3 + $0x10] sm:$0xff] %v303_v15 }
  0xc1   :  { %vm286_vm3 = vcmp.ge.f32.partialorder %v281_v17, 0.0  ;;  %v290_v18 = vmul.f32 0.2, %v281_v17 }
  0xc3   :  { %v294_v19 = vsel %vm286_vm3, %v281_v17, %v290_v18 }
  0xc4   :  { %v299_v20 = vmul.f32 %v295_v52, %v294_v19 }
  0xc6   :  { %v304_v21 = vadd.f32 %v300_v55, %v299_v20 }
  0xc8   :  { %308 = vst [vmem:[%s587_s3 + $0x18] sm:$0xff] %v304_v21 }

// kernel: model_forward.21
= control target key start
LH: loop header
LB: loop body
LE: loop exit
PB: predicated region body
PF: predicated region fallthrough
CT: control target
= control target key end

     0   :  { %s516_s1 = inlined_call_operand.vmem [shape: bf16[384,128], index: 1, kind: input, shape index: {}]   ;;  %s517_s0 = inlined_call_operand.vmem [shape: f32[16,384], index: 0, kind: input, shape index: {}]   ;;  %s518_s2 = inlined_call_operand.vmem [shape: f32[3,128], index: 2, kind: input, shape index: {}]   ;;  %s519_s3 = inlined_call_operand.vmem [shape: f32[16,128], index: 3, kind: output, shape index: {}]  }
   0x1   :  { %v380_v0 = vld [vmem:[%s516_s1 + $0x38] sm:$0xff]  ;;  %v379_v3 = vld [vmem:[%s516_s1 + $0x30] sm:$0xff]  ;;  %v378_v6 = vld [vmem:[%s516_s1 + $0x28] sm:$0xff] }
   0x2   :  { %v388_v1 = vld [vmem:[%s516_s1 + $0x78] sm:$0xff]  ;;  %217 = vmatpush.bf16.msra.mxu0 %v380_v0  ;;  %v387_v4 = vld [vmem:[%s516_s1 + $0x70] sm:$0xff]  ;;  %v386_v7 = vld [vmem:[%s516_s1 + $0x68] sm:$0xff] }
   0x3   :  { %v396_v2 = vld [vmem:[%s516_s1 + $0xb8] sm:$0xff]  ;;  %231 = vmatpush.bf16.msra.mxu1 %v388_v1  ;;  %v395_v5 = vld [vmem:[%s516_s1 + $0xb0] sm:$0xff]  ;;  %v394_v8 = vld [vmem:[%s516_s1 + $0xa8] sm:$0xff] }
   0x4   :  { %245 = vmatpush.bf16.msra.mxu2 %v396_v2  ;;  %v377_v9 = vld [vmem:[%s516_s1 + $0x20] sm:$0xff]  ;;  %v376_v12 = vld [vmem:[%s516_s1 + $0x18] sm:$0xff]  ;;  %v375_v15 = vld [vmem:[%s516_s1 + $0x10] sm:$0xff] }
   0x5   :  { %v385_v10 = vld [vmem:[%s516_s1 + $0x60] sm:$0xff]  ;;  %v384_v13 = vld [vmem:[%s516_s1 + $0x58] sm:$0xff]  ;;  %v383_v16 = vld [vmem:[%s516_s1 + $0x50] sm:$0xff] }
   0x6   :  { %218 = vmatpush.bf16.msra.mxu0 %v379_v3  ;;  %v393_v11 = vld [vmem:[%s516_s1 + $0xa0] sm:$0xff]  ;;  %v392_v14 = vld [vmem:[%s516_s1 + $0x98] sm:$0xff]  ;;  %v391_v17 = vld [vmem:[%s516_s1 + $0x90] sm:$0xff] }
   0x7   :  { %232 = vmatpush.bf16.msra.mxu1 %v387_v4  ;;  %v374_v18 = vld [vmem:[%s516_s1 + $0x8] sm:$0xff]  ;;  %v373_v21 = vld [vmem:[%s516_s1] sm:$0xff]  ;;  %v17_v24 = vld [vmem:[%s517_s0 + $0x18] sm:$0xff] }
   0x8   :  { %246 = vmatpush.bf16.msra.mxu2 %v395_v5  ;;  %v382_v19 = vld [vmem:[%s516_s1 + $0x48] sm:$0xff]  ;;  %v381_v22 = vld [vmem:[%s516_s1 + $0x40] sm:$0xff]  ;;  %v16_v28 = vld [vmem:[%s517_s0 + $0x10] sm:$0xff] }
   0x9   :  { %v390_v20 = vld [vmem:[%s516_s1 + $0x88] sm:$0xff]  ;;  %v14_v23 = vld [vmem:[%s517_s0] sm:$0xff] }
   0xa   :  { %219 = vmatpush.bf16.msra.mxu0 %v378_v6  ;;  %v15_v25 = vld [vmem:[%s517_s0 + $0x8] sm:$0xff]  ;;  %v18_v26 = vld [vmem:[%s517_s0 + $0x20] sm:$0xff]  ;;  %v20_v30 = vpack.c.bf16 %v17_v24, %v14_v23 }
   0xb   :  { %233 = vmatpush.bf16.msra.mxu1 %v386_v7  ;;  %v389_v27 = vld [vmem:[%s516_s1 + $0x80] sm:$0xff]  ;;  %v19_v29 = vld [vmem:[%s517_s0 + $0x28] sm:$0xff]  ;;  %v21_v31 = vpack.c.bf16 %v18_v26, %v15_v25 }
   0xc   :  { %247 = vmatpush.bf16.msra.mxu2 %v394_v8  ;;  %v22_v32 = vpack.c.bf16 %v19_v29, %v16_v28  ;;  %v71_v33 = vld [vmem:[%s518_s2] sm:$0x7] }
   0xd   :  { %v72_v34 = vperm.slane %v71_v33, 0  ;;  %v265_v42 = vperm.slane %v71_v33, 1  ;;  %v268_v45 = vperm.slane %v71_v33, 2 }
   0xe   :  { %220 = vmatpush.bf16.msra.mxu0 %v377_v9 }
   0xf   :  { %234 = vmatpush.bf16.msra.mxu1 %v385_v10 }
  0x10   :  { %248 = vmatpush.bf16.msra.mxu2 %v393_v11 }
  0x12   :  { %221 = vmatpush.bf16.msra.mxu0 %v376_v12 }
  0x13   :  { %235 = vmatpush.bf16.msra.mxu1 %v384_v13 }
  0x14   :  { %249 = vmatpush.bf16.msra.mxu2 %v392_v14 }
  0x16   :  { %222 = vmatpush.bf16.msra.mxu0 %v375_v15 }
  0x17   :  { %236 = vmatpush.bf16.msra.mxu1 %v383_v16 }
  0x18   :  { %250 = vmatpush.bf16.msra.mxu2 %v391_v17 }
  0x1a   :  { %223 = vmatpush.bf16.msra.mxu0 %v374_v18 }
  0x1b   :  { %237 = vmatpush.bf16.msra.mxu1 %v382_v19 }
  0x1c   :  { %251 = vmatpush.bf16.msra.mxu2 %v390_v20 }
  0x1e   :  { %224 = vmatpush.bf16.msra.mxu0 %v373_v21 }
  0x1f   :  { %238 = vmatpush.bf16.msra.mxu1 %v381_v22 }
  0x20   :  { %252 = vmatpush.bf16.msra.mxu2 %v389_v27 }
  0x21   :  { %225 = vmatmul.bf16.vlgmr.msra.gmra.mxu0 %v20_v30 }
  0x22   :  { %239 = vmatmul.bf16.vlgmr.msra.gmra.mxu1 %v21_v31 }
  0x23   :  { %253 = vmatmul.bf16.vlgmr.msra.gmra.mxu2 %v22_v32 }
  0x9e   :  { %v226_v35 = vpop.f32.mrf.mxu0 }
  0x9f   :  { %v227_v36 = vadd.f32 %v226_v35, %v72_v34  ;;  %v240_v37 = vpop.f32.mrf.mxu1 }
  0xa1   :  { %v241_v38 = vadd.f32 %v240_v37, %v227_v36 }
  0xa6   :  { %v254_v39 = vpop.f32.mrf.mxu2  ;;  %v228_v41 = vpop.f32.mrf.mxu0 }
  0xa7   :  { %v255_v40 = vadd.f32 %v254_v39, %v241_v38  ;;  %v229_v44 = vadd.f32 %v228_v41, %v72_v34  ;;  %v242_v48 = vpop.f32.mrf.mxu1 }
  0xa9   :  { %vm259_vm0 = vcmp.ge.f32.partialorder %v255_v40, 0.0  ;;  %v261_v43 = vmul.f32 0.2, %v255_v40  ;;  %v243_v49 = vadd.f32 %v242_v48, %v229_v44 }
  0xab   :  { %v263_v46 = vsel %vm259_vm0, %v255_v40, %v261_v43 }
  0xac   :  { %v266_v47 = vmul.f32 %v265_v42, %v263_v46 }
  0xae   :  { %v269_v50 = vadd.f32 %v268_v45, %v266_v47  ;;  %v256_v51 = vpop.f32.mrf.mxu2 }
  0xaf   :  { %v257_v52 = vadd.f32 %v256_v51, %v243_v49 }
  0xb0   :  { %271 = vst [vmem:[%s519_s3] sm:$0xff] %v269_v50 }
  0xb1   :  { %vm260_vm1 = vcmp.ge.f32.partialorder %v257_v52, 0.0  ;;  %v262_v53 = vmul.f32 0.2, %v257_v52 }
  0xb3   :  { %v264_v54 = vsel %vm260_vm1, %v257_v52, %v262_v53 }
  0xb4   :  { %v267_v55 = vmul.f32 %v265_v42, %v264_v54 }
  0xb6   :  { %v270_v56 = vadd.f32 %v268_v45, %v267_v55 }
  0xb8   :  { %272 = vst [vmem:[%s519_s3 + $0x8] sm:$0xff] %v270_v56 }

// kernel: model_forward.22
= control target key start
LH: loop header
LB: loop body
LE: loop exit
PB: predicated region body
PF: predicated region fallthrough
CT: control target
= control target key end

     0   :  { %s492_s1 = inlined_call_operand.vmem [shape: bf16[384,128], index: 1, kind: input, shape index: {}]   ;;  %s493_s0 = inlined_call_operand.vmem [shape: f32[8,384], index: 0, kind: input, shape index: {}]   ;;  %s494_s2 = inlined_call_operand.vmem [shape: f32[3,128], index: 2, kind: input, shape index: {}]   ;;  %s495_s3 = inlined_call_operand.vmem [shape: f32[8,128], index: 3, kind: output, shape index: {}]  }
   0x1   :  { %v368_v0 = vld [vmem:[%s492_s1 + $0x38] sm:$0xff]  ;;  %v367_v3 = vld [vmem:[%s492_s1 + $0x30] sm:$0xff]  ;;  %v366_v6 = vld [vmem:[%s492_s1 + $0x28] sm:$0xff] }
   0x2   :  { %v376_v1 = vld [vmem:[%s492_s1 + $0x78] sm:$0xff]  ;;  %214 = vmatpush.bf16.msra.mxu0 %v368_v0  ;;  %v375_v4 = vld [vmem:[%s492_s1 + $0x70] sm:$0xff]  ;;  %v374_v7 = vld [vmem:[%s492_s1 + $0x68] sm:$0xff] }
   0x3   :  { %v384_v2 = vld [vmem:[%s492_s1 + $0xb8] sm:$0xff]  ;;  %227 = vmatpush.bf16.msra.mxu1 %v376_v1  ;;  %v383_v5 = vld [vmem:[%s492_s1 + $0xb0] sm:$0xff]  ;;  %v382_v8 = vld [vmem:[%s492_s1 + $0xa8] sm:$0xff] }
   0x4   :  { %240 = vmatpush.bf16.msra.mxu2 %v384_v2  ;;  %v365_v9 = vld [vmem:[%s492_s1 + $0x20] sm:$0xff]  ;;  %v364_v12 = vld [vmem:[%s492_s1 + $0x18] sm:$0xff]  ;;  %v363_v15 = vld [vmem:[%s492_s1 + $0x10] sm:$0xff] }
   0x5   :  { %v373_v10 = vld [vmem:[%s492_s1 + $0x60] sm:$0xff]  ;;  %v372_v13 = vld [vmem:[%s492_s1 + $0x58] sm:$0xff]  ;;  %v371_v16 = vld [vmem:[%s492_s1 + $0x50] sm:$0xff] }
   0x6   :  { %215 = vmatpush.bf16.msra.mxu0 %v367_v3  ;;  %v381_v11 = vld [vmem:[%s492_s1 + $0xa0] sm:$0xff]  ;;  %v380_v14 = vld [vmem:[%s492_s1 + $0x98] sm:$0xff]  ;;  %v379_v17 = vld [vmem:[%s492_s1 + $0x90] sm:$0xff] }
   0x7   :  { %228 = vmatpush.bf16.msra.mxu1 %v375_v4  ;;  %v362_v18 = vld [vmem:[%s492_s1 + $0x8] sm:$0xff]  ;;  %v361_v21 = vld [vmem:[%s492_s1] sm:$0xff]  ;;  %v16_v26 = vld [vmem:[%s493_s0 + $0x10] sm:$0xff] }
   0x8   :  { %241 = vmatpush.bf16.msra.mxu2 %v383_v5  ;;  %v370_v19 = vld [vmem:[%s492_s1 + $0x48] sm:$0xff]  ;;  %v369_v22 = vld [vmem:[%s492_s1 + $0x40] sm:$0xff]  ;;  %v19_v29 = vpack.c.bf16 %v16_v26, %v16_v26 }
   0x9   :  { %v378_v20 = vld [vmem:[%s492_s1 + $0x88] sm:$0xff]  ;;  %v14_v23 = vld [vmem:[%s493_s0] sm:$0xff] }
   0xa   :  { %216 = vmatpush.bf16.msra.mxu0 %v366_v6  ;;  %v15_v24 = vld [vmem:[%s493_s0 + $0x8] sm:$0xff]  ;;  %v377_v25 = vld [vmem:[%s492_s1 + $0x80] sm:$0xff]  ;;  %v17_v27 = vpack.c.bf16 %v14_v23, %v14_v23 }
   0xb   :  { %229 = vmatpush.bf16.msra.mxu1 %v374_v7  ;;  %v18_v28 = vpack.c.bf16 %v15_v24, %v15_v24  ;;  %v68_v30 = vld [vmem:[%s494_s2] sm:$0x7] }
   0xc   :  { %242 = vmatpush.bf16.msra.mxu2 %v382_v8  ;;  %v69_v31 = vperm.slane %v68_v30, 0  ;;  %v256_v40 = vperm.slane %v68_v30, 1  ;;  %v258_v42 = vperm.slane %v68_v30, 2 }
   0xe   :  { %217 = vmatpush.bf16.msra.mxu0 %v365_v9 }
   0xf   :  { %230 = vmatpush.bf16.msra.mxu1 %v373_v10 }
  0x10   :  { %243 = vmatpush.bf16.msra.mxu2 %v381_v11 }
  0x12   :  { %218 = vmatpush.bf16.msra.mxu0 %v364_v12 }
  0x13   :  { %231 = vmatpush.bf16.msra.mxu1 %v372_v13 }
  0x14   :  { %244 = vmatpush.bf16.msra.mxu2 %v380_v14 }
  0x16   :  { %219 = vmatpush.bf16.msra.mxu0 %v363_v15 }
  0x17   :  { %232 = vmatpush.bf16.msra.mxu1 %v371_v16 }
  0x18   :  { %245 = vmatpush.bf16.msra.mxu2 %v379_v17 }
  0x1a   :  { %220 = vmatpush.bf16.msra.mxu0 %v362_v18 }
  0x1b   :  { %233 = vmatpush.bf16.msra.mxu1 %v370_v19 }
  0x1c   :  { %246 = vmatpush.bf16.msra.mxu2 %v378_v20 }
  0x1e   :  { %221 = vmatpush.bf16.msra.mxu0 %v361_v21 }
  0x1f   :  { %234 = vmatpush.bf16.msra.mxu1 %v369_v22 }
  0x20   :  { %247 = vmatpush.bf16.msra.mxu2 %v377_v25 }
  0x21   :  { %222 = vmatmul.bf16.vlgmr.msra.gmra.mxu0 %v17_v27 }
  0x22   :  { %235 = vmatmul.bf16.vlgmr.msra.gmra.mxu1 %v18_v28 }
  0x23   :  { %248 = vmatmul.bf16.vlgmr.msra.gmra.mxu2 %v19_v29 }
  0x9e   :  { %v223_v32 = vpop.f32.mrf.mxu0 }
  0x9f   :  { %v236_v33 = vpop.f32.mrf.mxu1  ;;  %v224_v34 = vadd.f32 %v223_v32, %v69_v31 }
  0xa1   :  { %v237_v35 = vadd.f32 %v236_v33, %v224_v34 }
  0xa6   :  { %v249_v36 = vpop.f32.mrf.mxu2  ;;  %v225_v38 = vpop.f32.mrf.mxu0 }
  0xa7   :  { %v250_v37 = vadd.f32 %v249_v36, %v237_v35  ;;  %v238_v39 = vpop.f32.mrf.mxu1 }
  0xa9   :  { %vm253_vm0 = vcmp.ge.f32.partialorder %v250_v37, 0.0  ;;  %v254_v41 = vmul.f32 0.2, %v250_v37 }
  0xab   :  { %v255_v43 = vsel %vm253_vm0, %v250_v37, %v254_v41 }
  0xac   :  { %v257_v44 = vmul.f32 %v256_v40, %v255_v43 }
  0xae   :  { %v259_v45 = vadd.f32 %v258_v42, %v257_v44  ;;  %v251_v46 = vpop.f32.mrf.mxu2 }
  0xb0   :  { %260 = vst [vmem:[%s495_s3] sm:$0xff] %v259_v45 }

// kernel: model_forward.23
= control target key start
LH: loop header
LB: loop body
LE: loop exit
PB: predicated region body
PF: predicated region fallthrough
CT: control target
= control target key end

     0   :  { %s499_s1 = inlined_call_operand.vmem [shape: bf16[384,128], index: 1, kind: input, shape index: {}]   ;;  %s500_s0 = inlined_call_operand.vmem [shape: f32[4,384], index: 0, kind: input, shape index: {}]   ;;  %s501_s2 = inlined_call_operand.vmem [shape: f32[3,128], index: 2, kind: input, shape index: {}]   ;;  %s502_s3 = inlined_call_operand.vmem [shape: f32[4,128], index: 3, kind: output, shape index: {}]  }
   0x1   :  { %v378_v0 = vld [vmem:[%s499_s1 + $0x38] sm:$0xff]  ;;  %v377_v3 = vld [vmem:[%s499_s1 + $0x30] sm:$0xff]  ;;  %v376_v6 = vld [vmem:[%s499_s1 + $0x28] sm:$0xff] }
   0x2   :  { %v386_v1 = vld [vmem:[%s499_s1 + $0x78] sm:$0xff]  ;;  %224 = vmatpush.bf16.msra.mxu0 %v378_v0  ;;  %v385_v4 = vld [vmem:[%s499_s1 + $0x70] sm:$0xff]  ;;  %v384_v7 = vld [vmem:[%s499_s1 + $0x68] sm:$0xff] }
   0x3   :  { %v394_v2 = vld [vmem:[%s499_s1 + $0xb8] sm:$0xff]  ;;  %237 = vmatpush.bf16.msra.mxu1 %v386_v1  ;;  %v393_v5 = vld [vmem:[%s499_s1 + $0xb0] sm:$0xff]  ;;  %v392_v8 = vld [vmem:[%s499_s1 + $0xa8] sm:$0xff] }
   0x4   :  { %250 = vmatpush.bf16.msra.mxu2 %v394_v2  ;;  %v14_v9 = vld [vmem:[%s500_s0] sm:$0xff]  ;;  %v15_v10 = vld [vmem:[%s500_s0 + $0x8] sm:$0xf]  ;;  %v374_v14 = vld [vmem:[%s499_s1 + $0x18] sm:$0xff] }
   0x5   :  { %18 = vst [vmem:[#allocation1] ss:$2 sm:$0xff] %v14_v9  ;;  %v375_v11 = vld [vmem:[%s499_s1 + $0x20] sm:$0xff]  ;;  %v382_v15 = vld [vmem:[%s499_s1 + $0x58] sm:$0xff]  ;;  %v373_v17 = vld [vmem:[%s499_s1 + $0x10] sm:$0xff] }
   0x6   :  { %225 = vmatpush.bf16.msra.mxu0 %v377_v3  ;;  %v383_v12 = vld [vmem:[%s499_s1 + $0x60] sm:$0xff]  ;;  %20 = vst [vmem:[#allocation1 + $0x10] ss:$2 sm:$0xff] %v15_v10  ;;  %v390_v16 = vld [vmem:[%s499_s1 + $0x98] sm:$0xff]  ;;  %v381_v18 = vld [vmem:[%s499_s1 + $0x50] sm:$0xff] }
   0x7   :  { %238 = vmatpush.bf16.msra.mxu1 %v385_v4  ;;  %v391_v13 = vld [vmem:[%s499_s1 + $0xa0] sm:$0xff]  ;;  %v389_v19 = vld [vmem:[%s499_s1 + $0x90] sm:$0xff]  ;;  %v372_v20 = vld [vmem:[%s499_s1 + $0x8] sm:$0xff] }
   0x8   :  { %251 = vmatpush.bf16.msra.mxu2 %v393_v5  ;;  %v380_v21 = vld [vmem:[%s499_s1 + $0x48] sm:$0xff]  ;;  %v371_v23 = vld [vmem:[%s499_s1] sm:$0xff] }
   0x9   :  { %v388_v22 = vld [vmem:[%s499_s1 + $0x88] sm:$0xff]  ;;  %v379_v24 = vld [vmem:[%s499_s1 + $0x40] sm:$0xff] }
   0xa   :  { %226 = vmatpush.bf16.msra.mxu0 %v376_v6  ;;  %v387_v27 = vld [vmem:[%s499_s1 + $0x80] sm:$0xff] }
   0xb   :  { %239 = vmatpush.bf16.msra.mxu1 %v384_v7  ;;  %v78_v32 = vld [vmem:[%s501_s2] sm:$0x7] }
   0xc   :  { %252 = vmatpush.bf16.msra.mxu2 %v392_v8  ;;  %v21_v25 = vld.sshfl [vmem:[#allocation1] sm:$0xff pattern:$0x75316420]  ;;  %v22_v26 = vld.sshfl [vmem:[#allocation1 + $0x8] sm:$0xff pattern:$0x75316420] }
   0xd   :  { %v23_v28 = vld.sshfl [vmem:[#allocation1 + $0x10] sm:$0xff pattern:$0x75316420]  ;;  %v27_v29 = vpack.c.bf16 %v21_v25, %v21_v25  ;;  %v28_v30 = vpack.c.bf16 %v22_v26, %v22_v26  ;;  %v79_v33 = vperm.slane %v78_v32, 0  ;;  %v266_v42 = vperm.slane %v78_v32, 1 }
   0xe   :  { %227 = vmatpush.bf16.msra.mxu0 %v375_v11  ;;  %v29_v31 = vpack.c.bf16 %v23_v28, %v23_v28  ;;  %v268_v44 = vperm.slane %v78_v32, 2 }
   0xf   :  { %240 = vmatpush.bf16.msra.mxu1 %v383_v12 }
  0x10   :  { %253 = vmatpush.bf16.msra.mxu2 %v391_v13 }
  0x12   :  { %228 = vmatpush.bf16.msra.mxu0 %v374_v14 }
  0x13   :  { %241 = vmatpush.bf16.msra.mxu1 %v382_v15 }
  0x14   :  { %254 = vmatpush.bf16.msra.mxu2 %v390_v16 }
  0x16   :  { %229 = vmatpush.bf16.msra.mxu0 %v373_v17 }
  0x17   :  { %242 = vmatpush.bf16.msra.mxu1 %v381_v18 }
  0x18   :  { %255 = vmatpush.bf16.msra.mxu2 %v389_v19 }
  0x1a   :  { %230 = vmatpush.bf16.msra.mxu0 %v372_v20 }
  0x1b   :  { %243 = vmatpush.bf16.msra.mxu1 %v380_v21 }
  0x1c   :  { %256 = vmatpush.bf16.msra.mxu2 %v388_v22 }
  0x1e   :  { %231 = vmatpush.bf16.msra.mxu0 %v371_v23 }
  0x1f   :  { %244 = vmatpush.bf16.msra.mxu1 %v379_v24 }
  0x20   :  { %257 = vmatpush.bf16.msra.mxu2 %v387_v27 }
  0x21   :  { %232 = vmatmul.bf16.vlgmr.msra.gmra.mxu0 %v27_v29 }
  0x22   :  { %245 = vmatmul.bf16.vlgmr.msra.gmra.mxu1 %v28_v30 }
  0x23   :  { %258 = vmatmul.bf16.vlgmr.msra.gmra.mxu2 %v29_v31 }
  0x9e   :  { %v233_v34 = vpop.f32.mrf.mxu0 }
  0x9f   :  { %v246_v35 = vpop.f32.mrf.mxu1  ;;  %v234_v36 = vadd.f32 %v233_v34, %v79_v33 }
  0xa1   :  { %v247_v37 = vadd.f32 %v246_v35, %v234_v36 }
  0xa6   :  { %v259_v38 = vpop.f32.mrf.mxu2  ;;  %v235_v40 = vpop.f32.mrf.mxu0 }
  0xa7   :  { %v260_v39 = vadd.f32 %v259_v38, %v247_v37  ;;  %v248_v41 = vpop.f32.mrf.mxu1 }
  0xa9   :  { %vm263_vm0 = vcmp.ge.f32.partialorder %v260_v39, 0.0  ;;  %v264_v43 = vmul.f32 0.2, %v260_v39 }
  0xab   :  { %v265_v45 = vsel %vm263_vm0, %v260_v39, %v264_v43 }
  0xac   :  { %v267_v46 = vmul.f32 %v266_v42, %v265_v45 }
  0xae   :  { %v269_v47 = vadd.f32 %v268_v44, %v267_v46  ;;  %v261_v48 = vpop.f32.mrf.mxu2 }
  0xb0   :  { %270 = vst [vmem:[%s502_s3] sm:$0xf] %v269_v47 }

// kernel: model_forward.24
= control target key start
LH: loop header
LB: loop body
LE: loop exit
PB: predicated region body
PF: predicated region fallthrough
CT: control target
= control target key end

     0   :  { %s492_s1 = inlined_call_operand.vmem [shape: bf16[384,128], index: 1, kind: input, shape index: {}]   ;;  %s493_s0 = inlined_call_operand.vmem [shape: f32[2,384], index: 0, kind: input, shape index: {}]   ;;  %s494_s2 = inlined_call_operand.vmem [shape: f32[3,128], index: 2, kind: input, shape index: {}]   ;;  %s495_s3 = inlined_call_operand.vmem [shape: f32[2,128], index: 3, kind: output, shape index: {}]  }
   0x1   :  { %v374_v0 = vld [vmem:[%s492_s1 + $0x38] sm:$0xff]  ;;  %v373_v3 = vld [vmem:[%s492_s1 + $0x30] sm:$0xff]  ;;  %v372_v6 = vld [vmem:[%s492_s1 + $0x28] sm:$0xff] }
   0x2   :  { %v382_v1 = vld [vmem:[%s492_s1 + $0x78] sm:$0xff]  ;;  %220 = vmatpush.bf16.msra.mxu0 %v374_v0  ;;  %v381_v4 = vld [vmem:[%s492_s1 + $0x70] sm:$0xff]  ;;  %v380_v7 = vld [vmem:[%s492_s1 + $0x68] sm:$0xff] }
   0x3   :  { %v390_v2 = vld [vmem:[%s492_s1 + $0xb8] sm:$0xff]  ;;  %233 = vmatpush.bf16.msra.mxu1 %v382_v1  ;;  %v389_v5 = vld [vmem:[%s492_s1 + $0xb0] sm:$0xff]  ;;  %v388_v8 = vld [vmem:[%s492_s1 + $0xa8] sm:$0xff] }
   0x4   :  { %246 = vmatpush.bf16.msra.mxu2 %v390_v2  ;;  %v14_v9 = vld [vmem:[%s493_s0] sm:$0x3f]  ;;  %v370_v13 = vld [vmem:[%s492_s1 + $0x18] sm:$0xff]  ;;  %v369_v16 = vld [vmem:[%s492_s1 + $0x10] sm:$0xff] }
   0x5   :  { %16 = vst [vmem:[#allocation1] ss:$4 sm:$0xff] %v14_v9  ;;  %v371_v10 = vld [vmem:[%s492_s1 + $0x20] sm:$0xff]  ;;  %v378_v14 = vld [vmem:[%s492_s1 + $0x58] sm:$0xff]  ;;  %v377_v17 = vld [vmem:[%s492_s1 + $0x50] sm:$0xff] }
   0x6   :  { %221 = vmatpush.bf16.msra.mxu0 %v373_v3  ;;  %v379_v11 = vld [vmem:[%s492_s1 + $0x60] sm:$0xff]  ;;  %v386_v15 = vld [vmem:[%s492_s1 + $0x98] sm:$0xff]  ;;  %v385_v18 = vld [vmem:[%s492_s1 + $0x90] sm:$0xff] }
   0x7   :  { %234 = vmatpush.bf16.msra.mxu1 %v381_v4  ;;  %v387_v12 = vld [vmem:[%s492_s1 + $0xa0] sm:$0xff]  ;;  %v368_v19 = vld [vmem:[%s492_s1 + $0x8] sm:$0xff] }
   0x8   :  { %247 = vmatpush.bf16.msra.mxu2 %v389_v5  ;;  %v376_v20 = vld [vmem:[%s492_s1 + $0x48] sm:$0xff]  ;;  %v367_v22 = vld [vmem:[%s492_s1] sm:$0xff] }
   0x9   :  { %v384_v21 = vld [vmem:[%s492_s1 + $0x88] sm:$0xff]  ;;  %v375_v23 = vld [vmem:[%s492_s1 + $0x40] sm:$0xff] }
   0xa   :  { %222 = vmatpush.bf16.msra.mxu0 %v372_v6  ;;  %v383_v26 = vld [vmem:[%s492_s1 + $0x80] sm:$0xff] }
   0xb   :  { %235 = vmatpush.bf16.msra.mxu1 %v380_v7  ;;  %v74_v31 = vld [vmem:[%s494_s2] sm:$0x7] }
   0xc   :  { %248 = vmatpush.bf16.msra.mxu2 %v388_v8  ;;  %v17_v24 = vld.sshfl [vmem:[#allocation1] sm:$0xff pattern:$0x73625140]  ;;  %v18_v25 = vld.sshfl [vmem:[#allocation1 + $0x8] sm:$0xff pattern:$0x73625140] }
   0xd   :  { %v19_v27 = vld.sshfl [vmem:[#allocation1 + $0x10] sm:$0xff pattern:$0x73625140]  ;;  %v23_v28 = vpack.c.bf16 %v17_v24, %v17_v24  ;;  %v24_v29 = vpack.c.bf16 %v18_v25, %v18_v25  ;;  %v75_v32 = vperm.slane %v74_v31, 0  ;;  %v262_v41 = vperm.slane %v74_v31, 1 }
   0xe   :  { %223 = vmatpush.bf16.msra.mxu0 %v371_v10  ;;  %v25_v30 = vpack.c.bf16 %v19_v27, %v19_v27  ;;  %v264_v43 = vperm.slane %v74_v31, 2 }
   0xf   :  { %236 = vmatpush.bf16.msra.mxu1 %v379_v11 }
  0x10   :  { %249 = vmatpush.bf16.msra.mxu2 %v387_v12 }
  0x12   :  { %224 = vmatpush.bf16.msra.mxu0 %v370_v13 }
  0x13   :  { %237 = vmatpush.bf16.msra.mxu1 %v378_v14 }
  0x14   :  { %250 = vmatpush.bf16.msra.mxu2 %v386_v15 }
  0x16   :  { %225 = vmatpush.bf16.msra.mxu0 %v369_v16 }
  0x17   :  { %238 = vmatpush.bf16.msra.mxu1 %v377_v17 }
  0x18   :  { %251 = vmatpush.bf16.msra.mxu2 %v385_v18 }
  0x1a   :  { %226 = vmatpush.bf16.msra.mxu0 %v368_v19 }
  0x1b   :  { %239 = vmatpush.bf16.msra.mxu1 %v376_v20 }
  0x1c   :  { %252 = vmatpush.bf16.msra.mxu2 %v384_v21 }
  0x1e   :  { %227 = vmatpush.bf16.msra.mxu0 %v367_v22 }
  0x1f   :  { %240 = vmatpush.bf16.msra.mxu1 %v375_v23 }
  0x20   :  { %253 = vmatpush.bf16.msra.mxu2 %v383_v26 }
  0x21   :  { %228 = vmatmul.bf16.vlgmr.msra.gmra.mxu0 %v23_v28 }
  0x22   :  { %241 = vmatmul.bf16.vlgmr.msra.gmra.mxu1 %v24_v29 }
  0x23   :  { %254 = vmatmul.bf16.vlgmr.msra.gmra.mxu2 %v25_v30 }
  0x9e   :  { %v229_v33 = vpop.f32.mrf.mxu0 }
  0x9f   :  { %v242_v34 = vpop.f32.mrf.mxu1  ;;  %v230_v35 = vadd.f32 %v229_v33, %v75_v32 }
  0xa1   :  { %v243_v36 = vadd.f32 %v242_v34, %v230_v35 }
  0xa6   :  { %v255_v37 = vpop.f32.mrf.mxu2  ;;  %v231_v39 = vpop.f32.mrf.mxu0 }
  0xa7   :  { %v256_v38 = vadd.f32 %v255_v37, %v243_v36  ;;  %v244_v40 = vpop.f32.mrf.mxu1 }
  0xa9   :  { %vm259_vm0 = vcmp.ge.f32.partialorder %v256_v38, 0.0  ;;  %v260_v42 = vmul.f32 0.2, %v256_v38 }
  0xab   :  { %v261_v44 = vsel %vm259_vm0, %v256_v38, %v260_v42 }
  0xac   :  { %v263_v45 = vmul.f32 %v262_v41, %v261_v44 }
  0xae   :  { %v265_v46 = vadd.f32 %v264_v43, %v263_v45  ;;  %v257_v47 = vpop.f32.mrf.mxu2 }
  0xb0   :  { %266 = vst [vmem:[%s495_s3] sm:$0x3] %v265_v46 }

// kernel: model_forward.25
= control target key start
LH: loop header
LB: loop body
LE: loop exit
PB: predicated region body
PF: predicated region fallthrough
CT: control target
= control target key end

     0   :  { %s557_s12 = smov 0   ;;  %s603_s0 = inlined_call_operand.vmem [shape: f32[2,2,256], index: 0, kind: input, shape index: {}]   ;;  %s604_s1 = inlined_call_operand.vmem [shape: bf16[2,256,128], index: 1, kind: input, shape index: {}]   ;;  %s605_s2 = inlined_call_operand.vmem [shape: f32[3,128], index: 2, kind: input, shape index: {}]   ;;  %s606_s3 = inlined_call_operand.vmem [shape: f32[2,2,128], index: 3, kind: output, shape index: {}]  }
   0x1 LB: > { %s427_s13 = sadd.s32 4294967295, %s535_s12   ;;  %p431_p0 = scmp.ge.s32.totalorder %s535_s12, 1  ;;  %s535_s12 = sphi %s557_s12, %s13_s12  }
   0x2   : > { %p147_p1 = scmp.lt.s32.totalorder %s535_s12, 3 }
   0x4   : > { %p148_p2 = pnand %p431_p0, %p147_p1 }
   0x5   : > { %p175_p3 = scmp.lt.s32.totalorder (!%p148_p2), %s427_s13, 1 }
   0x6   : > { %151 = sbr.rel (%p148_p2) target bundleno = 184 (0xb8), region = 32 }
   0xb   : > { %s608_s13 = smov (!%p175_p3, %s427_s13), 1  ;;  %v230_v21 = vld [vmem:[%s605_s2] sm:$0x7] }
   0xc   : > { %s504_s14 = sshll.u32 %s608_s13, 7  ;;  %s503_s18 = sshll.u32 %s608_s13, 2  ;;  %v231_v22 = vperm.slane %v230_v21, 0  ;;  %v357_v27 = vperm.slane %v230_v21, 1  ;;  %v359_v29 = vperm.slane %v230_v21, 2 }
   0xd   : > { %s571_s17 = scalar_lea.vmem %s604_s1, %s504_s14  ;;  %s179_s21 = scalar_lea.vmem %s603_s0, %s503_s18 }
   0xe   : > { %v512_v0 = vld [vmem:[%s571_s17 + $0x38] sm:$0xff]  ;;  %v511_v2 = vld [vmem:[%s571_s17 + $0x30] sm:$0xff]  ;;  %v189_v4 = vld [vmem:[%s179_s21] sm:$0xf]  ;;  %s436_s24 = sshll.u32 %s608_s13, 1 }
   0xf   : > { %v520_v1 = vld [vmem:[%s571_s17 + $0x78] sm:$0xff]  ;;  %328 = vmatpush.bf16.msra.mxu0 %v512_v0  ;;  %v519_v3 = vld [vmem:[%s571_s17 + $0x70] sm:$0xff]  ;;  %v510_v5 = vld [vmem:[%s571_s17 + $0x28] sm:$0xff]  ;;  %191 = vst [vmem:[#allocation1] ss:$4 sm:$0xff] %v189_v4  ;;  %s188_s27 = scalar_lea.vmem %s606_s3, %s436_s24 }
  0x10   : > { %341 = vmatpush.bf16.msra.mxu1 %v520_v1  ;;  %v518_v6 = vld [vmem:[%s571_s17 + $0x68] sm:$0xff]  ;;  %v509_v7 = vld [vmem:[%s571_s17 + $0x20] sm:$0xff]  ;;  %v508_v9 = vld [vmem:[%s571_s17 + $0x18] sm:$0xff] }
  0x11   : > { %v517_v8 = vld [vmem:[%s571_s17 + $0x60] sm:$0xff]  ;;  %v516_v10 = vld [vmem:[%s571_s17 + $0x58] sm:$0xff]  ;;  %v507_v11 = vld [vmem:[%s571_s17 + $0x10] sm:$0xff] }
  0x12   : > { %v515_v12 = vld [vmem:[%s571_s17 + $0x50] sm:$0xff]  ;;  %v506_v13 = vld [vmem:[%s571_s17 + $0x8] sm:$0xff]  ;;  %v505_v15 = vld [vmem:[%s571_s17] sm:$0xff] }
  0x13   : > { %329 = vmatpush.bf16.msra.mxu0 %v511_v2  ;;  %v514_v14 = vld [vmem:[%s571_s17 + $0x48] sm:$0xff]  ;;  %v513_v16 = vld [vmem:[%s571_s17 + $0x40] sm:$0xff] }
  0x14   : > { %342 = vmatpush.bf16.msra.mxu1 %v519_v3 }
  0x16   : > { %v192_v17 = vld.sshfl [vmem:[#allocation1] sm:$0xff pattern:$0x73625140]  ;;  %v193_v18 = vld.sshfl [vmem:[#allocation1 + $0x8] sm:$0xff pattern:$0x73625140] }
  0x17   : > { %330 = vmatpush.bf16.msra.mxu0 %v510_v5  ;;  %v196_v19 = vpack.c.bf16 %v192_v17, %v192_v17  ;;  %v197_v20 = vpack.c.bf16 %v193_v18, %v193_v18 }
  0x18   : > { %343 = vmatpush.bf16.msra.mxu1 %v518_v6 }
  0x1b   : > { %331 = vmatpush.bf16.msra.mxu0 %v509_v7 }
  0x1c   : > { %344 = vmatpush.bf16.msra.mxu1 %v517_v8 }
  0x1f   : > { %332 = vmatpush.bf16.msra.mxu0 %v508_v9 }
  0x20   : > { %345 = vmatpush.bf16.msra.mxu1 %v516_v10 }
  0x23   : > { %333 = vmatpush.bf16.msra.mxu0 %v507_v11 }
  0x24   : > { %346 = vmatpush.bf16.msra.mxu1 %v515_v12 }
  0x27   : > { %334 = vmatpush.bf16.msra.mxu0 %v506_v13 }
  0x28   : > { %347 = vmatpush.bf16.msra.mxu1 %v514_v14 }
  0x2b   : > { %335 = vmatpush.bf16.msra.mxu0 %v505_v15 }
  0x2c   : > { %348 = vmatpush.bf16.msra.mxu1 %v513_v16 }
  0x2e   : > { %336 = vmatmul.bf16.vlgmr.msra.gmra.mxu0 %v196_v19 }
  0x2f   : > { %349 = vmatmul.bf16.vlgmr.msra.gmra.mxu1 %v197_v20 }
  0xab   : > { %v337_v23 = vpop.f32.mrf.mxu0 }
  0xac   : > { %v350_v24 = vpop.f32.mrf.mxu1  ;;  %v338_v25 = vadd.f32 %v337_v23, %v231_v22 }
  0xae   : > { %v351_v26 = vadd.f32 %v350_v24, %v338_v25 }
  0xb0   : > { %vm354_vm0 = vcmp.ge.f32.partialorder %v351_v26, 0.0  ;;  %v355_v28 = vmul.f32 0.2, %v351_v26 }
  0xb2   : > { %v356_v30 = vsel %vm354_vm0, %v351_v26, %v355_v28 }
  0xb3   : > { %v358_v31 = vmul.f32 %v357_v27, %v356_v30  ;;  %v339_v32 = vpop.f32.mrf.mxu0 }
  0xb4   : > { %v352_v33 = vpop.f32.mrf.mxu1 }
  0xb5   : > { %v360_v34 = vadd.f32 %v359_v29, %v358_v31 }
  0xb7   : > { %361 = vst [vmem:[%s188_s27] sm:$0x3] %v360_v34 }
  0xb8 PF: > { %s13_s12 = sadd.s32 1, %s535_s12  }
  0xb9   : > { %p10_p4 = scmp.ge.s32.totalorder %s13_s12, 4  }
  0xbb   :  { %12 = sbr.rel (!%p10_p4) target bundleno = 1 (0x1), region = 65 }

// kernel: model_forward.26
= control target key start
LH: loop header
LB: loop body
LE: loop exit
PB: predicated region body
PF: predicated region fallthrough
CT: control target
= control target key end

     0   :  { %s557_s12 = smov 0   ;;  %s603_s0 = inlined_call_operand.vmem [shape: f32[2,4,256], index: 0, kind: input, shape index: {}]   ;;  %s604_s1 = inlined_call_operand.vmem [shape: bf16[2,256,128], index: 1, kind: input, shape index: {}]   ;;  %s605_s2 = inlined_call_operand.vmem [shape: f32[3,128], index: 2, kind: input, shape index: {}]   ;;  %s606_s3 = inlined_call_operand.vmem [shape: f32[2,4,128], index: 3, kind: output, shape index: {}]  }
   0x1 LB: > { %s427_s13 = sadd.s32 4294967295, %s535_s12   ;;  %p431_p0 = scmp.ge.s32.totalorder %s535_s12, 1  ;;  %s535_s12 = sphi %s557_s12, %s13_s12  }
   0x2   : > { %p147_p1 = scmp.lt.s32.totalorder %s535_s12, 3 }
   0x4   : > { %p148_p2 = pnand %p431_p0, %p147_p1 }
   0x5   : > { %p175_p3 = scmp.lt.s32.totalorder (!%p148_p2), %s427_s13, 1 }
   0x6   : > { %151 = sbr.rel (%p148_p2) target bundleno = 184 (0xb8), region = 32 }
   0xb   : > { %s608_s13 = smov (!%p175_p3, %s427_s13), 1  ;;  %v230_v21 = vld [vmem:[%s605_s2] sm:$0x7] }
   0xc   : > { %s504_s14 = sshll.u32 %s608_s13, 7  ;;  %s503_s18 = sshll.u32 %s608_s13, 3  ;;  %v231_v22 = vperm.slane %v230_v21, 0  ;;  %v357_v27 = vperm.slane %v230_v21, 1  ;;  %v359_v29 = vperm.slane %v230_v21, 2 }
   0xd   : > { %s571_s17 = scalar_lea.vmem %s604_s1, %s504_s14  ;;  %s179_s21 = scalar_lea.vmem %s603_s0, %s503_s18 }
   0xe   : > { %v512_v0 = vld [vmem:[%s571_s17 + $0x38] sm:$0xff]  ;;  %v511_v2 = vld [vmem:[%s571_s17 + $0x30] sm:$0xff]  ;;  %v189_v4 = vld [vmem:[%s179_s21] sm:$0xff]  ;;  %s436_s24 = sshll.u32 %s608_s13, 2 }
   0xf   : > { %v520_v1 = vld [vmem:[%s571_s17 + $0x78] sm:$0xff]  ;;  %328 = vmatpush.bf16.msra.mxu0 %v512_v0  ;;  %v519_v3 = vld [vmem:[%s571_s17 + $0x70] sm:$0xff]  ;;  %v510_v5 = vld [vmem:[%s571_s17 + $0x28] sm:$0xff]  ;;  %191 = vst [vmem:[#allocation1] ss:$2 sm:$0xff] %v189_v4  ;;  %s188_s27 = scalar_lea.vmem %s606_s3, %s436_s24 }
  0x10   : > { %341 = vmatpush.bf16.msra.mxu1 %v520_v1  ;;  %v518_v6 = vld [vmem:[%s571_s17 + $0x68] sm:$0xff]  ;;  %v509_v7 = vld [vmem:[%s571_s17 + $0x20] sm:$0xff]  ;;  %v508_v9 = vld [vmem:[%s571_s17 + $0x18] sm:$0xff] }
  0x11   : > { %v517_v8 = vld [vmem:[%s571_s17 + $0x60] sm:$0xff]  ;;  %v516_v10 = vld [vmem:[%s571_s17 + $0x58] sm:$0xff]  ;;  %v507_v11 = vld [vmem:[%s571_s17 + $0x10] sm:$0xff] }
  0x12   : > { %v515_v12 = vld [vmem:[%s571_s17 + $0x50] sm:$0xff]  ;;  %v506_v13 = vld [vmem:[%s571_s17 + $0x8] sm:$0xff]  ;;  %v505_v15 = vld [vmem:[%s571_s17] sm:$0xff] }
  0x13   : > { %329 = vmatpush.bf16.msra.mxu0 %v511_v2  ;;  %v514_v14 = vld [vmem:[%s571_s17 + $0x48] sm:$0xff]  ;;  %v513_v16 = vld [vmem:[%s571_s17 + $0x40] sm:$0xff] }
  0x14   : > { %342 = vmatpush.bf16.msra.mxu1 %v519_v3 }
  0x16   : > { %v192_v17 = vld.sshfl [vmem:[#allocation1] sm:$0xff pattern:$0x75316420]  ;;  %v193_v18 = vld.sshfl [vmem:[#allocation1 + $0x8] sm:$0xff pattern:$0x75316420] }
  0x17   : > { %330 = vmatpush.bf16.msra.mxu0 %v510_v5  ;;  %v196_v19 = vpack.c.bf16 %v192_v17, %v192_v17  ;;  %v197_v20 = vpack.c.bf16 %v193_v18, %v193_v18 }
  0x18   : > { %343 = vmatpush.bf16.msra.mxu1 %v518_v6 }
  0x1b   : > { %331 = vmatpush.bf16.msra.mxu0 %v509_v7 }
  0x1c   : > { %344 = vmatpush.bf16.msra.mxu1 %v517_v8 }
  0x1f   : > { %332 = vmatpush.bf16.msra.mxu0 %v508_v9 }
  0x20   : > { %345 = vmatpush.bf16.msra.mxu1 %v516_v10 }
  0x23   : > { %333 = vmatpush.bf16.msra.mxu0 %v507_v11 }
  0x24   : > { %346 = vmatpush.bf16.msra.mxu1 %v515_v12 }
  0x27   : > { %334 = vmatpush.bf16.msra.mxu0 %v506_v13 }
  0x28   : > { %347 = vmatpush.bf16.msra.mxu1 %v514_v14 }
  0x2b   : > { %335 = vmatpush.bf16.msra.mxu0 %v505_v15 }
  0x2c   : > { %348 = vmatpush.bf16.msra.mxu1 %v513_v16 }
  0x2e   : > { %336 = vmatmul.bf16.vlgmr.msra.gmra.mxu0 %v196_v19 }
  0x2f   : > { %349 = vmatmul.bf16.vlgmr.msra.gmra.mxu1 %v197_v20 }
  0xab   : > { %v337_v23 = vpop.f32.mrf.mxu0 }
  0xac   : > { %v350_v24 = vpop.f32.mrf.mxu1  ;;  %v338_v25 = vadd.f32 %v337_v23, %v231_v22 }
  0xae   : > { %v351_v26 = vadd.f32 %v350_v24, %v338_v25 }
  0xb0   : > { %vm354_vm0 = vcmp.ge.f32.partialorder %v351_v26, 0.0  ;;  %v355_v28 = vmul.f32 0.2, %v351_v26 }
  0xb2   : > { %v356_v30 = vsel %vm354_vm0, %v351_v26, %v355_v28 }
  0xb3   : > { %v358_v31 = vmul.f32 %v357_v27, %v356_v30  ;;  %v339_v32 = vpop.f32.mrf.mxu0 }
  0xb4   : > { %v352_v33 = vpop.f32.mrf.mxu1 }
  0xb5   : > { %v360_v34 = vadd.f32 %v359_v29, %v358_v31 }
  0xb7   : > { %361 = vst [vmem:[%s188_s27] sm:$0xf] %v360_v34 }
  0xb8 PF: > { %s13_s12 = sadd.s32 1, %s535_s12  }
  0xb9   : > { %p10_p4 = scmp.ge.s32.totalorder %s13_s12, 4  }
  0xbb   :  { %12 = sbr.rel (!%p10_p4) target bundleno = 1 (0x1), region = 65 }

// kernel: model_forward.27
= control target key start
LH: loop header
LB: loop body
LE: loop exit
PB: predicated region body
PF: predicated region fallthrough
CT: control target
= control target key end

     0   :  { %s552_s12 = smov 0   ;;  %s598_s0 = inlined_call_operand.vmem [shape: f32[2,8,256], index: 0, kind: input, shape index: {}]   ;;  %s599_s1 = inlined_call_operand.vmem [shape: bf16[2,256,128], index: 1, kind: input, shape index: {}]   ;;  %s600_s2 = inlined_call_operand.vmem [shape: f32[3,128], index: 2, kind: input, shape index: {}]   ;;  %s601_s3 = inlined_call_operand.vmem [shape: f32[2,8,128], index: 3, kind: output, shape index: {}]  }
   0x1 LB: > { %s422_s13 = sadd.s32 4294967295, %s530_s12   ;;  %p426_p0 = scmp.ge.s32.totalorder %s530_s12, 1  ;;  %s530_s12 = sphi %s552_s12, %s13_s12  }
   0x2   : > { %p147_p1 = scmp.lt.s32.totalorder %s530_s12, 3 }
   0x4   : > { %p148_p2 = pnand %p426_p0, %p147_p1 }
   0x5   : > { %p175_p3 = scmp.lt.s32.totalorder (!%p148_p2), %s422_s13, 1 }
   0x6   : > { %151 = sbr.rel (%p148_p2) target bundleno = 184 (0xb8), region = 32 }
   0xb   : > { %s603_s13 = smov (!%p175_p3, %s422_s13), 1  ;;  %v225_v20 = vld [vmem:[%s600_s2] sm:$0x7] }
   0xc   : > { %s499_s14 = sshll.u32 %s603_s13, 7  ;;  %s498_s18 = sshll.u32 %s603_s13, 4  ;;  %v226_v21 = vperm.slane %v225_v20, 0  ;;  %v352_v26 = vperm.slane %v225_v20, 1  ;;  %v354_v28 = vperm.slane %v225_v20, 2 }
   0xd   : > { %s566_s17 = scalar_lea.vmem %s599_s1, %s499_s14  ;;  %s179_s21 = scalar_lea.vmem %s598_s0, %s498_s18 }
   0xe   : > { %v507_v0 = vld [vmem:[%s566_s17 + $0x38] sm:$0xff]  ;;  %v506_v2 = vld [vmem:[%s566_s17 + $0x30] sm:$0xff]  ;;  %v505_v4 = vld [vmem:[%s566_s17 + $0x28] sm:$0xff]  ;;  %s431_s24 = sshll.u32 %s603_s13, 3 }
   0xf   : > { %v515_v1 = vld [vmem:[%s566_s17 + $0x78] sm:$0xff]  ;;  %323 = vmatpush.bf16.msra.mxu0 %v507_v0  ;;  %v514_v3 = vld [vmem:[%s566_s17 + $0x70] sm:$0xff]  ;;  %v513_v5 = vld [vmem:[%s566_s17 + $0x68] sm:$0xff]  ;;  %s188_s27 = scalar_lea.vmem %s601_s3, %s431_s24 }
  0x10   : > { %336 = vmatpush.bf16.msra.mxu1 %v515_v1  ;;  %v504_v6 = vld [vmem:[%s566_s17 + $0x20] sm:$0xff]  ;;  %v503_v8 = vld [vmem:[%s566_s17 + $0x18] sm:$0xff]  ;;  %v502_v10 = vld [vmem:[%s566_s17 + $0x10] sm:$0xff] }
  0x11   : > { %v512_v7 = vld [vmem:[%s566_s17 + $0x60] sm:$0xff]  ;;  %v511_v9 = vld [vmem:[%s566_s17 + $0x58] sm:$0xff]  ;;  %v510_v11 = vld [vmem:[%s566_s17 + $0x50] sm:$0xff] }
  0x12   : > { %v501_v12 = vld [vmem:[%s566_s17 + $0x8] sm:$0xff]  ;;  %v500_v14 = vld [vmem:[%s566_s17] sm:$0xff] }
  0x13   : > { %324 = vmatpush.bf16.msra.mxu0 %v506_v2  ;;  %v509_v13 = vld [vmem:[%s566_s17 + $0x48] sm:$0xff]  ;;  %v508_v15 = vld [vmem:[%s566_s17 + $0x40] sm:$0xff] }
  0x14   : > { %337 = vmatpush.bf16.msra.mxu1 %v514_v3  ;;  %v189_v16 = vld [vmem:[%s179_s21] sm:$0xff]  ;;  %v190_v17 = vld [vmem:[%s179_s21 + $0x8] sm:$0xff] }
  0x15   : > { %v191_v18 = vpack.c.bf16 %v189_v16, %v189_v16  ;;  %v192_v19 = vpack.c.bf16 %v190_v17, %v190_v17 }
  0x17   : > { %325 = vmatpush.bf16.msra.mxu0 %v505_v4 }
  0x18   : > { %338 = vmatpush.bf16.msra.mxu1 %v513_v5 }
  0x1b   : > { %326 = vmatpush.bf16.msra.mxu0 %v504_v6 }
  0x1c   : > { %339 = vmatpush.bf16.msra.mxu1 %v512_v7 }
  0x1f   : > { %327 = vmatpush.bf16.msra.mxu0 %v503_v8 }
  0x20   : > { %340 = vmatpush.bf16.msra.mxu1 %v511_v9 }
  0x23   : > { %328 = vmatpush.bf16.msra.mxu0 %v502_v10 }
  0x24   : > { %341 = vmatpush.bf16.msra.mxu1 %v510_v11 }
  0x27   : > { %329 = vmatpush.bf16.msra.mxu0 %v501_v12 }
  0x28   : > { %342 = vmatpush.bf16.msra.mxu1 %v509_v13 }
  0x2b   : > { %330 = vmatpush.bf16.msra.mxu0 %v500_v14 }
  0x2c   : > { %343 = vmatpush.bf16.msra.mxu1 %v508_v15 }
  0x2e   : > { %331 = vmatmul.bf16.vlgmr.msra.gmra.mxu0 %v191_v18 }
  0x2f   : > { %344 = vmatmul.bf16.vlgmr.msra.gmra.mxu1 %v192_v19 }
  0xab   : > { %v332_v22 = vpop.f32.mrf.mxu0 }
  0xac   : > { %v345_v23 = vpop.f32.mrf.mxu1  ;;  %v333_v24 = vadd.f32 %v332_v22, %v226_v21 }
  0xae   : > { %v346_v25 = vadd.f32 %v345_v23, %v333_v24 }
  0xb0   : > { %vm349_vm0 = vcmp.ge.f32.partialorder %v346_v25, 0.0  ;;  %v350_v27 = vmul.f32 0.2, %v346_v25 }
  0xb2   : > { %v351_v29 = vsel %vm349_vm0, %v346_v25, %v350_v27 }
  0xb3   : > { %v353_v30 = vmul.f32 %v352_v26, %v351_v29  ;;  %v334_v31 = vpop.f32.mrf.mxu0 }
  0xb4   : > { %v347_v32 = vpop.f32.mrf.mxu1 }
  0xb5   : > { %v355_v33 = vadd.f32 %v354_v28, %v353_v30 }
  0xb7   : > { %356 = vst [vmem:[%s188_s27] sm:$0xff] %v355_v33 }
  0xb8 PF: > { %s13_s12 = sadd.s32 1, %s530_s12  }
  0xb9   : > { %p10_p4 = scmp.ge.s32.totalorder %s13_s12, 4  }
  0xbb   :  { %12 = sbr.rel (!%p10_p4) target bundleno = 1 (0x1), region = 65 }

// kernel: model_forward.28
= control target key start
LH: loop header
LB: loop body
LE: loop exit
PB: predicated region body
PF: predicated region fallthrough
CT: control target
= control target key end

     0   :  { %8 = vsyncpa [#allocation3], 0  ;;  %s643_s12 = smov 0   ;;  %s689_s0 = inlined_call_operand.vmem [shape: f32[2,16,256], index: 0, kind: input, shape index: {}]   ;;  %s690_s1 = inlined_call_operand.vmem [shape: bf16[2,256,128], index: 1, kind: input, shape index: {}]   ;;  %s691_s2 = inlined_call_operand.hbm [shape: f32[3,128], index: 2, kind: input, shape index: {}]   ;;  %s692_s3 = inlined_call_operand.vmem [shape: f32[2,16,128], index: 3, kind: output, shape index: {}]  }
   0x1 LB: > { %s463_s13 = sadd.s32 4294967295, %s620_s12   ;;  %p465_p0 = scmp.ge.s32.totalorder %s620_s12, 1  ;;  %s620_s12 = sphi %s643_s12, %s14_s12  }
   0x2   : > { %p118_p1 = scmp.lt.s32.totalorder %s620_s12, 3  ;;  %s130_s16 = sshll.u32 %s691_s2, 4  ;;  %s131_s16 = int_to_ptr.hbm [resolvable:$true] %s130_s16 }
   0x3   : > { %p569_p3 = scmp.eq.s32.totalorder %s463_s13, 0  ;;  %s622_s17 = smov [#allocation2]  }
   0x4   : > { %p119_p2 = pnand %p465_p0, %p118_p1  ;;  %s132_s18 = sshll.u32 %s622_s17, 4  ;;  %s133_s18 = int_to_ptr.vmem [resolvable:$true] %s132_s18 }
   0x6   : > { %p565_p4 = pneg %p119_p2  ;;  %161 = sbr.rel (%p119_p2) target bundleno = 195 (0xc3), region = 32 }
   0x8   : > { %p566_p5 = pnand %p569_p3, %p565_p4 }
   0xa   : > { %568 = dma.hbm_to_vmem [thread:$0]  (!%p566_p5), %s131_s16, 64, %s133_s18, [#allocation3]  }
   0xb   : > { %615 = dma.done.wait (%p569_p3), [#allocation3], 64  }
   0xc   : > { %617 = vsyncadd (%p569_p3), [#allocation3], 4294967232  ;;  %p191_p6 = scmp.lt.s32.totalorder %s463_s13, 1  ;;  %v244_v22 = vld [vmem:[#allocation2] sm:$0x7] }
   0xd   : > { %v245_v23 = vperm.slane %v244_v22, 0  ;;  %v376_v28 = vperm.slane %v244_v22, 1  ;;  %v379_v30 = vperm.slane %v244_v22, 2 }
   0xe   : > { %s694_s13 = smov (!%p191_p6, %s463_s13), 1 }
   0xf   : > { %s543_s19 = sshll.u32 %s694_s13, 7  ;;  %s542_s23 = sshll.u32 %s694_s13, 5 }
  0x10   : > { %s660_s22 = scalar_lea.vmem %s690_s1, %s543_s19  ;;  %s195_s26 = scalar_lea.vmem %s689_s0, %s542_s23 }
  0x11   : > { %v552_v0 = vld [vmem:[%s660_s22 + $0x38] sm:$0xff]  ;;  %v551_v2 = vld [vmem:[%s660_s22 + $0x30] sm:$0xff]  ;;  %v550_v4 = vld [vmem:[%s660_s22 + $0x28] sm:$0xff]  ;;  %s544_s27 = sshll.u32 %s694_s13, 4 }
  0x12   : > { %v560_v1 = vld [vmem:[%s660_s22 + $0x78] sm:$0xff]  ;;  %342 = vmatpush.bf16.msra.mxu0 %v552_v0  ;;  %v559_v3 = vld [vmem:[%s660_s22 + $0x70] sm:$0xff]  ;;  %v558_v5 = vld [vmem:[%s660_s22 + $0x68] sm:$0xff]  ;;  %s205_s30 = scalar_lea.vmem %s692_s3, %s544_s27 }
  0x13   : > { %356 = vmatpush.bf16.msra.mxu1 %v560_v1  ;;  %v549_v6 = vld [vmem:[%s660_s22 + $0x20] sm:$0xff]  ;;  %v548_v8 = vld [vmem:[%s660_s22 + $0x18] sm:$0xff]  ;;  %v547_v10 = vld [vmem:[%s660_s22 + $0x10] sm:$0xff] }
  0x14   : > { %v557_v7 = vld [vmem:[%s660_s22 + $0x60] sm:$0xff]  ;;  %v556_v9 = vld [vmem:[%s660_s22 + $0x58] sm:$0xff]  ;;  %v555_v11 = vld [vmem:[%s660_s22 + $0x50] sm:$0xff] }
  0x15   : > { %v546_v12 = vld [vmem:[%s660_s22 + $0x8] sm:$0xff]  ;;  %v545_v14 = vld [vmem:[%s660_s22] sm:$0xff]  ;;  %v208_v17 = vld [vmem:[%s195_s26 + $0x10] sm:$0xff] }
  0x16   : > { %343 = vmatpush.bf16.msra.mxu0 %v551_v2  ;;  %v554_v13 = vld [vmem:[%s660_s22 + $0x48] sm:$0xff]  ;;  %v553_v15 = vld [vmem:[%s660_s22 + $0x40] sm:$0xff]  ;;  %v209_v19 = vld [vmem:[%s195_s26 + $0x18] sm:$0xff] }
  0x17   : > { %357 = vmatpush.bf16.msra.mxu1 %v559_v3  ;;  %v206_v16 = vld [vmem:[%s195_s26] sm:$0xff]  ;;  %v207_v18 = vld [vmem:[%s195_s26 + $0x8] sm:$0xff] }
  0x18   : > { %v210_v20 = vpack.c.bf16 %v208_v17, %v206_v16  ;;  %v211_v21 = vpack.c.bf16 %v209_v19, %v207_v18 }
  0x1a   : > { %344 = vmatpush.bf16.msra.mxu0 %v550_v4 }
  0x1b   : > { %358 = vmatpush.bf16.msra.mxu1 %v558_v5 }
  0x1e   : > { %345 = vmatpush.bf16.msra.mxu0 %v549_v6 }
  0x1f   : > { %359 = vmatpush.bf16.msra.mxu1 %v557_v7 }
  0x22   : > { %346 = vmatpush.bf16.msra.mxu0 %v548_v8 }
  0x23   : > { %360 = vmatpush.bf16.msra.mxu1 %v556_v9 }
  0x26   : > { %347 = vmatpush.bf16.msra.mxu0 %v547_v10 }
  0x27   : > { %361 = vmatpush.bf16.msra.mxu1 %v555_v11 }
  0x2a   : > { %348 = vmatpush.bf16.msra.mxu0 %v546_v12 }
  0x2b   : > { %362 = vmatpush.bf16.msra.mxu1 %v554_v13 }
  0x2e   : > { %349 = vmatpush.bf16.msra.mxu0 %v545_v14 }
  0x2f   : > { %363 = vmatpush.bf16.msra.mxu1 %v553_v15 }
  0x31   : > { %350 = vmatmul.bf16.vlgmr.msra.gmra.mxu0 %v210_v20 }
  0x32   : > { %364 = vmatmul.bf16.vlgmr.msra.gmra.mxu1 %v211_v21 }
  0xae   : > { %v351_v24 = vpop.f32.mrf.mxu0 }
  0xaf   : > { %v365_v25 = vpop.f32.mrf.mxu1  ;;  %v352_v26 = vadd.f32 %v351_v24, %v245_v23 }
  0xb1   : > { %v366_v27 = vadd.f32 %v365_v25, %v352_v26 }
  0xb3   : > { %vm370_vm0 = vcmp.ge.f32.partialorder %v366_v27, 0.0  ;;  %v372_v29 = vmul.f32 0.2, %v366_v27 }
  0xb5   : > { %v374_v31 = vsel %vm370_vm0, %v366_v27, %v372_v29 }
  0xb6   : > { %v377_v32 = vmul.f32 %v376_v28, %v374_v31  ;;  %v353_v33 = vpop.f32.mrf.mxu0 }
  0xb7   : > { %v354_v34 = vadd.f32 %v353_v33, %v245_v23  ;;  %v367_v36 = vpop.f32.mrf.mxu1 }
  0xb8   : > { %v380_v35 = vadd.f32 %v379_v30, %v377_v32 }
  0xb9   : > { %v368_v37 = vadd.f32 %v367_v36, %v354_v34 }
  0xba   : > { %382 = vst [vmem:[%s205_s30] sm:$0xff] %v380_v35 }
  0xbb   : > { %vm371_vm1 = vcmp.ge.f32.partialorder %v368_v37, 0.0  ;;  %v373_v38 = vmul.f32 0.2, %v368_v37 }
  0xbd   : > { %v375_v39 = vsel %vm371_vm1, %v368_v37, %v373_v38 }
  0xbe   : > { %v378_v40 = vmul.f32 %v376_v28, %v375_v39 }
  0xc0   : > { %v381_v41 = vadd.f32 %v379_v30, %v378_v40 }
  0xc2   : > { %383 = vst [vmem:[%s205_s30 + $0x8] sm:$0xff] %v381_v41 }
  0xc3 PF: > { %s14_s12 = sadd.s32 1, %s620_s12  }
  0xc4   : > { %p11_p7 = scmp.ge.s32.totalorder %s14_s12, 4  }
  0xc6   :  { %13 = sbr.rel (!%p11_p7) target bundleno = 1 (0x1), region = 70 }
  0xcb   :  { %405 = vsyncpa [#allocation3], 1 }
  0xcc   :  { %407 = vsyncpa [#allocation3 + $0x1], 1 }

// kernel: model_forward.29
= control target key start
LH: loop header
LB: loop body
LE: loop exit
PB: predicated region body
PF: predicated region fallthrough
CT: control target
= control target key end

     0   :  { %8 = vsyncpa [#allocation3], 0  ;;  %s687_s12 = smov 0   ;;  %s733_s0 = inlined_call_operand.vmem [shape: f32[2,32,256], index: 0, kind: input, shape index: {}]   ;;  %s734_s1 = inlined_call_operand.vmem [shape: bf16[2,256,128], index: 1, kind: input, shape index: {}]   ;;  %s735_s2 = inlined_call_operand.hbm [shape: f32[3,128], index: 2, kind: input, shape index: {}]   ;;  %s736_s3 = inlined_call_operand.vmem [shape: f32[2,32,128], index: 3, kind: output, shape index: {}]  }
   0x1 LB: > { %s491_s13 = sadd.s32 4294967295, %s664_s12   ;;  %p493_p0 = scmp.ge.s32.totalorder %s664_s12, 1  ;;  %s664_s12 = sphi %s687_s12, %s14_s12  }
   0x2   : > { %p118_p1 = scmp.lt.s32.totalorder %s664_s12, 3  ;;  %s130_s16 = sshll.u32 %s735_s2, 4  ;;  %s131_s16 = int_to_ptr.hbm [resolvable:$true] %s130_s16 }
   0x3   : > { %p613_p3 = scmp.eq.s32.totalorder %s491_s13, 0  ;;  %s666_s17 = smov [#allocation2]  }
   0x4   : > { %p119_p2 = pnand %p493_p0, %p118_p1  ;;  %s132_s18 = sshll.u32 %s666_s17, 4  ;;  %s133_s18 = int_to_ptr.vmem [resolvable:$true] %s132_s18 }
   0x6   : > { %p609_p4 = pneg %p119_p2  ;;  %161 = sbr.rel (%p119_p2) target bundleno = 201 (0xc9), region = 32 }
   0x8   : > { %p610_p5 = pnand %p613_p3, %p609_p4 }
   0xa   : > { %612 = dma.hbm_to_vmem [thread:$0]  (!%p610_p5), %s131_s16, 64, %s133_s18, [#allocation3]  }
   0xb   : > { %659 = dma.done.wait (%p613_p3), [#allocation3], 64  }
   0xc   : > { %661 = vsyncadd (%p613_p3), [#allocation3], 4294967232  ;;  %p191_p6 = scmp.lt.s32.totalorder %s491_s13, 1  ;;  %v250_v28 = vld [vmem:[#allocation2] sm:$0x7] }
   0xd   : > { %v251_v29 = vperm.slane %v250_v28, 0  ;;  %v398_v34 = vperm.slane %v250_v28, 1  ;;  %v403_v36 = vperm.slane %v250_v28, 2 }
   0xe   : > { %s738_s13 = smov (!%p191_p6, %s491_s13), 1 }
   0xf   : > { %s571_s19 = sshll.u32 %s738_s13, 7  ;;  %s570_s23 = sshll.u32 %s738_s13, 6 }
  0x10   : > { %s704_s22 = scalar_lea.vmem %s734_s1, %s571_s19  ;;  %s195_s26 = scalar_lea.vmem %s733_s0, %s570_s23 }
  0x11   : > { %v580_v0 = vld [vmem:[%s704_s22 + $0x38] sm:$0xff]  ;;  %v579_v2 = vld [vmem:[%s704_s22 + $0x30] sm:$0xff]  ;;  %v578_v4 = vld [vmem:[%s704_s22 + $0x28] sm:$0xff]  ;;  %s572_s27 = sshll.u32 %s738_s13, 5 }
  0x12   : > { %v588_v1 = vld [vmem:[%s704_s22 + $0x78] sm:$0xff]  ;;  %348 = vmatpush.bf16.msra.mxu0 %v580_v0  ;;  %589 = vmatpush.bf16.msra.mxu2 %v580_v0  ;;  %v587_v3 = vld [vmem:[%s704_s22 + $0x70] sm:$0xff]  ;;  %v586_v5 = vld [vmem:[%s704_s22 + $0x68] sm:$0xff]  ;;  %s205_s30 = scalar_lea.vmem %s736_s3, %s572_s27 }
  0x13   : > { %367 = vmatpush.bf16.msra.mxu1 %v588_v1  ;;  %597 = vmatpush.bf16.msra.mxu3 %v588_v1  ;;  %v577_v6 = vld [vmem:[%s704_s22 + $0x20] sm:$0xff]  ;;  %v576_v8 = vld [vmem:[%s704_s22 + $0x18] sm:$0xff]  ;;  %v575_v10 = vld [vmem:[%s704_s22 + $0x10] sm:$0xff] }
  0x14   : > { %v585_v7 = vld [vmem:[%s704_s22 + $0x60] sm:$0xff]  ;;  %v584_v9 = vld [vmem:[%s704_s22 + $0x58] sm:$0xff]  ;;  %v583_v11 = vld [vmem:[%s704_s22 + $0x50] sm:$0xff] }
  0x15   : > { %v574_v12 = vld [vmem:[%s704_s22 + $0x8] sm:$0xff]  ;;  %v573_v14 = vld [vmem:[%s704_s22] sm:$0xff]  ;;  %v208_v17 = vld [vmem:[%s195_s26 + $0x10] sm:$0xff] }
  0x16   : > { %349 = vmatpush.bf16.msra.mxu0 %v579_v2  ;;  %590 = vmatpush.bf16.msra.mxu2 %v579_v2  ;;  %v582_v13 = vld [vmem:[%s704_s22 + $0x48] sm:$0xff]  ;;  %v581_v15 = vld [vmem:[%s704_s22 + $0x40] sm:$0xff]  ;;  %v212_v19 = vld [vmem:[%s195_s26 + $0x30] sm:$0xff] }
  0x17   : > { %368 = vmatpush.bf16.msra.mxu1 %v587_v3  ;;  %598 = vmatpush.bf16.msra.mxu3 %v587_v3  ;;  %v206_v16 = vld [vmem:[%s195_s26] sm:$0xff]  ;;  %v207_v20 = vld [vmem:[%s195_s26 + $0x8] sm:$0xff]  ;;  %v209_v21 = vld [vmem:[%s195_s26 + $0x18] sm:$0xff] }
  0x18   : > { %v210_v18 = vld [vmem:[%s195_s26 + $0x20] sm:$0xff]  ;;  %v211_v22 = vld [vmem:[%s195_s26 + $0x28] sm:$0xff]  ;;  %v213_v23 = vld [vmem:[%s195_s26 + $0x38] sm:$0xff]  ;;  %v214_v24 = vpack.c.bf16 %v208_v17, %v206_v16  ;;  %v215_v26 = vpack.c.bf16 %v209_v21, %v207_v20 }
  0x19   : > { %v216_v25 = vpack.c.bf16 %v212_v19, %v210_v18  ;;  %v217_v27 = vpack.c.bf16 %v213_v23, %v211_v22 }
  0x1a   : > { %350 = vmatpush.bf16.msra.mxu0 %v578_v4  ;;  %591 = vmatpush.bf16.msra.mxu2 %v578_v4 }
  0x1b   : > { %369 = vmatpush.bf16.msra.mxu1 %v586_v5  ;;  %599 = vmatpush.bf16.msra.mxu3 %v586_v5 }
  0x1e   : > { %351 = vmatpush.bf16.msra.mxu0 %v577_v6  ;;  %592 = vmatpush.bf16.msra.mxu2 %v577_v6 }
  0x1f   : > { %370 = vmatpush.bf16.msra.mxu1 %v585_v7  ;;  %600 = vmatpush.bf16.msra.mxu3 %v585_v7 }
  0x22   : > { %352 = vmatpush.bf16.msra.mxu0 %v576_v8  ;;  %593 = vmatpush.bf16.msra.mxu2 %v576_v8 }
  0x23   : > { %371 = vmatpush.bf16.msra.mxu1 %v584_v9  ;;  %601 = vmatpush.bf16.msra.mxu3 %v584_v9 }
  0x26   : > { %353 = vmatpush.bf16.msra.mxu0 %v575_v10  ;;  %594 = vmatpush.bf16.msra.mxu2 %v575_v10 }
  0x27   : > { %372 = vmatpush.bf16.msra.mxu1 %v583_v11  ;;  %602 = vmatpush.bf16.msra.mxu3 %v583_v11 }
  0x2a   : > { %354 = vmatpush.bf16.msra.mxu0 %v574_v12  ;;  %595 = vmatpush.bf16.msra.mxu2 %v574_v12 }
  0x2b   : > { %373 = vmatpush.bf16.msra.mxu1 %v582_v13  ;;  %603 = vmatpush.bf16.msra.mxu3 %v582_v13 }
  0x2e   : > { %355 = vmatpush.bf16.msra.mxu0 %v573_v14  ;;  %596 = vmatpush.bf16.msra.mxu2 %v573_v14 }
  0x2f   : > { %374 = vmatpush.bf16.msra.mxu1 %v581_v15  ;;  %604 = vmatpush.bf16.msra.mxu3 %v581_v15 }
  0x31   : > { %356 = vmatmul.bf16.vlgmr.msra.gmra.mxu0 %v214_v24  ;;  %361 = vmatmul.bf16.vlgmr.msra.gmra.mxu2 %v216_v25 }
  0x32   : > { %375 = vmatmul.bf16.vlgmr.msra.gmra.mxu1 %v215_v26  ;;  %380 = vmatmul.bf16.vlgmr.msra.gmra.mxu3 %v217_v27 }
  0xae   : > { %v357_v30 = vpop.f32.mrf.mxu0 }
  0xaf   : > { %v358_v31 = vadd.f32 %v357_v30, %v251_v29  ;;  %v376_v32 = vpop.f32.mrf.mxu1 }
  0xb1   : > { %v377_v33 = vadd.f32 %v376_v32, %v358_v31 }
  0xb3   : > { %vm386_vm0 = vcmp.ge.f32.partialorder %v377_v33, 0.0  ;;  %v390_v35 = vmul.f32 0.2, %v377_v33 }
  0xb4   : > { %v362_v37 = vpop.f32.mrf.mxu2 }
  0xb5   : > { %v394_v38 = vsel %vm386_vm0, %v377_v33, %v390_v35  ;;  %v363_v39 = vadd.f32 %v362_v37, %v251_v29  ;;  %v381_v40 = vpop.f32.mrf.mxu3 }
  0xb6   : > { %v399_v41 = vmul.f32 %v398_v34, %v394_v38  ;;  %v359_v42 = vpop.f32.mrf.mxu0 }
  0xb7   : > { %v382_v43 = vadd.f32 %v381_v40, %v363_v39  ;;  %v360_v44 = vadd.f32 %v359_v42, %v251_v29  ;;  %v378_v46 = vpop.f32.mrf.mxu1 }
  0xb8   : > { %v404_v45 = vadd.f32 %v403_v36, %v399_v41 }
  0xb9   : > { %vm388_vm1 = vcmp.ge.f32.partialorder %v382_v43, 0.0  ;;  %v392_v47 = vmul.f32 0.2, %v382_v43  ;;  %v379_v48 = vadd.f32 %v378_v46, %v360_v44 }
  0xba   : > { %408 = vst [vmem:[%s205_s30] sm:$0xff] %v404_v45 }
  0xbb   : > { %v396_v49 = vsel %vm388_vm1, %v382_v43, %v392_v47  ;;  %vm387_vm2 = vcmp.ge.f32.partialorder %v379_v48, 0.0  ;;  %v391_v50 = vmul.f32 0.2, %v379_v48 }
  0xbc   : > { %v401_v51 = vmul.f32 %v398_v34, %v396_v49  ;;  %v364_v52 = vpop.f32.mrf.mxu2 }
  0xbd   : > { %v395_v53 = vsel %vm387_vm2, %v379_v48, %v391_v50  ;;  %v365_v54 = vadd.f32 %v364_v52, %v251_v29  ;;  %v383_v57 = vpop.f32.mrf.mxu3 }
  0xbe   : > { %v406_v55 = vadd.f32 %v403_v36, %v401_v51  ;;  %v400_v56 = vmul.f32 %v398_v34, %v395_v53 }
  0xbf   : > { %v384_v58 = vadd.f32 %v383_v57, %v365_v54 }
  0xc0   : > { %410 = vst [vmem:[%s205_s30 + $0x10] sm:$0xff] %v406_v55  ;;  %v405_v59 = vadd.f32 %v403_v36, %v400_v56 }
  0xc1   : > { %vm389_vm3 = vcmp.ge.f32.partialorder %v384_v58, 0.0  ;;  %v393_v60 = vmul.f32 0.2, %v384_v58 }
  0xc2   : > { %409 = vst [vmem:[%s205_s30 + $0x8] sm:$0xff] %v405_v59 }
  0xc3   : > { %v397_v61 = vsel %vm389_vm3, %v384_v58, %v393_v60 }
  0xc4   : > { %v402_v62 = vmul.f32 %v398_v34, %v397_v61 }
  0xc6   : > { %v407_v63 = vadd.f32 %v403_v36, %v402_v62 }
  0xc8   : > { %411 = vst [vmem:[%s205_s30 + $0x18] sm:$0xff] %v407_v63 }
  0xc9 PF: > { %s14_s12 = sadd.s32 1, %s664_s12  }
  0xca   : > { %p11_p7 = scmp.ge.s32.totalorder %s14_s12, 4  }
  0xcc   :  { %13 = sbr.rel (!%p11_p7) target bundleno = 1 (0x1), region = 70 }
  0xd1   :  { %433 = vsyncpa [#allocation3], 1 }
  0xd2   :  { %435 = vsyncpa [#allocation3 + $0x1], 1 }

// kernel: model_forward.30
= control target key start
LH: loop header
LB: loop body
LE: loop exit
PB: predicated region body
PF: predicated region fallthrough
CT: control target
= control target key end

     0   :  { %s827_s12 = smov 0   ;;  %s829_s13 = smov 0   ;;  %s1065_s0 = inlined_call_operand.vmem [shape: f32[64,128], index: 0, kind: input, shape index: {}]   ;;  %s1066_s1 = inlined_call_operand.vmem [shape: bf16[128,512], index: 1, kind: input, shape index: {}]   ;;  %s1067_s2 = inlined_call_operand.vmem [shape: f32[3,512], index: 2, kind: input, shape index: {}]   ;;  %s1068_s3 = inlined_call_operand.vmem [shape: f32[64,512], index: 3, kind: output, shape index: {}]  }
   0x1   :  { %s831_s14 = smov 0  }
   0x2 LB: > { %s843_s15 = sadd.s32 4294967295, %s805_s14   ;;  %s846_s16 = sadd.s32 1, %s805_s14   ;;  %s805_s14 = sphi %s831_s14, %s1072_s14   ;;  %s801_s13 = sphi %s829_s13, %s1071_s13   ;;  %s797_s12 = sphi %s827_s12, %s1070_s12  }
   0x3   : > { %s38_s17 = ssub.s32 %s805_s14, %s846_s16  ;;  %s41_s18 = sadd.s32 1, %s801_s13 }
   0x4   : > { %p39_p0 = scmp.eq.s32.totalorder %s38_s17, 0  ;;  %p48_p1 = scmp.ne.s32.totalorder %s801_s13, %s797_s12 }
   0x5   : > { %p49_p2 = scmp.eq.s32.totalorder %s805_s14, 0  ;;  %p104_p3 = scmp.eq.s32.totalorder %s843_s15, 1 }
   0x6   : > { %s856_s19 = scalar_select %p39_p0, %s801_s13, %s41_s18  }
   0x7   : > { %p50_p4 = por %p49_p2, %p48_p1  ;;  %p858_p5 = por %p104_p3, %p48_p1 }
   0x8   : > { %p647_p6 = scmp.ge.s32.totalorder %s805_s14, 2 }
   0xa   : > { %129 = sbr.rel (%p647_p6) target bundleno = 35 (0x23), region = 20 }
   0xf   : > { %132 = sbr.rel (!%p50_p4) target bundleno = 35 (0x23), region = 24  ;;  %s134_s21 = sand.u32 (%p50_p4), 1, %s801_s13  }
  0x10   : > { %s725_s22 = sshll.u32 (%p50_p4), %s805_s14, 3  ;;  %s648_s23 = sshll.u32 (%p50_p4), %s134_s21, 7 }
  0x11   : > { %s868_s26 = scalar_lea.vmem (%p50_p4), %s1066_s1, %s725_s22  ;;  %s136_s27 = scalar_lea.vmem (%p50_p4), [#allocation2], %s648_s23 }
  0x12   : > { %v198_v0 = vld [vmem:[%s868_s26] sm:$0xff] (%p50_p4)  ;;  %v200_v1 = vld [vmem:[%s868_s26 + $0x10] sm:$0xff] (%p50_p4) }
  0x13   : > { %v202_v2 = vld [vmem:[%s868_s26 + $0x20] sm:$0xff] (%p50_p4)  ;;  %199 = vst [vmem:[%s136_s27] sm:$0xff] (%p50_p4), %v198_v0  ;;  %v204_v3 = vld [vmem:[%s868_s26 + $0x30] sm:$0xff] (%p50_p4) }
  0x14   : > { %201 = vst [vmem:[%s136_s27 + $0x8] sm:$0xff] %v200_v1  ;;  %v206_v4 = vld [vmem:[%s868_s26 + $0x40] sm:$0xff]  ;;  %v208_v5 = vld [vmem:[%s868_s26 + $0x50] sm:$0xff] }
  0x15   : > { %203 = vst [vmem:[%s136_s27 + $0x10] sm:$0xff] %v202_v2  ;;  %v210_v6 = vld [vmem:[%s868_s26 + $0x60] sm:$0xff]  ;;  %v212_v7 = vld [vmem:[%s868_s26 + $0x70] sm:$0xff] }
  0x16   : > { %205 = vst [vmem:[%s136_s27 + $0x18] sm:$0xff] %v204_v3  ;;  %v214_v8 = vld [vmem:[%s868_s26 + $0x80] sm:$0xff]  ;;  %v216_v9 = vld [vmem:[%s868_s26 + $0x90] sm:$0xff] }
  0x17   : > { %207 = vst [vmem:[%s136_s27 + $0x20] sm:$0xff] %v206_v4  ;;  %v218_v10 = vld [vmem:[%s868_s26 + $0xa0] sm:$0xff]  ;;  %v220_v11 = vld [vmem:[%s868_s26 + $0xb0] sm:$0xff] }
  0x18   : > { %209 = vst [vmem:[%s136_s27 + $0x28] sm:$0xff] %v208_v5  ;;  %v222_v12 = vld [vmem:[%s868_s26 + $0xc0] sm:$0xff]  ;;  %v224_v13 = vld [vmem:[%s868_s26 + $0xd0] sm:$0xff] }
  0x19   : > { %211 = vst [vmem:[%s136_s27 + $0x30] sm:$0xff] %v210_v6  ;;  %v226_v14 = vld [vmem:[%s868_s26 + $0xe0] sm:$0xff]  ;;  %v228_v15 = vld [vmem:[%s868_s26 + $0xf0] sm:$0xff] }
  0x1a   : > { %213 = vst [vmem:[%s136_s27 + $0x38] sm:$0xff] %v212_v7 }
  0x1b   : > { %215 = vst [vmem:[%s136_s27 + $0x40] sm:$0xff] %v214_v8 }
  0x1c   : > { %217 = vst [vmem:[%s136_s27 + $0x48] sm:$0xff] %v216_v9 }
  0x1d   : > { %219 = vst [vmem:[%s136_s27 + $0x50] sm:$0xff] %v218_v10 }
  0x1e   : > { %221 = vst [vmem:[%s136_s27 + $0x58] sm:$0xff] %v220_v11 }
  0x1f   : > { %223 = vst [vmem:[%s136_s27 + $0x60] sm:$0xff] %v222_v12 }
  0x20   : > { %225 = vst [vmem:[%s136_s27 + $0x68] sm:$0xff] %v224_v13 }
  0x21   : > { %227 = vst [vmem:[%s136_s27 + $0x70] sm:$0xff] %v226_v14 }
  0x22   : > { %229 = vst [vmem:[%s136_s27 + $0x78] sm:$0xff] %v228_v15 }
  0x23 PF: > { %p651_p7 = scmp.ge.s32.totalorder %s805_s14, 1  ;;  %p243_p8 = scmp.lt.s32.totalorder %s805_s14, 3 }
  0x25   : > { %p244_p9 = pnand %p651_p7, %p243_p8 }
  0x26   : > { %s250_s28 = sand.u32 (!%p244_p9), 1, %s797_s12   ;;  %s654_s25 = sshll.u32 (!%p244_p9), %s843_s15, 1 }
  0x27   : > { %247 = sbr.rel (%p244_p9) target bundleno = 252 (0xfc), region = 66  ;;  %s889_s29 = sshll.u32 (!%p244_p9), %s250_s28, 7 }
  0x28   : > { %s892_s30 = scalar_lea.vmem (!%p244_p9), [#allocation2], %s889_s29  ;;  %p279_p10 = scmp.lt.s32.totalorder (!%p244_p9), %s654_s25, 3 }
  0x29   : > { %s973_s4 = scalar_lea.vmem (!%p244_p9), [#allocation3], %s889_s29 }
  0x2c   : > { %v714_v16 = vld [vmem:[%s892_s30 + $0x70] sm:$0xf]  ;;  %v741_v17 = vld [vmem:[%s892_s30 + $0x74] sm:$0xf0]  ;;  %v740_v18 = vld [vmem:[%s892_s30 + $0x74] sm:$0xf] }
  0x2d   : > { %v715_v19 = vor.u32 %v741_v17, %v714_v16  ;;  %v716_v20 = vld [vmem:[%s892_s30 + $0x78] sm:$0xf0]  ;;  %v706_v21 = vld [vmem:[%s892_s30 + $0x60] sm:$0xf]  ;;  %v739_v22 = vld [vmem:[%s892_s30 + $0x64] sm:$0xf0] }
  0x2e   : > { %v719_v23 = vor.u32 %v740_v18, %v716_v20  ;;  %v738_v24 = vld [vmem:[%s892_s30 + $0x64] sm:$0xf]  ;;  %v708_v25 = vld [vmem:[%s892_s30 + $0x68] sm:$0xf0]  ;;  %v707_v26 = vor.u32 %v739_v22, %v706_v21  ;;  %v698_v28 = vld [vmem:[%s892_s30 + $0x50] sm:$0xf] }
  0x2f   : > { %401 = vmatpush.bf16.msra.mxu0 %v715_v19  ;;  %743 = vmatpush.bf16.msra.mxu2 %v715_v19  ;;  %v711_v27 = vor.u32 %v738_v24, %v708_v25  ;;  %v737_v29 = vld [vmem:[%s892_s30 + $0x54] sm:$0xf0]  ;;  %v736_v30 = vld [vmem:[%s892_s30 + $0x54] sm:$0xf]  ;;  %v700_v31 = vld [vmem:[%s892_s30 + $0x58] sm:$0xf0] }
  0x30   : > { %430 = vmatpush.bf16.msra.mxu1 %v719_v23  ;;  %751 = vmatpush.bf16.msra.mxu3 %v719_v23  ;;  %v699_v32 = vor.u32 %v737_v29, %v698_v28  ;;  %v703_v33 = vor.u32 %v736_v30, %v700_v31  ;;  %v690_v34 = vld [vmem:[%s892_s30 + $0x40] sm:$0xf]  ;;  %v735_v35 = vld [vmem:[%s892_s30 + $0x44] sm:$0xf0]  ;;  %v734_v36 = vld [vmem:[%s892_s30 + $0x44] sm:$0xf] }
  0x31   : > { %v692_v37 = vld [vmem:[%s892_s30 + $0x48] sm:$0xf0]  ;;  %v691_v38 = vor.u32 %v735_v35, %v690_v34  ;;  %v682_v40 = vld [vmem:[%s892_s30 + $0x30] sm:$0xf]  ;;  %v733_v41 = vld [vmem:[%s892_s30 + $0x34] sm:$0xf0] }
  0x32   : > { %v695_v39 = vor.u32 %v734_v36, %v692_v37  ;;  %v732_v42 = vld [vmem:[%s892_s30 + $0x34] sm:$0xf]  ;;  %v684_v43 = vld [vmem:[%s892_s30 + $0x38] sm:$0xf0]  ;;  %v683_v44 = vor.u32 %v733_v41, %v682_v40  ;;  %v674_v46 = vld [vmem:[%s892_s30 + $0x20] sm:$0xf] }
  0x33   : > { %402 = vmatpush.bf16.msra.mxu0 %v707_v26  ;;  %744 = vmatpush.bf16.msra.mxu2 %v707_v26  ;;  %v687_v45 = vor.u32 %v732_v42, %v684_v43  ;;  %v731_v47 = vld [vmem:[%s892_s30 + $0x24] sm:$0xf0]  ;;  %v730_v48 = vld [vmem:[%s892_s30 + $0x24] sm:$0xf]  ;;  %v676_v49 = vld [vmem:[%s892_s30 + $0x28] sm:$0xf0] }
  0x34   : > { %431 = vmatpush.bf16.msra.mxu1 %v711_v27  ;;  %752 = vmatpush.bf16.msra.mxu3 %v711_v27  ;;  %v675_v50 = vor.u32 %v731_v47, %v674_v46  ;;  %v679_v51 = vor.u32 %v730_v48, %v676_v49  ;;  %v666_v52 = vld [vmem:[%s892_s30 + $0x10] sm:$0xf]  ;;  %v729_v53 = vld [vmem:[%s892_s30 + $0x14] sm:$0xf0]  ;;  %v728_v54 = vld [vmem:[%s892_s30 + $0x14] sm:$0xf] }
  0x35   : > { %v668_v55 = vld [vmem:[%s892_s30 + $0x18] sm:$0xf0]  ;;  %v667_v56 = vor.u32 %v729_v53, %v666_v52  ;;  %v658_v58 = vld [vmem:[%s892_s30] sm:$0xf]  ;;  %v727_v59 = vld [vmem:[%s892_s30 + $0x4] sm:$0xf0] }
  0x36   : > { %v671_v57 = vor.u32 %v728_v54, %v668_v55  ;;  %v726_v60 = vld [vmem:[%s892_s30 + $0x4] sm:$0xf]  ;;  %v660_v61 = vld [vmem:[%s892_s30 + $0x8] sm:$0xf0]  ;;  %v659_v63 = vor.u32 %v727_v59, %v658_v58  ;;  %v287_v6 = vld [vmem:[%s1065_s0 + $0x10] sm:$0xff]  ;;  %s1074_s25 = smov (!%p279_p10, %s654_s25), 3 }
  0x37   : > { %403 = vmatpush.bf16.msra.mxu0 %v699_v32  ;;  %745 = vmatpush.bf16.msra.mxu2 %v699_v32  ;;  %v285_v62 = vld [vmem:[%s1065_s0] sm:$0xff]  ;;  %v286_v0 = vld [vmem:[%s1065_s0 + $0x8] sm:$0xff]  ;;  %v663_v3 = vor.u32 %v726_v60, %v660_v61  ;;  %v288_v7 = vld [vmem:[%s1065_s0 + $0x18] sm:$0xff]  ;;  %s655_s26 = sshll.u32 %s1074_s25, 2  ;;  %s742_s29 = sshll.u32 (%p858_p5), %s843_s15, 4 }
  0x38   : > { %432 = vmatpush.bf16.msra.mxu1 %v703_v33  ;;  %753 = vmatpush.bf16.msra.mxu3 %v703_v33  ;;  %v289_v1 = vld [vmem:[%s1065_s0 + $0x20] sm:$0xff]  ;;  %v290_v2 = vld [vmem:[%s1065_s0 + $0x28] sm:$0xff]  ;;  %v293_v4 = vpack.c.bf16 %v286_v0, %v285_v62  ;;  %v291_v8 = vld [vmem:[%s1065_s0 + $0x30] sm:$0xff]  ;;  %v294_v10 = vpack.c.bf16 %v288_v7, %v287_v6  ;;  %s282_s30 = scalar_lea.vmem %s1067_s2, %s655_s26  ;;  %s528_s7 = scalar_lea.vmem (%p858_p5), %s1068_s3, %s742_s29 }
  0x39   : > { %v295_v5 = vpack.c.bf16 %v290_v2, %v289_v1  ;;  %v292_v9 = vld [vmem:[%s1065_s0 + $0x38] sm:$0xff]  ;;  %v313_v12 = vld [vmem:[%s282_s30] sm:$0x77] }
  0x3a   : > { %v296_v11 = vpack.c.bf16 %v292_v9, %v291_v8  ;;  %v315_v13 = vperm.slane %v313_v12, 0  ;;  %v316_v14 = vperm.slane %v313_v12, 4  ;;  %v459_v15 = vperm.slane %v313_v12, 1 }
  0x3b   : > { %404 = vmatpush.bf16.msra.mxu0 %v691_v38  ;;  %746 = vmatpush.bf16.msra.mxu2 %v691_v38  ;;  %v460_v16 = vperm.slane %v313_v12, 5  ;;  %v481_v18 = vperm.slane %v313_v12, 2  ;;  %v482_v20 = vperm.slane %v313_v12, 6 }
  0x3c   : > { %433 = vmatpush.bf16.msra.mxu1 %v695_v39  ;;  %754 = vmatpush.bf16.msra.mxu3 %v695_v39  ;;  %v954_v17 = vperm.slane %v315_v13, 0  ;;  %v956_v19 = vperm.slane %v316_v14, 0  ;;  %v958_v21 = vperm.slane %v459_v15, 1 }
  0x3d   : > { %v960_v23 = vperm.slane %v460_v16, 1  ;;  %v963_v25 = vperm.slane %v481_v18, 2  ;;  %v966_v28 = vperm.slane %v482_v20, 2 }
  0x3f   : > { %405 = vmatpush.bf16.msra.mxu0 %v683_v44  ;;  %747 = vmatpush.bf16.msra.mxu2 %v683_v44 }
  0x40   : > { %434 = vmatpush.bf16.msra.mxu1 %v687_v45  ;;  %755 = vmatpush.bf16.msra.mxu3 %v687_v45 }
  0x43   : > { %406 = vmatpush.bf16.msra.mxu0 %v675_v50  ;;  %748 = vmatpush.bf16.msra.mxu2 %v675_v50 }
  0x44   : > { %435 = vmatpush.bf16.msra.mxu1 %v679_v51  ;;  %756 = vmatpush.bf16.msra.mxu3 %v679_v51 }
  0x47   : > { %407 = vmatpush.bf16.msra.mxu0 %v667_v56  ;;  %749 = vmatpush.bf16.msra.mxu2 %v667_v56 }
  0x48   : > { %436 = vmatpush.bf16.msra.mxu1 %v671_v57  ;;  %757 = vmatpush.bf16.msra.mxu3 %v671_v57 }
  0x4b   : > { %408 = vmatpush.bf16.msra.mxu0 %v659_v63  ;;  %750 = vmatpush.bf16.msra.mxu2 %v659_v63 }
  0x4c   : > { %437 = vmatpush.bf16.msra.mxu1 %v663_v3  ;;  %758 = vmatpush.bf16.msra.mxu3 %v663_v3 }
  0x4e   : > { %409 = vmatmul.bf16.vlgmr.msra.gmra.mxu0 %v293_v4  ;;  %419 = vmatmul.bf16.vlgmr.msra.gmra.mxu2 %v295_v5 }
  0x4f   : > { %438 = vmatmul.bf16.vlgmr.msra.gmra.mxu1 %v293_v4  ;;  %448 = vmatmul.bf16.vlgmr.msra.gmra.mxu3 %v295_v5 }
  0x5e   : > { %414 = vmatmul.bf16.gmra.mxu0 %v294_v10  ;;  %424 = vmatmul.bf16.gmra.mxu2 %v296_v11 }
  0x5f   : > { %443 = vmatmul.bf16.gmra.mxu1 %v294_v10  ;;  %453 = vmatmul.bf16.gmra.mxu3 %v296_v11 }
  0xcb   : > { %v410_v22 = vpop.f32.mrf.mxu0 }
  0xcc   : > { %v411_v24 = vadd.f32 %v410_v22, %v954_v17  ;;  %v439_v26 = vpop.f32.mrf.mxu1 }
  0xcd   : > { %v440_v27 = vadd.f32 %v439_v26, %v956_v19 }
  0xce   : > { %v465_v29 = vmul.f32 %v958_v21, %v411_v24 }
  0xcf   : > { %v466_v30 = vmul.f32 %v960_v23, %v440_v27 }
  0xd0   : > { %v487_v31 = vadd.f32 %v963_v25, %v465_v29 }
  0xd1   : > { %v488_v32 = vadd.f32 %v966_v28, %v466_v30  ;;  %v420_v33 = vpop.f32.mrf.mxu2 }
  0xd2   : > { %503 = vst [vmem:[%s973_s4] sm:$0xff] %v487_v31  ;;  %v421_v34 = vadd.f32 %v420_v33, %v954_v17  ;;  %v449_v35 = vpop.f32.mrf.mxu3 }
  0xd3   : > { %504 = vst [vmem:[%s973_s4 + $0x8] sm:$0xff] %v488_v32  ;;  %v450_v36 = vadd.f32 %v449_v35, %v956_v19  ;;  %v412_v37 = vpop.f32.mrf.mxu0 }
  0xd4   : > { %v473_v38 = vmul.f32 %v958_v21, %v421_v34  ;;  %v413_v39 = vadd.f32 %v412_v37, %v954_v17  ;;  %v441_v40 = vpop.f32.mrf.mxu1 }
  0xd5   : > { %v474_v41 = vmul.f32 %v960_v23, %v450_v36  ;;  %v442_v42 = vadd.f32 %v441_v40, %v956_v19 }
  0xd6   : > { %v495_v43 = vadd.f32 %v963_v25, %v473_v38  ;;  %v467_v44 = vmul.f32 %v958_v21, %v413_v39 }
  0xd7   : > { %v496_v45 = vadd.f32 %v966_v28, %v474_v41  ;;  %v468_v46 = vmul.f32 %v960_v23, %v442_v42 }
  0xd8   : > { %511 = vst [vmem:[%s973_s4 + $0x40] sm:$0xff] %v495_v43  ;;  %v489_v47 = vadd.f32 %v963_v25, %v467_v44 }
  0xd9   : > { %512 = vst [vmem:[%s973_s4 + $0x48] sm:$0xff] %v496_v45  ;;  %v490_v48 = vadd.f32 %v966_v28, %v468_v46  ;;  %v422_v49 = vpop.f32.mrf.mxu2 }
  0xda   : > { %505 = vst [vmem:[%s973_s4 + $0x10] sm:$0xff] %v489_v47  ;;  %v423_v50 = vadd.f32 %v422_v49, %v954_v17  ;;  %v451_v51 = vpop.f32.mrf.mxu3 }
  0xdb   : > { %506 = vst [vmem:[%s973_s4 + $0x18] sm:$0xff] %v490_v48  ;;  %v452_v52 = vadd.f32 %v451_v51, %v956_v19  ;;  %v415_v53 = vpop.f32.mrf.mxu0 }
  0xdc   : > { %v475_v54 = vmul.f32 %v958_v21, %v423_v50  ;;  %v416_v55 = vadd.f32 %v415_v53, %v954_v17  ;;  %v444_v56 = vpop.f32.mrf.mxu1 }
  0xdd   : > { %v476_v57 = vmul.f32 %v960_v23, %v452_v52  ;;  %v445_v58 = vadd.f32 %v444_v56, %v956_v19 }
  0xde   : > { %v497_v59 = vadd.f32 %v963_v25, %v475_v54  ;;  %v469_v60 = vmul.f32 %v958_v21, %v416_v55 }
  0xdf   : > { %v498_v61 = vadd.f32 %v966_v28, %v476_v57  ;;  %v470_v62 = vmul.f32 %v960_v23, %v445_v58  ;;  %v557_v33 = vld [vmem:[%s973_s4 + $0x40] sm:$0xff] (%p858_p5) }
  0xe0   : > { %513 = vst [vmem:[%s973_s4 + $0x50] sm:$0xff] %v497_v59  ;;  %v491_v63 = vadd.f32 %v963_v25, %v469_v60  ;;  %v559_v34 = vld [vmem:[%s973_s4 + $0x48] sm:$0xff] (%p858_p5) }
  0xe1   : > { %514 = vst [vmem:[%s973_s4 + $0x58] sm:$0xff] %v498_v61  ;;  %v492_v0 = vadd.f32 %v966_v28, %v470_v62  ;;  %v425_v1 = vpop.f32.mrf.mxu2 }
  0xe2   : > { %507 = vst [vmem:[%s973_s4 + $0x20] sm:$0xff] %v491_v63  ;;  %v426_v2 = vadd.f32 %v425_v1, %v954_v17  ;;  %v454_v3 = vpop.f32.mrf.mxu3 }
  0xe3   : > { %508 = vst [vmem:[%s973_s4 + $0x28] sm:$0xff] %v492_v0  ;;  %v455_v4 = vadd.f32 %v454_v3, %v956_v19  ;;  %v417_v5 = vpop.f32.mrf.mxu0 }
  0xe4   : > { %v477_v6 = vmul.f32 %v958_v21, %v426_v2  ;;  %v418_v7 = vadd.f32 %v417_v5, %v954_v17  ;;  %v446_v8 = vpop.f32.mrf.mxu1  ;;  %558 = vst [vmem:[%s528_s7 + $0x80] sm:$0xff] (%p858_p5), %v557_v33 }
  0xe5   : > { %v478_v9 = vmul.f32 %v960_v23, %v455_v4  ;;  %v447_v10 = vadd.f32 %v446_v8, %v956_v19  ;;  %560 = vst [vmem:[%s528_s7 + $0x88] sm:$0xff] (%p858_p5), %v559_v34 }
  0xe6   : > { %v499_v11 = vadd.f32 %v963_v25, %v477_v6  ;;  %v471_v12 = vmul.f32 %v958_v21, %v418_v7 }
  0xe7   : > { %v500_v13 = vadd.f32 %v966_v28, %v478_v9  ;;  %v472_v14 = vmul.f32 %v960_v23, %v447_v10  ;;  %v561_v35 = vld [vmem:[%s973_s4 + $0x50] sm:$0xff] (%p858_p5) }
  0xe8   : > { %515 = vst [vmem:[%s973_s4 + $0x60] sm:$0xff] %v499_v11  ;;  %v493_v15 = vadd.f32 %v963_v25, %v471_v12  ;;  %v563_v36 = vld [vmem:[%s973_s4 + $0x58] sm:$0xff] (%p858_p5) }
  0xe9   : > { %516 = vst [vmem:[%s973_s4 + $0x68] sm:$0xff] %v500_v13  ;;  %v494_v16 = vadd.f32 %v966_v28, %v472_v14  ;;  %v427_v18 = vpop.f32.mrf.mxu2 }
  0xea   : > { %509 = vst [vmem:[%s973_s4 + $0x30] sm:$0xff] %v493_v15  ;;  %v428_v20 = vadd.f32 %v427_v18, %v954_v17  ;;  %v456_v22 = vpop.f32.mrf.mxu3  ;;  %v541_v17 = vld [vmem:[%s973_s4] sm:$0xff] (%p858_p5) }
  0xeb   : > { %510 = vst [vmem:[%s973_s4 + $0x38] sm:$0xff] %v494_v16  ;;  %v457_v24 = vadd.f32 %v456_v22, %v956_v19  ;;  %v543_v19 = vld [vmem:[%s973_s4 + $0x8] sm:$0xff] (%p858_p5) }
  0xec   : > { %v479_v26 = vmul.f32 %v958_v21, %v428_v20  ;;  %v545_v21 = vld [vmem:[%s973_s4 + $0x10] sm:$0xff] (%p858_p5)  ;;  %542 = vst [vmem:[%s528_s7] sm:$0xff] (%p858_p5), %v541_v17 }
  0xed   : > { %v480_v27 = vmul.f32 %v960_v23, %v457_v24  ;;  %525 = sbr.rel (!%p858_p5) target bundleno = 252 (0xfc), region = 74  ;;  %v547_v23 = vld [vmem:[%s973_s4 + $0x18] sm:$0xff] (%p858_p5)  ;;  %544 = vst [vmem:[%s528_s7 + $0x8] sm:$0xff] (%p858_p5), %v543_v19 }
  0xee   : > { %v501_v29 = vadd.f32 %v963_v25, %v479_v26  ;;  %v549_v25 = vld [vmem:[%s973_s4 + $0x20] sm:$0xff] (%p858_p5)  ;;  %546 = vst [vmem:[%s528_s7 + $0x20] sm:$0xff] (%p858_p5), %v545_v21 }
  0xef   : > { %v502_v30 = vadd.f32 %v966_v28, %v480_v27  ;;  %v551_v28 = vld [vmem:[%s973_s4 + $0x28] sm:$0xff] (%p858_p5)  ;;  %548 = vst [vmem:[%s528_s7 + $0x28] sm:$0xff] (%p858_p5), %v547_v23  ;;  %v565_v37 = vld [vmem:[%s973_s4 + $0x60] sm:$0xff] (%p858_p5) }
  0xf0   : > { %517 = vst [vmem:[%s973_s4 + $0x70] sm:$0xff] %v501_v29  ;;  %v567_v38 = vld [vmem:[%s973_s4 + $0x68] sm:$0xff] (%p858_p5) }
  0xf1   : > { %518 = vst [vmem:[%s973_s4 + $0x78] sm:$0xff] %v502_v30  ;;  %v553_v31 = vld [vmem:[%s973_s4 + $0x30] sm:$0xff] (%p858_p5) }
  0xf2   : > { %550 = vst [vmem:[%s528_s7 + $0x40] sm:$0xff] %v549_v25  ;;  %v555_v32 = vld [vmem:[%s973_s4 + $0x38] sm:$0xff] }
  0xf3   : > { %552 = vst [vmem:[%s528_s7 + $0x48] sm:$0xff] %v551_v28 }
  0xf4   : > { %554 = vst [vmem:[%s528_s7 + $0x60] sm:$0xff] %v553_v31 }
  0xf5   : > { %556 = vst [vmem:[%s528_s7 + $0x68] sm:$0xff] %v555_v32 }
  0xf6   : > { %562 = vst [vmem:[%s528_s7 + $0xa0] sm:$0xff] %v561_v35 }
  0xf7   : > { %564 = vst [vmem:[%s528_s7 + $0xa8] sm:$0xff] %v563_v36  ;;  %v569_v39 = vld [vmem:[%s973_s4 + $0x70] sm:$0xff] }
  0xf8   : > { %566 = vst [vmem:[%s528_s7 + $0xc0] sm:$0xff] %v565_v37  ;;  %v571_v40 = vld [vmem:[%s973_s4 + $0x78] sm:$0xff] }
  0xf9   : > { %568 = vst [vmem:[%s528_s7 + $0xc8] sm:$0xff] %v567_v38 }
  0xfa   : > { %570 = vst [vmem:[%s528_s7 + $0xe0] sm:$0xff] %v569_v39 }
  0xfb   : > { %572 = vst [vmem:[%s528_s7 + $0xe8] sm:$0xff] %v571_v40 }
  0xfc PF: > { %p10_p11 = scmp.ge.s32.totalorder %s846_s16, 4   ;;  %s1070_s12 = smov %s801_s13 }
  0xfd   : > { %s1071_s13 = smov %s856_s19  ;;  %s1072_s14 = smov %s846_s16 }
  0xfe   :  { %12 = sbr.rel (!%p10_p11) target bundleno = 2 (0x2), region = 131 }

// kernel: custom-call
= control target key start
LH: loop header
LB: loop body
LE: loop exit
PB: predicated region body
PF: predicated region fallthrough
CT: control target
= control target key end

     0   :  { %v1813_v0 = vmov 2147483648   ;;  %v1814_v1 = vmov 2147483647   ;;  %s2168_s0 = inlined_call_operand.vmem [shape: f32[2,16384], index: 0, kind: input, shape index: {}]   ;;  %s2169_s1 = inlined_call_operand.vmem [shape: f32[2,4], index: 1, kind: output, shape index: {0}]   ;;  %s2170_s2 = inlined_call_operand.vmem [shape: s32[2,4], index: 2, kind: output, shape index: {1}]  }
   0x1   :  { %6 = vst [vmem:[#allocation11] sm:$0xff] %v1813_v0 }
   0x2   :  { %7 = vst [vmem:[#allocation13] sm:$0xff] %v1814_v1 }
   0x3   :  { %v24_v2 = vld [vmem:[%s2168_s0] sm:$0xff]  ;;  %v26_v3 = vld [vmem:[%s2168_s0 + $0x8] sm:$0xff]  ;;  %v93_v4 = vlaneseq  ;;  %v28_v5 = vld [vmem:[%s2168_s0 + $0x10] sm:$0xff] }
   0x4   :  { %v30_v6 = vld [vmem:[%s2168_s0 + $0x18] sm:$0xff]  ;;  %v104_v8 = vsub.s32 2147483647, %v24_v2  ;;  %v32_v9 = vld [vmem:[%s2168_s0 + $0x20] sm:$0xff]  ;;  %vm103_vm0 = vcmp.lt.s32.totalorder %v24_v2, 0  ;;  %v34_v12 = vld [vmem:[%s2168_s0 + $0x28] sm:$0xff] }
   0x5   :  { %v1850_v7 = vshrl.u32 %v93_v4, 7  ;;  %v94_v10 = vand.u32 127, %v93_v4  ;;  %v113_v11 = vsub.s32 2147483647, %v26_v3  ;;  %vm112_vm1 = vcmp.lt.s32.totalorder %v26_v3, 0  ;;  %v36_v15 = vld [vmem:[%s2168_s0 + $0x30] sm:$0xff] }
   0x6   :  { %vm121_vm2 = vcmp.lt.s32.totalorder %v28_v5, 0  ;;  %v122_v14 = vsub.s32 2147483647, %v28_v5  ;;  %vm130_vm3 = vcmp.lt.s32.totalorder %v30_v6, 0  ;;  %v131_v16 = vsub.s32 2147483647, %v30_v6 }
   0x7   :  { %v97_v13 = vshrl.u32 %v1850_v7, 1  ;;  %v38_v17 = vld [vmem:[%s2168_s0 + $0x38] sm:$0xff]  ;;  %v40_v18 = vld [vmem:[%s2168_s0 + $0x40] sm:$0xff]  ;;  %v105_v20 = vsel %vm103_vm0, %v104_v8, %v24_v2  ;;  %vm139_vm4 = vcmp.lt.s32.totalorder %v32_v9, 0  ;;  %v114_v21 = vsel %vm112_vm1, %v113_v11, %v26_v3  ;;  %v42_v37 = vld [vmem:[%s2168_s0 + $0x48] sm:$0xff] }
   0x8   :  { %v123_v22 = vsel %vm121_vm2, %v122_v14, %v28_v5  ;;  %v140_v23 = vsub.s32 2147483647, %v32_v9  ;;  %vm148_vm5 = vcmp.lt.s32.totalorder %v34_v12, 0  ;;  %v132_v25 = vsel %vm130_vm3, %v131_v16, %v30_v6  ;;  %v44_v41 = vld [vmem:[%s2168_s0 + $0x50] sm:$0xff]  ;;  %v46_v49 = vld [vmem:[%s2168_s0 + $0x58] sm:$0xff]  ;;  %v48_v52 = vld [vmem:[%s2168_s0 + $0x60] sm:$0xff] }
   0x9   :  { %v99_v19 = vmul.u32 128, %v97_v13  ;;  %v149_v26 = vsub.s32 2147483647, %v34_v12  ;;  %vm157_vm6 = vcmp.lt.s32.totalorder %v36_v15, 0  ;;  %v158_v28 = vsub.s32 2147483647, %v36_v15 }
   0xa   :  { %v141_v27 = vsel %vm139_vm4, %v140_v23, %v32_v9  ;;  %vm166_vm7 = vcmp.lt.s32.totalorder %v38_v17, 0  ;;  %vm175_vm8 = vcmp.lt.s32.totalorder %v40_v18, 0  ;;  %v167_v44 = vsub.s32 2147483647, %v38_v17  ;;  %v50_v55 = vld [vmem:[%s2168_s0 + $0x68] sm:$0xff]  ;;  %v52_v0 = vld [vmem:[%s2168_s0 + $0x70] sm:$0xff] }
   0xb   :  { %v1869_v24 = vadd.s32 %v99_v19, %v94_v10  ;;  %v150_v34 = vsel %vm148_vm5, %v149_v26, %v34_v12  ;;  %v159_v36 = vsel %vm157_vm6, %v158_v28, %v36_v15  ;;  %v176_v47 = vsub.s32 2147483647, %v40_v18  ;;  %v54_v5 = vld [vmem:[%s2168_s0 + $0x78] sm:$0xff]  ;;  %v56_v10 = vld [vmem:[%s2168_s0 + $0x80] sm:$0xff]  ;;  %v58_v16 = vld [vmem:[%s2168_s0 + $0x88] sm:$0xff] }
   0xc   :  { %v168_v50 = vsel %vm166_vm7, %v167_v44, %v38_v17  ;;  %vm184_vm0 = vcmp.lt.s32.totalorder %v42_v37, 0  ;;  %v185_v51 = vsub.s32 2147483647, %v42_v37  ;;  %vm193_vm3 = vcmp.lt.s32.totalorder %v44_v41, 0  ;;  %v68_v44 = vld [vmem:[%s2168_s0 + $0xb0] sm:$0xff] }
   0xd   :  { %vm107_vm9 = vcmp.lt.s32.totalorder %v1869_v24, 16384  ;;  %v115_v29 = vadd.s32 512, %v1869_v24  ;;  %v1874_v30 = vadd.s32 1024, %v1869_v24  ;;  %v1877_v31 = vadd.s32 1536, %v1869_v24  ;;  %399 = vst [vmem:[#allocation16] sm:$0xff] %v1869_v24 }
   0xe   :  { %v108_v32 = vsel %vm107_vm9, %v105_v20, 2147483648  ;;  %v1880_v33 = vadd.s32 2048, %v1869_v24  ;;  %v1883_v35 = vadd.s32 2560, %v1869_v24  ;;  %v1898_v43 = vadd.s32 3072, %v1869_v24  ;;  %v60_v20 = vld [vmem:[%s2168_s0 + $0x90] sm:$0xff] }
   0xf   :  { %109 = vst [vmem:[#allocation15] sm:$0xff] %v108_v32  ;;  %vm116_vm10 = vcmp.lt.s32.totalorder %v115_v29, 16384  ;;  %vm125_vm11 = vcmp.lt.s32.totalorder %v1874_v30, 16384  ;;  %vm134_vm12 = vcmp.lt.s32.totalorder %v1877_v31, 16384  ;;  %v1901_v46 = vadd.s32 3584, %v1869_v24  ;;  %v64_v32 = vld [vmem:[%s2168_s0 + $0xa0] sm:$0xff] }
  0x10   :  { %v117_v38 = vsel %vm116_vm10, %v114_v21, 2147483648  ;;  %v126_v39 = vsel %vm125_vm11, %v123_v22, 2147483648  ;;  %v135_v40 = vsel %vm134_vm12, %v132_v25, 2147483648  ;;  %vm143_vm13 = vcmp.lt.s32.totalorder %v1880_v33, 16384  ;;  %402 = vst [vmem:[#allocation16 + $0x8] sm:$0xff] %v115_v29 }
  0x11   :  { %118 = vst [vmem:[#allocation15 + $0x8] sm:$0xff] %v117_v38  ;;  %v144_v42 = vsel %vm143_vm13, %v141_v27, 2147483648  ;;  %vm152_vm14 = vcmp.lt.s32.totalorder %v1883_v35, 16384  ;;  %v1904_v48 = vadd.s32 4096, %v1869_v24  ;;  %vm161_vm15 = vcmp.lt.s32.totalorder %v1898_v43, 16384  ;;  %v62_v27 = vld [vmem:[%s2168_s0 + $0x98] sm:$0xff] }
  0x12   :  { %127 = vst [vmem:[#allocation15 + $0x10] sm:$0xff] %v126_v39  ;;  %v153_v45 = vsel %vm152_vm14, %v150_v34, 2147483648  ;;  %v162_v53 = vsel %vm161_vm15, %v159_v36, 2147483648  ;;  %vm170_vm1 = vcmp.lt.s32.totalorder %v1901_v46, 16384  ;;  %v177_v54 = vsel %vm175_vm8, %v176_v47, %v40_v18  ;;  %v66_v39 = vld [vmem:[%s2168_s0 + $0xa8] sm:$0xff] }
  0x13   :  { %136 = vst [vmem:[#allocation15 + $0x18] sm:$0xff] %v135_v40  ;;  %vm179_vm2 = vcmp.lt.s32.totalorder %v1904_v48, 16384  ;;  %v171_v56 = vsel %vm170_vm1, %v168_v50, 2147483648  ;;  %v186_v58 = vsel %vm184_vm0, %v185_v51, %v42_v37  ;;  %v1921_v59 = vadd.s32 4608, %v1869_v24 }
  0x14   :  { %145 = vst [vmem:[#allocation15 + $0x20] sm:$0xff] %v144_v42  ;;  %v180_v57 = vsel %vm179_vm2, %v177_v54, 2147483648  ;;  %v194_v60 = vsub.s32 2147483647, %v44_v41  ;;  %v1924_v61 = vadd.s32 5120, %v1869_v24  ;;  %vm202_vm4 = vcmp.lt.s32.totalorder %v46_v49, 0 }
  0x15   :  { %154 = vst [vmem:[#allocation15 + $0x28] sm:$0xff] %v153_v45  ;;  %vm188_vm5 = vcmp.lt.s32.totalorder %v1921_v59, 16384  ;;  %v203_v62 = vsub.s32 2147483647, %v46_v49  ;;  %v1928_v63 = vadd.s32 5632, %v1869_v24  ;;  %vm211_vm6 = vcmp.lt.s32.totalorder %v48_v52, 0 }
  0x16   :  { %163 = vst [vmem:[#allocation15 + $0x30] sm:$0xff] %v162_v53  ;;  %v189_v1 = vsel %vm188_vm5, %v186_v58, 2147483648  ;;  %v195_v2 = vsel %vm193_vm3, %v194_v60, %v44_v41  ;;  %vm197_vm7 = vcmp.lt.s32.totalorder %v1924_v61, 16384  ;;  %v212_v3 = vsub.s32 2147483647, %v48_v52 }
  0x17   :  { %172 = vst [vmem:[#allocation15 + $0x38] sm:$0xff] %v171_v56  ;;  %v198_v6 = vsel %vm197_vm7, %v195_v2, 2147483648  ;;  %v204_v8 = vsel %vm202_vm4, %v203_v62, %v46_v49  ;;  %vm206_vm8 = vcmp.lt.s32.totalorder %v1928_v63, 16384  ;;  %v1939_v9 = vadd.s32 6144, %v1869_v24  ;;  %v74_v62 = vld [vmem:[%s2168_s0 + $0xc8] sm:$0xff] }
  0x18   :  { %181 = vst [vmem:[#allocation15 + $0x40] sm:$0xff] %v180_v57  ;;  %v207_v11 = vsel %vm206_vm8, %v204_v8, 2147483648  ;;  %v213_v12 = vsel %vm211_vm6, %v212_v3, %v48_v52  ;;  %vm220_vm9 = vcmp.lt.s32.totalorder %v50_v55, 0  ;;  %v221_v13 = vsub.s32 2147483647, %v50_v55  ;;  %v76_v3 = vld [vmem:[%s2168_s0 + $0xd0] sm:$0xff] }
  0x19   :  { %190 = vst [vmem:[#allocation15 + $0x48] sm:$0xff] %v189_v1  ;;  %vm215_vm10 = vcmp.lt.s32.totalorder %v1939_v9, 16384  ;;  %v1947_v14 = vadd.s32 6656, %v1869_v24  ;;  %vm229_vm11 = vcmp.lt.s32.totalorder %v52_v0, 0  ;;  %v230_v15 = vsub.s32 2147483647, %v52_v0 }
  0x1a   :  { %199 = vst [vmem:[#allocation15 + $0x50] sm:$0xff] %v198_v6  ;;  %v216_v17 = vsel %vm215_vm10, %v213_v12, 2147483648  ;;  %v222_v18 = vsel %vm220_vm9, %v221_v13, %v50_v55  ;;  %v1953_v19 = vadd.s32 7168, %v1869_v24  ;;  %vm238_vm12 = vcmp.lt.s32.totalorder %v54_v5, 0  ;;  %v72_v55 = vld [vmem:[%s2168_s0 + $0xc0] sm:$0xff] }
  0x1b   :  { %208 = vst [vmem:[#allocation15 + $0x58] sm:$0xff] %v207_v11  ;;  %vm224_vm13 = vcmp.lt.s32.totalorder %v1947_v14, 16384  ;;  %v231_v21 = vsel %vm229_vm11, %v230_v15, %v52_v0  ;;  %v239_v22 = vsub.s32 2147483647, %v54_v5  ;;  %v1961_v23 = vadd.s32 7680, %v1869_v24 }
  0x1c   :  { %405 = vst [vmem:[#allocation16 + $0x10] sm:$0xff] %v1874_v30  ;;  %v225_v25 = vsel %vm224_vm13, %v222_v18, 2147483648  ;;  %vm233_vm14 = vcmp.lt.s32.totalorder %v1953_v19, 16384  ;;  %vm247_vm15 = vcmp.lt.s32.totalorder %v56_v10, 0  ;;  %v248_v26 = vsub.s32 2147483647, %v56_v10 }
  0x1d   :  { %217 = vst [vmem:[#allocation15 + $0x60] sm:$0xff] %v216_v17  ;;  %v234_v28 = vsel %vm233_vm14, %v231_v21, 2147483648  ;;  %v240_v29 = vsel %vm238_vm12, %v239_v22, %v54_v5  ;;  %vm242_vm0 = vcmp.lt.s32.totalorder %v1961_v23, 16384  ;;  %v1971_v30 = vadd.s32 8192, %v1869_v24  ;;  %v82_v22 = vld [vmem:[%s2168_s0 + $0xe8] sm:$0xff] }
  0x1e   :  { %408 = vst [vmem:[#allocation16 + $0x18] sm:$0xff] %v1877_v31  ;;  %v243_v34 = vsel %vm242_vm0, %v240_v29, 2147483648  ;;  %v249_v31 = vsel %vm247_vm15, %v248_v26, %v56_v10  ;;  %vm256_vm1 = vcmp.lt.s32.totalorder %v58_v16, 0  ;;  %v257_v36 = vsub.s32 2147483647, %v58_v16 }
  0x1f   :  { %226 = vst [vmem:[#allocation15 + $0x68] sm:$0xff] %v225_v25  ;;  %vm251_vm2 = vcmp.lt.s32.totalorder %v1971_v30, 16384  ;;  %v1978_v37 = vadd.s32 8704, %v1869_v24  ;;  %vm265_vm3 = vcmp.lt.s32.totalorder %v60_v20, 0  ;;  %v266_v38 = vsub.s32 2147483647, %v60_v20 }
  0x20   :  { %235 = vst [vmem:[#allocation15 + $0x70] sm:$0xff] %v234_v28  ;;  %v252_v40 = vsel %vm251_vm2, %v249_v31, 2147483648  ;;  %v258_v41 = vsel %vm256_vm1, %v257_v36, %v58_v16  ;;  %v1984_v42 = vadd.s32 9216, %v1869_v24  ;;  %vm274_vm4 = vcmp.lt.s32.totalorder %v62_v27, 0  ;;  %v80_v16 = vld [vmem:[%s2168_s0 + $0xe0] sm:$0xff]  ;;  %v84_v28 = vld [vmem:[%s2168_s0 + $0xf0] sm:$0xff] }
  0x21   :  { %244 = vst [vmem:[#allocation15 + $0x78] sm:$0xff] %v243_v34  ;;  %vm260_vm5 = vcmp.lt.s32.totalorder %v1978_v37, 16384  ;;  %v267_v45 = vsel %vm265_vm3, %v266_v38, %v60_v20  ;;  %v275_v47 = vsub.s32 2147483647, %v62_v27  ;;  %v1992_v49 = vadd.s32 9728, %v1869_v24 }
  0x22   :  { %411 = vst [vmem:[#allocation16 + $0x20] sm:$0xff] %v1880_v33  ;;  %v261_v50 = vsel %vm260_vm5, %v258_v41, 2147483648  ;;  %vm269_vm6 = vcmp.lt.s32.totalorder %v1984_v42, 16384  ;;  %vm283_vm7 = vcmp.lt.s32.totalorder %v64_v32, 0  ;;  %v284_v51 = vsub.s32 2147483647, %v64_v32 }
  0x23   :  { %253 = vst [vmem:[#allocation15 + $0x80] sm:$0xff] %v252_v40  ;;  %v70_v33 = vld [vmem:[%s2168_s0 + $0xb8] sm:$0xff]  ;;  %v270_v52 = vsel %vm269_vm6, %v267_v45, 2147483648  ;;  %v276_v53 = vsel %vm274_vm4, %v275_v47, %v62_v27  ;;  %vm278_vm8 = vcmp.lt.s32.totalorder %v1992_v49, 16384  ;;  %v2002_v54 = vadd.s32 10240, %v1869_v24 }
  0x24   :  { %414 = vst [vmem:[#allocation16 + $0x28] sm:$0xff] %v1883_v35  ;;  %v279_v56 = vsel %vm278_vm8, %v276_v53, 2147483648  ;;  %v285_v35 = vsel %vm283_vm7, %v284_v51, %v64_v32  ;;  %vm292_vm9 = vcmp.lt.s32.totalorder %v66_v39, 0  ;;  %v293_v57 = vsub.s32 2147483647, %v66_v39 }
  0x25   :  { %262 = vst [vmem:[#allocation15 + $0x88] sm:$0xff] %v261_v50  ;;  %vm287_vm10 = vcmp.lt.s32.totalorder %v2002_v54, 16384  ;;  %v2009_v58 = vadd.s32 10752, %v1869_v24  ;;  %vm301_vm11 = vcmp.lt.s32.totalorder %v68_v44, 0  ;;  %v302_v60 = vsub.s32 2147483647, %v68_v44 }
  0x26   :  { %271 = vst [vmem:[#allocation15 + $0x90] sm:$0xff] %v270_v52  ;;  %v288_v0 = vsel %vm287_vm10, %v285_v35, 2147483648  ;;  %v294_v1 = vsel %vm292_vm9, %v293_v57, %v66_v39  ;;  %v2015_v2 = vadd.s32 11264, %v1869_v24  ;;  %vm310_vm12 = vcmp.lt.s32.totalorder %v70_v33, 0 }
  0x27   :  { %280 = vst [vmem:[#allocation15 + $0x98] sm:$0xff] %v279_v56  ;;  %vm296_vm13 = vcmp.lt.s32.totalorder %v2009_v58, 16384  ;;  %v303_v5 = vsel %vm301_vm11, %v302_v60, %v68_v44  ;;  %v311_v6 = vsub.s32 2147483647, %v70_v33  ;;  %v2023_v8 = vadd.s32 11776, %v1869_v24 }
  0x28   :  { %417 = vst [vmem:[#allocation16 + $0x30] sm:$0xff] %v1898_v43  ;;  %v297_v10 = vsel %vm296_vm13, %v294_v1, 2147483648  ;;  %vm305_vm14 = vcmp.lt.s32.totalorder %v2015_v2, 16384  ;;  %vm319_vm15 = vcmp.lt.s32.totalorder %v72_v55, 0  ;;  %v320_v11 = vsub.s32 2147483647, %v72_v55 }
  0x29   :  { %289 = vst [vmem:[#allocation15 + $0xa0] sm:$0xff] %v288_v0  ;;  %v78_v43 = vld [vmem:[%s2168_s0 + $0xd8] sm:$0xff]  ;;  %v306_v12 = vsel %vm305_vm14, %v303_v5, 2147483648  ;;  %v312_v13 = vsel %vm310_vm12, %v311_v6, %v70_v33  ;;  %vm314_vm0 = vcmp.lt.s32.totalorder %v2023_v8, 16384  ;;  %v2033_v15 = vadd.s32 12288, %v1869_v24 }
  0x2a   :  { %420 = vst [vmem:[#allocation16 + $0x38] sm:$0xff] %v1901_v46  ;;  %v315_v17 = vsel %vm314_vm0, %v312_v13, 2147483648  ;;  %v321_v46 = vsel %vm319_vm15, %v320_v11, %v72_v55  ;;  %vm328_vm1 = vcmp.lt.s32.totalorder %v74_v62, 0  ;;  %v329_v18 = vsub.s32 2147483647, %v74_v62 }
  0x2b   :  { %298 = vst [vmem:[#allocation15 + $0xa8] sm:$0xff] %v297_v10  ;;  %vm323_vm2 = vcmp.lt.s32.totalorder %v2033_v15, 16384  ;;  %v2040_v20 = vadd.s32 12800, %v1869_v24  ;;  %vm337_vm3 = vcmp.lt.s32.totalorder %v76_v3, 0  ;;  %v338_v21 = vsub.s32 2147483647, %v76_v3 }
  0x2c   :  { %307 = vst [vmem:[#allocation15 + $0xb0] sm:$0xff] %v306_v12  ;;  %v324_v25 = vsel %vm323_vm2, %v321_v46, 2147483648  ;;  %v330_v26 = vsel %vm328_vm1, %v329_v18, %v74_v62  ;;  %v2046_v27 = vadd.s32 13312, %v1869_v24  ;;  %vm346_vm4 = vcmp.lt.s32.totalorder %v78_v43, 0 }
  0x2d   :  { %316 = vst [vmem:[#allocation15 + $0xb8] sm:$0xff] %v315_v17  ;;  %vm332_vm5 = vcmp.lt.s32.totalorder %v2040_v20, 16384  ;;  %v339_v29 = vsel %vm337_vm3, %v338_v21, %v76_v3  ;;  %v347_v32 = vsub.s32 2147483647, %v78_v43  ;;  %v349_v34 = vadd.s32 13824, %v1869_v24 }
  0x2e   :  { %423 = vst [vmem:[#allocation16 + $0x40] sm:$0xff] %v1904_v48  ;;  %v333_v31 = vsel %vm332_vm5, %v330_v26, 2147483648  ;;  %vm341_vm6 = vcmp.lt.s32.totalorder %v2046_v27, 16384  ;;  %vm355_vm7 = vcmp.lt.s32.totalorder %v80_v16, 0  ;;  %v356_v36 = vsub.s32 2147483647, %v80_v16 }
  0x2f   :  { %325 = vst [vmem:[#allocation15 + $0xc0] sm:$0xff] %v324_v25  ;;  %v86_v48 = vld [vmem:[%s2168_s0 + $0xf8] sm:$0xff]  ;;  %v342_v38 = vsel %vm341_vm6, %v339_v29, 2147483648  ;;  %v348_v39 = vsel %vm346_vm4, %v347_v32, %v78_v43  ;;  %vm350_vm8 = vcmp.lt.s32.totalorder %v349_v34, 16384  ;;  %v358_v40 = vadd.s32 14336, %v1869_v24  ;;  %s2081_s0 = smov 0  }
  0x30   :  { %426 = vst [vmem:[#allocation16 + $0x48] sm:$0xff] %v1921_v59  ;;  %v351_v41 = vsel %vm350_vm8, %v348_v39, 2147483648  ;;  %v357_v44 = vsel %vm355_vm7, %v356_v36, %v80_v16  ;;  %vm364_vm9 = vcmp.lt.s32.totalorder %v82_v22, 0  ;;  %v365_v45 = vsub.s32 2147483647, %v82_v22 }
  0x31   :  { %334 = vst [vmem:[#allocation15 + $0xc8] sm:$0xff] %v333_v31  ;;  %vm359_vm10 = vcmp.lt.s32.totalorder %v358_v40, 16384  ;;  %v367_v59 = vadd.s32 14848, %v1869_v24  ;;  %vm373_vm11 = vcmp.lt.s32.totalorder %v84_v28, 0  ;;  %v374_v47 = vsub.s32 2147483647, %v84_v28 }
  0x32   :  { %343 = vst [vmem:[#allocation15 + $0xd0] sm:$0xff] %v342_v38  ;;  %v360_v50 = vsel %vm359_vm10, %v357_v44, 2147483648  ;;  %v366_v51 = vsel %vm364_vm9, %v365_v45, %v82_v22  ;;  %v376_v33 = vadd.s32 15360, %v1869_v24  ;;  %vm382_vm12 = vcmp.lt.s32.totalorder %v86_v48, 0 }
  0x33   :  { %352 = vst [vmem:[#allocation15 + $0xd8] sm:$0xff] %v351_v41  ;;  %vm368_vm13 = vcmp.lt.s32.totalorder %v367_v59, 16384  ;;  %v375_v52 = vsel %vm373_vm11, %v374_v47, %v84_v28  ;;  %v383_v53 = vsub.s32 2147483647, %v86_v48  ;;  %v385_v55 = vadd.s32 15872, %v1869_v24 }
  0x34   :  { %429 = vst [vmem:[#allocation16 + $0x50] sm:$0xff] %v1924_v61  ;;  %v369_v56 = vsel %vm368_vm13, %v366_v51, 2147483648  ;;  %vm377_vm14 = vcmp.lt.s32.totalorder %v376_v33, 16384  ;;  %v1815_v24 = vmov 2147483648   ;;  %v1816_v61 = vmov 2147483647  }
  0x35   :  { %361 = vst [vmem:[#allocation15 + $0xe0] sm:$0xff] %v360_v50  ;;  %v378_v35 = vsel %vm377_vm14, %v375_v52, 2147483648  ;;  %v384_v57 = vsel %vm382_vm12, %v383_v53, %v86_v48  ;;  %vm386_vm15 = vcmp.lt.s32.totalorder %v385_v55, 16384 }
  0x36   :  { %432 = vst [vmem:[#allocation16 + $0x58] sm:$0xff] %v1928_v63  ;;  %v387_v60 = vsel %vm386_vm15, %v384_v57, 2147483648 }
  0x37   :  { %370 = vst [vmem:[#allocation15 + $0xe8] sm:$0xff] %v369_v56 }
  0x38   :  { %379 = vst [vmem:[#allocation15 + $0xf0] sm:$0xff] %v378_v35 }
  0x39   :  { %388 = vst [vmem:[#allocation15 + $0xf8] sm:$0xff] %v387_v60 }
  0x3a   :  { %435 = vst [vmem:[#allocation16 + $0x60] sm:$0xff] %v1939_v9 }
  0x3b   :  { %438 = vst [vmem:[#allocation16 + $0x68] sm:$0xff] %v1947_v14 }
  0x3c   :  { %441 = vst [vmem:[#allocation16 + $0x70] sm:$0xff] %v1953_v19 }
  0x3d   :  { %444 = vst [vmem:[#allocation16 + $0x78] sm:$0xff] %v1961_v23 }
  0x3e   :  { %447 = vst [vmem:[#allocation16 + $0x80] sm:$0xff] %v1971_v30 }
  0x3f   :  { %450 = vst [vmem:[#allocation16 + $0x88] sm:$0xff] %v1978_v37 }
  0x40   :  { %453 = vst [vmem:[#allocation16 + $0x90] sm:$0xff] %v1984_v42 }
  0x41   :  { %456 = vst [vmem:[#allocation16 + $0x98] sm:$0xff] %v1992_v49 }
  0x42   :  { %459 = vst [vmem:[#allocation16 + $0xa0] sm:$0xff] %v2002_v54 }
  0x43   :  { %462 = vst [vmem:[#allocation16 + $0xa8] sm:$0xff] %v2009_v58 }
  0x44   :  { %465 = vst [vmem:[#allocation16 + $0xb0] sm:$0xff] %v2015_v2 }
  0x45   :  { %468 = vst [vmem:[#allocation16 + $0xb8] sm:$0xff] %v2023_v8 }
  0x46   :  { %471 = vst [vmem:[#allocation16 + $0xc0] sm:$0xff] %v2033_v15 }
  0x47   :  { %474 = vst [vmem:[#allocation16 + $0xc8] sm:$0xff] %v2040_v20 }
  0x48   :  { %477 = vst [vmem:[#allocation16 + $0xd0] sm:$0xff] %v2046_v27 }
  0x49   :  { %480 = vst [vmem:[#allocation16 + $0xd8] sm:$0xff] %v349_v34 }
  0x4a   :  { %483 = vst [vmem:[#allocation16 + $0xe0] sm:$0xff] %v358_v40 }
  0x4b   :  { %486 = vst [vmem:[#allocation16 + $0xe8] sm:$0xff] %v367_v59 }
  0x4c   :  { %489 = vst [vmem:[#allocation16 + $0xf0] sm:$0xff] %v376_v33 }
  0x4d   :  { %492 = vst [vmem:[#allocation16 + $0xf8] sm:$0xff] %v385_v55 }
  0x4e   :  { %494 = vst [vmem:[#allocation12] sm:$0xff] %v1815_v24 }
  0x4f   :  { %495 = vst [vmem:[#allocation14] sm:$0xff] %v1816_v61 }
  0x50 LB: > { %v503_v63 = vld [vmem:[#allocation15] sm:$0xff]  ;;  %v507_v14 = vld [vmem:[#allocation15 + $0x8] sm:$0xff]  ;;  %v520_v23 = vld [vmem:[#allocation15 + $0x10] sm:$0xff]  ;;  %s1219_s17 = scalar_lea.vmem [#allocation12], %s1811_s0  ;;  %s1221_s18 = scalar_lea.vmem [#allocation14], %s1811_s0  ;;  %s1811_s0 = sphi %s2081_s0, %s502_s0  }
  0x51   : > { %v504_v9 = vld [vmem:[#allocation16] sm:$0xff]  ;;  %v509_v19 = vld [vmem:[#allocation16 + $0x8] sm:$0xff]  ;;  %vm511_vm0 = vcmp.gt.s32.totalorder %v507_v14, %v503_v63  ;;  %vm512_vm1 = vcmp.eq.s32.totalorder %v507_v14, %v503_v63  ;;  %v522_v30 = vld [vmem:[#allocation16 + $0x10] sm:$0xff]  ;;  %s502_s0 = sadd.s32 1, %s1811_s0  }
  0x52   : > { %vm513_vm2 = vcmp.lt.s32.totalorder %v509_v19, %v504_v9  ;;  %v533_v49 = vld [vmem:[#allocation15 + $0x18] sm:$0xff]  ;;  %v546_v0 = vld [vmem:[#allocation15 + $0x20] sm:$0xff]  ;;  %v559_v5 = vld [vmem:[#allocation15 + $0x28] sm:$0xff]  ;;  %p499_p2 = scmp.ge.s32.totalorder %s502_s0, 4  }
  0x53   : > { %vm514_vm3 = vmand %vm512_vm1, %vm513_vm2  ;;  %v535_v54 = vld [vmem:[#allocation16 + $0x18] sm:$0xff]  ;;  %v548_v1 = vld [vmem:[#allocation16 + $0x20] sm:$0xff] }
  0x54   : > { %vm515_vm4 = vmor %vm511_vm0, %vm514_vm3  ;;  %v561_v6 = vld [vmem:[#allocation16 + $0x28] sm:$0xff]  ;;  %v572_v11 = vld [vmem:[#allocation15 + $0x30] sm:$0xff] }
  0x55   : > { %v516_v37 = vsel %vm515_vm4, %v507_v14, %v503_v63  ;;  %v517_v42 = vsel %vm515_vm4, %v509_v19, %v504_v9  ;;  %v574_v43 = vld [vmem:[#allocation16 + $0x30] sm:$0xff]  ;;  %v585_v15 = vld [vmem:[#allocation15 + $0x38] sm:$0xff]  ;;  %v598_v18 = vld [vmem:[#allocation15 + $0x40] sm:$0xff] }
  0x56   : > { %vm524_vm5 = vcmp.gt.s32.totalorder %v520_v23, %v516_v37  ;;  %vm525_vm6 = vcmp.eq.s32.totalorder %v520_v23, %v516_v37  ;;  %vm526_vm7 = vcmp.lt.s32.totalorder %v522_v30, %v517_v42  ;;  %v587_v16 = vld [vmem:[#allocation16 + $0x38] sm:$0xff]  ;;  %v600_v20 = vld [vmem:[#allocation16 + $0x40] sm:$0xff]  ;;  %v611_v25 = vld [vmem:[#allocation15 + $0x48] sm:$0xff] }
  0x57   : > { %vm527_vm8 = vmand %vm525_vm6, %vm526_vm7  ;;  %v613_v26 = vld [vmem:[#allocation16 + $0x48] sm:$0xff]  ;;  %v624_v29 = vld [vmem:[#allocation15 + $0x50] sm:$0xff] }
  0x58   : > { %vm528_vm9 = vmor %vm524_vm5, %vm527_vm8  ;;  %v626_v32 = vld [vmem:[#allocation16 + $0x50] sm:$0xff]  ;;  %v637_v36 = vld [vmem:[#allocation15 + $0x58] sm:$0xff] }
  0x59   : > { %v529_v58 = vsel %vm528_vm9, %v520_v23, %v516_v37  ;;  %v530_v62 = vsel %vm528_vm9, %v522_v30, %v517_v42  ;;  %v639_v48 = vld [vmem:[#allocation16 + $0x58] sm:$0xff]  ;;  %v650_v40 = vld [vmem:[#allocation15 + $0x60] sm:$0xff]  ;;  %v663_v59 = vld [vmem:[#allocation15 + $0x68] sm:$0xff] }
  0x5a   : > { %vm537_vm10 = vcmp.gt.s32.totalorder %v533_v49, %v529_v58  ;;  %vm538_vm11 = vcmp.eq.s32.totalorder %v533_v49, %v529_v58  ;;  %vm539_vm12 = vcmp.lt.s32.totalorder %v535_v54, %v530_v62  ;;  %v652_v41 = vld [vmem:[#allocation16 + $0x60] sm:$0xff]  ;;  %v665_v47 = vld [vmem:[#allocation16 + $0x68] sm:$0xff]  ;;  %v676_v33 = vld [vmem:[#allocation15 + $0x70] sm:$0xff] }
  0x5b   : > { %vm540_vm13 = vmand %vm538_vm11, %vm539_vm12  ;;  %v678_v52 = vld [vmem:[#allocation16 + $0x70] sm:$0xff]  ;;  %v689_v56 = vld [vmem:[#allocation15 + $0x78] sm:$0xff] }
  0x5c   : > { %vm541_vm14 = vmor %vm537_vm10, %vm540_vm13  ;;  %v691_v35 = vld [vmem:[#allocation16 + $0x78] sm:$0xff]  ;;  %v702_v24 = vld [vmem:[#allocation15 + $0x80] sm:$0xff] }
  0x5d   : > { %v542_v2 = vsel %vm541_vm14, %v533_v49, %v529_v58  ;;  %v543_v3 = vsel %vm541_vm14, %v535_v54, %v530_v62  ;;  %v704_v61 = vld [vmem:[#allocation16 + $0x80] sm:$0xff]  ;;  %v715_v14 = vld [vmem:[#allocation15 + $0x88] sm:$0xff]  ;;  %v728_v37 = vld [vmem:[#allocation15 + $0x90] sm:$0xff] }
  0x5e   : > { %vm550_vm15 = vcmp.gt.s32.totalorder %v546_v0, %v542_v2  ;;  %vm551_vm0 = vcmp.eq.s32.totalorder %v546_v0, %v542_v2  ;;  %vm552_vm1 = vcmp.lt.s32.totalorder %v548_v1, %v543_v3  ;;  %v717_v19 = vld [vmem:[#allocation16 + $0x88] sm:$0xff]  ;;  %v730_v42 = vld [vmem:[#allocation16 + $0x90] sm:$0xff]  ;;  %v741_v58 = vld [vmem:[#allocation15 + $0x98] sm:$0xff] }
  0x5f   : > { %vm553_vm2 = vmand %vm551_vm0, %vm552_vm1  ;;  %v743_v62 = vld [vmem:[#allocation16 + $0x98] sm:$0xff] }
  0x60   : > { %vm554_vm3 = vmor %vm550_vm15, %vm553_vm2 }
  0x61   : > { %v555_v8 = vsel %vm554_vm3, %v546_v0, %v542_v2  ;;  %v556_v10 = vsel %vm554_vm3, %v548_v1, %v543_v3  ;;  %v754_v2 = vld [vmem:[#allocation15 + $0xa0] sm:$0xff] }
  0x62   : > { %vm563_vm4 = vcmp.gt.s32.totalorder %v559_v5, %v555_v8  ;;  %vm564_vm5 = vcmp.eq.s32.totalorder %v559_v5, %v555_v8  ;;  %vm565_vm6 = vcmp.lt.s32.totalorder %v561_v6, %v556_v10  ;;  %v756_v3 = vld [vmem:[#allocation16 + $0xa0] sm:$0xff] }
  0x63   : > { %vm566_vm7 = vmand %vm564_vm5, %vm565_vm6 }
  0x64   : > { %vm567_vm8 = vmor %vm563_vm4, %vm566_vm7 }
  0x65   : > { %v568_v12 = vsel %vm567_vm8, %v559_v5, %v555_v8  ;;  %v569_v13 = vsel %vm567_vm8, %v561_v6, %v556_v10  ;;  %v767_v8 = vld [vmem:[#allocation15 + $0xa8] sm:$0xff] }
  0x66   : > { %vm576_vm9 = vcmp.gt.s32.totalorder %v572_v11, %v568_v12  ;;  %vm577_vm10 = vcmp.eq.s32.totalorder %v572_v11, %v568_v12  ;;  %vm578_vm11 = vcmp.lt.s32.totalorder %v574_v43, %v569_v13  ;;  %v769_v10 = vld [vmem:[#allocation16 + $0xa8] sm:$0xff] }
  0x67   : > { %vm579_vm12 = vmand %vm577_vm10, %vm578_vm11 }
  0x68   : > { %vm580_vm13 = vmor %vm576_vm9, %vm579_vm12 }
  0x69   : > { %v581_v17 = vsel %vm580_vm13, %v572_v11, %v568_v12  ;;  %v582_v46 = vsel %vm580_vm13, %v574_v43, %v569_v13  ;;  %v780_v12 = vld [vmem:[#allocation15 + $0xb0] sm:$0xff] }
  0x6a   : > { %vm589_vm14 = vcmp.gt.s32.totalorder %v585_v15, %v581_v17  ;;  %vm590_vm15 = vcmp.eq.s32.totalorder %v585_v15, %v581_v17  ;;  %vm591_vm0 = vcmp.lt.s32.totalorder %v587_v16, %v582_v46  ;;  %v782_v13 = vld [vmem:[#allocation16 + $0xb0] sm:$0xff] }
  0x6b   : > { %vm592_vm1 = vmand %vm590_vm15, %vm591_vm0 }
  0x6c   : > { %vm593_vm2 = vmor %vm589_vm14, %vm592_vm1 }
  0x6d   : > { %v594_v21 = vsel %vm593_vm2, %v585_v15, %v581_v17  ;;  %v595_v22 = vsel %vm593_vm2, %v587_v16, %v582_v46  ;;  %v793_v17 = vld [vmem:[#allocation15 + $0xb8] sm:$0xff] }
  0x6e   : > { %vm602_vm3 = vcmp.gt.s32.totalorder %v598_v18, %v594_v21  ;;  %vm603_vm4 = vcmp.eq.s32.totalorder %v598_v18, %v594_v21  ;;  %vm604_vm5 = vcmp.lt.s32.totalorder %v600_v20, %v595_v22  ;;  %v795_v46 = vld [vmem:[#allocation16 + $0xb8] sm:$0xff] }
  0x6f   : > { %vm605_vm6 = vmand %vm603_vm4, %vm604_vm5 }
  0x70   : > { %vm606_vm7 = vmor %vm602_vm3, %vm605_vm6 }
  0x71   : > { %v607_v27 = vsel %vm606_vm7, %v598_v18, %v594_v21  ;;  %v608_v28 = vsel %vm606_vm7, %v600_v20, %v595_v22  ;;  %v806_v21 = vld [vmem:[#allocation15 + $0xc0] sm:$0xff] }
  0x72   : > { %vm615_vm8 = vcmp.gt.s32.totalorder %v611_v25, %v607_v27  ;;  %vm616_vm9 = vcmp.eq.s32.totalorder %v611_v25, %v607_v27  ;;  %vm617_vm10 = vcmp.lt.s32.totalorder %v613_v26, %v608_v28  ;;  %v808_v22 = vld [vmem:[#allocation16 + $0xc0] sm:$0xff] }
  0x73   : > { %vm618_vm11 = vmand %vm616_vm9, %vm617_vm10 }
  0x74   : > { %vm619_vm12 = vmor %vm615_vm8, %vm618_vm11 }
  0x75   : > { %v620_v34 = vsel %vm619_vm12, %v611_v25, %v607_v27  ;;  %v621_v31 = vsel %vm619_vm12, %v613_v26, %v608_v28  ;;  %v819_v27 = vld [vmem:[#allocation15 + $0xc8] sm:$0xff] }
  0x76   : > { %vm628_vm13 = vcmp.gt.s32.totalorder %v624_v29, %v620_v34  ;;  %vm629_vm14 = vcmp.eq.s32.totalorder %v624_v29, %v620_v34  ;;  %vm630_vm15 = vcmp.lt.s32.totalorder %v626_v32, %v621_v31  ;;  %v821_v28 = vld [vmem:[#allocation16 + $0xc8] sm:$0xff] }
  0x77   : > { %vm631_vm0 = vmand %vm629_vm14, %vm630_vm15 }
  0x78   : > { %vm632_vm1 = vmor %vm628_vm13, %vm631_vm0 }
  0x79   : > { %v633_v38 = vsel %vm632_vm1, %v624_v29, %v620_v34  ;;  %v634_v39 = vsel %vm632_vm1, %v626_v32, %v621_v31  ;;  %v832_v34 = vld [vmem:[#allocation15 + $0xd0] sm:$0xff] }
  0x7a   : > { %vm641_vm2 = vcmp.gt.s32.totalorder %v637_v36, %v633_v38  ;;  %vm642_vm3 = vcmp.eq.s32.totalorder %v637_v36, %v633_v38  ;;  %vm643_vm4 = vcmp.lt.s32.totalorder %v639_v48, %v634_v39  ;;  %v834_v31 = vld [vmem:[#allocation16 + $0xd0] sm:$0xff] }
  0x7b   : > { %vm644_vm5 = vmand %vm642_vm3, %vm643_vm4 }
  0x7c   : > { %vm645_vm6 = vmor %vm641_vm2, %vm644_vm5 }
  0x7d   : > { %v646_v44 = vsel %vm645_vm6, %v637_v36, %v633_v38  ;;  %v647_v45 = vsel %vm645_vm6, %v639_v48, %v634_v39  ;;  %v845_v38 = vld [vmem:[#allocation15 + $0xd8] sm:$0xff] }
  0x7e   : > { %vm654_vm7 = vcmp.gt.s32.totalorder %v650_v40, %v646_v44  ;;  %vm655_vm8 = vcmp.eq.s32.totalorder %v650_v40, %v646_v44  ;;  %vm656_vm9 = vcmp.lt.s32.totalorder %v652_v41, %v647_v45  ;;  %v847_v39 = vld [vmem:[#allocation16 + $0xd8] sm:$0xff] }
  0x7f   : > { %vm657_vm10 = vmand %vm655_vm8, %vm656_vm9 }
  0x80   : > { %vm658_vm11 = vmor %vm654_vm7, %vm657_vm10 }
  0x81   : > { %v659_v50 = vsel %vm658_vm11, %v650_v40, %v646_v44  ;;  %v660_v51 = vsel %vm658_vm11, %v652_v41, %v647_v45  ;;  %v858_v44 = vld [vmem:[#allocation15 + $0xe0] sm:$0xff] }
  0x82   : > { %vm667_vm12 = vcmp.gt.s32.totalorder %v663_v59, %v659_v50  ;;  %vm668_vm13 = vcmp.eq.s32.totalorder %v663_v59, %v659_v50  ;;  %vm669_vm14 = vcmp.lt.s32.totalorder %v665_v47, %v660_v51  ;;  %v860_v45 = vld [vmem:[#allocation16 + $0xe0] sm:$0xff] }
  0x83   : > { %vm670_vm15 = vmand %vm668_vm13, %vm669_vm14 }
  0x84   : > { %vm671_vm0 = vmor %vm667_vm12, %vm670_vm15 }
  0x85   : > { %v672_v53 = vsel %vm671_vm0, %v663_v59, %v659_v50  ;;  %v673_v55 = vsel %vm671_vm0, %v665_v47, %v660_v51  ;;  %v871_v50 = vld [vmem:[#allocation15 + $0xe8] sm:$0xff] }
  0x86   : > { %vm680_vm1 = vcmp.gt.s32.totalorder %v676_v33, %v672_v53  ;;  %vm681_vm2 = vcmp.eq.s32.totalorder %v676_v33, %v672_v53  ;;  %vm682_vm3 = vcmp.lt.s32.totalorder %v678_v52, %v673_v55  ;;  %v873_v51 = vld [vmem:[#allocation16 + $0xe8] sm:$0xff] }
  0x87   : > { %vm683_vm4 = vmand %vm681_vm2, %vm682_vm3 }
  0x88   : > { %vm684_vm5 = vmor %vm680_vm1, %vm683_vm4 }
  0x89   : > { %v685_v57 = vsel %vm684_vm5, %v676_v33, %v672_v53  ;;  %v686_v60 = vsel %vm684_vm5, %v678_v52, %v673_v55  ;;  %v884_v53 = vld [vmem:[#allocation15 + $0xf0] sm:$0xff] }
  0x8a   : > { %vm693_vm6 = vcmp.gt.s32.totalorder %v689_v56, %v685_v57  ;;  %vm694_vm7 = vcmp.eq.s32.totalorder %v689_v56, %v685_v57  ;;  %vm695_vm8 = vcmp.lt.s32.totalorder %v691_v35, %v686_v60  ;;  %v886_v55 = vld [vmem:[#allocation16 + $0xf0] sm:$0xff] }
  0x8b   : > { %vm696_vm9 = vmand %vm694_vm7, %vm695_vm8 }
  0x8c   : > { %vm697_vm10 = vmor %vm693_vm6, %vm696_vm9 }
  0x8d   : > { %v698_v63 = vsel %vm697_vm10, %v689_v56, %v685_v57  ;;  %v699_v9 = vsel %vm697_vm10, %v691_v35, %v686_v60  ;;  %v897_v57 = vld [vmem:[#allocation15 + $0xf8] sm:$0xff] }
  0x8e   : > { %vm706_vm11 = vcmp.gt.s32.totalorder %v702_v24, %v698_v63  ;;  %vm707_vm12 = vcmp.eq.s32.totalorder %v702_v24, %v698_v63  ;;  %vm708_vm13 = vcmp.lt.s32.totalorder %v704_v61, %v699_v9  ;;  %v899_v60 = vld [vmem:[#allocation16 + $0xf8] sm:$0xff] }
  0x8f   : > { %vm709_vm14 = vmand %vm707_vm12, %vm708_vm13 }
  0x90   : > { %vm710_vm15 = vmor %vm706_vm11, %vm709_vm14 }
  0x91   : > { %v711_v23 = vsel %vm710_vm15, %v702_v24, %v698_v63  ;;  %v712_v30 = vsel %vm710_vm15, %v704_v61, %v699_v9 }
  0x92   : > { %vm719_vm0 = vcmp.gt.s32.totalorder %v715_v14, %v711_v23  ;;  %vm720_vm1 = vcmp.eq.s32.totalorder %v715_v14, %v711_v23  ;;  %vm721_vm2 = vcmp.lt.s32.totalorder %v717_v19, %v712_v30 }
  0x93   : > { %vm722_vm3 = vmand %vm720_vm1, %vm721_vm2 }
  0x94   : > { %vm723_vm4 = vmor %vm719_vm0, %vm722_vm3 }
  0x95   : > { %v724_v49 = vsel %vm723_vm4, %v715_v14, %v711_v23  ;;  %v725_v54 = vsel %vm723_vm4, %v717_v19, %v712_v30 }
  0x96   : > { %vm732_vm5 = vcmp.gt.s32.totalorder %v728_v37, %v724_v49  ;;  %vm733_vm6 = vcmp.eq.s32.totalorder %v728_v37, %v724_v49  ;;  %vm734_vm7 = vcmp.lt.s32.totalorder %v730_v42, %v725_v54 }
  0x97   : > { %vm735_vm8 = vmand %vm733_vm6, %vm734_vm7 }
  0x98   : > { %vm736_vm9 = vmor %vm732_vm5, %vm735_vm8 }
  0x99   : > { %v737_v0 = vsel %vm736_vm9, %v728_v37, %v724_v49  ;;  %v738_v1 = vsel %vm736_vm9, %v730_v42, %v725_v54 }
  0x9a   : > { %vm745_vm10 = vcmp.gt.s32.totalorder %v741_v58, %v737_v0  ;;  %vm746_vm11 = vcmp.eq.s32.totalorder %v741_v58, %v737_v0  ;;  %vm747_vm12 = vcmp.lt.s32.totalorder %v743_v62, %v738_v1 }
  0x9b   : > { %vm748_vm13 = vmand %vm746_vm11, %vm747_vm12 }
  0x9c   : > { %vm749_vm14 = vmor %vm745_vm10, %vm748_vm13 }
  0x9d   : > { %v750_v5 = vsel %vm749_vm14, %v741_v58, %v737_v0  ;;  %v751_v6 = vsel %vm749_vm14, %v743_v62, %v738_v1 }
  0x9e   : > { %vm758_vm15 = vcmp.gt.s32.totalorder %v754_v2, %v750_v5  ;;  %vm759_vm0 = vcmp.eq.s32.totalorder %v754_v2, %v750_v5  ;;  %vm760_vm1 = vcmp.lt.s32.totalorder %v756_v3, %v751_v6 }
  0x9f   : > { %vm761_vm2 = vmand %vm759_vm0, %vm760_vm1 }
  0xa0   : > { %vm762_vm3 = vmor %vm758_vm15, %vm761_vm2 }
  0xa1   : > { %v763_v11 = vsel %vm762_vm3, %v754_v2, %v750_v5  ;;  %v764_v43 = vsel %vm762_vm3, %v756_v3, %v751_v6 }
  0xa2   : > { %vm771_vm4 = vcmp.gt.s32.totalorder %v767_v8, %v763_v11  ;;  %vm772_vm5 = vcmp.eq.s32.totalorder %v767_v8, %v763_v11  ;;  %vm773_vm6 = vcmp.lt.s32.totalorder %v769_v10, %v764_v43 }
  0xa3   : > { %vm774_vm7 = vmand %vm772_vm5, %vm773_vm6 }
  0xa4   : > { %vm775_vm8 = vmor %vm771_vm4, %vm774_vm7 }
  0xa5   : > { %v776_v15 = vsel %vm775_vm8, %v767_v8, %v763_v11  ;;  %v777_v16 = vsel %vm775_vm8, %v769_v10, %v764_v43 }
  0xa6   : > { %vm784_vm9 = vcmp.gt.s32.totalorder %v780_v12, %v776_v15  ;;  %vm785_vm10 = vcmp.eq.s32.totalorder %v780_v12, %v776_v15  ;;  %vm786_vm11 = vcmp.lt.s32.totalorder %v782_v13, %v777_v16 }
  0xa7   : > { %vm787_vm12 = vmand %vm785_vm10, %vm786_vm11 }
  0xa8   : > { %vm788_vm13 = vmor %vm784_vm9, %vm787_vm12 }
  0xa9   : > { %v789_v18 = vsel %vm788_vm13, %v780_v12, %v776_v15  ;;  %v790_v20 = vsel %vm788_vm13, %v782_v13, %v777_v16 }
  0xaa   : > { %vm797_vm14 = vcmp.gt.s32.totalorder %v793_v17, %v789_v18  ;;  %vm798_vm15 = vcmp.eq.s32.totalorder %v793_v17, %v789_v18  ;;  %vm799_vm0 = vcmp.lt.s32.totalorder %v795_v46, %v790_v20 }
  0xab   : > { %vm800_vm1 = vmand %vm798_vm15, %vm799_vm0 }
  0xac   : > { %vm801_vm2 = vmor %vm797_vm14, %vm800_vm1 }
  0xad   : > { %v802_v25 = vsel %vm801_vm2, %v793_v17, %v789_v18  ;;  %v803_v26 = vsel %vm801_vm2, %v795_v46, %v790_v20 }
  0xae   : > { %vm810_vm3 = vcmp.gt.s32.totalorder %v806_v21, %v802_v25  ;;  %vm811_vm4 = vcmp.eq.s32.totalorder %v806_v21, %v802_v25  ;;  %vm812_vm5 = vcmp.lt.s32.totalorder %v808_v22, %v803_v26 }
  0xaf   : > { %vm813_vm6 = vmand %vm811_vm4, %vm812_vm5 }
  0xb0   : > { %vm814_vm7 = vmor %vm810_vm3, %vm813_vm6 }
  0xb1   : > { %v815_v29 = vsel %vm814_vm7, %v806_v21, %v802_v25  ;;  %v816_v32 = vsel %vm814_vm7, %v808_v22, %v803_v26 }
  0xb2   : > { %vm823_vm8 = vcmp.gt.s32.totalorder %v819_v27, %v815_v29  ;;  %vm824_vm9 = vcmp.eq.s32.totalorder %v819_v27, %v815_v29  ;;  %vm825_vm10 = vcmp.lt.s32.totalorder %v821_v28, %v816_v32 }
  0xb3   : > { %vm826_vm11 = vmand %vm824_vm9, %vm825_vm10 }
  0xb4   : > { %vm827_vm12 = vmor %vm823_vm8, %vm826_vm11 }
  0xb5   : > { %v828_v36 = vsel %vm827_vm12, %v819_v27, %v815_v29  ;;  %v829_v48 = vsel %vm827_vm12, %v821_v28, %v816_v32 }
  0xb6   : > { %vm836_vm13 = vcmp.gt.s32.totalorder %v832_v34, %v828_v36  ;;  %vm837_vm14 = vcmp.eq.s32.totalorder %v832_v34, %v828_v36  ;;  %vm838_vm15 = vcmp.lt.s32.totalorder %v834_v31, %v829_v48 }
  0xb7   : > { %vm839_vm0 = vmand %vm837_vm14, %vm838_vm15 }
  0xb8   : > { %vm840_vm1 = vmor %vm836_vm13, %vm839_vm0 }
  0xb9   : > { %v841_v40 = vsel %vm840_vm1, %v832_v34, %v828_v36  ;;  %v842_v41 = vsel %vm840_vm1, %v834_v31, %v829_v48 }
  0xba   : > { %vm849_vm2 = vcmp.gt.s32.totalorder %v845_v38, %v841_v40  ;;  %vm850_vm3 = vcmp.eq.s32.totalorder %v845_v38, %v841_v40  ;;  %vm851_vm4 = vcmp.lt.s32.totalorder %v847_v39, %v842_v41 }
  0xbb   : > { %vm852_vm5 = vmand %vm850_vm3, %vm851_vm4 }
  0xbc   : > { %vm853_vm6 = vmor %vm849_vm2, %vm852_vm5 }
  0xbd   : > { %v854_v59 = vsel %vm853_vm6, %v845_v38, %v841_v40  ;;  %v855_v47 = vsel %vm853_vm6, %v847_v39, %v842_v41 }
  0xbe   : > { %vm862_vm7 = vcmp.gt.s32.totalorder %v858_v44, %v854_v59  ;;  %vm863_vm8 = vcmp.eq.s32.totalorder %v858_v44, %v854_v59  ;;  %vm864_vm9 = vcmp.lt.s32.totalorder %v860_v45, %v855_v47 }
  0xbf   : > { %vm865_vm10 = vmand %vm863_vm8, %vm864_vm9 }
  0xc0   : > { %vm866_vm11 = vmor %vm862_vm7, %vm865_vm10 }
  0xc1   : > { %v867_v33 = vsel %vm866_vm11, %v858_v44, %v854_v59  ;;  %v868_v52 = vsel %vm866_vm11, %v860_v45, %v855_v47 }
  0xc2   : > { %vm875_vm12 = vcmp.gt.s32.totalorder %v871_v50, %v867_v33  ;;  %vm876_vm13 = vcmp.eq.s32.totalorder %v871_v50, %v867_v33  ;;  %vm877_vm14 = vcmp.lt.s32.totalorder %v873_v51, %v868_v52 }
  0xc3   : > { %vm878_vm15 = vmand %vm876_vm13, %vm877_vm14 }
  0xc4   : > { %vm879_vm0 = vmor %vm875_vm12, %vm878_vm15 }
  0xc5   : > { %v880_v56 = vsel %vm879_vm0, %v871_v50, %v867_v33  ;;  %v881_v35 = vsel %vm879_vm0, %v873_v51, %v868_v52 }
  0xc6   : > { %vm888_vm1 = vcmp.gt.s32.totalorder %v884_v53, %v880_v56  ;;  %vm889_vm2 = vcmp.eq.s32.totalorder %v884_v53, %v880_v56  ;;  %vm890_vm3 = vcmp.lt.s32.totalorder %v886_v55, %v881_v35 }
  0xc7   : > { %vm891_vm4 = vmand %vm889_vm2, %vm890_vm3 }
  0xc8   : > { %vm892_vm5 = vmor %vm888_vm1, %vm891_vm4 }
  0xc9   : > { %v893_v24 = vsel %vm892_vm5, %v884_v53, %v880_v56  ;;  %v894_v61 = vsel %vm892_vm5, %v886_v55, %v881_v35 }
  0xca   : > { %vm901_vm6 = vcmp.gt.s32.totalorder %v897_v57, %v893_v24  ;;  %vm902_vm7 = vcmp.eq.s32.totalorder %v897_v57, %v893_v24  ;;  %vm903_vm8 = vcmp.lt.s32.totalorder %v899_v60, %v894_v61 }
  0xcb   : > { %vm904_vm9 = vmand %vm902_vm7, %vm903_vm8 }
  0xcc   : > { %vm905_vm10 = vmor %vm901_vm6, %vm904_vm9 }
  0xcd   : > { %v906_v63 = vsel %vm905_vm10, %v897_v57, %v893_v24  ;;  %v907_v9 = vsel %vm905_vm10, %v899_v60, %v894_v61 }
  0xce   : > { %v909_v14 = vrot.slane %v906_v63, 2  ;;  %v910_v19 = vrot.slane %v907_v9, 2 }
  0xd0   : > { %vm912_vm11 = vcmp.gt.s32.totalorder %v909_v14, %v906_v63  ;;  %vm913_vm12 = vcmp.eq.s32.totalorder %v909_v14, %v906_v63  ;;  %vm914_vm13 = vcmp.lt.s32.totalorder %v910_v19, %v907_v9 }
  0xd1   : > { %vm915_vm14 = vmand %vm913_vm12, %vm914_vm13 }
  0xd2   : > { %vm916_vm15 = vmor %vm912_vm11, %vm915_vm14 }
  0xd3   : > { %v917_v23 = vsel %vm916_vm15, %v909_v14, %v906_v63  ;;  %v918_v30 = vsel %vm916_vm15, %v910_v19, %v907_v9 }
  0xd4   : > { %v920_v37 = vrot.slane %v917_v23, 2  ;;  %v921_v42 = vrot.slane %v918_v30, 2 }
  0xd6   : > { %vm923_vm0 = vcmp.gt.s32.totalorder %v920_v37, %v917_v23  ;;  %vm924_vm1 = vcmp.eq.s32.totalorder %v920_v37, %v917_v23  ;;  %vm925_vm2 = vcmp.lt.s32.totalorder %v921_v42, %v918_v30 }
  0xd7   : > { %vm926_vm3 = vmand %vm924_vm1, %vm925_vm2 }
  0xd8   : > { %vm927_vm4 = vmor %vm923_vm0, %vm926_vm3 }
  0xd9   : > { %v928_v49 = vsel %vm927_vm4, %v920_v37, %v917_v23  ;;  %v929_v54 = vsel %vm927_vm4, %v921_v42, %v918_v30 }
  0xda   : > { %v931_v58 = vrot.slane %v928_v49, 2  ;;  %v932_v62 = vrot.slane %v929_v54, 2 }
  0xdc   : > { %vm934_vm5 = vcmp.gt.s32.totalorder %v931_v58, %v928_v49  ;;  %vm935_vm6 = vcmp.eq.s32.totalorder %v931_v58, %v928_v49  ;;  %vm936_vm7 = vcmp.lt.s32.totalorder %v932_v62, %v929_v54 }
  0xdd   : > { %vm937_vm8 = vmand %vm935_vm6, %vm936_vm7 }
  0xde   : > { %vm938_vm9 = vmor %vm934_vm5, %vm937_vm8 }
  0xdf   : > { %v940_v0 = vsel %vm938_vm9, %v932_v62, %v929_v54  ;;  %v939_v1 = vsel %vm938_vm9, %v931_v58, %v928_v49 }
  0xe0   : > { %974 = vxpose.xlu1.b32.start [1/16] %v940_v0, 128  ;;  %942 = vxpose.xlu0.b32.start [1/16] %v939_v1, 128 }
  0xe8   : > { %975 = vxpose.xlu1.b32.cont [2/16] %v940_v0, 128  ;;  %943 = vxpose.xlu0.b32.cont [2/16] %v939_v1, 128 }
  0xf0   : > { %976 = vxpose.xlu1.b32.cont [3/16] %v940_v0, 128  ;;  %944 = vxpose.xlu0.b32.cont [3/16] %v939_v1, 128 }
  0xf8   : > { %977 = vxpose.xlu1.b32.cont [4/16] %v940_v0, 128  ;;  %945 = vxpose.xlu0.b32.cont [4/16] %v939_v1, 128 }
 0x100   : > { %978 = vxpose.xlu1.b32.cont [5/16] %v940_v0, 128  ;;  %946 = vxpose.xlu0.b32.cont [5/16] %v939_v1, 128 }
 0x108   : > { %979 = vxpose.xlu1.b32.cont [6/16] %v940_v0, 128  ;;  %947 = vxpose.xlu0.b32.cont [6/16] %v939_v1, 128 }
 0x110   : > { %980 = vxpose.xlu1.b32.cont [7/16] %v940_v0, 128  ;;  %948 = vxpose.xlu0.b32.cont [7/16] %v939_v1, 128 }
 0x118   : > { %981 = vxpose.xlu1.b32.cont [8/16] %v940_v0, 128  ;;  %949 = vxpose.xlu0.b32.cont [8/16] %v939_v1, 128 }
 0x120   : > { %982 = vxpose.xlu1.b32.cont [9/16] %v940_v0, 128  ;;  %950 = vxpose.xlu0.b32.cont [9/16] %v939_v1, 128 }
 0x128   : > { %983 = vxpose.xlu1.b32.cont [10/16] %v940_v0, 128  ;;  %951 = vxpose.xlu0.b32.cont [10/16] %v939_v1, 128 }
 0x130   : > { %984 = vxpose.xlu1.b32.cont [11/16] %v940_v0, 128  ;;  %952 = vxpose.xlu0.b32.cont [11/16] %v939_v1, 128 }
 0x138   : > { %985 = vxpose.xlu1.b32.cont [12/16] %v940_v0, 128  ;;  %953 = vxpose.xlu0.b32.cont [12/16] %v939_v1, 128 }
 0x140   : > { %986 = vxpose.xlu1.b32.cont [13/16] %v940_v0, 128  ;;  %954 = vxpose.xlu0.b32.cont [13/16] %v939_v1, 128 }
 0x148   : > { %987 = vxpose.xlu1.b32.cont [14/16] %v940_v0, 128  ;;  %955 = vxpose.xlu0.b32.cont [14/16] %v939_v1, 128 }
 0x150   : > { %988 = vxpose.xlu1.b32.cont [15/16] %v940_v0, 128  ;;  %956 = vxpose.xlu0.b32.cont [15/16] %v939_v1, 128 }
 0x158   : > { %989 = vxpose.xlu1.b32.end [16/16] %v940_v0, 128  ;;  %957 = vxpose.xlu0.b32.end [16/16] %v939_v1, 128 }
 0x184   : > { %v990_v2 = vpop.trf.xlu1  ;;  %v958_v3 = vpop.trf.xlu0 }
 0x18c   : > { %v991_v5 = vpop.trf.xlu1  ;;  %v959_v6 = vpop.trf.xlu0 }
 0x18d   : > { %vm1010_vm10 = vcmp.lt.s32.totalorder %v991_v5, %v990_v2  ;;  %vm1008_vm11 = vcmp.gt.s32.totalorder %v959_v6, %v958_v3  ;;  %vm1009_vm12 = vcmp.eq.s32.totalorder %v959_v6, %v958_v3 }
 0x18e   : > { %vm1011_vm13 = vmand %vm1009_vm12, %vm1010_vm10 }
 0x18f   : > { %vm1012_vm14 = vmor %vm1008_vm11, %vm1011_vm13 }
 0x190   : > { %v1013_v8 = vsel %vm1012_vm14, %v959_v6, %v958_v3  ;;  %v1014_v10 = vsel %vm1012_vm14, %v991_v5, %v990_v2 }
 0x194   : > { %v992_v11 = vpop.trf.xlu1  ;;  %v960_v43 = vpop.trf.xlu0 }
 0x195   : > { %vm1019_vm15 = vcmp.lt.s32.totalorder %v992_v11, %v1014_v10  ;;  %vm1017_vm0 = vcmp.gt.s32.totalorder %v960_v43, %v1013_v8  ;;  %vm1018_vm1 = vcmp.eq.s32.totalorder %v960_v43, %v1013_v8 }
 0x196   : > { %vm1020_vm2 = vmand %vm1018_vm1, %vm1019_vm15 }
 0x197   : > { %vm1021_vm3 = vmor %vm1017_vm0, %vm1020_vm2 }
 0x198   : > { %v1022_v12 = vsel %vm1021_vm3, %v960_v43, %v1013_v8  ;;  %v1023_v13 = vsel %vm1021_vm3, %v992_v11, %v1014_v10 }
 0x19c   : > { %v993_v15 = vpop.trf.xlu1  ;;  %v961_v16 = vpop.trf.xlu0 }
 0x19d   : > { %vm1028_vm4 = vcmp.lt.s32.totalorder %v993_v15, %v1023_v13  ;;  %vm1026_vm5 = vcmp.gt.s32.totalorder %v961_v16, %v1022_v12  ;;  %vm1027_vm6 = vcmp.eq.s32.totalorder %v961_v16, %v1022_v12 }
 0x19e   : > { %vm1029_vm7 = vmand %vm1027_vm6, %vm1028_vm4 }
 0x19f   : > { %vm1030_vm8 = vmor %vm1026_vm5, %vm1029_vm7 }
 0x1a0   : > { %v1031_v17 = vsel %vm1030_vm8, %v961_v16, %v1022_v12  ;;  %v1032_v46 = vsel %vm1030_vm8, %v993_v15, %v1023_v13 }
 0x1a4   : > { %v994_v18 = vpop.trf.xlu1  ;;  %v962_v20 = vpop.trf.xlu0 }
 0x1a5   : > { %vm1037_vm9 = vcmp.lt.s32.totalorder %v994_v18, %v1032_v46  ;;  %vm1035_vm10 = vcmp.gt.s32.totalorder %v962_v20, %v1031_v17  ;;  %vm1036_vm11 = vcmp.eq.s32.totalorder %v962_v20, %v1031_v17 }
 0x1a6   : > { %vm1038_vm12 = vmand %vm1036_vm11, %vm1037_vm9 }
 0x1a7   : > { %vm1039_vm13 = vmor %vm1035_vm10, %vm1038_vm12 }
 0x1a8   : > { %v1040_v21 = vsel %vm1039_vm13, %v962_v20, %v1031_v17  ;;  %v1041_v22 = vsel %vm1039_vm13, %v994_v18, %v1032_v46 }
 0x1ac   : > { %v995_v25 = vpop.trf.xlu1  ;;  %v963_v26 = vpop.trf.xlu0 }
 0x1ad   : > { %vm1046_vm14 = vcmp.lt.s32.totalorder %v995_v25, %v1041_v22  ;;  %vm1044_vm15 = vcmp.gt.s32.totalorder %v963_v26, %v1040_v21  ;;  %vm1045_vm0 = vcmp.eq.s32.totalorder %v963_v26, %v1040_v21 }
 0x1ae   : > { %vm1047_vm1 = vmand %vm1045_vm0, %vm1046_vm14 }
 0x1af   : > { %vm1048_vm2 = vmor %vm1044_vm15, %vm1047_vm1 }
 0x1b0   : > { %v1049_v27 = vsel %vm1048_vm2, %v963_v26, %v1040_v21  ;;  %v1050_v28 = vsel %vm1048_vm2, %v995_v25, %v1041_v22 }
 0x1b4   : > { %v996_v29 = vpop.trf.xlu1  ;;  %v964_v32 = vpop.trf.xlu0 }
 0x1b5   : > { %vm1055_vm3 = vcmp.lt.s32.totalorder %v996_v29, %v1050_v28  ;;  %vm1053_vm4 = vcmp.gt.s32.totalorder %v964_v32, %v1049_v27  ;;  %vm1054_vm5 = vcmp.eq.s32.totalorder %v964_v32, %v1049_v27 }
 0x1b6   : > { %vm1056_vm6 = vmand %vm1054_vm5, %vm1055_vm3 }
 0x1b7   : > { %vm1057_vm7 = vmor %vm1053_vm4, %vm1056_vm6 }
 0x1b8   : > { %v1058_v34 = vsel %vm1057_vm7, %v964_v32, %v1049_v27  ;;  %v1059_v31 = vsel %vm1057_vm7, %v996_v29, %v1050_v28 }
 0x1bc   : > { %v997_v36 = vpop.trf.xlu1  ;;  %v965_v48 = vpop.trf.xlu0 }
 0x1bd   : > { %vm1064_vm8 = vcmp.lt.s32.totalorder %v997_v36, %v1059_v31  ;;  %vm1062_vm9 = vcmp.gt.s32.totalorder %v965_v48, %v1058_v34  ;;  %vm1063_vm10 = vcmp.eq.s32.totalorder %v965_v48, %v1058_v34 }
 0x1be   : > { %vm1065_vm11 = vmand %vm1063_vm10, %vm1064_vm8 }
 0x1bf   : > { %vm1066_vm12 = vmor %vm1062_vm9, %vm1065_vm11 }
 0x1c0   : > { %v1067_v38 = vsel %vm1066_vm12, %v965_v48, %v1058_v34  ;;  %v1068_v39 = vsel %vm1066_vm12, %v997_v36, %v1059_v31 }
 0x1c4   : > { %v998_v40 = vpop.trf.xlu1  ;;  %v966_v41 = vpop.trf.xlu0 }
 0x1c5   : > { %vm1073_vm13 = vcmp.lt.s32.totalorder %v998_v40, %v1068_v39  ;;  %vm1071_vm14 = vcmp.gt.s32.totalorder %v966_v41, %v1067_v38  ;;  %vm1072_vm15 = vcmp.eq.s32.totalorder %v966_v41, %v1067_v38 }
 0x1c6   : > { %vm1074_vm0 = vmand %vm1072_vm15, %vm1073_vm13 }
 0x1c7   : > { %vm1075_vm1 = vmor %vm1071_vm14, %vm1074_vm0 }
 0x1c8   : > { %v1076_v44 = vsel %vm1075_vm1, %v966_v41, %v1067_v38  ;;  %v1077_v45 = vsel %vm1075_vm1, %v998_v40, %v1068_v39  ;;  %v1817_v41 = vmov 2147483648  }
 0x1cc   : > { %v999_v59 = vpop.trf.xlu1  ;;  %v967_v47 = vpop.trf.xlu0 }
 0x1cd   : > { %vm1082_vm2 = vcmp.lt.s32.totalorder %v999_v59, %v1077_v45  ;;  %vm1080_vm3 = vcmp.gt.s32.totalorder %v967_v47, %v1076_v44  ;;  %vm1081_vm4 = vcmp.eq.s32.totalorder %v967_v47, %v1076_v44 }
 0x1ce   : > { %vm1083_vm5 = vmand %vm1081_vm4, %vm1082_vm2 }
 0x1cf   : > { %vm1084_vm6 = vmor %vm1080_vm3, %vm1083_vm5 }
 0x1d0   : > { %v1085_v50 = vsel %vm1084_vm6, %v967_v47, %v1076_v44  ;;  %v1086_v51 = vsel %vm1084_vm6, %v999_v59, %v1077_v45  ;;  %v1818_v44 = vmov 2147483647  }
 0x1d4   : > { %v1000_v33 = vpop.trf.xlu1  ;;  %v968_v52 = vpop.trf.xlu0 }
 0x1d5   : > { %vm1091_vm7 = vcmp.lt.s32.totalorder %v1000_v33, %v1086_v51  ;;  %vm1089_vm8 = vcmp.gt.s32.totalorder %v968_v52, %v1085_v50  ;;  %vm1090_vm9 = vcmp.eq.s32.totalorder %v968_v52, %v1085_v50 }
 0x1d6   : > { %vm1092_vm10 = vmand %vm1090_vm9, %vm1091_vm7 }
 0x1d7   : > { %vm1093_vm11 = vmor %vm1089_vm8, %vm1092_vm10 }
 0x1d8   : > { %v1094_v53 = vsel %vm1093_vm11, %v968_v52, %v1085_v50  ;;  %v1095_v55 = vsel %vm1093_vm11, %v1000_v33, %v1086_v51  ;;  %v1317_v51 = vld [vmem:[#allocation11] sm:$0xff] (%p499_p2)  ;;  %v1318_v33 = vld [vmem:[#allocation13] sm:$0xff] (%p499_p2)  ;;  %v1819_v52 = vmov (%p499_p2), 839939668  }
 0x1dc   : > { %v1001_v56 = vpop.trf.xlu1  ;;  %v969_v35 = vpop.trf.xlu0 }
 0x1dd   : > { %vm1100_vm12 = vcmp.lt.s32.totalorder %v1001_v56, %v1095_v55  ;;  %vm1098_vm13 = vcmp.gt.s32.totalorder %v969_v35, %v1094_v53  ;;  %vm1099_vm14 = vcmp.eq.s32.totalorder %v969_v35, %v1094_v53 }
 0x1de   : > { %vm1101_vm15 = vmand %vm1099_vm14, %vm1100_vm12 }
 0x1df   : > { %vm1102_vm0 = vmor %vm1098_vm13, %vm1101_vm15 }
 0x1e0   : > { %v1103_v57 = vsel %vm1102_vm0, %v969_v35, %v1094_v53  ;;  %v1104_v60 = vsel %vm1102_vm0, %v1001_v56, %v1095_v55  ;;  %v1342_v53 = vunpack.c.l.s4 (%p499_p2), %v1819_v52  ;;  %v1357_v56 = vand.u32 (%p499_p2), 4, %v1850_v7 }
 0x1e1   :  { %v1820_v35 = vmov (%p499_p2), 1417023538  }
 0x1e2   :  { %v2093_v55 = vunpack.c.0.s8 (%p499_p2), %v1342_v53 }
 0x1e4   : > { %v1002_v24 = vpop.trf.xlu1  ;;  %v970_v61 = vpop.trf.xlu0 }
 0x1e5   : > { %vm1109_vm1 = vcmp.lt.s32.totalorder %v1002_v24, %v1104_v60  ;;  %vm1107_vm2 = vcmp.gt.s32.totalorder %v970_v61, %v1103_v57  ;;  %vm1108_vm3 = vcmp.eq.s32.totalorder %v970_v61, %v1103_v57 }
 0x1e6   : > { %vm1110_vm4 = vmand %vm1108_vm3, %vm1109_vm1 }
 0x1e7   : > { %vm1111_vm5 = vmor %vm1107_vm2, %vm1110_vm4 }
 0x1e8   : > { %v1112_v63 = vsel %vm1111_vm5, %v970_v61, %v1103_v57  ;;  %v1113_v9 = vsel %vm1111_vm5, %v1002_v24, %v1104_v60  ;;  %v1364_v57 = vunpack.c.l.s4 (%p499_p2), %v1820_v35 }
 0x1ec   : > { %v1003_v14 = vpop.trf.xlu1  ;;  %v971_v19 = vpop.trf.xlu0 }
 0x1ed   : > { %vm1118_vm6 = vcmp.lt.s32.totalorder %v1003_v14, %v1113_v9  ;;  %vm1116_vm7 = vcmp.gt.s32.totalorder %v971_v19, %v1112_v63  ;;  %vm1117_vm8 = vcmp.eq.s32.totalorder %v971_v19, %v1112_v63 }
 0x1ee   : > { %vm1119_vm9 = vmand %vm1117_vm8, %vm1118_vm6 }
 0x1ef   : > { %vm1120_vm10 = vmor %vm1116_vm7, %vm1119_vm9 }
 0x1f0   : > { %v1121_v23 = vsel %vm1120_vm10, %v971_v19, %v1112_v63  ;;  %v1122_v30 = vsel %vm1120_vm10, %v1003_v14, %v1113_v9 }
 0x1f4   : > { %v1004_v37 = vpop.trf.xlu1  ;;  %v972_v42 = vpop.trf.xlu0 }
 0x1f5   : > { %vm1127_vm11 = vcmp.lt.s32.totalorder %v1004_v37, %v1122_v30  ;;  %vm1125_vm12 = vcmp.gt.s32.totalorder %v972_v42, %v1121_v23  ;;  %vm1126_vm13 = vcmp.eq.s32.totalorder %v972_v42, %v1121_v23 }
 0x1f6   : > { %vm1128_vm14 = vmand %vm1126_vm13, %vm1127_vm11 }
 0x1f7   : > { %vm1129_vm15 = vmor %vm1125_vm12, %vm1128_vm14 }
 0x1f8   : > { %v1130_v49 = vsel %vm1129_vm15, %v972_v42, %v1121_v23  ;;  %v1131_v54 = vsel %vm1129_vm15, %v1004_v37, %v1122_v30  ;;  %v2104_v30 = vunpack.c.0.s8 (%p499_p2), %v1364_v57  ;;  %v1379_v37 = vand.u32 (%p499_p2), 2, %v1850_v7 }
 0x1fc   : > { %v1005_v58 = vpop.trf.xlu1  ;;  %v973_v62 = vpop.trf.xlu0 }
 0x1fd   : > { %vm1136_vm0 = vcmp.lt.s32.totalorder %v1005_v58, %v1131_v54  ;;  %vm1134_vm1 = vcmp.gt.s32.totalorder %v973_v62, %v1130_v49  ;;  %vm1135_vm2 = vcmp.eq.s32.totalorder %v973_v62, %v1130_v49 }
 0x1fe   : > { %vm1137_vm3 = vmand %vm1135_vm2, %vm1136_vm0 }
 0x1ff   : > { %vm1138_vm4 = vmor %vm1134_vm1, %vm1137_vm3 }
 0x200   : > { %v1139_v0 = vsel %vm1138_vm4, %v973_v62, %v1130_v49  ;;  %v1140_v1 = vsel %vm1138_vm4, %v1005_v58, %v1131_v54  ;;  %v1821_v54 = vmov (%p499_p2), 1732584193  }
 0x201   : > { %v1142_v2 = vrot.slane %v1139_v0, 1  ;;  %v1143_v3 = vrot.slane %v1140_v1, 1  ;;  %v1386_v58 = vunpack.c.l.s4 (%p499_p2), %v1821_v54 }
 0x203   : > { %vm1145_vm5 = vcmp.gt.s32.totalorder %v1142_v2, %v1139_v0  ;;  %vm1146_vm6 = vcmp.eq.s32.totalorder %v1142_v2, %v1139_v0  ;;  %vm1147_vm7 = vcmp.lt.s32.totalorder %v1143_v3, %v1140_v1 }
 0x204   : > { %vm1148_vm8 = vmand %vm1146_vm6, %vm1147_vm7 }
 0x205   : > { %vm1149_vm9 = vmor %vm1145_vm5, %vm1148_vm8 }
 0x206   : > { %v1150_v5 = vsel %vm1149_vm9, %v1142_v2, %v1139_v0  ;;  %v1151_v6 = vsel %vm1149_vm9, %v1143_v3, %v1140_v1  ;;  %v2117_v3 = vunpack.c.0.s8 (%p499_p2), %v1386_v58 }
 0x207   : > { %v1153_v8 = vrot.slane %v1150_v5, 1  ;;  %v1154_v10 = vrot.slane %v1151_v6, 1 }
 0x209   : > { %vm1156_vm10 = vcmp.gt.s32.totalorder %v1153_v8, %v1150_v5  ;;  %vm1157_vm11 = vcmp.eq.s32.totalorder %v1153_v8, %v1150_v5  ;;  %vm1158_vm12 = vcmp.lt.s32.totalorder %v1154_v10, %v1151_v6 }
 0x20a   : > { %vm1159_vm13 = vmand %vm1157_vm11, %vm1158_vm12 }
 0x20b   : > { %vm1160_vm14 = vmor %vm1156_vm10, %vm1159_vm13 }
 0x20c   : > { %v1161_v11 = vsel %vm1160_vm14, %v1153_v8, %v1150_v5  ;;  %v1162_v43 = vsel %vm1160_vm14, %v1154_v10, %v1151_v6  ;;  %v1401_v10 = vand.u32 (%p499_p2), 1, %v1850_v7 }
 0x20d   : > { %v1164_v12 = vrot.slane %v1161_v11, 1  ;;  %v1165_v13 = vrot.slane %v1162_v43, 1 }
 0x20f   : > { %vm1169_vm15 = vcmp.lt.s32.totalorder %v1165_v13, %v1162_v43  ;;  %vm1167_vm0 = vcmp.gt.s32.totalorder %v1164_v12, %v1161_v11  ;;  %vm1168_vm1 = vcmp.eq.s32.totalorder %v1164_v12, %v1161_v11 }
 0x210   : > { %vm1170_vm2 = vmand %vm1168_vm1, %vm1169_vm15 }
 0x211   : > { %vm1171_vm3 = vmor %vm1167_vm0, %vm1170_vm2 }
 0x212   : > { %v1172_v15 = vsel %vm1171_vm3, %v1164_v12, %v1161_v11  ;;  %v1173_v16 = vsel %vm1171_vm3, %v1165_v13, %v1162_v43 }
 0x213   : > { %v1175_v17 = vrot.slane %v1172_v15, 1  ;;  %v1176_v46 = vrot.slane %v1173_v16, 1 }
 0x215   : > { %vm1178_vm4 = vcmp.gt.s32.totalorder %v1175_v17, %v1172_v15  ;;  %vm1179_vm5 = vcmp.eq.s32.totalorder %v1175_v17, %v1172_v15  ;;  %vm1180_vm6 = vcmp.lt.s32.totalorder %v1176_v46, %v1173_v16 }
 0x216   : > { %vm1181_vm7 = vmand %vm1179_vm5, %vm1180_vm6 }
 0x217   : > { %vm1182_vm8 = vmor %vm1178_vm4, %vm1181_vm7 }
 0x218   : > { %v1183_v18 = vsel %vm1182_vm8, %v1175_v17, %v1172_v15  ;;  %v1184_v20 = vsel %vm1182_vm8, %v1176_v46, %v1173_v16 }
 0x219   : > { %v1186_v21 = vrot.slane %v1183_v18, 1  ;;  %v1187_v22 = vrot.slane %v1184_v20, 1 }
 0x21b   : > { %vm1189_vm9 = vcmp.gt.s32.totalorder %v1186_v21, %v1183_v18  ;;  %vm1190_vm10 = vcmp.eq.s32.totalorder %v1186_v21, %v1183_v18  ;;  %vm1191_vm11 = vcmp.lt.s32.totalorder %v1187_v22, %v1184_v20 }
 0x21c   : > { %vm1192_vm12 = vmand %vm1190_vm10, %vm1191_vm11 }
 0x21d   : > { %vm1193_vm13 = vmor %vm1189_vm9, %vm1192_vm12 }
 0x21e   : > { %v1194_v25 = vsel %vm1193_vm13, %v1186_v21, %v1183_v18  ;;  %v1195_v26 = vsel %vm1193_vm13, %v1187_v22, %v1184_v20 }
 0x21f   : > { %v1197_v27 = vrot.slane %v1194_v25, 1  ;;  %v1198_v28 = vrot.slane %v1195_v26, 1 }
 0x221   : > { %vm1200_vm14 = vcmp.gt.s32.totalorder %v1197_v27, %v1194_v25  ;;  %vm1201_vm15 = vcmp.eq.s32.totalorder %v1197_v27, %v1194_v25  ;;  %vm1202_vm0 = vcmp.lt.s32.totalorder %v1198_v28, %v1195_v26 }
 0x222   : > { %vm1203_vm1 = vmand %vm1201_vm15, %vm1202_vm0 }
 0x223   : > { %vm1204_vm2 = vmor %vm1200_vm14, %vm1203_vm1 }
 0x224   : > { %v1205_v29 = vsel %vm1204_vm2, %v1197_v27, %v1194_v25  ;;  %v1206_v32 = vsel %vm1204_vm2, %v1198_v28, %v1195_v26  ;;  %vm2100_vm2 = vcmp.ne.s32.totalorder (%p499_p2), %v1357_v56, 0 }
 0x225   : > { %v1208_v34 = vrot.slane %v1205_v29, 1  ;;  %v1209_v31 = vrot.slane %v1206_v32, 1 }
 0x227   : > { %vm1211_vm3 = vcmp.gt.s32.totalorder %v1208_v34, %v1205_v29  ;;  %vm1212_vm4 = vcmp.eq.s32.totalorder %v1208_v34, %v1205_v29  ;;  %vm1213_vm5 = vcmp.lt.s32.totalorder %v1209_v31, %v1206_v32 }
 0x228   : > { %vm1214_vm6 = vmand %vm1212_vm4, %vm1213_vm5 }
 0x229   : > { %vm1215_vm7 = vmor %vm1211_vm3, %vm1214_vm6 }
 0x22a   : > { %v1217_v36 = vsel %vm1215_vm7, %v1209_v31, %v1206_v32  ;;  %v1216_v48 = vsel %vm1215_vm7, %v1208_v34, %v1205_v29 }
 0x22b   : > { %1224 = vxpose.xlu2.b32.start.end [1/1] (short) (narrow) %v1217_v36, 8  ;;  %1220 = vst [vmem:[%s1219_s17] sm:$0x1] %v1216_v48 }
 0x22c   : > { %1222 = vst [vmem:[%s1221_s18] sm:$0x1] %v1217_v36 }
 0x232   :  { %v1305_v47 = vld [vmem:[#allocation12 + $0x7] ss:$-1 sm:$0xff] (%p499_p2) }
 0x233   :  { %v1311_v50 = vld [vmem:[#allocation14 + $0x7] ss:$-1 sm:$0xff] (%p499_p2)  ;;  %vm1323_vm10 = vcmp.gt.s32.totalorder (%p499_p2), %v1317_v51, %v1305_v47  ;;  %vm1324_vm11 = vcmp.eq.s32.totalorder (%p499_p2), %v1317_v51, %v1305_v47 }
 0x234   :  { %vm1325_vm12 = vcmp.lt.s32.totalorder (%p499_p2), %v1318_v33, %v1311_v50 }
 0x235   :  { %vm1326_vm13 = vmand (%p499_p2), %vm1324_vm11, %vm1325_vm12  ;;  %vm2111_vm11 = vcmp.ne.s32.totalorder (%p499_p2), %v1379_v37, 0 }
 0x236   :  { %vm1327_vm14 = vmor (%p499_p2), %vm1323_vm10, %vm1326_vm13 }
 0x237   :  { %v1328_v60 = vsel (%p499_p2), %vm1327_vm14, %v1317_v51, %v1305_v47  ;;  %v1330_v24 = vsel (%p499_p2), %vm1327_vm14, %v1305_v47, %v1317_v51  ;;  %v1332_v61 = vsel (%p499_p2), %vm1327_vm14, %v1318_v33, %v1311_v50 }
 0x238   :  { %v1344_v63 = vperm.slane (%p499_p2), %v1328_v60, %v2093_v55  ;;  %v1348_v9 = vperm.slane (%p499_p2), %v1332_v61, %v2093_v55  ;;  %v1489_v14 = vperm.slane (%p499_p2), %v1330_v24, %v2093_v55 }
 0x23a   :  { %vm1350_vm15 = vcmp.gt.s32.totalorder (%p499_p2), %v1328_v60, %v1344_v63  ;;  %vm1351_vm0 = vcmp.eq.s32.totalorder (%p499_p2), %v1328_v60, %v1344_v63  ;;  %vm1352_vm1 = vcmp.lt.s32.totalorder (%p499_p2), %v1332_v61, %v1348_v9  ;;  %vm1496_vm4 = vcmp.eq.s32.totalorder (%p499_p2), %v1330_v24, %v1489_v14 }
 0x23b   :  { %vm1353_vm3 = vmand (%p499_p2), %vm1351_vm0, %vm1352_vm1  ;;  %vm1495_vm7 = vcmp.gt.s32.totalorder (%p499_p2), %v1330_v24, %v1489_v14 }
 0x23c   :  { %vm1354_vm6 = vmor (%p499_p2), %vm1350_vm15, %vm1353_vm3 }
 0x2c4   : > { %v1240_v38 = vpop.trf.xlu2 }
 0x2c5   : > { %v1279_v39 = vrot.slane %v1240_v38, 1  ;;  %1783 = vpush %v1240_v38 }
 0x2c7   : > { %1785 = vpush %v1279_v39 }
 0x2f6   : > { %s1784_s19 = spop %1783 }
 0x2f7   : > { %s1257_s20 = sshrl.u32 %s1784_s19, 9  ;;  %s1259_s21 = ssub.s32 0, %s1784_s19 }
 0x2f8   : > { %p1258_p0 = scmp.lt.s32.totalorder %s1784_s19, 0  ;;  %s1775_s22 = smin.u32 %s1784_s19, %s1259_s21 }
 0x2f9   : > { %s1261_s23 = sand.u32 511, %s1775_s22   ;;  %s1777_s24 = sshll.u32 %s1257_s20, 3 }
 0x2fa   : > { %s1262_s25 = ssub.s32 0, %s1261_s23  ;;  %s1786_s26 = spop %1785 }
 0x2fb   : > { %s2178_s25 = smov (!%p1258_p0, %s1262_s25), %s1261_s23  ;;  %s1283_s30 = ssub.s32 0, %s1786_s26 }
 0x2fc   : > { %s1264_s27 = sshrl.u32 %s2178_s25, 7  ;;  %s1266_s28 = sand.u32 127, %s2178_s25  }
 0x2fd   : > { %s1776_s29 = sshll.u32 %s1264_s27, 8  ;;  %s1779_s4 = smin.u32 %s1786_s26, %s1283_s30 }
 0x2fe   : > { %s1267_s3 = sadd.s32 %s1776_s29, %s1266_s28  ;;  %p1282_p1 = scmp.lt.s32.totalorder %s1786_s26, 0 }
 0x2ff   : > { %v1269_v40 = vstv %s1267_s3  ;;  %s1285_s5 = sand.u32 511, %s1779_s4   ;;  %s1273_s7 = scalar_lea.vmem [#allocation15], %s1777_s24 }
 0x300   : > { %vm1271_vm8 = vcmp.eq.s32.totalorder %v93_v4, %v1269_v40  ;;  %s1286_s6 = ssub.s32 0, %s1285_s5  ;;  %s1276_s8 = scalar_lea.vmem [#allocation16], %s1777_s24 }
 0x301   : > { %1274 = vst.msk [vmem:[%s1273_s7] sm:$0xff] %vm1271_vm8, %v1817_v41  ;;  %s2180_s6 = smov (!%p1282_p1, %s1286_s6), %s1285_s5  ;;  %s1281_s9 = sshrl.u32 %s1786_s26, 9 }
 0x302   : > { %1277 = vst.msk [vmem:[%s1276_s8] sm:$0xff] %vm1271_vm8, %v1818_v44  ;;  %s1288_s10 = sshrl.u32 %s2180_s6, 7  ;;  %s1290_s11 = sand.u32 127, %s2180_s6   ;;  %vm1359_vm8 = vmxor (%p499_p2), %vm1354_vm6, %vm2100_vm2 }
 0x303   : > { %s1780_s12 = sshll.u32 %s1288_s10, 8  ;;  %s1781_s14 = sshll.u32 %s1281_s9, 3  ;;  %v1360_v42 = vsel (%p499_p2), %vm1359_vm8, %v1328_v60, %v1344_v63  ;;  %v1361_v49 = vsel (%p499_p2), %vm1359_vm8, %v1332_v61, %v1348_v9 }
 0x304   : > { %s1291_s13 = sadd.s32 %s1780_s12, %s1290_s11  ;;  %s1297_s15 = scalar_lea.vmem [#allocation15], %s1781_s14  ;;  %v1366_v62 = vperm.slane (%p499_p2), %v1360_v42, %v2104_v30  ;;  %v1370_v0 = vperm.slane (%p499_p2), %v1361_v49, %v2104_v30 }
 0x305   : > { %v1293_v45 = vstv %s1291_s13  ;;  %s1300_s16 = scalar_lea.vmem [#allocation16], %s1781_s14 }
 0x306   : > { %v1294_v59 = vadd.s32 128, %v1293_v45  ;;  %501 = sbr.rel (!%p499_p2) target bundleno = 80 (0x50), region = 252  ;;  %vm1372_vm13 = vcmp.gt.s32.totalorder (%p499_p2), %v1360_v42, %v1366_v62  ;;  %vm1374_vm15 = vcmp.lt.s32.totalorder (%p499_p2), %v1361_v49, %v1370_v0 }
 0x308   : > { %vm1295_vm9 = vcmp.eq.s32.totalorder %v93_v4, %v1294_v59  ;;  %v1334_v4 = vsel (%p499_p2), %vm1327_vm14, %v1311_v50, %v1318_v33  ;;  %vm1373_vm14 = vcmp.eq.s32.totalorder (%p499_p2), %v1360_v42, %v1366_v62 }
 0x309   : > { %1298 = vst.msk [vmem:[%s1297_s15] sm:$0xff] %vm1295_vm9, %v1817_v41  ;;  %v1493_v19 = vperm.slane (%p499_p2), %v1334_v4, %v2093_v55  ;;  %vm1375_vm0 = vmand (%p499_p2), %vm1373_vm14, %vm1374_vm15 }
 0x30a   : > { %1301 = vst.msk [vmem:[%s1300_s16] sm:$0xff] %vm1295_vm9, %v1818_v44  ;;  %vm1376_vm1 = vmor (%p499_p2), %vm1372_vm13, %vm1375_vm0  ;;  %vm2126_vm13 = vcmp.ne.s32.totalorder (%p499_p2), %v1401_v10, 0 }
 0x30b   :  { %vm1497_vm5 = vcmp.lt.s32.totalorder %v1334_v4, %v1493_v19  ;;  %vm1381_vm3 = vmxor %vm1376_vm1, %vm2111_vm11 }
 0x30c   :  { %vm1498_vm9 = vmand %vm1496_vm4, %vm1497_vm5  ;;  %v1382_v11 = vsel %vm1381_vm3, %v1360_v42, %v1366_v62  ;;  %v1383_v43 = vsel %vm1381_vm3, %v1361_v49, %v1370_v0 }
 0x30d   :  { %vm1499_vm10 = vmor %vm1495_vm7, %vm1498_vm9  ;;  %v1388_v12 = vperm.slane %v1382_v11, %v2117_v3  ;;  %v1392_v13 = vperm.slane %v1383_v43, %v2117_v3 }
 0x30e   :  { %vm1504_vm12 = vmxor %vm1499_vm10, %vm2100_vm2 }
 0x30f   :  { %v1505_v2 = vsel %vm1504_vm12, %v1330_v24, %v1489_v14  ;;  %v1506_v5 = vsel %vm1504_vm12, %v1334_v4, %v1493_v19  ;;  %vm1394_vm9 = vcmp.gt.s32.totalorder %v1382_v11, %v1388_v12  ;;  %vm1395_vm10 = vcmp.eq.s32.totalorder %v1382_v11, %v1388_v12 }
 0x310   :  { %v1511_v6 = vperm.slane %v1505_v2, %v2104_v30  ;;  %v1515_v8 = vperm.slane %v1506_v5, %v2104_v30  ;;  %vm1396_vm12 = vcmp.lt.s32.totalorder %v1383_v43, %v1392_v13 }
 0x311   :  { %vm1397_vm15 = vmand %vm1395_vm10, %vm1396_vm12 }
 0x312   :  { %vm1517_vm4 = vcmp.gt.s32.totalorder %v1505_v2, %v1511_v6  ;;  %vm1518_vm5 = vcmp.eq.s32.totalorder %v1505_v2, %v1511_v6  ;;  %vm1519_vm6 = vcmp.lt.s32.totalorder %v1506_v5, %v1515_v8  ;;  %vm1398_vm0 = vmor %vm1394_vm9, %vm1397_vm15 }
 0x313   :  { %vm1520_vm7 = vmand %vm1518_vm5, %vm1519_vm6 }
 0x314   :  { %vm1521_vm8 = vmor %vm1517_vm4, %vm1520_vm7 }
 0x315   :  { %vm1526_vm14 = vmxor %vm1521_vm8, %vm2111_vm11 }
 0x316   :  { %v1527_v7 = vsel %vm1526_vm14, %v1505_v2, %v1511_v6  ;;  %v1528_v16 = vsel %vm1526_vm14, %v1506_v5, %v1515_v8  ;;  %vm1403_vm1 = vmxor %vm1398_vm0, %vm2126_vm13 }
 0x317   :  { %v1533_v17 = vperm.slane %v1527_v7, %v2117_v3  ;;  %v1537_v46 = vperm.slane %v1528_v16, %v2117_v3  ;;  %v1404_v18 = vsel %vm1403_vm1, %v1382_v11, %v1388_v12  ;;  %v1405_v20 = vsel %vm1403_vm1, %v1383_v43, %v1392_v13 }
 0x318   :  { %v1416_v21 = vperm.slane %v1404_v18, %v2093_v55  ;;  %v1420_v22 = vperm.slane %v1405_v20, %v2093_v55 }
 0x319   :  { %vm1539_vm3 = vcmp.gt.s32.totalorder %v1527_v7, %v1533_v17  ;;  %vm1540_vm4 = vcmp.eq.s32.totalorder %v1527_v7, %v1533_v17  ;;  %vm1541_vm5 = vcmp.lt.s32.totalorder %v1528_v16, %v1537_v46 }
 0x31a   :  { %vm1542_vm6 = vmand %vm1540_vm4, %vm1541_vm5  ;;  %vm1422_vm7 = vcmp.gt.s32.totalorder %v1404_v18, %v1416_v21  ;;  %vm1423_vm8 = vcmp.eq.s32.totalorder %v1404_v18, %v1416_v21  ;;  %vm1424_vm9 = vcmp.lt.s32.totalorder %v1405_v20, %v1420_v22 }
 0x31b   :  { %vm1543_vm10 = vmor %vm1539_vm3, %vm1542_vm6 }
 0x31c   :  { %vm1425_vm12 = vmand %vm1423_vm8, %vm1424_vm9 }
 0x31d   :  { %vm1426_vm14 = vmor %vm1422_vm7, %vm1425_vm12 }
 0x31e   :  { %vm1431_vm15 = vmxor %vm1426_vm14, %vm2100_vm2 }
 0x31f   :  { %v1432_v25 = vsel %vm1431_vm15, %v1404_v18, %v1416_v21  ;;  %v1433_v26 = vsel %vm1431_vm15, %v1405_v20, %v1420_v22  ;;  %vm1548_vm0 = vmxor %vm1543_vm10, %vm2126_vm13 }
 0x320   :  { %v1438_v27 = vperm.slane %v1432_v25, %v2104_v30  ;;  %v1442_v28 = vperm.slane %v1433_v26, %v2104_v30  ;;  %v1549_v29 = vsel %vm1548_vm0, %v1527_v7, %v1533_v17  ;;  %v1550_v32 = vsel %vm1548_vm0, %v1528_v16, %v1537_v46 }
 0x321   :  { %v1561_v34 = vperm.slane %v1549_v29, %v2093_v55  ;;  %v1565_v31 = vperm.slane %v1550_v32, %v2093_v55 }
 0x322   :  { %vm1444_vm1 = vcmp.gt.s32.totalorder %v1432_v25, %v1438_v27  ;;  %vm1445_vm3 = vcmp.eq.s32.totalorder %v1432_v25, %v1438_v27  ;;  %vm1446_vm4 = vcmp.lt.s32.totalorder %v1433_v26, %v1442_v28 }
 0x323   :  { %vm1447_vm5 = vmand %vm1445_vm3, %vm1446_vm4  ;;  %vm1568_vm6 = vcmp.eq.s32.totalorder %v1549_v29, %v1561_v34  ;;  %vm1569_vm7 = vcmp.lt.s32.totalorder %v1550_v32, %v1565_v31  ;;  %vm1567_vm9 = vcmp.gt.s32.totalorder %v1549_v29, %v1561_v34 }
 0x324   :  { %vm1448_vm8 = vmor %vm1444_vm1, %vm1447_vm5 }
 0x325   :  { %vm1453_vm10 = vmxor %vm1448_vm8, %vm2111_vm11 }
 0x326   :  { %v1454_v36 = vsel %vm1453_vm10, %v1432_v25, %v1438_v27  ;;  %v1455_v48 = vsel %vm1453_vm10, %v1433_v26, %v1442_v28  ;;  %vm1570_vm12 = vmand %vm1568_vm6, %vm1569_vm7 }
 0x327   :  { %v1460_v38 = vperm.slane %v1454_v36, %v2117_v3  ;;  %v1464_v39 = vperm.slane %v1455_v48, %v2117_v3  ;;  %vm1571_vm14 = vmor %vm1567_vm9, %vm1570_vm12 }
 0x328   :  { %vm1576_vm15 = vmxor %vm1571_vm14, %vm2100_vm2 }
 0x329   :  { %vm1466_vm0 = vcmp.gt.s32.totalorder %v1454_v36, %v1460_v38  ;;  %vm1467_vm3 = vcmp.eq.s32.totalorder %v1454_v36, %v1460_v38  ;;  %vm1468_vm4 = vcmp.lt.s32.totalorder %v1455_v48, %v1464_v39  ;;  %v1577_v40 = vsel %vm1576_vm15, %v1549_v29, %v1561_v34 }
 0x32a   :  { %vm1469_vm1 = vmand %vm1467_vm3, %vm1468_vm4  ;;  %v1578_v41 = vsel %vm1576_vm15, %v1550_v32, %v1565_v31  ;;  %v1583_v44 = vperm.slane %v1577_v40, %v2104_v30 }
 0x32b   :  { %vm1470_vm5 = vmor %vm1466_vm0, %vm1469_vm1  ;;  %v1587_v45 = vperm.slane %v1578_v41, %v2104_v30 }
 0x32c   :  { %vm1475_vm6 = vmxor %vm1470_vm5, %vm2126_vm13  ;;  %vm1589_vm7 = vcmp.gt.s32.totalorder %v1577_v40, %v1583_v44  ;;  %vm1590_vm8 = vcmp.eq.s32.totalorder %v1577_v40, %v1583_v44 }
 0x32d   :  { %v1476_v59 = vsel %vm1475_vm6, %v1454_v36, %v1460_v38  ;;  %v1477_v47 = vsel %vm1475_vm6, %v1455_v48, %v1464_v39  ;;  %vm1591_vm9 = vcmp.lt.s32.totalorder %v1578_v41, %v1587_v45 }
 0x32e   :  { %1479 = vst [vmem:[#allocation11] sm:$0xff] %v1476_v59  ;;  %vm1592_vm2 = vmand %vm1590_vm8, %vm1591_vm9 }
 0x32f   :  { %1480 = vst [vmem:[#allocation13] sm:$0xff] %v1477_v47  ;;  %vm1593_vm10 = vmor %vm1589_vm7, %vm1592_vm2 }
 0x330   :  { %vm1598_vm12 = vmxor %vm1593_vm10, %vm2111_vm11 }
 0x331   :  { %v1599_v50 = vsel %vm1598_vm12, %v1577_v40, %v1583_v44  ;;  %v1600_v51 = vsel %vm1598_vm12, %v1578_v41, %v1587_v45 }
 0x332   :  { %v1605_v33 = vperm.slane %v1599_v50, %v2117_v3  ;;  %v1609_v52 = vperm.slane %v1600_v51, %v2117_v3 }
 0x334   :  { %vm1611_vm14 = vcmp.gt.s32.totalorder %v1599_v50, %v1605_v33  ;;  %vm1612_vm15 = vcmp.eq.s32.totalorder %v1599_v50, %v1605_v33  ;;  %vm1613_vm0 = vcmp.lt.s32.totalorder %v1600_v51, %v1609_v52 }
 0x335   :  { %vm1614_vm3 = vmand %vm1612_vm15, %vm1613_vm0  ;;  %v1627_v56 = vld [vmem:[#allocation11] sm:$0xff] }
 0x336   :  { %vm1615_vm4 = vmor %vm1611_vm14, %vm1614_vm3  ;;  %vm1628_vm11 = vcmp.lt.s32.totalorder %v1627_v56, 0  ;;  %v1629_v35 = vsub.s32 2147483647, %v1627_v56  ;;  %v1651_v60 = vld [vmem:[#allocation13] sm:$0xff] }
 0x337   :  { %vm1620_vm1 = vmxor %vm1615_vm4, %vm2126_vm13 }
 0x338   :  { %v1621_v53 = vsel %vm1620_vm1, %v1599_v50, %v1605_v33  ;;  %v1622_v55 = vsel %vm1620_vm1, %v1600_v51, %v1609_v52  ;;  %v1630_v57 = vsel %vm1628_vm11, %v1629_v35, %v1627_v56 }
 0x339   :  { %1624 = vst [vmem:[#allocation12] sm:$0xff] %v1621_v53  ;;  %1633 = vxpose.xlu0.b32.start.end [1/1] (short) (narrow) %v1630_v57, 8 }
 0x33a   :  { %1625 = vst [vmem:[#allocation14] sm:$0xff] %v1622_v55 }
 0x33b   :  { %1631 = vst [vmem:[#allocation11] sm:$0xff] %v1630_v57 }
 0x341   :  { %1652 = vxpose.xlu0.b32.start.end [1/1] (short) (narrow) %v1651_v60, 8 }
 0x3dd   :  { %v1634_v24 = vpop.trf.xlu0 }
 0x3de   :  { %1650 = vst [vmem:[#allocation7] sm:$0xff] %v1634_v24 }
 0x3e5   :  { %v1672_v61 = vld [vmem:[#allocation7] sm:$0x3]  ;;  %v1653_v4 = vpop.trf.xlu0 }
 0x3e6   :  { %1675 = vst [vmem:[#allocation8] sm:$0x3] %v1672_v61 }
 0x3e7   :  { %1669 = vst [vmem:[#allocation9] sm:$0xff] %v1653_v4 }
 0x3ed   :  { %v1698_v63 = vld [vmem:[#allocation8] sm:$0x3] }
 0x3ee   :  { %1699 = vst [vmem:[%s2169_s1] sm:$0x3] %v1698_v63  ;;  %v1678_v9 = vld [vmem:[#allocation9] sm:$0x3] }
 0x3ef   :  { %1681 = vst [vmem:[#allocation10] sm:$0x3] %v1678_v9 }
 0x3f6   :  { %v1731_v14 = vld [vmem:[#allocation10] sm:$0x3] }
 0x3f7   :  { %1732 = vst [vmem:[%s2170_s2] sm:$0x3] %v1731_v14 }

// kernel: model_forward.32
= control target key start
LH: loop header
LB: loop body
LE: loop exit
PB: predicated region body
PF: predicated region fallthrough
CT: control target
= control target key end

     0   :  { %s718_s12 = smov 0   ;;  %s720_s13 = smov 0   ;;  %s832_s0 = inlined_call_operand.vmem [shape: f32[8,64], index: 0, kind: input, shape index: {}]   ;;  %s833_s1 = inlined_call_operand.vmem [shape: bf16[64,2560], index: 1, kind: input, shape index: {}]   ;;  %s834_s2 = inlined_call_operand.vmem [shape: f32[3,2560], index: 2, kind: input, shape index: {}]   ;;  %s835_s3 = inlined_call_operand.vmem [shape: f32[8,2560], index: 3, kind: output, shape index: {}]  }
   0x1   :  { %s722_s14 = smov 0  }
   0x2 LB: > { %s542_s15 = sadd.s32 4294967295, %s696_s14   ;;  %s735_s16 = sadd.s32 1, %s696_s14   ;;  %s696_s14 = sphi %s722_s14, %s838_s14   ;;  %s692_s13 = sphi %s720_s13, %s837_s13   ;;  %s688_s12 = sphi %s718_s12, %s836_s12  }
   0x3   : > { %s38_s17 = ssub.s32 %s696_s14, %s735_s16  ;;  %s41_s18 = sadd.s32 1, %s692_s13 }
   0x4   : > { %p39_p0 = scmp.eq.s32.totalorder %s38_s17, 0  ;;  %p48_p1 = scmp.ne.s32.totalorder %s692_s13, %s688_s12 }
   0x5   : > { %p49_p2 = scmp.eq.s32.totalorder %s696_s14, 0  ;;  %p545_p4 = scmp.ge.s32.totalorder %s696_s14, 5 }
   0x6   : > { %s744_s19 = scalar_select %p39_p0, %s692_s13, %s41_s18  }
   0x7   : > { %p50_p3 = por %p49_p2, %p48_p1  ;;  %129 = sbr.rel (%p545_p4) target bundleno = 32 (0x20), region = 20 }
   0xc   : > { %132 = sbr.rel (!%p50_p3) target bundleno = 32 (0x20), region = 24  ;;  %s134_s20 = sand.u32 (%p50_p3), 1, %s692_s13  }
   0xd   : > { %s625_s21 = sshll.u32 (%p50_p3), %s696_s14, 4  ;;  %s546_s22 = sshll.u32 (%p50_p3), %s134_s20, 7 }
   0xe   : > { %s752_s25 = scalar_lea.vmem (%p50_p3), %s833_s1, %s625_s21  ;;  %s136_s26 = scalar_lea.vmem (%p50_p3), [#allocation2], %s546_s22 }
   0xf   : > { %v152_v0 = vld [vmem:[%s752_s25] sm:$0xff] (%p50_p3)  ;;  %v154_v1 = vld [vmem:[%s752_s25 + $0x8] sm:$0xff] (%p50_p3)  ;;  %v156_v2 = vld [vmem:[%s752_s25 + $0x50] sm:$0xff] (%p50_p3) }
  0x10   : > { %153 = vst [vmem:[%s136_s26] sm:$0xff] (%p50_p3), %v152_v0  ;;  %v158_v3 = vld [vmem:[%s752_s25 + $0x58] sm:$0xff] (%p50_p3)  ;;  %v160_v4 = vld [vmem:[%s752_s25 + $0xa0] sm:$0xff] (%p50_p3)  ;;  %v162_v5 = vld [vmem:[%s752_s25 + $0xa8] sm:$0xff] (%p50_p3) }
  0x11   : > { %155 = vst [vmem:[%s136_s26 + $0x8] sm:$0xff] %v154_v1  ;;  %v164_v6 = vld [vmem:[%s752_s25 + $0xf0] sm:$0xff]  ;;  %v166_v7 = vld [vmem:[%s752_s25 + $0xf8] sm:$0xff]  ;;  %v168_v8 = vld [vmem:[%s752_s25 + $0x140] sm:$0xff] }
  0x12   : > { %157 = vst [vmem:[%s136_s26 + $0x10] sm:$0xff] %v156_v2  ;;  %v170_v9 = vld [vmem:[%s752_s25 + $0x148] sm:$0xff]  ;;  %v172_v10 = vld [vmem:[%s752_s25 + $0x190] sm:$0xff]  ;;  %v174_v11 = vld [vmem:[%s752_s25 + $0x198] sm:$0xff] }
  0x13   : > { %159 = vst [vmem:[%s136_s26 + $0x18] sm:$0xff] %v158_v3  ;;  %v176_v12 = vld [vmem:[%s752_s25 + $0x1e0] sm:$0xff]  ;;  %v178_v13 = vld [vmem:[%s752_s25 + $0x1e8] sm:$0xff]  ;;  %v180_v14 = vld [vmem:[%s752_s25 + $0x230] sm:$0xff] }
  0x14   : > { %161 = vst [vmem:[%s136_s26 + $0x20] sm:$0xff] %v160_v4  ;;  %v182_v15 = vld [vmem:[%s752_s25 + $0x238] sm:$0xff] }
  0x15   : > { %163 = vst [vmem:[%s136_s26 + $0x28] sm:$0xff] %v162_v5 }
  0x16   : > { %165 = vst [vmem:[%s136_s26 + $0x30] sm:$0xff] %v164_v6 }
  0x17   : > { %167 = vst [vmem:[%s136_s26 + $0x38] sm:$0xff] %v166_v7 }
  0x18   : > { %169 = vst [vmem:[%s136_s26 + $0x40] sm:$0xff] %v168_v8 }
  0x19   : > { %171 = vst [vmem:[%s136_s26 + $0x48] sm:$0xff] %v170_v9 }
  0x1a   : > { %173 = vst [vmem:[%s136_s26 + $0x50] sm:$0xff] %v172_v10 }
  0x1b   : > { %175 = vst [vmem:[%s136_s26 + $0x58] sm:$0xff] %v174_v11 }
  0x1c   : > { %177 = vst [vmem:[%s136_s26 + $0x60] sm:$0xff] %v176_v12 }
  0x1d   : > { %179 = vst [vmem:[%s136_s26 + $0x68] sm:$0xff] %v178_v13 }
  0x1e   : > { %181 = vst [vmem:[%s136_s26 + $0x70] sm:$0xff] %v180_v14 }
  0x1f   : > { %183 = vst [vmem:[%s136_s26 + $0x78] sm:$0xff] %v182_v15 }
  0x20 PF: > { %p549_p5 = scmp.ge.s32.totalorder %s696_s14, 1  ;;  %p197_p6 = scmp.lt.s32.totalorder %s696_s14, 6 }
  0x22   : > { %p198_p7 = pnand %p549_p5, %p197_p6 }
  0x23   : > { %s204_s27 = sand.u32 (!%p198_p7), 1, %s688_s12   ;;  %s551_s5 = sshll.u32 (!%p198_p7), %s542_s15, 2 }
  0x24   : > { %201 = sbr.rel (%p198_p7) target bundleno = 213 (0xd5), region = 51  ;;  %s550_s28 = sshll.u32 (!%p198_p7), %s204_s27, 7 }
  0x25   : > { %s773_s29 = scalar_lea.vmem (!%p198_p7), [#allocation2], %s550_s28  ;;  %p234_p8 = scmp.lt.s32.totalorder (!%p198_p7), %s551_s5, 19 }
  0x29   : > { %v605_v16 = vld [vmem:[%s773_s29 + $0x60] sm:$0xf]  ;;  %v640_v17 = vld [vmem:[%s773_s29 + $0x6c] sm:$0xf0]  ;;  %v638_v18 = vld [vmem:[%s773_s29 + $0x64] sm:$0xf] }
  0x2a   : > { %v606_v19 = vor.u32 %v640_v17, %v605_v16  ;;  %v607_v20 = vld [vmem:[%s773_s29 + $0x70] sm:$0xf0]  ;;  %v613_v21 = vld [vmem:[%s773_s29 + $0x68] sm:$0xf]  ;;  %v641_v22 = vld [vmem:[%s773_s29 + $0x74] sm:$0xf0] }
  0x2b   : > { %v610_v23 = vor.u32 %v638_v18, %v607_v20  ;;  %v614_v24 = vor.u32 %v641_v22, %v613_v21  ;;  %v639_v25 = vld [vmem:[%s773_s29 + $0x6c] sm:$0xf]  ;;  %v615_v26 = vld [vmem:[%s773_s29 + $0x78] sm:$0xf0]  ;;  %v589_v27 = vld [vmem:[%s773_s29 + $0x40] sm:$0xf] }
  0x2c   : > { %368 = vmatpush.bf16.msra.mxu0 %v606_v19  ;;  %v618_v28 = vor.u32 %v639_v25, %v615_v26  ;;  %v636_v29 = vld [vmem:[%s773_s29 + $0x4c] sm:$0xf0]  ;;  %v634_v30 = vld [vmem:[%s773_s29 + $0x44] sm:$0xf]  ;;  %v591_v31 = vld [vmem:[%s773_s29 + $0x50] sm:$0xf0] }
  0x2d   : > { %381 = vmatpush.bf16.msra.mxu1 %v610_v23  ;;  %394 = vmatpush.bf16.msra.mxu2 %v614_v24  ;;  %v590_v32 = vor.u32 %v636_v29, %v589_v27  ;;  %v594_v33 = vor.u32 %v634_v30, %v591_v31  ;;  %v597_v34 = vld [vmem:[%s773_s29 + $0x48] sm:$0xf]  ;;  %v637_v35 = vld [vmem:[%s773_s29 + $0x54] sm:$0xf0]  ;;  %v635_v36 = vld [vmem:[%s773_s29 + $0x4c] sm:$0xf] }
  0x2e   : > { %407 = vmatpush.bf16.msra.mxu3 %v618_v28  ;;  %v598_v37 = vor.u32 %v637_v35, %v597_v34  ;;  %v599_v38 = vld [vmem:[%s773_s29 + $0x58] sm:$0xf0]  ;;  %v573_v39 = vld [vmem:[%s773_s29 + $0x20] sm:$0xf]  ;;  %v632_v40 = vld [vmem:[%s773_s29 + $0x2c] sm:$0xf0] }
  0x2f   : > { %v602_v41 = vor.u32 %v635_v36, %v599_v38  ;;  %v630_v42 = vld [vmem:[%s773_s29 + $0x24] sm:$0xf]  ;;  %v575_v43 = vld [vmem:[%s773_s29 + $0x30] sm:$0xf0]  ;;  %v581_v44 = vld [vmem:[%s773_s29 + $0x28] sm:$0xf]  ;;  %v574_v45 = vor.u32 %v632_v40, %v573_v39 }
  0x30   : > { %369 = vmatpush.bf16.msra.mxu0 %v590_v32  ;;  %v633_v46 = vld [vmem:[%s773_s29 + $0x34] sm:$0xf0]  ;;  %v631_v47 = vld [vmem:[%s773_s29 + $0x2c] sm:$0xf]  ;;  %v583_v48 = vld [vmem:[%s773_s29 + $0x38] sm:$0xf0]  ;;  %v578_v49 = vor.u32 %v630_v42, %v575_v43 }
  0x31   : > { %382 = vmatpush.bf16.msra.mxu1 %v594_v33  ;;  %395 = vmatpush.bf16.msra.mxu2 %v598_v37  ;;  %v582_v50 = vor.u32 %v633_v46, %v581_v44  ;;  %v557_v51 = vld [vmem:[%s773_s29] sm:$0xf]  ;;  %v628_v52 = vld [vmem:[%s773_s29 + $0xc] sm:$0xf0]  ;;  %v626_v53 = vld [vmem:[%s773_s29 + $0x4] sm:$0xf]  ;;  %v586_v54 = vor.u32 %v631_v47, %v583_v48 }
  0x32   : > { %408 = vmatpush.bf16.msra.mxu3 %v602_v41  ;;  %v559_v55 = vld [vmem:[%s773_s29 + $0x10] sm:$0xf0]  ;;  %v565_v56 = vld [vmem:[%s773_s29 + $0x8] sm:$0xf]  ;;  %v629_v57 = vld [vmem:[%s773_s29 + $0x14] sm:$0xf0]  ;;  %v558_v60 = vor.u32 %v628_v52, %v557_v51 }
  0x33   : > { %v627_v58 = vld [vmem:[%s773_s29 + $0xc] sm:$0xf]  ;;  %v567_v59 = vld [vmem:[%s773_s29 + $0x18] sm:$0xf0]  ;;  %v246_v61 = vld [vmem:[%s832_s0] sm:$0xff]  ;;  %v562_v62 = vor.u32 %v626_v53, %v559_v55  ;;  %v566_v63 = vor.u32 %v629_v57, %v565_v56  ;;  %vm360_vm0 = vcmask 523264  }
  0x34   : > { %370 = vmatpush.bf16.msra.mxu0 %v574_v45  ;;  %v570_v0 = vor.u32 %v627_v58, %v567_v59  ;;  %v247_v1 = vpack.c.bf16 %v246_v61, %v246_v61  ;;  %s840_s5 = smov (!%p234_p8, %s551_s5), 19 }
  0x35   : > { %383 = vmatpush.bf16.msra.mxu1 %v578_v49  ;;  %396 = vmatpush.bf16.msra.mxu2 %v582_v50  ;;  %s552_s6 = sshll.u32 %s840_s5, 2  ;;  %s554_s10 = sshll.u32 %s840_s5, 3 }
  0x36   : > { %409 = vmatpush.bf16.msra.mxu3 %v586_v54  ;;  %s237_s9 = scalar_lea.vmem %s834_s2, %s552_s6  ;;  %s243_s14 = scalar_lea.vmem %s835_s3, %s554_s10 }
  0x37   : > { %v264_v2 = vld [vmem:[%s237_s9] sm:$0x77]  ;;  %v265_v6 = vld [vmem:[%s237_s9 + $0x8] sm:$0x77] }
  0x38   : > { %371 = vmatpush.bf16.msra.mxu0 %v558_v60  ;;  %v268_v3 = vperm.slane %v264_v2, 0  ;;  %v269_v4 = vperm.slane %v264_v2, 4  ;;  %v270_v9 = vperm.slane %v265_v6, 0  ;;  %v271_v12 = vperm.slane %v265_v6, 4 }
  0x39   : > { %384 = vmatpush.bf16.msra.mxu1 %v562_v62  ;;  %397 = vmatpush.bf16.msra.mxu2 %v566_v63  ;;  %v432_v19 = vperm.slane %v264_v2, 1  ;;  %v433_v23 = vperm.slane %v264_v2, 5  ;;  %v448_v26 = vperm.slane %v264_v2, 2  ;;  %v449_v29 = vperm.slane %v264_v2, 6 }
  0x3a   : > { %410 = vmatpush.bf16.msra.mxu3 %v570_v0  ;;  %v276_v5 = vperm.slane %v268_v3, 0  ;;  %v277_v7 = vperm.slane %v269_v4, 0  ;;  %v278_v16 = vperm.slane %v270_v9, 0  ;;  %v279_v17 = vperm.slane %v271_v12, 0 }
  0x3b   : > { %619 = vmatmul.msk.bf16.vlgmr.msra.gmra.mxu0 %vm360_vm0, %v247_v1  ;;  %v440_v33 = vperm.slane %v432_v19, 1  ;;  %v441_v35 = vperm.slane %v433_v23, 1  ;;  %v456_v37 = vperm.slane %v448_v26, 2  ;;  %v457_v39 = vperm.slane %v449_v29, 2 }
  0x3c   : > { %620 = vmatmul.msk.bf16.vlgmr.msra.gmra.mxu1 %vm360_vm0, %v247_v1  ;;  %621 = vmatmul.msk.bf16.vlgmr.msra.gmra.mxu2 %vm360_vm0, %v247_v1  ;;  %v434_v40 = vperm.slane %v265_v6, 1  ;;  %v435_v43 = vperm.slane %v265_v6, 5  ;;  %v450_v46 = vperm.slane %v265_v6, 2  ;;  %v451_v49 = vperm.slane %v265_v6, 6 }
  0x3d   : > { %622 = vmatmul.msk.bf16.vlgmr.msra.gmra.mxu3 %vm360_vm0, %v247_v1 }
  0x3e   : > { %v442_v53 = vperm.slane %v434_v40, 1  ;;  %v443_v55 = vperm.slane %v435_v43, 1  ;;  %v458_v57 = vperm.slane %v450_v46, 2  ;;  %v459_v59 = vperm.slane %v451_v49, 2 }
  0xb8   : > { %v373_v8 = vpop.f32.mrf.mxu0 }
  0xb9   : > { %v374_v10 = vadd.f32 %v373_v8, %v276_v5  ;;  %v386_v11 = vpop.f32.mrf.mxu1 }
  0xba   : > { %v387_v13 = vadd.f32 %v386_v11, %v277_v7 }
  0xbb   : > { %v416_v14 = vmul.f32 0.5, %v374_v10 }
  0xbc   : > { %v417_v15 = vmul.f32 0.5, %v387_v13 }
  0xbd   : > { %666 = vtanh.f32 %v416_v14 }
  0xbe   : > { %668 = vtanh.f32 %v417_v15 }
  0xbf   : > { %v399_v18 = vpop.f32.mrf.mxu2 }
  0xc0   : > { %v400_v20 = vadd.f32 %v399_v18, %v278_v16  ;;  %v412_v21 = vpop.f32.mrf.mxu3  ;;  %v375_v22 = vpop.f32.mrf.mxu0 }
  0xc1   : > { %v413_v24 = vadd.f32 %v412_v21, %v279_v17  ;;  %v388_v25 = vpop.f32.mrf.mxu1 }
  0xc2   : > { %v418_v27 = vmul.f32 0.5, %v400_v20 }
  0xc3   : > { %v667_v28 = vpop.eup %666  ;;  %v419_v30 = vmul.f32 0.5, %v413_v24 }
  0xc4   : > { %v669_v31 = vpop.eup %668  ;;  %v424_v32 = vadd.f32 1.0, %v667_v28  ;;  %670 = vtanh.f32 %v418_v27 }
  0xc5   : > { %v425_v34 = vadd.f32 1.0, %v669_v31  ;;  %672 = vtanh.f32 %v419_v30 }
  0xc6   : > { %v428_v36 = vmul.f32 0.5, %v424_v32 }
  0xc7   : > { %v429_v38 = vmul.f32 0.5, %v425_v34  ;;  %v401_v41 = vpop.f32.mrf.mxu2 }
  0xc8   : > { %v444_v42 = vmul.f32 %v440_v33, %v428_v36  ;;  %v414_v44 = vpop.f32.mrf.mxu3 }
  0xc9   : > { %v445_v45 = vmul.f32 %v441_v35, %v429_v38 }
  0xca   : > { %v671_v47 = vpop.eup %670  ;;  %v460_v48 = vadd.f32 %v456_v37, %v444_v42 }
  0xcb   : > { %v673_v50 = vpop.eup %672  ;;  %v461_v51 = vadd.f32 %v457_v39, %v445_v45  ;;  %v426_v52 = vadd.f32 1.0, %v671_v47 }
  0xcc   : > { %464 = vst [vmem:[%s243_s14] sm:$0xff] %v460_v48  ;;  %v427_v54 = vadd.f32 1.0, %v673_v50 }
  0xcd   : > { %465 = vst [vmem:[%s243_s14 + $0x8] sm:$0xff] %v461_v51  ;;  %v430_v56 = vmul.f32 0.5, %v426_v52 }
  0xce   : > { %v431_v58 = vmul.f32 0.5, %v427_v54 }
  0xcf   : > { %v446_v60 = vmul.f32 %v442_v53, %v430_v56 }
  0xd0   : > { %v447_v61 = vmul.f32 %v443_v55, %v431_v58 }
  0xd1   : > { %v462_v62 = vadd.f32 %v458_v57, %v446_v60 }
  0xd2   : > { %v463_v63 = vadd.f32 %v459_v59, %v447_v61 }
  0xd3   : > { %466 = vst [vmem:[%s243_s14 + $0x10] sm:$0xff] %v462_v62 }
  0xd4   : > { %467 = vst [vmem:[%s243_s14 + $0x18] sm:$0xff] %v463_v63 }
  0xd5 PF: > { %p10_p9 = scmp.ge.s32.totalorder %s735_s16, 7   ;;  %s836_s12 = smov %s692_s13 }
  0xd6   : > { %s837_s13 = smov %s744_s19  ;;  %s838_s14 = smov %s735_s16 }
  0xd7   :  { %12 = sbr.rel (!%p10_p9) target bundleno = 2 (0x2), region = 93 }

// kernel: reverse.1
= control target key start
LH: loop header
LB: loop body
LE: loop exit
PB: predicated region body
PF: predicated region fallthrough
CT: control target
= control target key end

     0   :  { %v2_v0 = vlaneseq  ;;  %s763_s0 = inlined_call_operand.vmem [shape: f32[8,32,63], index: 0, kind: input, shape index: {}]   ;;  %s764_s1 = inlined_call_operand.vmem [shape: f32[8,32,63], index: 1, kind: output, shape index: {}]  }
   0x1   :  { %v103_v2 = vld [vmem:[%s763_s0 + $0x20] sm:$0xff]  ;;  %v99_v3 = vld [vmem:[%s763_s0 + $0x10] sm:$0xff]  ;;  %v105_v5 = vld [vmem:[%s763_s0 + $0x28] sm:$0xff] }
   0x2   :  { %v3_v1 = vsub.s32 62, %v2_v0  ;;  %v95_v4 = vld [vmem:[%s763_s0] sm:$0xff]  ;;  %v101_v6 = vld [vmem:[%s763_s0 + $0x18] sm:$0xff]  ;;  %v97_v7 = vld [vmem:[%s763_s0 + $0x8] sm:$0xff] }
   0x3   :  { %v111_v8 = vld [vmem:[%s763_s0 + $0x40] sm:$0xff]  ;;  %v109_v9 = vld [vmem:[%s763_s0 + $0x38] sm:$0xff]  ;;  %v107_v10 = vld [vmem:[%s763_s0 + $0x30] sm:$0xff] }
   0x4   :  { %4 = vset.pattern.permute.xlu0 %v3_v1  ;;  %560 = vset.pattern.permute.xlu2 %v3_v1  ;;  %v117_v11 = vld [vmem:[%s763_s0 + $0x58] sm:$0xff]  ;;  %v115_v12 = vld [vmem:[%s763_s0 + $0x50] sm:$0xff]  ;;  %v113_v13 = vld [vmem:[%s763_s0 + $0x48] sm:$0xff] }
   0x5   :  { %559 = vset.pattern.permute.xlu1 %v3_v1  ;;  %187 = vperm.xlu2 %560, %v103_v2   ;;  %v123_v14 = vld [vmem:[%s763_s0 + $0x70] sm:$0xff]  ;;  %v121_v15 = vld [vmem:[%s763_s0 + $0x68] sm:$0xff]  ;;  %v119_v16 = vld [vmem:[%s763_s0 + $0x60] sm:$0xff] }
   0x6   :  { %175 = vperm.xlu1 %559, %v99_v3   ;;  %163 = vperm.xlu0 %4, %v95_v4   ;;  %v129_v17 = vld [vmem:[%s763_s0 + $0x88] sm:$0xff]  ;;  %v127_v18 = vld [vmem:[%s763_s0 + $0x80] sm:$0xff]  ;;  %v125_v19 = vld [vmem:[%s763_s0 + $0x78] sm:$0xff] }
   0x7   :  { %v135_v20 = vld [vmem:[%s763_s0 + $0xa0] sm:$0xff]  ;;  %v133_v21 = vld [vmem:[%s763_s0 + $0x98] sm:$0xff]  ;;  %v131_v22 = vld [vmem:[%s763_s0 + $0x90] sm:$0xff] }
   0x8   :  { %v141_v23 = vld [vmem:[%s763_s0 + $0xb8] sm:$0xff]  ;;  %v139_v24 = vld [vmem:[%s763_s0 + $0xb0] sm:$0xff]  ;;  %v137_v25 = vld [vmem:[%s763_s0 + $0xa8] sm:$0xff] }
   0x9   :  { %v147_v26 = vld [vmem:[%s763_s0 + $0xd0] sm:$0xff]  ;;  %v145_v27 = vld [vmem:[%s763_s0 + $0xc8] sm:$0xff]  ;;  %v143_v28 = vld [vmem:[%s763_s0 + $0xc0] sm:$0xff] }
   0xa   :  { %v153_v29 = vld [vmem:[%s763_s0 + $0xe8] sm:$0xff]  ;;  %v151_v30 = vld [vmem:[%s763_s0 + $0xe0] sm:$0xff]  ;;  %v149_v31 = vld [vmem:[%s763_s0 + $0xd8] sm:$0xff] }
   0xb   :  { %v157_v32 = vld [vmem:[%s763_s0 + $0xf8] sm:$0xff]  ;;  %v155_v33 = vld [vmem:[%s763_s0 + $0xf0] sm:$0xff] }
   0xd   :  { %193 = vperm.xlu2 %560, %v105_v5  }
   0xe   :  { %181 = vperm.xlu1 %559, %v101_v6   ;;  %169 = vperm.xlu0 %4, %v97_v7  }
  0x15   :  { %211 = vperm.xlu2 %560, %v111_v8  }
  0x16   :  { %205 = vperm.xlu1 %559, %v109_v9   ;;  %199 = vperm.xlu0 %4, %v107_v10  }
  0x1d   :  { %229 = vperm.xlu2 %560, %v117_v11  }
  0x1e   :  { %223 = vperm.xlu1 %559, %v115_v12   ;;  %217 = vperm.xlu0 %4, %v113_v13  }
  0x25   :  { %247 = vperm.xlu2 %560, %v123_v14  }
  0x26   :  { %241 = vperm.xlu1 %559, %v121_v15   ;;  %235 = vperm.xlu0 %4, %v119_v16  }
  0x2d   :  { %265 = vperm.xlu2 %560, %v129_v17  }
  0x2e   :  { %259 = vperm.xlu1 %559, %v127_v18   ;;  %253 = vperm.xlu0 %4, %v125_v19  }
  0x35   :  { %283 = vperm.xlu2 %560, %v135_v20  }
  0x36   :  { %277 = vperm.xlu1 %559, %v133_v21   ;;  %271 = vperm.xlu0 %4, %v131_v22  }
  0x3d   :  { %301 = vperm.xlu2 %560, %v141_v23  }
  0x3e   :  { %295 = vperm.xlu1 %559, %v139_v24   ;;  %289 = vperm.xlu0 %4, %v137_v25  }
  0x45   :  { %319 = vperm.xlu2 %560, %v147_v26  }
  0x46   :  { %313 = vperm.xlu1 %559, %v145_v27   ;;  %307 = vperm.xlu0 %4, %v143_v28  }
  0x4d   :  { %337 = vperm.xlu2 %560, %v153_v29  }
  0x4e   :  { %331 = vperm.xlu1 %559, %v151_v30   ;;  %325 = vperm.xlu0 %4, %v149_v31  }
  0x56   :  { %349 = vperm.xlu1 %559, %v157_v32   ;;  %343 = vperm.xlu0 %4, %v155_v33  }
  0x5f   :  { %v188_v34 = vpop.permute.xlu2 %187 }
  0x60   :  { %451 = vst [vmem:[%s764_s1 + $0x20] sm:$0xff] %v188_v34 }
  0x67   :  { %v194_v35 = vpop.permute.xlu2 %193 }
  0x68   :  { %453 = vst [vmem:[%s764_s1 + $0x28] sm:$0xff] %v194_v35 }
  0x6f   :  { %v212_v36 = vpop.permute.xlu2 %211 }
  0x70   :  { %459 = vst [vmem:[%s764_s1 + $0x40] sm:$0xff] %v212_v36 }
  0x77   :  { %v230_v37 = vpop.permute.xlu2 %229 }
  0x78   :  { %v176_v38 = vpop.permute.xlu1 %175  ;;  %465 = vst [vmem:[%s764_s1 + $0x58] sm:$0xff] %v230_v37  ;;  %v164_v39 = vpop.permute.xlu0 %163 }
  0x79   :  { %447 = vst [vmem:[%s764_s1 + $0x10] sm:$0xff] %v176_v38 }
  0x7a   :  { %443 = vst [vmem:[%s764_s1] sm:$0xff] %v164_v39 }
  0x7f   :  { %v248_v40 = vpop.permute.xlu2 %247 }
  0x80   :  { %v182_v41 = vpop.permute.xlu1 %181  ;;  %471 = vst [vmem:[%s764_s1 + $0x70] sm:$0xff] %v248_v40  ;;  %v170_v42 = vpop.permute.xlu0 %169 }
  0x81   :  { %449 = vst [vmem:[%s764_s1 + $0x18] sm:$0xff] %v182_v41 }
  0x82   :  { %445 = vst [vmem:[%s764_s1 + $0x8] sm:$0xff] %v170_v42 }
  0x87   :  { %v266_v43 = vpop.permute.xlu2 %265 }
  0x88   :  { %v206_v44 = vpop.permute.xlu1 %205  ;;  %477 = vst [vmem:[%s764_s1 + $0x88] sm:$0xff] %v266_v43  ;;  %v200_v45 = vpop.permute.xlu0 %199 }
  0x89   :  { %457 = vst [vmem:[%s764_s1 + $0x38] sm:$0xff] %v206_v44 }
  0x8a   :  { %455 = vst [vmem:[%s764_s1 + $0x30] sm:$0xff] %v200_v45 }
  0x8f   :  { %v284_v46 = vpop.permute.xlu2 %283 }
  0x90   :  { %v224_v47 = vpop.permute.xlu1 %223  ;;  %483 = vst [vmem:[%s764_s1 + $0xa0] sm:$0xff] %v284_v46  ;;  %v218_v48 = vpop.permute.xlu0 %217 }
  0x91   :  { %463 = vst [vmem:[%s764_s1 + $0x50] sm:$0xff] %v224_v47 }
  0x92   :  { %461 = vst [vmem:[%s764_s1 + $0x48] sm:$0xff] %v218_v48 }
  0x97   :  { %v302_v49 = vpop.permute.xlu2 %301 }
  0x98   :  { %v242_v50 = vpop.permute.xlu1 %241  ;;  %489 = vst [vmem:[%s764_s1 + $0xb8] sm:$0xff] %v302_v49  ;;  %v236_v51 = vpop.permute.xlu0 %235 }
  0x99   :  { %469 = vst [vmem:[%s764_s1 + $0x68] sm:$0xff] %v242_v50 }
  0x9a   :  { %467 = vst [vmem:[%s764_s1 + $0x60] sm:$0xff] %v236_v51 }
  0x9f   :  { %v320_v52 = vpop.permute.xlu2 %319 }
  0xa0   :  { %v260_v53 = vpop.permute.xlu1 %259  ;;  %495 = vst [vmem:[%s764_s1 + $0xd0] sm:$0xff] %v320_v52  ;;  %v254_v54 = vpop.permute.xlu0 %253 }
  0xa1   :  { %475 = vst [vmem:[%s764_s1 + $0x80] sm:$0xff] %v260_v53 }
  0xa2   :  { %473 = vst [vmem:[%s764_s1 + $0x78] sm:$0xff] %v254_v54 }
  0xa7   :  { %v338_v55 = vpop.permute.xlu2 %337 }
  0xa8   :  { %v278_v56 = vpop.permute.xlu1 %277  ;;  %501 = vst [vmem:[%s764_s1 + $0xe8] sm:$0xff] %v338_v55  ;;  %v272_v57 = vpop.permute.xlu0 %271 }
  0xa9   :  { %481 = vst [vmem:[%s764_s1 + $0x98] sm:$0xff] %v278_v56 }
  0xaa   :  { %479 = vst [vmem:[%s764_s1 + $0x90] sm:$0xff] %v272_v57 }
  0xb0   :  { %v296_v58 = vpop.permute.xlu1 %295  ;;  %v290_v59 = vpop.permute.xlu0 %289 }
  0xb1   :  { %487 = vst [vmem:[%s764_s1 + $0xb0] sm:$0xff] %v296_v58 }
  0xb2   :  { %485 = vst [vmem:[%s764_s1 + $0xa8] sm:$0xff] %v290_v59 }
  0xb8   :  { %v314_v60 = vpop.permute.xlu1 %313  ;;  %v308_v61 = vpop.permute.xlu0 %307 }
  0xb9   :  { %493 = vst [vmem:[%s764_s1 + $0xc8] sm:$0xff] %v314_v60 }
  0xba   :  { %491 = vst [vmem:[%s764_s1 + $0xc0] sm:$0xff] %v308_v61 }
  0xc0   :  { %v332_v62 = vpop.permute.xlu1 %331  ;;  %v326_v63 = vpop.permute.xlu0 %325 }
  0xc1   :  { %499 = vst [vmem:[%s764_s1 + $0xe0] sm:$0xff] %v332_v62 }
  0xc2   :  { %497 = vst [vmem:[%s764_s1 + $0xd8] sm:$0xff] %v326_v63 }
  0xc8   :  { %v350_v0 = vpop.permute.xlu1 %349  ;;  %v344_v1 = vpop.permute.xlu0 %343 }
  0xc9   :  { %505 = vst [vmem:[%s764_s1 + $0xf8] sm:$0xff] %v350_v0 }
  0xca   :  { %503 = vst [vmem:[%s764_s1 + $0xf0] sm:$0xff] %v344_v1 }

// kernel: model_forward.31
= control target key start
LH: loop header
LB: loop body
LE: loop exit
PB: predicated region body
PF: predicated region fallthrough
CT: control target
= control target key end

     0   :  { %s3795_s18 = smov 0   ;;  %s5531_s0 = inlined_call_operand.vmem [shape: f32[8,64], index: 0, kind: input, shape index: {}]   ;;  %s5532_s1 = inlined_call_operand.vmem [shape: bf16[4,64,128], index: 1, kind: input, shape index: {}]   ;;  %s5533_s2 = inlined_call_operand.vmem [shape: f32[4,1,128], index: 2, kind: input, shape index: {}]   ;;  %s5534_s3 = inlined_call_operand.vmem [shape: bf16[128,4096], index: 3, kind: input, shape index: {}]   ;;  %s5535_s4 = inlined_call_operand.vmem [shape: f32[8,4096], index: 4, kind: input, shape index: {}]   ;;  %s5536_s5 = inlined_call_operand.vmem [shape: f32[4,8,4096], index: 5, kind: output, shape index: {}]  }
   0x1 LB: > { %s2430_s19 = sadd.s32 4294967295, %s3763_s18   ;;  %p2434_p0 = scmp.ge.s32.totalorder %s3763_s18, 1  ;;  %s3763_s18 = sphi %s3795_s18, %s15_s18  }
   0x2   : > { %p195_p1 = scmp.lt.s32.totalorder %s3763_s18, 5 }
   0x4   : > { %p196_p2 = pnand %p2434_p0, %p195_p1 }
   0x5   : > { %p226_p3 = scmp.lt.s32.totalorder (!%p196_p2), %s2430_s19, 3 }
   0x6   : > { %199 = sbr.rel (%p196_p2) target bundleno = 756 (0x2f4), region = 40 }
   0xb   : > { %s5538_s19 = smov (!%p226_p3, %s2430_s19), 3  ;;  %v240_v4 = vld [vmem:[%s5531_s0] sm:$0xff]  ;;  %vm278_vm0 = vcmask 523264   ;;  %v3362_v15 = vld [vmem:[%s5534_s3 + $0x708] sm:$0xf] }
   0xc   : > { %s3482_s20 = sshll.u32 %s5538_s19, 5  ;;  %s233_s26 = scalar_lea.vmem %s5533_s2, %s5538_s19  ;;  %v241_v5 = vpack.c.bf16 %v240_v4, %v240_v4  ;;  %v3354_v10 = vld [vmem:[%s5534_s3 + $0x700] sm:$0xf]  ;;  %v3712_v12 = vld [vmem:[%s5534_s3 + $0x704] sm:$0xf] }
   0xd   : > { %s230_s23 = scalar_lea.vmem %s5532_s1, %s3482_s20  ;;  %v3752_v6 = vld [vmem:[%s233_s26] ss:$0 sm:$0xff]  ;;  %v3356_v14 = vld [vmem:[%s5534_s3 + $0x780] sm:$0xf0]  ;;  %v3729_v16 = vld [vmem:[%s5534_s3 + $0x784] sm:$0xf0] }
   0xe   : > { %v3487_v0 = vld [vmem:[%s230_s23 + $0x18] sm:$0xff]  ;;  %v3486_v1 = vld [vmem:[%s230_s23 + $0x10] sm:$0xff]  ;;  %v3485_v2 = vld [vmem:[%s230_s23 + $0x8] sm:$0xff]  ;;  %v3359_v17 = vor.u32 %v3712_v12, %v3356_v14  ;;  %v3363_v18 = vor.u32 %v3729_v16, %v3362_v15  ;;  %s3483_s24 = sshll.u32 %s5538_s19, 8 }
   0xf   : > { %286 = vmatpush.bf16.msra.mxu0 %v3487_v0  ;;  %v3484_v3 = vld [vmem:[%s230_s23] sm:$0xff]  ;;  %v3713_v19 = vld [vmem:[%s5534_s3 + $0x70c] sm:$0xf]  ;;  %v3234_v28 = vld [vmem:[%s5534_s3 + $0x608] sm:$0xf]  ;;  %s5082_s23 = scalar_lea.vmem %s5536_s5, %s3483_s24 }
  0x10   : > { %v3728_v11 = vld [vmem:[%s5534_s3 + $0x77c] sm:$0xf0]  ;;  %v3364_v20 = vld [vmem:[%s5534_s3 + $0x788] sm:$0xf0]  ;;  %v3680_v24 = vld [vmem:[%s5534_s3 + $0x604] sm:$0xf]  ;;  %1867 = vmatpush.bf16.msra.mxu2 %v3359_v17  ;;  %1880 = vmatpush.bf16.msra.mxu3 %v3363_v18 }
  0x11   : > { %v3355_v13 = vor.u32 %v3728_v11, %v3354_v10  ;;  %v3226_v21 = vld [vmem:[%s5534_s3 + $0x600] sm:$0xf]  ;;  %v3367_v22 = vor.u32 %v3713_v19, %v3364_v20  ;;  %v3228_v25 = vld [vmem:[%s5534_s3 + $0x680] sm:$0xf0]  ;;  %v3697_v29 = vld [vmem:[%s5534_s3 + $0x684] sm:$0xf0] }
  0x12   : > { %v3696_v23 = vld [vmem:[%s5534_s3 + $0x67c] sm:$0xf0]  ;;  %v3231_v27 = vor.u32 %v3680_v24, %v3228_v25  ;;  %v3681_v30 = vld [vmem:[%s5534_s3 + $0x60c] sm:$0xf]  ;;  %v3235_v31 = vor.u32 %v3697_v29, %v3234_v28  ;;  %v3648_v36 = vld [vmem:[%s5534_s3 + $0x504] sm:$0xf] }
  0x13   : > { %287 = vmatpush.bf16.msra.mxu0 %v3486_v1  ;;  %1854 = vmatpush.bf16.msra.mxu1 %v3355_v13  ;;  %v3227_v26 = vor.u32 %v3696_v23, %v3226_v21  ;;  %v3236_v32 = vld [vmem:[%s5534_s3 + $0x688] sm:$0xf0]  ;;  %v3098_v33 = vld [vmem:[%s5534_s3 + $0x500] sm:$0xf]  ;;  %v3100_v37 = vld [vmem:[%s5534_s3 + $0x580] sm:$0xf0] }
  0x14   : > { %v3664_v34 = vld [vmem:[%s5534_s3 + $0x57c] sm:$0xf0]  ;;  %v3239_v35 = vor.u32 %v3681_v30, %v3236_v32  ;;  %v3106_v38 = vld [vmem:[%s5534_s3 + $0x508] sm:$0xf]  ;;  %v3649_v41 = vld [vmem:[%s5534_s3 + $0x50c] sm:$0xf]  ;;  %1868 = vmatpush.bf16.msra.mxu2 %v3231_v27  ;;  %1881 = vmatpush.bf16.msra.mxu3 %v3235_v31  ;;  %v3103_v43 = vor.u32 %v3648_v36, %v3100_v37 }
  0x15   : > { %v3099_v39 = vor.u32 %v3664_v34, %v3098_v33  ;;  %v3665_v40 = vld [vmem:[%s5534_s3 + $0x584] sm:$0xf0]  ;;  %v3108_v42 = vld [vmem:[%s5534_s3 + $0x588] sm:$0xf0]  ;;  %v2970_v45 = vld [vmem:[%s5534_s3 + $0x400] sm:$0xf] }
  0x16   : > { %v3107_v44 = vor.u32 %v3665_v40, %v3106_v38  ;;  %v3632_v46 = vld [vmem:[%s5534_s3 + $0x47c] sm:$0xf0]  ;;  %v3616_v47 = vld [vmem:[%s5534_s3 + $0x404] sm:$0xf]  ;;  %v3111_v48 = vor.u32 %v3649_v41, %v3108_v42  ;;  %v2978_v50 = vld [vmem:[%s5534_s3 + $0x408] sm:$0xf] }
  0x17   : > { %288 = vmatpush.bf16.msra.mxu0 %v3485_v2  ;;  %1855 = vmatpush.bf16.msra.mxu1 %v3227_v26  ;;  %v2972_v49 = vld [vmem:[%s5534_s3 + $0x480] sm:$0xf0]  ;;  %v3633_v51 = vld [vmem:[%s5534_s3 + $0x484] sm:$0xf0]  ;;  %v3617_v52 = vld [vmem:[%s5534_s3 + $0x40c] sm:$0xf]  ;;  %v2971_v54 = vor.u32 %v3632_v46, %v2970_v45 }
  0x18   : > { %v2980_v53 = vld [vmem:[%s5534_s3 + $0x488] sm:$0xf0]  ;;  %1869 = vmatpush.bf16.msra.mxu2 %v3103_v43  ;;  %1882 = vmatpush.bf16.msra.mxu3 %v3107_v44  ;;  %v2975_v55 = vor.u32 %v3616_v47, %v2972_v49  ;;  %v2979_v56 = vor.u32 %v3633_v51, %v2978_v50  ;;  %v2842_v57 = vld [vmem:[%s5534_s3 + $0x300] sm:$0xf]  ;;  %v3584_v59 = vld [vmem:[%s5534_s3 + $0x304] sm:$0xf] }
  0x19   : > { %v3600_v58 = vld [vmem:[%s5534_s3 + $0x37c] sm:$0xf0]  ;;  %v2983_v60 = vor.u32 %v3617_v52, %v2980_v53  ;;  %v2844_v61 = vld [vmem:[%s5534_s3 + $0x380] sm:$0xf0]  ;;  %v2850_v62 = vld [vmem:[%s5534_s3 + $0x308] sm:$0xf] }
  0x1a   : > { %v3601_v63 = vld [vmem:[%s5534_s3 + $0x384] sm:$0xf0]  ;;  %v3585_v0 = vld [vmem:[%s5534_s3 + $0x30c] sm:$0xf]  ;;  %v2843_v2 = vor.u32 %v3600_v58, %v2842_v57  ;;  %v2716_v10 = vld [vmem:[%s5534_s3 + $0x280] sm:$0xf0] }
  0x1b   : > { %289 = vmatpush.bf16.msra.mxu0 %v3484_v3  ;;  %1856 = vmatpush.bf16.msra.mxu1 %v3099_v39  ;;  %v2852_v1 = vld [vmem:[%s5534_s3 + $0x388] sm:$0xf0]  ;;  %v2847_v3 = vor.u32 %v3584_v59, %v2844_v61  ;;  %v2851_v4 = vor.u32 %v3601_v63, %v2850_v62  ;;  %v2722_v11 = vld [vmem:[%s5534_s3 + $0x208] sm:$0xf]  ;;  %v2586_v19 = vld [vmem:[%s5534_s3 + $0x100] sm:$0xf] }
  0x1c   : > { %1870 = vmatpush.bf16.msra.mxu2 %v2975_v55  ;;  %1883 = vmatpush.bf16.msra.mxu3 %v2979_v56  ;;  %v3569_v12 = vld [vmem:[%s5534_s3 + $0x284] sm:$0xf0]  ;;  %v3553_v13 = vld [vmem:[%s5534_s3 + $0x20c] sm:$0xf]  ;;  %v3536_v20 = vld [vmem:[%s5534_s3 + $0x17c] sm:$0xf0] }
  0x1d   : > { %v2724_v14 = vld [vmem:[%s5534_s3 + $0x288] sm:$0xf0]  ;;  %v2723_v18 = vor.u32 %v3569_v12, %v2722_v11  ;;  %v3520_v21 = vld [vmem:[%s5534_s3 + $0x104] sm:$0xf]  ;;  %v2594_v25 = vld [vmem:[%s5534_s3 + $0x108] sm:$0xf]  ;;  %v2587_v29 = vor.u32 %v3536_v20, %v2586_v19 }
  0x1e   : > { %2455 = vmatmul.msk.bf16.vlgmr.msra.gmra.mxu0 %vm278_vm0, %v241_v5  ;;  %v2714_v5 = vld [vmem:[%s5534_s3 + $0x200] sm:$0xf]  ;;  %v2727_v23 = vor.u32 %v3553_v13, %v2724_v14  ;;  %v2588_v24 = vld [vmem:[%s5534_s3 + $0x180] sm:$0xf0]  ;;  %v3537_v26 = vld [vmem:[%s5534_s3 + $0x184] sm:$0xf0] }
  0x1f   : > { %1893 = vmatpush.bf16.msrb.mxu0 %v3367_v22  ;;  %1857 = vmatpush.bf16.msra.mxu1 %v2971_v54  ;;  %v3521_v27 = vld [vmem:[%s5534_s3 + $0x10c] sm:$0xf]  ;;  %v2458_v30 = vld [vmem:[%s5534_s3] sm:$0xf]  ;;  %v2591_v31 = vor.u32 %v3520_v21, %v2588_v24  ;;  %v2595_v32 = vor.u32 %v3537_v26, %v2594_v25  ;;  %v3488_v34 = vld [vmem:[%s5534_s3 + $0x4] sm:$0xf] }
  0x20   : > { %1871 = vmatpush.bf16.msra.mxu2 %v2847_v3  ;;  %1884 = vmatpush.bf16.msra.mxu3 %v2851_v4  ;;  %v3504_v33 = vld [vmem:[%s5534_s3 + $0x7c] sm:$0xf0]  ;;  %v2466_v37 = vld [vmem:[%s5534_s3 + $0x8] sm:$0xf]  ;;  %v3489_v39 = vld [vmem:[%s5534_s3 + $0xc] sm:$0xf] }
  0x21   : > { %v3505_v38 = vld [vmem:[%s5534_s3 + $0x84] sm:$0xf0]  ;;  %v2468_v40 = vld [vmem:[%s5534_s3 + $0x88] sm:$0xf0]  ;;  %v3370_v41 = vld [vmem:[%s5534_s3 + $0x710] sm:$0xf]  ;;  %v2459_v43 = vor.u32 %v3504_v33, %v2458_v30 }
  0x22   : > { %v3730_v42 = vld [vmem:[%s5534_s3 + $0x78c] sm:$0xf0]  ;;  %v3714_v44 = vld [vmem:[%s5534_s3 + $0x714] sm:$0xf]  ;;  %v3378_v46 = vld [vmem:[%s5534_s3 + $0x718] sm:$0xf]  ;;  %v2467_v51 = vor.u32 %v3505_v38, %v2466_v37  ;;  %v2471_v52 = vor.u32 %v3489_v39, %v2468_v40 }
  0x23   : > { %1894 = vmatpush.bf16.msrb.mxu0 %v3239_v35  ;;  %1858 = vmatpush.bf16.msra.mxu1 %v2843_v2  ;;  %v2460_v35 = vld [vmem:[%s5534_s3 + $0x80] sm:$0xf0]  ;;  %v3372_v45 = vld [vmem:[%s5534_s3 + $0x790] sm:$0xf0]  ;;  %v3715_v49 = vld [vmem:[%s5534_s3 + $0x71c] sm:$0xf]  ;;  %v3371_v53 = vor.u32 %v3730_v42, %v3370_v41 }
  0x24   : > { %1885 = vmatpush.bf16.msra.mxu3 %v2723_v18  ;;  %v2463_v47 = vor.u32 %v3488_v34, %v2460_v35  ;;  %v3380_v50 = vld [vmem:[%s5534_s3 + $0x798] sm:$0xf0]  ;;  %v3375_v54 = vor.u32 %v3714_v44, %v3372_v45  ;;  %v3242_v55 = vld [vmem:[%s5534_s3 + $0x610] sm:$0xf]  ;;  %v3244_v61 = vld [vmem:[%s5534_s3 + $0x690] sm:$0xf0] }
  0x25   : > { %v3698_v56 = vld [vmem:[%s5534_s3 + $0x68c] sm:$0xf0]  ;;  %v3383_v59 = vor.u32 %v3715_v49, %v3380_v50  ;;  %v3250_v62 = vld [vmem:[%s5534_s3 + $0x618] sm:$0xf]  ;;  %v3116_v11 = vld [vmem:[%s5534_s3 + $0x590] sm:$0xf0] }
  0x26   : > { %v3699_v63 = vld [vmem:[%s5534_s3 + $0x694] sm:$0xf0]  ;;  %v3243_v2 = vor.u32 %v3698_v56, %v3242_v55  ;;  %v2986_v19 = vld [vmem:[%s5534_s3 + $0x410] sm:$0xf]  ;;  %v3618_v21 = vld [vmem:[%s5534_s3 + $0x414] sm:$0xf] }
  0x27   : > { %1895 = vmatpush.bf16.msrb.mxu0 %v3111_v48  ;;  %v3731_v48 = vld [vmem:[%s5534_s3 + $0x794] sm:$0xf0]  ;;  %v3251_v4 = vor.u32 %v3699_v63, %v3250_v62  ;;  %v3634_v20 = vld [vmem:[%s5534_s3 + $0x48c] sm:$0xf0]  ;;  %v2860_v34 = vld [vmem:[%s5534_s3 + $0x390] sm:$0xf0] }
  0x28   : > { %1886 = vmatpush.bf16.msra.mxu3 %v2595_v32  ;;  %v3379_v58 = vor.u32 %v3731_v48, %v3378_v46  ;;  %v3122_v12 = vld [vmem:[%s5534_s3 + $0x518] sm:$0xf]  ;;  %v2858_v30 = vld [vmem:[%s5534_s3 + $0x310] sm:$0xf]  ;;  %v3586_v32 = vld [vmem:[%s5534_s3 + $0x314] sm:$0xf] }
  0x29   : > { %v3667_v13 = vld [vmem:[%s5534_s3 + $0x594] sm:$0xf0]  ;;  %v2863_v37 = vor.u32 %v3586_v32, %v2860_v34  ;;  %v3587_v39 = vld [vmem:[%s5534_s3 + $0x31c] sm:$0xf]  ;;  %v2730_v42 = vld [vmem:[%s5534_s3 + $0x210] sm:$0xf] }
  0x2a   : > { %v2994_v24 = vld [vmem:[%s5534_s3 + $0x418] sm:$0xf]  ;;  %v2868_v40 = vld [vmem:[%s5534_s3 + $0x398] sm:$0xf0]  ;;  %v3554_v44 = vld [vmem:[%s5534_s3 + $0x214] sm:$0xf] }
  0x2b   : > { %1896 = vmatpush.bf16.msrb.mxu0 %v2983_v60  ;;  %v3682_v60 = vld [vmem:[%s5534_s3 + $0x614] sm:$0xf]  ;;  %v3635_v25 = vld [vmem:[%s5534_s3 + $0x494] sm:$0xf0]  ;;  %v2871_v41 = vor.u32 %v3587_v39, %v2868_v40  ;;  %v3538_v55 = vld [vmem:[%s5534_s3 + $0x18c] sm:$0xf0] }
  0x2c   : > { %1887 = vmatpush.bf16.msra.mxu3 %v2467_v51  ;;  %v3247_v3 = vor.u32 %v3682_v60, %v3244_v61  ;;  %v2866_v35 = vld [vmem:[%s5534_s3 + $0x318] sm:$0xf]  ;;  %v2732_v46 = vld [vmem:[%s5534_s3 + $0x290] sm:$0xf0]  ;;  %v3555_v51 = vld [vmem:[%s5534_s3 + $0x21c] sm:$0xf] }
  0x2d   : > { %v3571_v48 = vld [vmem:[%s5534_s3 + $0x294] sm:$0xf0]  ;;  %v2735_v49 = vor.u32 %v3554_v44, %v2732_v46  ;;  %v3522_v56 = vld [vmem:[%s5534_s3 + $0x114] sm:$0xf]  ;;  %v3733_v32 = vld [vmem:[%s5534_s3 + $0x7a4] sm:$0xf0] }
  0x2e   : > { %v2610_v60 = vld [vmem:[%s5534_s3 + $0x118] sm:$0xf]  ;;  %v3396_v34 = vld [vmem:[%s5534_s3 + $0x7a8] sm:$0xf0]  ;;  %v3701_v44 = vld [vmem:[%s5534_s3 + $0x6a4] sm:$0xf0] }
  0x2f   : > { %v3539_v61 = vld [vmem:[%s5534_s3 + $0x194] sm:$0xf0]  ;;  %v3268_v46 = vld [vmem:[%s5534_s3 + $0x6a8] sm:$0xf0] }
  0x30   : > { %1932 = vmatpush.bf16.msrb.mxu3 %v3379_v58  ;;  %v2611_v63 = vor.u32 %v3539_v61, %v2610_v60 }
  0x34   : > { %1933 = vmatpush.bf16.msrb.mxu3 %v3251_v4  ;;  %v3506_v4 = vld [vmem:[%s5534_s3 + $0x8c] sm:$0xf0] }
  0x9b   : > { %v291_v7 = vpop.f32.mrf.mxu0 }
  0x9c   : > { %v3816_v8 = vadd.f32 %v3752_v6, %v291_v7  ;;  %v3568_v6 = vld [vmem:[%s5534_s3 + $0x27c] sm:$0xf0]  ;;  %v3552_v7 = vld [vmem:[%s5534_s3 + $0x204] sm:$0xf] }
  0x9d   : > { %v2715_v15 = vor.u32 %v3568_v6, %v2714_v5  ;;  %v2719_v17 = vor.u32 %v3552_v7, %v2716_v10  ;;  %v3114_v6 = vld [vmem:[%s5534_s3 + $0x510] sm:$0xf] }
  0x9e   : > { %295 = vmax.xlane.f32.xlu0 %v3816_v8  ;;  %v3666_v7 = vld [vmem:[%s5534_s3 + $0x58c] sm:$0xf0] }
  0x9f   : > { %1859 = vmatpush.bf16.msra.mxu1 %v2715_v15  ;;  %1872 = vmatpush.bf16.msra.mxu2 %v2719_v17  ;;  %v3115_v10 = vor.u32 %v3666_v7, %v3114_v6  ;;  %v3123_v15 = vor.u32 %v3667_v13, %v3122_v12  ;;  %v3124_v17 = vld [vmem:[%s5534_s3 + $0x598] sm:$0xf0]  ;;  %v2476_v7 = vld [vmem:[%s5534_s3 + $0x90] sm:$0xf0] }
  0xa0   : > { %v3491_v13 = vld [vmem:[%s5534_s3 + $0x1c] sm:$0xf] }
  0xa1   : > { %1934 = vmatpush.bf16.msrb.mxu3 %v3123_v15 }
  0xa3   : > { %v293_v9 = vpop.f32.mrf.mxu0  ;;  %1860 = vmatpush.bf16.msra.mxu1 %v2587_v29  ;;  %1873 = vmatpush.bf16.msra.mxu2 %v2591_v31  ;;  %v3602_v31 = vld [vmem:[%s5534_s3 + $0x38c] sm:$0xf0] }
  0xa4   : > { %v2855_v9 = vor.u32 %v3585_v0, %v2852_v1  ;;  %v3683_v0 = vld [vmem:[%s5534_s3 + $0x61c] sm:$0xf]  ;;  %v2859_v33 = vor.u32 %v3602_v31, %v2858_v30  ;;  %v3394_v30 = vld [vmem:[%s5534_s3 + $0x728] sm:$0xf] }
  0xa5   : > { %v3252_v1 = vld [vmem:[%s5534_s3 + $0x698] sm:$0xf0]  ;;  %v3395_v39 = vor.u32 %v3733_v32, %v3394_v30  ;;  %v3557_v30 = vld [vmem:[%s5534_s3 + $0x22c] sm:$0xf] }
  0xa6   : > { %1897 = vmatpush.bf16.msrb.mxu0 %v2855_v9  ;;  %v3255_v5 = vor.u32 %v3683_v0, %v3252_v1  ;;  %v3650_v9 = vld [vmem:[%s5534_s3 + $0x514] sm:$0xf]  ;;  %v3523_v0 = vld [vmem:[%s5534_s3 + $0x11c] sm:$0xf] }
  0xa7   : > { %1861 = vmatpush.bf16.msra.mxu1 %v2459_v43  ;;  %1874 = vmatpush.bf16.msra.mxu2 %v2463_v47  ;;  %v3119_v14 = vor.u32 %v3650_v9, %v3116_v11  ;;  %v3570_v43 = vld [vmem:[%s5534_s3 + $0x28c] sm:$0xf0]  ;;  %v2738_v47 = vld [vmem:[%s5534_s3 + $0x218] sm:$0xf]  ;;  %v2612_v1 = vld [vmem:[%s5534_s3 + $0x198] sm:$0xf0] }
  0xa8   : > { %v2731_v45 = vor.u32 %v3570_v43, %v2730_v42  ;;  %v2739_v50 = vor.u32 %v3571_v48, %v2738_v47  ;;  %v2482_v9 = vld [vmem:[%s5534_s3 + $0x18] sm:$0xf]  ;;  %v3260_v42 = vld [vmem:[%s5534_s3 + $0x6a0] sm:$0xf0]  ;;  %v3266_v43 = vld [vmem:[%s5534_s3 + $0x628] sm:$0xf] }
  0xaa   : > { %1898 = vmatpush.bf16.msrb.mxu0 %v2727_v23  ;;  %v2988_v23 = vld [vmem:[%s5534_s3 + $0x490] sm:$0xf0] }
  0xab   : > { %1906 = vmatpush.bf16.msrb.mxu1 %v3371_v53  ;;  %1919 = vmatpush.bf16.msrb.mxu2 %v3375_v54  ;;  %v2991_v26 = vor.u32 %v3618_v21, %v2988_v23  ;;  %v2602_v54 = vld [vmem:[%s5534_s3 + $0x110] sm:$0xf] }
  0xac   : > { %v2603_v58 = vor.u32 %v3538_v55, %v2602_v54  ;;  %v3132_v54 = vld [vmem:[%s5534_s3 + $0x5a0] sm:$0xf0]  ;;  %v3138_v55 = vld [vmem:[%s5534_s3 + $0x528] sm:$0xf] }
  0xaf   : > { %1907 = vmatpush.bf16.msrb.mxu1 %v3243_v2  ;;  %1920 = vmatpush.bf16.msrb.mxu2 %v3247_v3  ;;  %v2615_v2 = vor.u32 %v3523_v0, %v2612_v1  ;;  %v2474_v3 = vld [vmem:[%s5534_s3 + $0x10] sm:$0xf] }
  0xb0   : > { %v2475_v6 = vor.u32 %v3506_v4, %v2474_v3  ;;  %v3004_v3 = vld [vmem:[%s5534_s3 + $0x4a0] sm:$0xf0]  ;;  %v3010_v4 = vld [vmem:[%s5534_s3 + $0x428] sm:$0xf] }
  0xb3   : > { %1908 = vmatpush.bf16.msrb.mxu1 %v3115_v10  ;;  %1921 = vmatpush.bf16.msrb.mxu2 %v3119_v14  ;;  %v3507_v10 = vld [vmem:[%s5534_s3 + $0x94] sm:$0xf0]  ;;  %v2484_v14 = vld [vmem:[%s5534_s3 + $0x98] sm:$0xf0] }
  0xb4   : > { %v2483_v12 = vor.u32 %v3507_v10, %v2482_v9  ;;  %v2487_v15 = vor.u32 %v3491_v13, %v2484_v14 }
  0xb7   : > { %1922 = vmatpush.bf16.msrb.mxu2 %v2991_v26  ;;  %v3386_v26 = vld [vmem:[%s5534_s3 + $0x720] sm:$0xf] }
  0xbb   : > { %1923 = vmatpush.bf16.msrb.mxu2 %v2863_v37 }
  0xbf   : > { %1924 = vmatpush.bf16.msrb.mxu2 %v2735_v49  ;;  %v3130_v49 = vld [vmem:[%s5534_s3 + $0x520] sm:$0xf] }
 0x111   : > { %v296_v16 = vpop.xlane.xlu0 %295 }
 0x112   : > { %v297_v22 = vsub.f32 %v3816_v8, %v296_v16  ;;  %v2596_v8 = vld [vmem:[%s5534_s3 + $0x188] sm:$0xf0]  ;;  %v3651_v16 = vld [vmem:[%s5534_s3 + $0x51c] sm:$0xf] }
 0x113   : > { %v2599_v36 = vor.u32 %v3521_v27, %v2596_v8  ;;  %v3127_v18 = vor.u32 %v3651_v16, %v3124_v17  ;;  %v2995_v27 = vor.u32 %v3635_v25, %v2994_v24  ;;  %v3619_v8 = vld [vmem:[%s5534_s3 + $0x41c] sm:$0xf] }
 0x114   : > { %v298_v28 = vmul.f32 1.442695, %v297_v22  ;;  %v2987_v22 = vor.u32 %v3634_v20, %v2986_v19 }
 0x115   : > { %1899 = vmatpush.bf16.msrb.mxu0 %v2599_v36  ;;  %1935 = vmatpush.bf16.msrb.mxu3 %v2995_v27  ;;  %v3603_v36 = vld [vmem:[%s5534_s3 + $0x394] sm:$0xf0]  ;;  %v3732_v27 = vld [vmem:[%s5534_s3 + $0x79c] sm:$0xf0] }
 0x116   : > { %3753 = vpow2.f32 %v298_v28  ;;  %v2996_v28 = vld [vmem:[%s5534_s3 + $0x498] sm:$0xf0]  ;;  %1909 = vmatpush.bf16.msrb.mxu1 %v2987_v22  ;;  %v2867_v38 = vor.u32 %v3603_v36, %v2866_v35  ;;  %v3387_v36 = vor.u32 %v3732_v27, %v3386_v26  ;;  %v3556_v27 = vld [vmem:[%s5534_s3 + $0x224] sm:$0xf] }
 0x117   : > { %v2999_v29 = vor.u32 %v3619_v8, %v2996_v28  ;;  %v3716_v28 = vld [vmem:[%s5534_s3 + $0x724] sm:$0xf] }
 0x119   : > { %1900 = vmatpush.bf16.msrb.mxu0 %v2471_v52  ;;  %1936 = vmatpush.bf16.msrb.mxu3 %v2867_v38  ;;  %v2740_v52 = vld [vmem:[%s5534_s3 + $0x298] sm:$0xf0]  ;;  %v3700_v38 = vld [vmem:[%s5534_s3 + $0x69c] sm:$0xf0] }
 0x11a   : > { %1910 = vmatpush.bf16.msrb.mxu1 %v2859_v33  ;;  %v2743_v53 = vor.u32 %v3555_v51, %v2740_v52  ;;  %v3717_v33 = vld [vmem:[%s5534_s3 + $0x72c] sm:$0xf]  ;;  %v3267_v51 = vor.u32 %v3701_v44, %v3266_v43  ;;  %v2490_v44 = vld [vmem:[%s5534_s3 + $0x20] sm:$0xf] }
 0x11b   : > { %v3399_v40 = vor.u32 %v3717_v33, %v3396_v34  ;;  %v2618_v34 = vld [vmem:[%s5534_s3 + $0x120] sm:$0xf]  ;;  %v2628_v43 = vld [vmem:[%s5534_s3 + $0x1a8] sm:$0xf0] }
 0x11c   : > { %v4042_v57 = vpop.eup %3753 }
 0x11d   : > { %300 = vadd.xlane.f32.xlu0 %v4042_v57  ;;  %1945 = vmatpush.bf16.msra.mxu0 %v3383_v59  ;;  %v2604_v59 = vld [vmem:[%s5534_s3 + $0x190] sm:$0xf0] }
 0x11e   : > { %1911 = vmatpush.bf16.msrb.mxu1 %v2731_v45  ;;  %1937 = vmatpush.bf16.msrb.mxu3 %v2739_v50  ;;  %v2607_v62 = vor.u32 %v3522_v56, %v2604_v59  ;;  %v3685_v45 = vld [vmem:[%s5534_s3 + $0x62c] sm:$0xf]  ;;  %v3668_v50 = vld [vmem:[%s5534_s3 + $0x59c] sm:$0xf0]  ;;  %v3669_v56 = vld [vmem:[%s5534_s3 + $0x5a4] sm:$0xf0] }
 0x11f   : > { %v3271_v52 = vor.u32 %v3685_v45, %v3268_v46  ;;  %v3140_v59 = vld [vmem:[%s5534_s3 + $0x5a8] sm:$0xf0]  ;;  %v3131_v60 = vor.u32 %v3668_v50, %v3130_v49  ;;  %v3139_v0 = vor.u32 %v3669_v56, %v3138_v55  ;;  %v2492_v49 = vld [vmem:[%s5534_s3 + $0xa0] sm:$0xf0]  ;;  %v3402_v56 = vld [vmem:[%s5534_s3 + $0x730] sm:$0xf] }
 0x120   : > { %1925 = vmatpush.bf16.msrb.mxu2 %v2607_v62  ;;  %v3002_v62 = vld [vmem:[%s5534_s3 + $0x420] sm:$0xf]  ;;  %v2500_v55 = vld [vmem:[%s5534_s3 + $0xa8] sm:$0xf0] }
 0x121   : > { %1946 = vmatpush.bf16.msra.mxu0 %v3255_v5  ;;  %v3490_v5 = vld [vmem:[%s5534_s3 + $0x14] sm:$0xf] }
 0x122   : > { %1912 = vmatpush.bf16.msrb.mxu1 %v2603_v58  ;;  %1938 = vmatpush.bf16.msrb.mxu3 %v2611_v63  ;;  %v2479_v11 = vor.u32 %v3490_v5, %v2476_v7  ;;  %v3653_v58 = vld [vmem:[%s5534_s3 + $0x52c] sm:$0xf]  ;;  %v3636_v63 = vld [vmem:[%s5534_s3 + $0x49c] sm:$0xf0]  ;;  %v3637_v5 = vld [vmem:[%s5534_s3 + $0x4a4] sm:$0xf0] }
 0x123   : > { %v3143_v1 = vor.u32 %v3653_v58, %v3140_v59  ;;  %v3012_v7 = vld [vmem:[%s5534_s3 + $0x4a8] sm:$0xf0]  ;;  %v3003_v9 = vor.u32 %v3636_v63, %v3002_v62  ;;  %v3011_v13 = vor.u32 %v3637_v5, %v3010_v4  ;;  %v3734_v58 = vld [vmem:[%s5534_s3 + $0x7ac] sm:$0xf0]  ;;  %v3718_v59 = vld [vmem:[%s5534_s3 + $0x734] sm:$0xf] }
 0x124   : > { %1926 = vmatpush.bf16.msrb.mxu2 %v2479_v11  ;;  %v2874_v11 = vld [vmem:[%s5534_s3 + $0x320] sm:$0xf]  ;;  %v3403_v5 = vor.u32 %v3734_v58, %v3402_v56  ;;  %v3574_v56 = vld [vmem:[%s5534_s3 + $0x2ac] sm:$0xf0] }
 0x125   : > { %1947 = vmatpush.bf16.msra.mxu0 %v3127_v18 }
 0x126   : > { %1913 = vmatpush.bf16.msrb.mxu1 %v2475_v6  ;;  %1939 = vmatpush.bf16.msrb.mxu3 %v2483_v12  ;;  %v3621_v6 = vld [vmem:[%s5534_s3 + $0x42c] sm:$0xf]  ;;  %v3604_v12 = vld [vmem:[%s5534_s3 + $0x39c] sm:$0xf0] }
 0x127   : > { %v3015_v14 = vor.u32 %v3621_v6, %v3012_v7  ;;  %v3274_v7 = vld [vmem:[%s5534_s3 + $0x630] sm:$0xf] }
 0x129   : > { %1948 = vmatpush.bf16.msra.mxu0 %v2999_v29  ;;  %v3388_v29 = vld [vmem:[%s5534_s3 + $0x7a0] sm:$0xf0] }
 0x12a   : > { %v3391_v37 = vor.u32 %v3716_v28, %v3388_v29  ;;  %v2754_v28 = vld [vmem:[%s5534_s3 + $0x228] sm:$0xf] }
 0x12b   : > { %v3573_v29 = vld [vmem:[%s5534_s3 + $0x2a4] sm:$0xf0] }
 0x12d   : > { %1949 = vmatpush.bf16.msra.mxu0 %v2871_v41  ;;  %v3684_v41 = vld [vmem:[%s5534_s3 + $0x624] sm:$0xf] }
 0x12e   : > { %v3263_v48 = vor.u32 %v3684_v41, %v3260_v42  ;;  %v3541_v41 = vld [vmem:[%s5534_s3 + $0x1a4] sm:$0xf0]  ;;  %v3525_v42 = vld [vmem:[%s5534_s3 + $0x12c] sm:$0xf] }
 0x131   : > { %1950 = vmatpush.bf16.msra.mxu0 %v2743_v53  ;;  %v3652_v53 = vld [vmem:[%s5534_s3 + $0x524] sm:$0xf] }
 0x132   : > { %v3135_v61 = vor.u32 %v3652_v53, %v3132_v54  ;;  %v3509_v53 = vld [vmem:[%s5534_s3 + $0xa4] sm:$0xf0]  ;;  %v3493_v54 = vld [vmem:[%s5534_s3 + $0x2c] sm:$0xf] }
 0x133   : > { %v2503_v4 = vor.u32 %v3493_v54, %v2500_v55  ;;  %v2762_v55 = vld [vmem:[%s5534_s3 + $0x230] sm:$0xf] }
 0x135   : > { %1951 = vmatpush.bf16.msra.mxu0 %v2615_v2  ;;  %v3620_v2 = vld [vmem:[%s5534_s3 + $0x424] sm:$0xf] }
 0x136   : > { %v3007_v10 = vor.u32 %v3620_v2, %v3004_v3  ;;  %v3412_v2 = vld [vmem:[%s5534_s3 + $0x7b8] sm:$0xf0] }
 0x139   : > { %1952 = vmatpush.bf16.msra.mxu0 %v2487_v15  ;;  %v3588_v15 = vld [vmem:[%s5534_s3 + $0x324] sm:$0xf] }
 0x190   : > { %v301_v16 = vpop.xlane.xlu0 %300 }
 0x191   : > { %3755 = vrcp.f32 %v301_v16  ;;  %v313_v20 = vand.u32 2147483648, %v301_v16  ;;  %v311_v22 = vand.u32 2147483647, %v301_v16  ;;  %vm307_vm2 = vweird.f32 %v301_v16 }
 0x193   : > { %v314_v24 = vor.u32 1.1754944e-38, %v313_v20  ;;  %vm312_vm4 = vcmp.eq.f32.partialorder %v311_v22, 8.507059e+37  ;;  %v2884_v20 = vld [vmem:[%s5534_s3 + $0x3a8] sm:$0xf0] }
 0x197   : > { %v3756_v17 = vpop.eup %3755 }
 0x198   : > { %v303_v18 = vmul.f32 %v3756_v17, %v301_v16  ;;  %vm308_vm1 = vweird.f32 %v3756_v17  ;;  %v2876_v16 = vld [vmem:[%s5534_s3 + $0x3a0] sm:$0xf0] }
 0x199   : > { %vm309_vm3 = vmor %vm307_vm2, %vm308_vm1  ;;  %v2879_v22 = vor.u32 %v3588_v15, %v2876_v16  ;;  %v3703_v15 = vld [vmem:[%s5534_s3 + $0x6b4] sm:$0xf0]  ;;  %v3687_v16 = vld [vmem:[%s5534_s3 + $0x63c] sm:$0xf] }
 0x19a   : > { %v304_v19 = vsub.f32 1.0, %v303_v18  ;;  %v3605_v18 = vld [vmem:[%s5534_s3 + $0x3a4] sm:$0xf0] }
 0x19c   : > { %v305_v21 = vmul.f32 %v3756_v17, %v304_v19  ;;  %v3589_v19 = vld [vmem:[%s5534_s3 + $0x32c] sm:$0xf] }
 0x19d   : > { %v2887_v26 = vor.u32 %v3589_v19, %v2884_v20  ;;  %v3146_v20 = vld [vmem:[%s5534_s3 + $0x530] sm:$0xf] }
 0x19e   : > { %v306_v23 = vadd.f32 %v3756_v17, %v305_v21  ;;  %v2875_v21 = vor.u32 %v3604_v12, %v2874_v11  ;;  %v3686_v12 = vld [vmem:[%s5534_s3 + $0x634] sm:$0xf] }
 0x1a0   : > { %v310_v25 = vsel %vm309_vm3, %v3756_v17, %v306_v23  ;;  %v2882_v17 = vld [vmem:[%s5534_s3 + $0x328] sm:$0xf]  ;;  %v2746_v23 = vld [vmem:[%s5534_s3 + $0x220] sm:$0xf] }
 0x1a1   : > { %v315_v8 = vsel %vm312_vm4, %v314_v24, %v310_v25  ;;  %v3572_v24 = vld [vmem:[%s5534_s3 + $0x29c] sm:$0xf0]  ;;  %v2883_v25 = vor.u32 %v3605_v18, %v2882_v17  ;;  %v3284_v17 = vld [vmem:[%s5534_s3 + $0x6b8] sm:$0xf0] }
 0x1a2   : > { %v316_v31 = vmul.f32 %v4042_v57, %v315_v8  ;;  %v3258_v57 = vld [vmem:[%s5534_s3 + $0x620] sm:$0xf]  ;;  %v2748_v8 = vld [vmem:[%s5534_s3 + $0x2a0] sm:$0xf0]  ;;  %v2747_v32 = vor.u32 %v3572_v24, %v2746_v23  ;;  %v3287_v23 = vor.u32 %v3687_v16, %v3284_v17  ;;  %v3654_v24 = vld [vmem:[%s5534_s3 + $0x534] sm:$0xf] }
 0x1a3   : > { %v3259_v47 = vor.u32 %v3700_v38, %v3258_v57  ;;  %v2751_v33 = vor.u32 %v3556_v27, %v2748_v8  ;;  %v3524_v38 = vld [vmem:[%s5534_s3 + $0x124] sm:$0xf]  ;;  %v3671_v27 = vld [vmem:[%s5534_s3 + $0x5b4] sm:$0xf0]  ;;  %v3655_v8 = vld [vmem:[%s5534_s3 + $0x53c] sm:$0xf] }
 0x1a4   : > { %v4232_v35 = vpack.c.bf16 %v316_v31, %v316_v31  ;;  %v2756_v31 = vld [vmem:[%s5534_s3 + $0x2a8] sm:$0xf0] }
 0x1a5   : > { %v2759_v57 = vor.u32 %v3557_v30, %v2756_v31  ;;  %v3018_v31 = vld [vmem:[%s5534_s3 + $0x430] sm:$0xf] }
 0x1a6   : > { %1862 = vmatmul.bf16.vlgmr.msra.gmra.mxu1 %v4232_v35  ;;  %1875 = vmatmul.bf16.vlgmr.msra.gmra.mxu2 %v4232_v35 }
 0x1a7   : > { %1888 = vmatmul.bf16.vlgmr.msra.gmra.mxu3 %v4232_v35  ;;  %1901 = vmatmul.bf16.vlgmr.msrb.gmra.mxu0 %v4232_v35 }
 0x1a8   : > { %1958 = vmatpush.bf16.msra.mxu1 %v3387_v36  ;;  %1971 = vmatpush.bf16.msra.mxu2 %v3391_v37  ;;  %v3540_v36 = vld [vmem:[%s5534_s3 + $0x19c] sm:$0xf0]  ;;  %v2755_v37 = vor.u32 %v3573_v29, %v2754_v28  ;;  %v3156_v28 = vld [vmem:[%s5534_s3 + $0x5b8] sm:$0xf0] }
 0x1a9   : > { %1984 = vmatpush.bf16.msra.mxu3 %v3395_v39  ;;  %1997 = vmatpush.bf16.msrb.mxu0 %v3399_v40  ;;  %v2620_v39 = vld [vmem:[%s5534_s3 + $0x1a0] sm:$0xf0]  ;;  %v2626_v40 = vld [vmem:[%s5534_s3 + $0x128] sm:$0xf]  ;;  %v2619_v45 = vor.u32 %v3540_v36, %v2618_v34  ;;  %v3159_v34 = vor.u32 %v3655_v8, %v3156_v28  ;;  %v3622_v36 = vld [vmem:[%s5534_s3 + $0x434] sm:$0xf] }
 0x1aa   : > { %v2623_v46 = vor.u32 %v3524_v38, %v2620_v39  ;;  %v2627_v50 = vor.u32 %v3541_v41, %v2626_v40  ;;  %v3639_v38 = vld [vmem:[%s5534_s3 + $0x4b4] sm:$0xf0]  ;;  %v3623_v39 = vld [vmem:[%s5534_s3 + $0x43c] sm:$0xf]  ;;  %v3736_v8 = vld [vmem:[%s5534_s3 + $0x7bc] sm:$0xf0] }
 0x1ab   : > { %v3028_v40 = vld [vmem:[%s5534_s3 + $0x4b8] sm:$0xf0]  ;;  %v3720_v28 = vld [vmem:[%s5534_s3 + $0x744] sm:$0xf] }
 0x1ac   : > { %1959 = vmatpush.bf16.msra.mxu1 %v3259_v47  ;;  %1972 = vmatpush.bf16.msra.mxu2 %v3263_v48  ;;  %v3508_v47 = vld [vmem:[%s5534_s3 + $0x9c] sm:$0xf0]  ;;  %v3492_v48 = vld [vmem:[%s5534_s3 + $0x24] sm:$0xf] }
 0x1ad   : > { %1985 = vmatpush.bf16.msra.mxu3 %v3267_v51  ;;  %1998 = vmatpush.bf16.msrb.mxu0 %v3271_v52  ;;  %v2631_v51 = vor.u32 %v3525_v42, %v2628_v43  ;;  %v2498_v52 = vld [vmem:[%s5534_s3 + $0x28] sm:$0xf]  ;;  %v2491_v62 = vor.u32 %v3508_v47, %v2490_v44  ;;  %v2495_v63 = vor.u32 %v3492_v48, %v2492_v49  ;;  %v2890_v43 = vld [vmem:[%s5534_s3 + $0x330] sm:$0xf]  ;;  %v3590_v47 = vld [vmem:[%s5534_s3 + $0x334] sm:$0xf] }
 0x1ae   : > { %v2499_v3 = vor.u32 %v3509_v53, %v2498_v52  ;;  %v3606_v44 = vld [vmem:[%s5534_s3 + $0x3ac] sm:$0xf0]  ;;  %v2892_v48 = vld [vmem:[%s5534_s3 + $0x3b0] sm:$0xf0]  ;;  %v2898_v49 = vld [vmem:[%s5534_s3 + $0x338] sm:$0xf] }
 0x1af   : > { %v2900_v52 = vld [vmem:[%s5534_s3 + $0x3b8] sm:$0xf0]  ;;  %v2891_v53 = vor.u32 %v3606_v44, %v2890_v43  ;;  %v2895_v54 = vor.u32 %v3590_v47, %v2892_v48  ;;  %v3688_v44 = vld [vmem:[%s5534_s3 + $0x644] sm:$0xf]  ;;  %v3705_v47 = vld [vmem:[%s5534_s3 + $0x6c4] sm:$0xf0] }
 0x1b0   : > { %1960 = vmatpush.bf16.msra.mxu1 %v3131_v60  ;;  %1973 = vmatpush.bf16.msra.mxu2 %v3135_v61  ;;  %v3404_v60 = vld [vmem:[%s5534_s3 + $0x7b0] sm:$0xf0]  ;;  %v3410_v61 = vld [vmem:[%s5534_s3 + $0x738] sm:$0xf]  ;;  %v3689_v48 = vld [vmem:[%s5534_s3 + $0x64c] sm:$0xf] }
 0x1b1   : > { %1986 = vmatpush.bf16.msra.mxu3 %v3139_v0  ;;  %1999 = vmatpush.bf16.msrb.mxu0 %v3143_v1  ;;  %v3735_v0 = vld [vmem:[%s5534_s3 + $0x7b4] sm:$0xf0]  ;;  %v3719_v1 = vld [vmem:[%s5534_s3 + $0x73c] sm:$0xf]  ;;  %v3407_v6 = vor.u32 %v3718_v59, %v3404_v60  ;;  %v3558_v60 = vld [vmem:[%s5534_s3 + $0x234] sm:$0xf] }
 0x1b2   : > { %v3415_v11 = vor.u32 %v3719_v1, %v3412_v2  ;;  %v2772_v1 = vld [vmem:[%s5534_s3 + $0x2b8] sm:$0xf0]  ;;  %v2763_v2 = vor.u32 %v3574_v56, %v2762_v55  ;;  %v3656_v56 = vld [vmem:[%s5534_s3 + $0x544] sm:$0xf] }
 0x1b4   : > { %1961 = vmatpush.bf16.msra.mxu1 %v3003_v9  ;;  %1974 = vmatpush.bf16.msra.mxu2 %v3007_v10  ;;  %v3702_v9 = vld [vmem:[%s5534_s3 + $0x6ac] sm:$0xf0]  ;;  %v3411_v10 = vor.u32 %v3735_v0, %v3410_v61  ;;  %v2764_v61 = vld [vmem:[%s5534_s3 + $0x2b0] sm:$0xf0]  ;;  %v3559_v0 = vld [vmem:[%s5534_s3 + $0x23c] sm:$0xf] }
 0x1b5   : > { %1987 = vmatpush.bf16.msra.mxu3 %v3011_v13  ;;  %2000 = vmatpush.bf16.msrb.mxu0 %v3015_v14  ;;  %v3276_v13 = vld [vmem:[%s5534_s3 + $0x6b0] sm:$0xf0]  ;;  %v3282_v14 = vld [vmem:[%s5534_s3 + $0x638] sm:$0xf]  ;;  %v3275_v18 = vor.u32 %v3702_v9, %v3274_v7  ;;  %v2775_v7 = vor.u32 %v3559_v0, %v2772_v1  ;;  %v3034_v1 = vld [vmem:[%s5534_s3 + $0x440] sm:$0xf] }
 0x1b6   : > { %1914 = vmatmul.bf16.vlgmr.msrb.gmra.mxu1 %v4232_v35  ;;  %1927 = vmatmul.bf16.vlgmr.msrb.gmra.mxu2 %v4232_v35  ;;  %v3279_v19 = vor.u32 %v3686_v12, %v3276_v13  ;;  %v3526_v9 = vld [vmem:[%s5534_s3 + $0x134] sm:$0xf]  ;;  %v3543_v12 = vld [vmem:[%s5534_s3 + $0x1b4] sm:$0xf0]  ;;  %v3527_v13 = vld [vmem:[%s5534_s3 + $0x13c] sm:$0xf] }
 0x1b7   : > { %1940 = vmatmul.bf16.vlgmr.msrb.gmra.mxu3 %v4232_v35  ;;  %1953 = vmatmul.bf16.vlgmr.msra.gmra.mxu0 %v4232_v35 }
 0x1b8   : > { %1962 = vmatpush.bf16.msra.mxu1 %v2875_v21  ;;  %1975 = vmatpush.bf16.msra.mxu2 %v2879_v22  ;;  %v3670_v21 = vld [vmem:[%s5534_s3 + $0x5ac] sm:$0xf0]  ;;  %v3283_v22 = vor.u32 %v3703_v15, %v3282_v14  ;;  %v2644_v14 = vld [vmem:[%s5534_s3 + $0x1b8] sm:$0xf0] }
 0x1b9   : > { %1988 = vmatpush.bf16.msra.mxu3 %v2883_v25  ;;  %2001 = vmatpush.bf16.msrb.mxu0 %v2887_v26  ;;  %v3148_v25 = vld [vmem:[%s5534_s3 + $0x5b0] sm:$0xf0]  ;;  %v3154_v26 = vld [vmem:[%s5534_s3 + $0x538] sm:$0xf]  ;;  %v3147_v29 = vor.u32 %v3670_v21, %v3146_v20  ;;  %v2506_v15 = vld [vmem:[%s5534_s3 + $0x30] sm:$0xf] }
 0x1ba   : > { %v3151_v30 = vor.u32 %v3654_v24, %v3148_v25  ;;  %v2508_v20 = vld [vmem:[%s5534_s3 + $0xb0] sm:$0xf0]  ;;  %v3511_v24 = vld [vmem:[%s5534_s3 + $0xb4] sm:$0xf0]  ;;  %v3495_v25 = vld [vmem:[%s5534_s3 + $0x3c] sm:$0xf] }
 0x1bc   : > { %1963 = vmatpush.bf16.msra.mxu1 %v2747_v32  ;;  %1976 = vmatpush.bf16.msra.mxu2 %v2751_v33  ;;  %v3638_v32 = vld [vmem:[%s5534_s3 + $0x4ac] sm:$0xf0]  ;;  %v3155_v33 = vor.u32 %v3671_v27, %v3154_v26  ;;  %v2516_v26 = vld [vmem:[%s5534_s3 + $0xb8] sm:$0xf0]  ;;  %v3418_v27 = vld [vmem:[%s5534_s3 + $0x740] sm:$0xf] }
 0x1bd   : > { %1989 = vmatpush.bf16.msra.mxu3 %v2755_v37  ;;  %2002 = vmatpush.bf16.msrb.mxu0 %v2759_v57  ;;  %v3020_v37 = vld [vmem:[%s5534_s3 + $0x4b0] sm:$0xf0]  ;;  %v3026_v57 = vld [vmem:[%s5534_s3 + $0x438] sm:$0xf]  ;;  %v3019_v41 = vor.u32 %v3638_v32, %v3018_v31 }
 0x1be   : > { %v3023_v42 = vor.u32 %v3622_v36, %v3020_v37  ;;  %v3428_v36 = vld [vmem:[%s5534_s3 + $0x7c8] sm:$0xf0] }
 0x1c0   : > { %1964 = vmatpush.bf16.msra.mxu1 %v2619_v45  ;;  %1977 = vmatpush.bf16.msra.mxu2 %v2623_v46  ;;  %v3027_v45 = vor.u32 %v3639_v38, %v3026_v57  ;;  %v3031_v46 = vor.u32 %v3623_v39, %v3028_v40  ;;  %v2519_v57 = vor.u32 %v3495_v25, %v2516_v26  ;;  %v3290_v40 = vld [vmem:[%s5534_s3 + $0x640] sm:$0xf] }
 0x1c1   : > { %1990 = vmatpush.bf16.msra.mxu3 %v2627_v50  ;;  %2003 = vmatpush.bf16.msrb.mxu0 %v2631_v51  ;;  %v3607_v50 = vld [vmem:[%s5534_s3 + $0x3b4] sm:$0xf0]  ;;  %v3591_v51 = vld [vmem:[%s5534_s3 + $0x33c] sm:$0xf]  ;;  %v3419_v38 = vor.u32 %v3736_v8, %v3418_v27  ;;  %v2778_v26 = vld [vmem:[%s5534_s3 + $0x240] sm:$0xf] }
 0x1c2   : > { %v2899_v58 = vor.u32 %v3607_v50, %v2898_v49  ;;  %v2903_v59 = vor.u32 %v3591_v51, %v2900_v52  ;;  %v3300_v49 = vld [vmem:[%s5534_s3 + $0x6c8] sm:$0xf0]  ;;  %v3162_v52 = vld [vmem:[%s5534_s3 + $0x540] sm:$0xf] }
 0x1c3   : > { %v3303_v55 = vor.u32 %v3689_v48, %v3300_v49  ;;  %v3576_v27 = vld [vmem:[%s5534_s3 + $0x2bc] sm:$0xf0] }
 0x1c4   : > { %1965 = vmatpush.bf16.msra.mxu1 %v2491_v62  ;;  %1978 = vmatpush.bf16.msra.mxu2 %v2495_v63  ;;  %v2770_v62 = vld [vmem:[%s5534_s3 + $0x238] sm:$0xf] }
 0x1c5   : > { %1991 = vmatpush.bf16.msra.mxu3 %v2499_v3  ;;  %2004 = vmatpush.bf16.msrb.mxu0 %v2503_v4  ;;  %v3575_v63 = vld [vmem:[%s5534_s3 + $0x2b4] sm:$0xf0]  ;;  %v2767_v3 = vor.u32 %v3558_v60, %v2764_v61  ;;  %v2634_v4 = vld [vmem:[%s5534_s3 + $0x130] sm:$0xf]  ;;  %v3673_v60 = vld [vmem:[%s5534_s3 + $0x5c4] sm:$0xf0] }
 0x1c6   : > { %v3657_v61 = vld [vmem:[%s5534_s3 + $0x54c] sm:$0xf] }
 0x1c7   : > { %1966 = vmatmul.bf16.vlgmr.msra.gmra.mxu1 %v4232_v35  ;;  %1979 = vmatmul.bf16.vlgmr.msra.gmra.mxu2 %v4232_v35 }
 0x1c8   : > { %2010 = vmatpush.bf16.msrb.mxu1 %v3403_v5  ;;  %2023 = vmatpush.bf16.msrb.mxu2 %v3407_v6  ;;  %v3542_v5 = vld [vmem:[%s5534_s3 + $0x1ac] sm:$0xf0]  ;;  %v2771_v6 = vor.u32 %v3575_v63, %v2770_v62  ;;  %v3172_v62 = vld [vmem:[%s5534_s3 + $0x5c8] sm:$0xf0] }
 0x1c9   : > { %2036 = vmatpush.bf16.msrb.mxu3 %v3411_v10  ;;  %2049 = vmatpush.bf16.msra.mxu0 %v3415_v11  ;;  %v2636_v10 = vld [vmem:[%s5534_s3 + $0x1b0] sm:$0xf0]  ;;  %v2642_v11 = vld [vmem:[%s5534_s3 + $0x138] sm:$0xf]  ;;  %v2635_v16 = vor.u32 %v3542_v5, %v2634_v4  ;;  %v3175_v4 = vor.u32 %v3657_v61, %v3172_v62  ;;  %v3624_v5 = vld [vmem:[%s5534_s3 + $0x444] sm:$0xf] }
 0x1ca   : > { %1992 = vmatmul.bf16.vlgmr.msra.gmra.mxu3 %v4232_v35  ;;  %2005 = vmatmul.bf16.vlgmr.msrb.gmra.mxu0 %v4232_v35  ;;  %v2639_v17 = vor.u32 %v3526_v9, %v2636_v10  ;;  %v2643_v21 = vor.u32 %v3543_v12, %v2642_v11  ;;  %v3641_v9 = vld [vmem:[%s5534_s3 + $0x4c4] sm:$0xf0]  ;;  %v3625_v10 = vld [vmem:[%s5534_s3 + $0x44c] sm:$0xf]  ;;  %v3738_v61 = vld [vmem:[%s5534_s3 + $0x7cc] sm:$0xf0] }
 0x1cb   : > { %v3044_v11 = vld [vmem:[%s5534_s3 + $0x4c8] sm:$0xf0]  ;;  %v3722_v62 = vld [vmem:[%s5534_s3 + $0x754] sm:$0xf] }
 0x1cc   : > { %2011 = vmatpush.bf16.msrb.mxu1 %v3275_v18  ;;  %2024 = vmatpush.bf16.msrb.mxu2 %v3279_v19  ;;  %v3510_v18 = vld [vmem:[%s5534_s3 + $0xac] sm:$0xf0]  ;;  %v3494_v19 = vld [vmem:[%s5534_s3 + $0x34] sm:$0xf] }
 0x1cd   : > { %2037 = vmatpush.bf16.msrb.mxu3 %v3283_v22  ;;  %2050 = vmatpush.bf16.msra.mxu0 %v3287_v23  ;;  %v2647_v22 = vor.u32 %v3527_v13, %v2644_v14  ;;  %v2514_v23 = vld [vmem:[%s5534_s3 + $0x38] sm:$0xf]  ;;  %v2507_v31 = vor.u32 %v3510_v18, %v2506_v15  ;;  %v2511_v32 = vor.u32 %v3494_v19, %v2508_v20  ;;  %v2906_v14 = vld [vmem:[%s5534_s3 + $0x340] sm:$0xf]  ;;  %v3592_v18 = vld [vmem:[%s5534_s3 + $0x344] sm:$0xf] }
 0x1ce   : > { %v2515_v37 = vor.u32 %v3511_v24, %v2514_v23  ;;  %v3608_v15 = vld [vmem:[%s5534_s3 + $0x3bc] sm:$0xf0]  ;;  %v2908_v19 = vld [vmem:[%s5534_s3 + $0x3c0] sm:$0xf0]  ;;  %v2914_v20 = vld [vmem:[%s5534_s3 + $0x348] sm:$0xf] }
 0x1cf   : > { %v2916_v23 = vld [vmem:[%s5534_s3 + $0x3c8] sm:$0xf0]  ;;  %v2907_v24 = vor.u32 %v3608_v15, %v2906_v14  ;;  %v2911_v25 = vor.u32 %v3592_v18, %v2908_v19  ;;  %v3690_v15 = vld [vmem:[%s5534_s3 + $0x654] sm:$0xf]  ;;  %v3707_v18 = vld [vmem:[%s5534_s3 + $0x6d4] sm:$0xf0] }
 0x1d0   : > { %2012 = vmatpush.bf16.msrb.mxu1 %v3147_v29  ;;  %2025 = vmatpush.bf16.msrb.mxu2 %v3151_v30  ;;  %v3420_v29 = vld [vmem:[%s5534_s3 + $0x7c0] sm:$0xf0]  ;;  %v3426_v30 = vld [vmem:[%s5534_s3 + $0x748] sm:$0xf]  ;;  %v3691_v19 = vld [vmem:[%s5534_s3 + $0x65c] sm:$0xf] }
 0x1d1   : > { %2038 = vmatpush.bf16.msrb.mxu3 %v3155_v33  ;;  %2051 = vmatpush.bf16.msra.mxu0 %v3159_v34  ;;  %v3737_v33 = vld [vmem:[%s5534_s3 + $0x7c4] sm:$0xf0]  ;;  %v3721_v34 = vld [vmem:[%s5534_s3 + $0x74c] sm:$0xf]  ;;  %v3423_v39 = vor.u32 %v3720_v28, %v3420_v29  ;;  %v3560_v29 = vld [vmem:[%s5534_s3 + $0x244] sm:$0xf] }
 0x1d2   : > { %v3431_v43 = vor.u32 %v3721_v34, %v3428_v36  ;;  %v2788_v34 = vld [vmem:[%s5534_s3 + $0x2c8] sm:$0xf0]  ;;  %v2779_v36 = vor.u32 %v3576_v27, %v2778_v26  ;;  %v3658_v27 = vld [vmem:[%s5534_s3 + $0x554] sm:$0xf] }
 0x1d4   : > { %2013 = vmatpush.bf16.msrb.mxu1 %v3019_v41  ;;  %2026 = vmatpush.bf16.msrb.mxu2 %v3023_v42  ;;  %v3704_v41 = vld [vmem:[%s5534_s3 + $0x6bc] sm:$0xf0]  ;;  %v3427_v42 = vor.u32 %v3737_v33, %v3426_v30  ;;  %v2780_v30 = vld [vmem:[%s5534_s3 + $0x2c0] sm:$0xf0]  ;;  %v3561_v33 = vld [vmem:[%s5534_s3 + $0x24c] sm:$0xf] }
 0x1d5   : > { %2039 = vmatpush.bf16.msrb.mxu3 %v3027_v45  ;;  %2052 = vmatpush.bf16.msra.mxu0 %v3031_v46  ;;  %v3292_v45 = vld [vmem:[%s5534_s3 + $0x6c0] sm:$0xf0]  ;;  %v3298_v46 = vld [vmem:[%s5534_s3 + $0x648] sm:$0xf]  ;;  %v3291_v50 = vor.u32 %v3704_v41, %v3290_v40  ;;  %v2791_v40 = vor.u32 %v3561_v33, %v2788_v34  ;;  %v3050_v34 = vld [vmem:[%s5534_s3 + $0x450] sm:$0xf] }
 0x1d6   : > { %v3295_v51 = vor.u32 %v3688_v44, %v3292_v45  ;;  %v3528_v41 = vld [vmem:[%s5534_s3 + $0x144] sm:$0xf]  ;;  %v3545_v44 = vld [vmem:[%s5534_s3 + $0x1c4] sm:$0xf0]  ;;  %v3529_v45 = vld [vmem:[%s5534_s3 + $0x14c] sm:$0xf] }
 0x1d8   : > { %2014 = vmatpush.bf16.msrb.mxu1 %v2891_v53  ;;  %2027 = vmatpush.bf16.msrb.mxu2 %v2895_v54  ;;  %v3672_v53 = vld [vmem:[%s5534_s3 + $0x5bc] sm:$0xf0]  ;;  %v3299_v54 = vor.u32 %v3705_v47, %v3298_v46  ;;  %v2660_v46 = vld [vmem:[%s5534_s3 + $0x1c8] sm:$0xf0] }
 0x1d9   : > { %2040 = vmatpush.bf16.msrb.mxu3 %v2899_v58  ;;  %2053 = vmatpush.bf16.msra.mxu0 %v2903_v59  ;;  %v3164_v58 = vld [vmem:[%s5534_s3 + $0x5c0] sm:$0xf0]  ;;  %v3170_v59 = vld [vmem:[%s5534_s3 + $0x548] sm:$0xf]  ;;  %v3163_v63 = vor.u32 %v3672_v53, %v3162_v52  ;;  %v2522_v47 = vld [vmem:[%s5534_s3 + $0x40] sm:$0xf] }
 0x1da   : > { %v3167_v0 = vor.u32 %v3656_v56, %v3164_v58  ;;  %v2524_v52 = vld [vmem:[%s5534_s3 + $0xc0] sm:$0xf0]  ;;  %v3513_v56 = vld [vmem:[%s5534_s3 + $0xc4] sm:$0xf0]  ;;  %v3497_v58 = vld [vmem:[%s5534_s3 + $0x4c] sm:$0xf] }
 0x1dc   : > { %2015 = vmatpush.bf16.msrb.mxu1 %v2763_v2  ;;  %2028 = vmatpush.bf16.msrb.mxu2 %v2767_v3  ;;  %v3640_v2 = vld [vmem:[%s5534_s3 + $0x4bc] sm:$0xf0]  ;;  %v3171_v3 = vor.u32 %v3673_v60, %v3170_v59  ;;  %v2532_v59 = vld [vmem:[%s5534_s3 + $0xc8] sm:$0xf0]  ;;  %v3434_v60 = vld [vmem:[%s5534_s3 + $0x750] sm:$0xf] }
 0x1dd   : > { %2041 = vmatpush.bf16.msrb.mxu3 %v2771_v6  ;;  %2054 = vmatpush.bf16.msra.mxu0 %v2775_v7  ;;  %v3036_v6 = vld [vmem:[%s5534_s3 + $0x4c0] sm:$0xf0]  ;;  %v3042_v7 = vld [vmem:[%s5534_s3 + $0x448] sm:$0xf]  ;;  %v3035_v12 = vor.u32 %v3640_v2, %v3034_v1 }
 0x1de   : > { %v3039_v13 = vor.u32 %v3624_v5, %v3036_v6  ;;  %v3444_v5 = vld [vmem:[%s5534_s3 + $0x7d8] sm:$0xf0] }
 0x1e0   : > { %2016 = vmatpush.bf16.msrb.mxu1 %v2635_v16  ;;  %2029 = vmatpush.bf16.msrb.mxu2 %v2639_v17  ;;  %v3043_v16 = vor.u32 %v3641_v9, %v3042_v7  ;;  %v3047_v17 = vor.u32 %v3625_v10, %v3044_v11  ;;  %v2535_v7 = vor.u32 %v3497_v58, %v2532_v59  ;;  %v3306_v11 = vld [vmem:[%s5534_s3 + $0x650] sm:$0xf] }
 0x1e1   : > { %2042 = vmatpush.bf16.msrb.mxu3 %v2643_v21  ;;  %2055 = vmatpush.bf16.msra.mxu0 %v2647_v22  ;;  %v3609_v21 = vld [vmem:[%s5534_s3 + $0x3c4] sm:$0xf0]  ;;  %v3593_v22 = vld [vmem:[%s5534_s3 + $0x34c] sm:$0xf]  ;;  %v3435_v9 = vor.u32 %v3738_v61, %v3434_v60  ;;  %v2794_v59 = vld [vmem:[%s5534_s3 + $0x250] sm:$0xf] }
 0x1e2   : > { %v2915_v8 = vor.u32 %v3609_v21, %v2914_v20  ;;  %v2919_v28 = vor.u32 %v3593_v22, %v2916_v23  ;;  %v3316_v20 = vld [vmem:[%s5534_s3 + $0x6d8] sm:$0xf0]  ;;  %v3178_v23 = vld [vmem:[%s5534_s3 + $0x550] sm:$0xf] }
 0x1e3   : > { %v3319_v26 = vor.u32 %v3691_v19, %v3316_v20  ;;  %v3578_v60 = vld [vmem:[%s5534_s3 + $0x2cc] sm:$0xf0] }
 0x1e4   : > { %2017 = vmatpush.bf16.msrb.mxu1 %v2507_v31  ;;  %2030 = vmatpush.bf16.msrb.mxu2 %v2511_v32  ;;  %v2786_v31 = vld [vmem:[%s5534_s3 + $0x248] sm:$0xf] }
 0x1e5   : > { %2043 = vmatpush.bf16.msrb.mxu3 %v2515_v37  ;;  %2056 = vmatpush.bf16.msra.mxu0 %v2519_v57  ;;  %v3577_v32 = vld [vmem:[%s5534_s3 + $0x2c4] sm:$0xf0]  ;;  %v2783_v37 = vor.u32 %v3560_v29, %v2780_v30  ;;  %v2650_v57 = vld [vmem:[%s5534_s3 + $0x140] sm:$0xf]  ;;  %v3675_v29 = vld [vmem:[%s5534_s3 + $0x5d4] sm:$0xf0] }
 0x1e6   : > { %v3659_v30 = vld [vmem:[%s5534_s3 + $0x55c] sm:$0xf] }
 0x1e7   : > { %2018 = vmatmul.bf16.vlgmr.msrb.gmra.mxu1 %v4232_v35  ;;  %2031 = vmatmul.bf16.vlgmr.msrb.gmra.mxu2 %v4232_v35 }
 0x1e8   : > { %2062 = vmatpush.bf16.msra.mxu1 %v3419_v38  ;;  %2075 = vmatpush.bf16.msra.mxu2 %v3423_v39  ;;  %v3544_v38 = vld [vmem:[%s5534_s3 + $0x1bc] sm:$0xf0]  ;;  %v2787_v39 = vor.u32 %v3577_v32, %v2786_v31  ;;  %v3188_v31 = vld [vmem:[%s5534_s3 + $0x5d8] sm:$0xf0] }
 0x1e9   : > { %2088 = vmatpush.bf16.msra.mxu3 %v3427_v42  ;;  %2101 = vmatpush.bf16.msrb.mxu0 %v3431_v43  ;;  %v2652_v42 = vld [vmem:[%s5534_s3 + $0x1c0] sm:$0xf0]  ;;  %v2658_v43 = vld [vmem:[%s5534_s3 + $0x148] sm:$0xf]  ;;  %v2651_v48 = vor.u32 %v3544_v38, %v2650_v57  ;;  %v3191_v57 = vor.u32 %v3659_v30, %v3188_v31  ;;  %v3626_v38 = vld [vmem:[%s5534_s3 + $0x454] sm:$0xf] }
 0x1ea   : > { %2044 = vmatmul.bf16.vlgmr.msrb.gmra.mxu3 %v4232_v35  ;;  %2057 = vmatmul.bf16.vlgmr.msra.gmra.mxu0 %v4232_v35  ;;  %v2655_v49 = vor.u32 %v3528_v41, %v2652_v42  ;;  %v2659_v53 = vor.u32 %v3545_v44, %v2658_v43  ;;  %v3643_v41 = vld [vmem:[%s5534_s3 + $0x4d4] sm:$0xf0]  ;;  %v3627_v42 = vld [vmem:[%s5534_s3 + $0x45c] sm:$0xf]  ;;  %v3740_v30 = vld [vmem:[%s5534_s3 + $0x7dc] sm:$0xf0] }
 0x1eb   : > { %v3060_v43 = vld [vmem:[%s5534_s3 + $0x4d8] sm:$0xf0]  ;;  %v3724_v31 = vld [vmem:[%s5534_s3 + $0x764] sm:$0xf] }
 0x1ec   : > { %2063 = vmatpush.bf16.msra.mxu1 %v3291_v50  ;;  %2076 = vmatpush.bf16.msra.mxu2 %v3295_v51  ;;  %v3512_v50 = vld [vmem:[%s5534_s3 + $0xbc] sm:$0xf0]  ;;  %v3496_v51 = vld [vmem:[%s5534_s3 + $0x44] sm:$0xf] }
 0x1ed   : > { %2089 = vmatpush.bf16.msra.mxu3 %v3299_v54  ;;  %2102 = vmatpush.bf16.msrb.mxu0 %v3303_v55  ;;  %v2663_v54 = vor.u32 %v3529_v45, %v2660_v46  ;;  %v2530_v55 = vld [vmem:[%s5534_s3 + $0x48] sm:$0xf]  ;;  %v2523_v1 = vor.u32 %v3512_v50, %v2522_v47  ;;  %v2527_v2 = vor.u32 %v3496_v51, %v2524_v52  ;;  %v2922_v46 = vld [vmem:[%s5534_s3 + $0x350] sm:$0xf]  ;;  %v3594_v50 = vld [vmem:[%s5534_s3 + $0x354] sm:$0xf] }
 0x1ee   : > { %v2531_v6 = vor.u32 %v3513_v56, %v2530_v55  ;;  %v3610_v47 = vld [vmem:[%s5534_s3 + $0x3cc] sm:$0xf0]  ;;  %v2924_v51 = vld [vmem:[%s5534_s3 + $0x3d0] sm:$0xf0]  ;;  %v2930_v52 = vld [vmem:[%s5534_s3 + $0x358] sm:$0xf] }
 0x1ef   : > { %v2932_v55 = vld [vmem:[%s5534_s3 + $0x3d8] sm:$0xf0]  ;;  %v2923_v56 = vor.u32 %v3610_v47, %v2922_v46  ;;  %v2927_v58 = vor.u32 %v3594_v50, %v2924_v51  ;;  %v3692_v47 = vld [vmem:[%s5534_s3 + $0x664] sm:$0xf]  ;;  %v3709_v50 = vld [vmem:[%s5534_s3 + $0x6e4] sm:$0xf0] }
 0x1f0   : > { %2064 = vmatpush.bf16.msra.mxu1 %v3163_v63  ;;  %2077 = vmatpush.bf16.msra.mxu2 %v3167_v0  ;;  %v3436_v63 = vld [vmem:[%s5534_s3 + $0x7d0] sm:$0xf0]  ;;  %v3442_v0 = vld [vmem:[%s5534_s3 + $0x758] sm:$0xf]  ;;  %v3693_v51 = vld [vmem:[%s5534_s3 + $0x66c] sm:$0xf] }
 0x1f1   : > { %2090 = vmatpush.bf16.msra.mxu3 %v3171_v3  ;;  %2103 = vmatpush.bf16.msrb.mxu0 %v3175_v4  ;;  %v3739_v3 = vld [vmem:[%s5534_s3 + $0x7d4] sm:$0xf0]  ;;  %v3723_v4 = vld [vmem:[%s5534_s3 + $0x75c] sm:$0xf]  ;;  %v3439_v10 = vor.u32 %v3722_v62, %v3436_v63  ;;  %v3562_v63 = vld [vmem:[%s5534_s3 + $0x254] sm:$0xf] }
 0x1f2   : > { %v3447_v14 = vor.u32 %v3723_v4, %v3444_v5  ;;  %v2804_v4 = vld [vmem:[%s5534_s3 + $0x2d8] sm:$0xf0]  ;;  %v2795_v5 = vor.u32 %v3578_v60, %v2794_v59  ;;  %v3196_v59 = vld [vmem:[%s5534_s3 + $0x5e0] sm:$0xf0] }
 0x1f4   : > { %2065 = vmatpush.bf16.msra.mxu1 %v3035_v12  ;;  %2078 = vmatpush.bf16.msra.mxu2 %v3039_v13  ;;  %v3706_v12 = vld [vmem:[%s5534_s3 + $0x6cc] sm:$0xf0]  ;;  %v3443_v13 = vor.u32 %v3739_v3, %v3442_v0  ;;  %v2796_v0 = vld [vmem:[%s5534_s3 + $0x2d0] sm:$0xf0]  ;;  %v3563_v3 = vld [vmem:[%s5534_s3 + $0x25c] sm:$0xf] }
 0x1f5   : > { %2091 = vmatpush.bf16.msra.mxu3 %v3043_v16  ;;  %2104 = vmatpush.bf16.msrb.mxu0 %v3047_v17  ;;  %v3308_v16 = vld [vmem:[%s5534_s3 + $0x6d0] sm:$0xf0]  ;;  %v3314_v17 = vld [vmem:[%s5534_s3 + $0x658] sm:$0xf]  ;;  %v3307_v21 = vor.u32 %v3706_v12, %v3306_v11  ;;  %v2807_v11 = vor.u32 %v3563_v3, %v2804_v4 }
 0x1f6   : > { %v3311_v22 = vor.u32 %v3690_v15, %v3308_v16  ;;  %v3530_v12 = vld [vmem:[%s5534_s3 + $0x154] sm:$0xf]  ;;  %v3547_v15 = vld [vmem:[%s5534_s3 + $0x1d4] sm:$0xf0]  ;;  %v3531_v16 = vld [vmem:[%s5534_s3 + $0x15c] sm:$0xf] }
 0x1f7   : > { %v2273_v3 = vld [vmem:[%s5535_s4 + $0x18] sm:$0xff] }
 0x1f8   : > { %2066 = vmatpush.bf16.msra.mxu1 %v2907_v24  ;;  %2079 = vmatpush.bf16.msra.mxu2 %v2911_v25  ;;  %v3674_v24 = vld [vmem:[%s5534_s3 + $0x5cc] sm:$0xf0]  ;;  %v3315_v25 = vor.u32 %v3707_v18, %v3314_v17  ;;  %v2676_v17 = vld [vmem:[%s5534_s3 + $0x1d8] sm:$0xf0] }
 0x1f9   : > { %2092 = vmatpush.bf16.msra.mxu3 %v2915_v8  ;;  %2105 = vmatpush.bf16.msrb.mxu0 %v2919_v28  ;;  %v3180_v8 = vld [vmem:[%s5534_s3 + $0x5d0] sm:$0xf0]  ;;  %v3186_v28 = vld [vmem:[%s5534_s3 + $0x558] sm:$0xf]  ;;  %v3179_v32 = vor.u32 %v3674_v24, %v3178_v23  ;;  %v2538_v18 = vld [vmem:[%s5534_s3 + $0x50] sm:$0xf] }
 0x1fa   : > { %v3183_v33 = vor.u32 %v3658_v27, %v3180_v8  ;;  %v2540_v23 = vld [vmem:[%s5534_s3 + $0xd0] sm:$0xf0]  ;;  %v3515_v27 = vld [vmem:[%s5534_s3 + $0xd4] sm:$0xf0]  ;;  %v3499_v8 = vld [vmem:[%s5534_s3 + $0x5c] sm:$0xf] }
 0x1fc   : > { %2067 = vmatpush.bf16.msra.mxu1 %v2779_v36  ;;  %2080 = vmatpush.bf16.msra.mxu2 %v2783_v37  ;;  %v3642_v36 = vld [vmem:[%s5534_s3 + $0x4cc] sm:$0xf0]  ;;  %v3187_v37 = vor.u32 %v3675_v29, %v3186_v28  ;;  %v2548_v28 = vld [vmem:[%s5534_s3 + $0xd8] sm:$0xf0]  ;;  %v3450_v29 = vld [vmem:[%s5534_s3 + $0x760] sm:$0xf] }
 0x1fd   : > { %2093 = vmatpush.bf16.msra.mxu3 %v2787_v39  ;;  %2106 = vmatpush.bf16.msrb.mxu0 %v2791_v40  ;;  %v3052_v39 = vld [vmem:[%s5534_s3 + $0x4d0] sm:$0xf0]  ;;  %v3058_v40 = vld [vmem:[%s5534_s3 + $0x458] sm:$0xf]  ;;  %v3051_v44 = vor.u32 %v3642_v36, %v3050_v34 }
 0x1fe   : > { %v3055_v45 = vor.u32 %v3626_v38, %v3052_v39  ;;  %v3460_v38 = vld [vmem:[%s5534_s3 + $0x7e8] sm:$0xf0] }
 0x200   : > { %2068 = vmatpush.bf16.msra.mxu1 %v2651_v48  ;;  %2081 = vmatpush.bf16.msra.mxu2 %v2655_v49  ;;  %v3059_v48 = vor.u32 %v3643_v41, %v3058_v40  ;;  %v3063_v49 = vor.u32 %v3627_v42, %v3060_v43  ;;  %v2551_v40 = vor.u32 %v3499_v8, %v2548_v28  ;;  %v3322_v43 = vld [vmem:[%s5534_s3 + $0x660] sm:$0xf] }
 0x201   : > { %2094 = vmatpush.bf16.msra.mxu3 %v2659_v53  ;;  %2107 = vmatpush.bf16.msrb.mxu0 %v2663_v54  ;;  %v3611_v53 = vld [vmem:[%s5534_s3 + $0x3d4] sm:$0xf0]  ;;  %v3595_v54 = vld [vmem:[%s5534_s3 + $0x35c] sm:$0xf]  ;;  %v3451_v41 = vor.u32 %v3740_v30, %v3450_v29  ;;  %v3596_v29 = vld [vmem:[%s5534_s3 + $0x364] sm:$0xf] }
 0x202   : > { %v2931_v61 = vor.u32 %v3611_v53, %v2930_v52  ;;  %v2935_v62 = vor.u32 %v3595_v54, %v2932_v55  ;;  %v3332_v52 = vld [vmem:[%s5534_s3 + $0x6e8] sm:$0xf0]  ;;  %v3194_v53 = vld [vmem:[%s5534_s3 + $0x560] sm:$0xf]  ;;  %v2940_v30 = vld [vmem:[%s5534_s3 + $0x3e0] sm:$0xf0] }
 0x204   : > { %2069 = vmatpush.bf16.msra.mxu1 %v2523_v1  ;;  %2082 = vmatpush.bf16.msra.mxu2 %v2527_v2  ;;  %v2802_v1 = vld [vmem:[%s5534_s3 + $0x258] sm:$0xf] }
 0x205   : > { %2095 = vmatpush.bf16.msra.mxu3 %v2531_v6  ;;  %2108 = vmatpush.bf16.msrb.mxu0 %v2535_v7  ;;  %v3579_v2 = vld [vmem:[%s5534_s3 + $0x2d4] sm:$0xf0]  ;;  %v2799_v6 = vor.u32 %v3562_v63, %v2796_v0  ;;  %v2666_v7 = vld [vmem:[%s5534_s3 + $0x150] sm:$0xf]  ;;  %v3677_v63 = vld [vmem:[%s5534_s3 + $0x5e4] sm:$0xf0] }
 0x206   : > { %v2270_v0 = vld [vmem:[%s5535_s4] sm:$0xff] }
 0x207   : > { %2070 = vmatmul.bf16.vlgmr.msra.gmra.mxu1 %v4232_v35  ;;  %2083 = vmatmul.bf16.vlgmr.msra.gmra.mxu2 %v4232_v35 }
 0x208   : > { %2114 = vmatpush.bf16.msrb.mxu1 %v3435_v9  ;;  %2127 = vmatpush.bf16.msrb.mxu2 %v3439_v10  ;;  %v3546_v9 = vld [vmem:[%s5534_s3 + $0x1cc] sm:$0xf0]  ;;  %v2803_v10 = vor.u32 %v3579_v2, %v2802_v1  ;;  %v3661_v1 = vld [vmem:[%s5534_s3 + $0x56c] sm:$0xf] }
 0x209   : > { %2140 = vmatpush.bf16.msrb.mxu3 %v3443_v13  ;;  %2153 = vmatpush.bf16.msra.mxu0 %v3447_v14  ;;  %v2668_v13 = vld [vmem:[%s5534_s3 + $0x1d0] sm:$0xf0]  ;;  %v2674_v14 = vld [vmem:[%s5534_s3 + $0x158] sm:$0xf]  ;;  %v2667_v19 = vor.u32 %v3546_v9, %v2666_v7  ;;  %v3204_v2 = vld [vmem:[%s5534_s3 + $0x5e8] sm:$0xf0] }
 0x20a   : > { %2096 = vmatmul.bf16.vlgmr.msra.gmra.mxu3 %v4232_v35  ;;  %2109 = vmatmul.bf16.vlgmr.msrb.gmra.mxu0 %v4232_v35  ;;  %v2671_v20 = vor.u32 %v3530_v12, %v2668_v13  ;;  %v2675_v24 = vor.u32 %v3547_v15, %v2674_v14  ;;  %v3207_v13 = vor.u32 %v3661_v1, %v3204_v2  ;;  %v3628_v15 = vld [vmem:[%s5534_s3 + $0x464] sm:$0xf]  ;;  %v3533_v2 = vld [vmem:[%s5534_s3 + $0x16c] sm:$0xf] }
 0x20c   : > { %2115 = vmatpush.bf16.msrb.mxu1 %v3307_v21  ;;  %2128 = vmatpush.bf16.msrb.mxu2 %v3311_v22  ;;  %v3514_v21 = vld [vmem:[%s5534_s3 + $0xcc] sm:$0xf0]  ;;  %v3498_v22 = vld [vmem:[%s5534_s3 + $0x54] sm:$0xf] }
 0x20d   : > { %2141 = vmatpush.bf16.msrb.mxu3 %v3315_v25  ;;  %2154 = vmatpush.bf16.msra.mxu0 %v3319_v26  ;;  %v2679_v25 = vor.u32 %v3531_v16, %v2676_v17  ;;  %v2546_v26 = vld [vmem:[%s5534_s3 + $0x58] sm:$0xf]  ;;  %v2539_v34 = vor.u32 %v3514_v21, %v2538_v18  ;;  %v2543_v36 = vor.u32 %v3498_v22, %v2540_v23  ;;  %v3068_v16 = vld [vmem:[%s5534_s3 + $0x4e0] sm:$0xf0]  ;;  %v3074_v17 = vld [vmem:[%s5534_s3 + $0x468] sm:$0xf] }
 0x20e   : > { %v2547_v39 = vor.u32 %v3515_v27, %v2546_v26  ;;  %v3645_v18 = vld [vmem:[%s5534_s3 + $0x4e4] sm:$0xf0]  ;;  %v3071_v23 = vor.u32 %v3628_v15, %v3068_v16  ;;  %v3612_v26 = vld [vmem:[%s5534_s3 + $0x3dc] sm:$0xf0] }
 0x20f   : > { %v2271_v21 = vld [vmem:[%s5535_s4 + $0x8] sm:$0xff]  ;;  %v3075_v27 = vor.u32 %v3645_v18, %v3074_v17 }
 0x210   : > { %2116 = vmatpush.bf16.msrb.mxu1 %v3179_v32  ;;  %2129 = vmatpush.bf16.msrb.mxu2 %v3183_v33  ;;  %v3452_v32 = vld [vmem:[%s5534_s3 + $0x7e0] sm:$0xf0]  ;;  %v3458_v33 = vld [vmem:[%s5534_s3 + $0x768] sm:$0xf]  ;;  %v3501_v17 = vld [vmem:[%s5534_s3 + $0x6c] sm:$0xf] }
 0x211   : > { %2142 = vmatpush.bf16.msrb.mxu3 %v3187_v37  ;;  %2155 = vmatpush.bf16.msra.mxu0 %v3191_v57  ;;  %v3741_v37 = vld [vmem:[%s5534_s3 + $0x7e4] sm:$0xf0]  ;;  %v3725_v57 = vld [vmem:[%s5534_s3 + $0x76c] sm:$0xf]  ;;  %v3455_v42 = vor.u32 %v3724_v31, %v3452_v32 }
 0x212   : > { %v3463_v46 = vor.u32 %v3725_v57, %v3460_v38  ;;  %v2946_v31 = vld [vmem:[%s5534_s3 + $0x368] sm:$0xf] }
 0x213   : > { %v2562_v15 = vld [vmem:[%s5534_s3 + $0x68] sm:$0xf] }
 0x214   : > { %2117 = vmatpush.bf16.msrb.mxu1 %v3051_v44  ;;  %2130 = vmatpush.bf16.msrb.mxu2 %v3055_v45  ;;  %v3708_v44 = vld [vmem:[%s5534_s3 + $0x6dc] sm:$0xf0]  ;;  %v3459_v45 = vor.u32 %v3741_v37, %v3458_v33  ;;  %v2948_v37 = vld [vmem:[%s5534_s3 + $0x3e8] sm:$0xf0]  ;;  %v3517_v16 = vld [vmem:[%s5534_s3 + $0xe4] sm:$0xf0] }
 0x215   : > { %2143 = vmatpush.bf16.msrb.mxu3 %v3059_v48  ;;  %2156 = vmatpush.bf16.msra.mxu0 %v3063_v49  ;;  %v3324_v48 = vld [vmem:[%s5534_s3 + $0x6e0] sm:$0xf0]  ;;  %v3330_v49 = vld [vmem:[%s5534_s3 + $0x668] sm:$0xf]  ;;  %v3323_v54 = vor.u32 %v3708_v44, %v3322_v43  ;;  %v3580_v43 = vld [vmem:[%s5534_s3 + $0x2dc] sm:$0xf0] }
 0x216   : > { %v3327_v55 = vor.u32 %v3692_v47, %v3324_v48  ;;  %v3331_v60 = vor.u32 %v3709_v50, %v3330_v49  ;;  %v3564_v44 = vld [vmem:[%s5534_s3 + $0x264] sm:$0xf]  ;;  %v2818_v48 = vld [vmem:[%s5534_s3 + $0x268] sm:$0xf]  ;;  %v3565_v50 = vld [vmem:[%s5534_s3 + $0x26c] sm:$0xf] }
 0x217   : > { %v2812_v47 = vld [vmem:[%s5534_s3 + $0x2e0] sm:$0xf0]  ;;  %v3581_v49 = vld [vmem:[%s5534_s3 + $0x2e4] sm:$0xf0] }
 0x218   : > { %2118 = vmatpush.bf16.msrb.mxu1 %v2923_v56  ;;  %2131 = vmatpush.bf16.msrb.mxu2 %v2927_v58  ;;  %v3676_v56 = vld [vmem:[%s5534_s3 + $0x5dc] sm:$0xf0]  ;;  %v3660_v58 = vld [vmem:[%s5534_s3 + $0x564] sm:$0xf] }
 0x219   : > { %2144 = vmatpush.bf16.msrb.mxu3 %v2931_v61  ;;  %2157 = vmatpush.bf16.msra.mxu0 %v2935_v62  ;;  %v3335_v61 = vor.u32 %v3693_v51, %v3332_v52  ;;  %v3202_v62 = vld [vmem:[%s5534_s3 + $0x568] sm:$0xf]  ;;  %v2820_v51 = vld [vmem:[%s5534_s3 + $0x2e8] sm:$0xf0]  ;;  %v2682_v52 = vld [vmem:[%s5534_s3 + $0x160] sm:$0xf] }
 0x21a   : > { %v3203_v12 = vor.u32 %v3677_v63, %v3202_v62  ;;  %v2690_v62 = vld [vmem:[%s5534_s3 + $0x168] sm:$0xf] }
 0x21b   : > { %v3549_v63 = vld [vmem:[%s5534_s3 + $0x1e4] sm:$0xf0] }
 0x21c   : > { %2119 = vmatpush.bf16.msrb.mxu1 %v2795_v5  ;;  %2132 = vmatpush.bf16.msrb.mxu2 %v2799_v6  ;;  %v3195_v5 = vor.u32 %v3676_v56, %v3194_v53  ;;  %v3199_v6 = vor.u32 %v3660_v58, %v3196_v59  ;;  %v3532_v56 = vld [vmem:[%s5534_s3 + $0x164] sm:$0xf]  ;;  %v2819_v59 = vor.u32 %v3581_v49, %v2818_v48  ;;  %v3346_v48 = vld [vmem:[%s5534_s3 + $0x678] sm:$0xf] }
 0x21d   : > { %2145 = vmatpush.bf16.msrb.mxu3 %v2803_v10  ;;  %2158 = vmatpush.bf16.msra.mxu0 %v2807_v11  ;;  %v3066_v10 = vld [vmem:[%s5534_s3 + $0x460] sm:$0xf]  ;;  %v2684_v58 = vld [vmem:[%s5534_s3 + $0x1e0] sm:$0xf0]  ;;  %v2691_v18 = vor.u32 %v3549_v63, %v2690_v62  ;;  %v3711_v49 = vld [vmem:[%s5534_s3 + $0x6f4] sm:$0xf0] }
 0x21e   : > { %v3644_v11 = vld [vmem:[%s5534_s3 + $0x4dc] sm:$0xf0]  ;;  %v3218_v62 = vld [vmem:[%s5534_s3 + $0x578] sm:$0xf] }
 0x21f   : > { %v3067_v22 = vor.u32 %v3644_v11, %v3066_v10  ;;  %v2556_v10 = vld [vmem:[%s5534_s3 + $0xe0] sm:$0xf0]  ;;  %v3679_v63 = vld [vmem:[%s5534_s3 + $0x5f4] sm:$0xf0] }
 0x220   : > { %2120 = vmatpush.bf16.msrb.mxu1 %v2667_v19  ;;  %2133 = vmatpush.bf16.msrb.mxu2 %v2671_v20  ;;  %v3629_v19 = vld [vmem:[%s5534_s3 + $0x46c] sm:$0xf] }
 0x221   : > { %2146 = vmatpush.bf16.msrb.mxu3 %v2675_v24  ;;  %2159 = vmatpush.bf16.msra.mxu0 %v2679_v25  ;;  %v3076_v20 = vld [vmem:[%s5534_s3 + $0x4e8] sm:$0xf0]  ;;  %v2272_v24 = vld [vmem:[%s5535_s4 + $0x10] sm:$0xff]  ;;  %v2938_v25 = vld [vmem:[%s5534_s3 + $0x360] sm:$0xf] }
 0x222   : > { %v3079_v8 = vor.u32 %v3629_v19, %v3076_v20 }
 0x223   : > { %v1863_v4 = vpop.f32.mrf.mxu1 }
 0x224   : > { %2121 = vmatpush.bf16.msrb.mxu1 %v2539_v34  ;;  %2134 = vmatpush.bf16.msrb.mxu2 %v2543_v36  ;;  %v2302_v7 = vmul.f32 %v2270_v0, %v1863_v4  ;;  %v1902_v9 = vpop.f32.mrf.mxu0  ;;  %v3613_v34 = vld [vmem:[%s5534_s3 + $0x3e4] sm:$0xf0]  ;;  %v3597_v36 = vld [vmem:[%s5534_s3 + $0x36c] sm:$0xf]  ;;  %v2274_v0 = vld [vmem:[%s5535_s4 + $0x20] sm:$0xff] }
 0x225   : > { %2147 = vmatpush.bf16.msrb.mxu3 %v2547_v39  ;;  %2160 = vmatpush.bf16.msra.mxu0 %v2551_v40  ;;  %v2305_v14 = vmul.f32 %v2273_v3, %v1902_v9  ;;  %v2810_v39 = vld [vmem:[%s5534_s3 + $0x260] sm:$0xf]  ;;  %v2939_v40 = vor.u32 %v3612_v26, %v2938_v25  ;;  %v2692_v3 = vld [vmem:[%s5534_s3 + $0x1e8] sm:$0xf0]  ;;  %v2277_v4 = vld [vmem:[%s5535_s4 + $0x38] sm:$0xff] }
 0x226   : > { %2334 = vst [vmem:[%s5082_s23] sm:$0xff] %v2302_v7  ;;  %v2811_v53 = vor.u32 %v3580_v43, %v2810_v39  ;;  %v3516_v7 = vld [vmem:[%s5534_s3 + $0xdc] sm:$0xf0]  ;;  %v3500_v9 = vld [vmem:[%s5534_s3 + $0x64] sm:$0xf]  ;;  %v2695_v19 = vor.u32 %v3533_v2, %v2692_v3  ;;  %v3468_v25 = vld [vmem:[%s5534_s3 + $0x7f0] sm:$0xf0] }
 0x227   : > { %2122 = vmatmul.bf16.vlgmr.msrb.gmra.mxu1 %v4232_v35  ;;  %2135 = vmatmul.bf16.vlgmr.msrb.gmra.mxu2 %v4232_v35  ;;  %2337 = vst [vmem:[%s5082_s23 + $0x18] sm:$0xff] %v2305_v14  ;;  %v3474_v26 = vld [vmem:[%s5534_s3 + $0x778] sm:$0xf]  ;;  %v2278_v3 = vld [vmem:[%s5535_s4 + $0x40] sm:$0xff] }
 0x228   : > { %2166 = vmatpush.bf16.msra.mxu1 %v3451_v41  ;;  %2179 = vmatpush.bf16.msra.mxu2 %v3455_v42  ;;  %v2943_v41 = vor.u32 %v3596_v29, %v2940_v30  ;;  %v2559_v29 = vor.u32 %v3500_v9, %v2556_v10  ;;  %v3727_v30 = vld [vmem:[%s5534_s3 + $0x77c] sm:$0xf]  ;;  %v3082_v9 = vld [vmem:[%s5534_s3 + $0x470] sm:$0xf] }
 0x229   : > { %2192 = vmatpush.bf16.msra.mxu3 %v3459_v45  ;;  %2205 = vmatpush.bf16.msrb.mxu0 %v3463_v46  ;;  %v1876_v28 = vpop.f32.mrf.mxu2  ;;  %v2947_v45 = vor.u32 %v3613_v34, %v2946_v31  ;;  %v2951_v46 = vor.u32 %v3597_v36, %v2948_v37  ;;  %v3476_v31 = vld [vmem:[%s5534_s3 + $0x7f8] sm:$0xf0]  ;;  %v3646_v10 = vld [vmem:[%s5534_s3 + $0x4ec] sm:$0xf0] }
 0x22a   : > { %2148 = vmatmul.bf16.vlgmr.msrb.gmra.mxu3 %v4232_v35  ;;  %2161 = vmatmul.bf16.vlgmr.msra.gmra.mxu0 %v4232_v35  ;;  %v2303_v32 = vmul.f32 %v2271_v21, %v1876_v28  ;;  %v1889_v33 = vpop.f32.mrf.mxu3  ;;  %v2564_v21 = vld [vmem:[%s5534_s3 + $0xe8] sm:$0xf0] }
 0x22b   : > { %v2304_v57 = vmul.f32 %v2272_v24, %v1889_v33  ;;  %v1865_v38 = vpop.f32.mrf.mxu1  ;;  %v3726_v24 = vld [vmem:[%s5534_s3 + $0x774] sm:$0xf]  ;;  %v2563_v33 = vor.u32 %v3517_v16, %v2562_v15  ;;  %v2567_v34 = vor.u32 %v3501_v17, %v2564_v21  ;;  %v3090_v15 = vld [vmem:[%s5534_s3 + $0x478] sm:$0xf]  ;;  %v3631_v17 = vld [vmem:[%s5534_s3 + $0x47c] sm:$0xf] }
 0x22c   : > { %2167 = vmatpush.bf16.msra.mxu1 %v3323_v54  ;;  %2180 = vmatpush.bf16.msra.mxu2 %v3327_v55  ;;  %2335 = vst [vmem:[%s5082_s23 + $0x8] sm:$0xff] %v2303_v32  ;;  %v1904_v42 = vpop.f32.mrf.mxu0  ;;  %v2815_v54 = vor.u32 %v3564_v44, %v2812_v47  ;;  %v3548_v55 = vld [vmem:[%s5534_s3 + $0x1dc] sm:$0xf0]  ;;  %v2276_v32 = vld [vmem:[%s5535_s4 + $0x30] sm:$0xff]  ;;  %v3479_v44 = vor.u32 %v3727_v30, %v3476_v31  ;;  %v3647_v16 = vld [vmem:[%s5534_s3 + $0x4f4] sm:$0xf0] }
 0x22d   : > { %2193 = vmatpush.bf16.msra.mxu3 %v3331_v60  ;;  %2206 = vmatpush.bf16.msrb.mxu0 %v3335_v61  ;;  %2336 = vst [vmem:[%s5082_s23 + $0x10] sm:$0xff] %v2304_v57  ;;  %v2823_v60 = vor.u32 %v3565_v50, %v2820_v51  ;;  %v2683_v11 = vor.u32 %v3548_v55, %v2682_v52  ;;  %v3694_v42 = vld [vmem:[%s5534_s3 + $0x674] sm:$0xf]  ;;  %v3695_v51 = vld [vmem:[%s5534_s3 + $0x67c] sm:$0xf] }
 0x22e   : > { %v3471_v57 = vor.u32 %v3726_v24, %v3468_v25  ;;  %v3340_v47 = vld [vmem:[%s5534_s3 + $0x6f0] sm:$0xf0]  ;;  %v3348_v52 = vld [vmem:[%s5534_s3 + $0x6f8] sm:$0xf0]  ;;  %v3210_v55 = vld [vmem:[%s5534_s3 + $0x570] sm:$0xf] }
 0x22f   : > { %v2954_v24 = vld [vmem:[%s5534_s3 + $0x370] sm:$0xf]  ;;  %v2962_v30 = vld [vmem:[%s5534_s3 + $0x378] sm:$0xf] }
 0x230   : > { %2168 = vmatpush.bf16.msra.mxu1 %v3195_v5  ;;  %2181 = vmatpush.bf16.msra.mxu2 %v3199_v6  ;;  %v2554_v6 = vld [vmem:[%s5534_s3 + $0x60] sm:$0xf]  ;;  %v3614_v25 = vld [vmem:[%s5534_s3 + $0x3ec] sm:$0xf0]  ;;  %v3615_v31 = vld [vmem:[%s5534_s3 + $0x3f4] sm:$0xf0] }
 0x231   : > { %2194 = vmatpush.bf16.msra.mxu3 %v3203_v12  ;;  %2207 = vmatpush.bf16.msrb.mxu0 %v3207_v13  ;;  %v1878_v61 = vpop.f32.mrf.mxu2  ;;  %v2687_v12 = vor.u32 %v3532_v56, %v2684_v58  ;;  %v2555_v28 = vor.u32 %v3516_v7, %v2554_v6  ;;  %v3678_v56 = vld [vmem:[%s5534_s3 + $0x5ec] sm:$0xf0]  ;;  %v3347_v58 = vor.u32 %v3711_v49, %v3346_v48  ;;  %v2281_v7 = vld [vmem:[%s5535_s4 + $0x58] sm:$0xff] }
 0x232   : > { %v1891_v1 = vpop.f32.mrf.mxu3  ;;  %v3212_v61 = vld [vmem:[%s5534_s3 + $0x5f0] sm:$0xf0]  ;;  %v3583_v48 = vld [vmem:[%s5534_s3 + $0x2f4] sm:$0xf0]  ;;  %v3567_v49 = vld [vmem:[%s5534_s3 + $0x27c] sm:$0xf] }
 0x233   : > { %v1915_v5 = vpop.f32.mrf.mxu1  ;;  %v3220_v1 = vld [vmem:[%s5534_s3 + $0x5f8] sm:$0xf0] }
 0x234   : > { %2169 = vmatpush.bf16.msra.mxu1 %v3067_v22  ;;  %2182 = vmatpush.bf16.msra.mxu2 %v3071_v23  ;;  %v2306_v13 = vmul.f32 %v2274_v0, %v1915_v5  ;;  %v1954_v14 = vpop.f32.mrf.mxu0  ;;  %v3466_v22 = vld [vmem:[%s5534_s3 + $0x770] sm:$0xf]  ;;  %v3663_v0 = vld [vmem:[%s5534_s3 + $0x57c] sm:$0xf] }
 0x235   : > { %2195 = vmatpush.bf16.msra.mxu3 %v3075_v27  ;;  %2208 = vmatpush.bf16.msrb.mxu0 %v3079_v8  ;;  %v2309_v20 = vmul.f32 %v2277_v4, %v1954_v14  ;;  %v3742_v23 = vld [vmem:[%s5534_s3 + $0x7ec] sm:$0xf0]  ;;  %v3743_v27 = vld [vmem:[%s5534_s3 + $0x7f4] sm:$0xf0]  ;;  %v2275_v8 = vld [vmem:[%s5535_s4 + $0x28] sm:$0xff]  ;;  %v3211_v4 = vor.u32 %v3678_v56, %v3210_v55 }
 0x236   : > { %2338 = vst [vmem:[%s5082_s23 + $0x20] sm:$0xff] %v2306_v13  ;;  %v3467_v37 = vor.u32 %v3742_v23, %v3466_v22  ;;  %v3475_v43 = vor.u32 %v3743_v27, %v3474_v26  ;;  %v3630_v13 = vld [vmem:[%s5534_s3 + $0x474] sm:$0xf]  ;;  %v3083_v22 = vor.u32 %v3646_v10, %v3082_v9 }
 0x237   : > { %2341 = vst [vmem:[%s5082_s23 + $0x38] sm:$0xff] %v2309_v20  ;;  %v3084_v14 = vld [vmem:[%s5534_s3 + $0x4f0] sm:$0xf0] }
 0x238   : > { %2170 = vmatpush.bf16.msra.mxu1 %v2939_v40  ;;  %2183 = vmatpush.bf16.msra.mxu2 %v2943_v41  ;;  %v3338_v40 = vld [vmem:[%s5534_s3 + $0x670] sm:$0xf]  ;;  %v3087_v23 = vor.u32 %v3630_v13, %v3084_v14  ;;  %v3598_v26 = vld [vmem:[%s5534_s3 + $0x374] sm:$0xf]  ;;  %v2578_v13 = vld [vmem:[%s5534_s3 + $0x78] sm:$0xf] }
 0x239   : > { %2196 = vmatpush.bf16.msra.mxu3 %v2947_v45  ;;  %2209 = vmatpush.bf16.msrb.mxu0 %v2951_v46  ;;  %v1928_v36 = vpop.f32.mrf.mxu2  ;;  %v3710_v41 = vld [vmem:[%s5534_s3 + $0x6ec] sm:$0xf0] }
 0x23a   : > { %v2307_v38 = vmul.f32 %v2275_v8, %v1928_v36  ;;  %v1941_v39 = vpop.f32.mrf.mxu3  ;;  %v3091_v8 = vor.u32 %v3647_v16, %v3090_v15  ;;  %v2955_v36 = vor.u32 %v3614_v25, %v2954_v24  ;;  %v3519_v15 = vld [vmem:[%s5534_s3 + $0xf4] sm:$0xf0]  ;;  %v3503_v16 = vld [vmem:[%s5534_s3 + $0x7c] sm:$0xf] }
 0x23b   : > { %v2308_v45 = vmul.f32 %v2276_v32, %v1941_v39  ;;  %v1917_v46 = vpop.f32.mrf.mxu1  ;;  %v3599_v32 = vld [vmem:[%s5534_s3 + $0x37c] sm:$0xf]  ;;  %v3582_v39 = vld [vmem:[%s5534_s3 + $0x2ec] sm:$0xf0] }
 0x23c   : > { %2171 = vmatpush.bf16.msra.mxu1 %v2811_v53  ;;  %2184 = vmatpush.bf16.msra.mxu2 %v2815_v54  ;;  %2339 = vst [vmem:[%s5082_s23 + $0x28] sm:$0xff] %v2307_v38  ;;  %v1956_v50 = vpop.f32.mrf.mxu0  ;;  %v3339_v53 = vor.u32 %v3710_v41, %v3338_v40  ;;  %v3343_v54 = vor.u32 %v3694_v42, %v3340_v47  ;;  %v2826_v38 = vld [vmem:[%s5534_s3 + $0x270] sm:$0xf] }
 0x23d   : > { %2197 = vmatpush.bf16.msra.mxu3 %v2819_v59  ;;  %2210 = vmatpush.bf16.msrb.mxu0 %v2823_v60  ;;  %2340 = vst [vmem:[%s5082_s23 + $0x30] sm:$0xff] %v2308_v45  ;;  %v3351_v59 = vor.u32 %v3695_v51, %v3348_v52  ;;  %v3662_v60 = vld [vmem:[%s5534_s3 + $0x574] sm:$0xf]  ;;  %v2963_v40 = vor.u32 %v3615_v31, %v2962_v30  ;;  %v2834_v45 = vld [vmem:[%s5534_s3 + $0x278] sm:$0xf] }
 0x23e   : > { %v3215_v5 = vor.u32 %v3662_v60, %v3212_v61  ;;  %v2836_v50 = vld [vmem:[%s5534_s3 + $0x2f8] sm:$0xf0]  ;;  %v2827_v55 = vor.u32 %v3582_v39, %v2826_v38  ;;  %v2835_v60 = vor.u32 %v3583_v48, %v2834_v45 }
 0x23f   : > { %v2839_v61 = vor.u32 %v3567_v49, %v2836_v50 }
 0x240   : > { %2172 = vmatpush.bf16.msra.mxu1 %v2683_v11  ;;  %2185 = vmatpush.bf16.msra.mxu2 %v2687_v12  ;;  %v3219_v11 = vor.u32 %v3679_v63, %v3218_v62  ;;  %v3223_v12 = vor.u32 %v3663_v0, %v3220_v1  ;;  %v2700_v62 = vld [vmem:[%s5534_s3 + $0x1f0] sm:$0xf0]  ;;  %v2706_v63 = vld [vmem:[%s5534_s3 + $0x178] sm:$0xf]  ;;  %v3535_v1 = vld [vmem:[%s5534_s3 + $0x17c] sm:$0xf] }
 0x241   : > { %2198 = vmatpush.bf16.msra.mxu3 %v2691_v18  ;;  %2211 = vmatpush.bf16.msrb.mxu0 %v2695_v19  ;;  %v1930_v2 = vpop.f32.mrf.mxu2  ;;  %v3092_v18 = vld [vmem:[%s5534_s3 + $0x4f8] sm:$0xf0]  ;;  %v3551_v0 = vld [vmem:[%s5534_s3 + $0x1f4] sm:$0xf0] }
 0x242   : > { %v1943_v6 = vpop.f32.mrf.mxu3  ;;  %v2708_v2 = vld [vmem:[%s5534_s3 + $0x1f8] sm:$0xf0] }
 0x243   : > { %v3518_v6 = vld [vmem:[%s5534_s3 + $0xec] sm:$0xf0]  ;;  %v2711_v9 = vor.u32 %v3535_v1, %v2708_v2 }
 0x244   : > { %2173 = vmatpush.bf16.msra.mxu1 %v2555_v28  ;;  %2186 = vmatpush.bf16.msra.mxu2 %v2559_v29  ;;  %v1967_v19 = vpop.f32.mrf.mxu1  ;;  %v3095_v28 = vor.u32 %v3631_v17, %v3092_v18  ;;  %v2956_v29 = vld [vmem:[%s5534_s3 + $0x3f0] sm:$0xf0]  ;;  %v2580_v17 = vld [vmem:[%s5534_s3 + $0xf8] sm:$0xf0] }
 0x245   : > { %2199 = vmatpush.bf16.msra.mxu3 %v2563_v33  ;;  %2212 = vmatpush.bf16.msrb.mxu0 %v2567_v34  ;;  %v2310_v20 = vmul.f32 %v2278_v3, %v1967_v19  ;;  %v2964_v33 = vld [vmem:[%s5534_s3 + $0x3f8] sm:$0xf0]  ;;  %v2279_v34 = vld [vmem:[%s5535_s4 + $0x48] sm:$0xff] }
 0x246   : > { %v2967_v41 = vor.u32 %v3599_v32, %v2964_v33 }
 0x247   : > { %2174 = vmatmul.bf16.vlgmr.msra.gmra.mxu1 %v4232_v35  ;;  %2187 = vmatmul.bf16.vlgmr.msra.gmra.mxu2 %v4232_v35  ;;  %v2006_v21 = vpop.f32.mrf.mxu0  ;;  %2342 = vst [vmem:[%s5082_s23 + $0x40] sm:$0xff] %v2310_v20  ;;  %v2579_v20 = vor.u32 %v3519_v15, %v2578_v13  ;;  %v2296_v13 = vld [vmem:[%s5535_s4 + $0xd0] sm:$0xff] }
 0x248   : > { %2218 = vmatpush.bf16.msrb.mxu1 %v3467_v37  ;;  %2231 = vmatpush.bf16.msrb.mxu2 %v3471_v57  ;;  %v2313_v27 = vmul.f32 %v2281_v7, %v2006_v21  ;;  %v2959_v37 = vor.u32 %v3598_v26, %v2956_v29  ;;  %v2280_v57 = vld [vmem:[%s5535_s4 + $0x50] sm:$0xff]  ;;  %v2707_v7 = vor.u32 %v3551_v0, %v2706_v63 }
 0x249   : > { %2244 = vmatpush.bf16.msrb.mxu3 %v3475_v43  ;;  %2257 = vmatpush.bf16.msra.mxu0 %v3479_v44  ;;  %v3566_v43 = vld [vmem:[%s5534_s3 + $0x274] sm:$0xf]  ;;  %v2583_v21 = vor.u32 %v3503_v16, %v2580_v17 }
 0x24a   : > { %2200 = vmatmul.bf16.vlgmr.msra.gmra.mxu3 %v4232_v35  ;;  %2213 = vmatmul.bf16.vlgmr.msrb.gmra.mxu0 %v4232_v35  ;;  %2345 = vst [vmem:[%s5082_s23 + $0x58] sm:$0xff] %v2313_v27  ;;  %v1980_v42 = vpop.f32.mrf.mxu2  ;;  %v2828_v44 = vld [vmem:[%s5534_s3 + $0x2f0] sm:$0xf0] }
 0x24b   : > { %v2311_v46 = vmul.f32 %v2279_v34, %v1980_v42  ;;  %v2831_v56 = vor.u32 %v3566_v43, %v2828_v44  ;;  %v2287_v42 = vld [vmem:[%s5535_s4 + $0x88] sm:$0xff]  ;;  %v2288_v43 = vld [vmem:[%s5535_s4 + $0x90] sm:$0xff] }
 0x24c   : > { %2219 = vmatpush.bf16.msrb.mxu1 %v3339_v53  ;;  %2232 = vmatpush.bf16.msrb.mxu2 %v3343_v54  ;;  %v1969_v52 = vpop.f32.mrf.mxu1  ;;  %v2698_v53 = vld [vmem:[%s5534_s3 + $0x170] sm:$0xf] }
 0x24d   : > { %2245 = vmatpush.bf16.msrb.mxu3 %v3347_v58  ;;  %2258 = vmatpush.bf16.msra.mxu0 %v3351_v59  ;;  %v1993_v47 = vpop.f32.mrf.mxu3  ;;  %2343 = vst [vmem:[%s5082_s23 + $0x48] sm:$0xff] %v2311_v46  ;;  %v3550_v58 = vld [vmem:[%s5534_s3 + $0x1ec] sm:$0xf0]  ;;  %v3534_v59 = vld [vmem:[%s5534_s3 + $0x174] sm:$0xf]  ;;  %v2290_v52 = vld [vmem:[%s5535_s4 + $0xa0] sm:$0xff] }
 0x24e   : > { %v2312_v51 = vmul.f32 %v2280_v57, %v1993_v47  ;;  %v2699_v3 = vor.u32 %v3550_v58, %v2698_v53  ;;  %v2289_v57 = vld [vmem:[%s5535_s4 + $0x98] sm:$0xff] }
 0x24f   : > { %v2008_v54 = vpop.f32.mrf.mxu0  ;;  %v2293_v53 = vld [vmem:[%s5535_s4 + $0xb8] sm:$0xff] }
 0x250   : > { %2220 = vmatpush.bf16.msrb.mxu1 %v3211_v4  ;;  %2233 = vmatpush.bf16.msrb.mxu2 %v3215_v5  ;;  %2344 = vst [vmem:[%s5082_s23 + $0x50] sm:$0xff] %v2312_v51  ;;  %v2703_v4 = vor.u32 %v3534_v59, %v2700_v62  ;;  %v2570_v5 = vld [vmem:[%s5534_s3 + $0x70] sm:$0xf]  ;;  %v2291_v59 = vld [vmem:[%s5535_s4 + $0xa8] sm:$0xff] }
 0x251   : > { %2246 = vmatpush.bf16.msrb.mxu3 %v3219_v11  ;;  %2259 = vmatpush.bf16.msra.mxu0 %v3223_v12  ;;  %v3502_v11 = vld [vmem:[%s5534_s3 + $0x74] sm:$0xf]  ;;  %v2571_v18 = vor.u32 %v3518_v6, %v2570_v5  ;;  %v2294_v5 = vld [vmem:[%s5535_s4 + $0xc0] sm:$0xff]  ;;  %v2297_v6 = vld [vmem:[%s5535_s4 + $0xd8] sm:$0xff] }
 0x252   : > { %v1982_v10 = vpop.f32.mrf.mxu2  ;;  %v2572_v12 = vld [vmem:[%s5534_s3 + $0xf0] sm:$0xf0] }
 0x253   : > { %v2575_v19 = vor.u32 %v3502_v11, %v2572_v12  ;;  %v2295_v12 = vld [vmem:[%s5535_s4 + $0xc8] sm:$0xff] }
 0x254   : > { %2221 = vmatpush.bf16.msrb.mxu1 %v3083_v22  ;;  %2234 = vmatpush.bf16.msrb.mxu2 %v3087_v23  ;;  %v2282_v22 = vld [vmem:[%s5535_s4 + $0x60] sm:$0xff]  ;;  %v2285_v23 = vld [vmem:[%s5535_s4 + $0x78] sm:$0xff] }
 0x255   : > { %2247 = vmatpush.bf16.msrb.mxu3 %v3091_v8  ;;  %2260 = vmatpush.bf16.msra.mxu0 %v3095_v28  ;;  %v1995_v14 = vpop.f32.mrf.mxu3  ;;  %v2284_v8 = vld [vmem:[%s5535_s4 + $0x70] sm:$0xff] }
 0x258   : > { %2222 = vmatpush.bf16.msrb.mxu1 %v2955_v36  ;;  %2235 = vmatpush.bf16.msrb.mxu2 %v2959_v37  ;;  %v2286_v37 = vld [vmem:[%s5535_s4 + $0x80] sm:$0xff] }
 0x259   : > { %2248 = vmatpush.bf16.msrb.mxu3 %v2963_v40  ;;  %2261 = vmatpush.bf16.msra.mxu0 %v2967_v41 }
 0x25c   : > { %2223 = vmatpush.bf16.msrb.mxu1 %v2827_v55  ;;  %2236 = vmatpush.bf16.msrb.mxu2 %v2831_v56 }
 0x25d   : > { %2249 = vmatpush.bf16.msrb.mxu3 %v2835_v60  ;;  %2262 = vmatpush.bf16.msra.mxu0 %v2839_v61  ;;  %v2292_v60 = vld [vmem:[%s5535_s4 + $0xb0] sm:$0xff] }
 0x260   : > { %2224 = vmatpush.bf16.msrb.mxu1 %v2699_v3  ;;  %2237 = vmatpush.bf16.msrb.mxu2 %v2703_v4 }
 0x261   : > { %2250 = vmatpush.bf16.msrb.mxu3 %v2707_v7  ;;  %2263 = vmatpush.bf16.msra.mxu0 %v2711_v9 }
 0x264   : > { %2225 = vmatpush.bf16.msrb.mxu1 %v2571_v18  ;;  %2238 = vmatpush.bf16.msrb.mxu2 %v2575_v19  ;;  %v2019_v24 = vpop.f32.mrf.mxu1 }
 0x265   : > { %2251 = vmatpush.bf16.msrb.mxu3 %v2579_v20  ;;  %2264 = vmatpush.bf16.msra.mxu0 %v2583_v21  ;;  %v2314_v25 = vmul.f32 %v2282_v22, %v2019_v24  ;;  %v2298_v22 = vld [vmem:[%s5535_s4 + $0xe0] sm:$0xff] }
 0x267   : > { %2226 = vmatmul.bf16.vlgmr.msrb.gmra.mxu1 %v4232_v35  ;;  %2239 = vmatmul.bf16.vlgmr.msrb.gmra.mxu2 %v4232_v35  ;;  %v2058_v26 = vpop.f32.mrf.mxu0  ;;  %2346 = vst [vmem:[%s5082_s23 + $0x60] sm:$0xff] %v2314_v25 }
 0x268   : > { %2252 = vmatmul.bf16.vlgmr.msrb.gmra.mxu3 %v4232_v35  ;;  %2265 = vmatmul.bf16.vlgmr.msra.gmra.mxu0 %v4232_v35  ;;  %v2317_v27 = vmul.f32 %v2285_v23, %v2058_v26  ;;  %v2283_v35 = vld [vmem:[%s5535_s4 + $0x68] sm:$0xff]  ;;  %v2301_v23 = vld [vmem:[%s5535_s4 + $0xf8] sm:$0xff] }
 0x26a   : > { %2349 = vst [vmem:[%s5082_s23 + $0x78] sm:$0xff] %v2317_v27  ;;  %v2032_v28 = vpop.f32.mrf.mxu2 }
 0x26b   : > { %v2315_v29 = vmul.f32 %v2283_v35, %v2032_v28  ;;  %v2299_v35 = vld [vmem:[%s5535_s4 + $0xe8] sm:$0xff] }
 0x26c   : > { %v2021_v32 = vpop.f32.mrf.mxu1 }
 0x26d   : > { %v2045_v30 = vpop.f32.mrf.mxu3  ;;  %2347 = vst [vmem:[%s5082_s23 + $0x68] sm:$0xff] %v2315_v29 }
 0x26e   : > { %v2316_v31 = vmul.f32 %v2284_v8, %v2045_v30  ;;  %v2300_v8 = vld [vmem:[%s5535_s4 + $0xf0] sm:$0xff] }
 0x26f   : > { %v2060_v33 = vpop.f32.mrf.mxu0 }
 0x270   : > { %2348 = vst [vmem:[%s5082_s23 + $0x70] sm:$0xff] %v2316_v31 }
 0x272   : > { %v2034_v34 = vpop.f32.mrf.mxu2 }
 0x275   : > { %v2047_v36 = vpop.f32.mrf.mxu3 }
 0x284   : > { %v2071_v38 = vpop.f32.mrf.mxu1 }
 0x285   : > { %v2318_v39 = vmul.f32 %v2286_v37, %v2071_v38 }
 0x287   : > { %v2110_v40 = vpop.f32.mrf.mxu0  ;;  %2350 = vst [vmem:[%s5082_s23 + $0x80] sm:$0xff] %v2318_v39 }
 0x288   : > { %v2321_v41 = vmul.f32 %v2289_v57, %v2110_v40 }
 0x28a   : > { %2353 = vst [vmem:[%s5082_s23 + $0x98] sm:$0xff] %v2321_v41  ;;  %v2084_v44 = vpop.f32.mrf.mxu2 }
 0x28b   : > { %v2319_v45 = vmul.f32 %v2287_v42, %v2084_v44 }
 0x28c   : > { %v2073_v48 = vpop.f32.mrf.mxu1 }
 0x28d   : > { %v2097_v46 = vpop.f32.mrf.mxu3  ;;  %2351 = vst [vmem:[%s5082_s23 + $0x88] sm:$0xff] %v2319_v45 }
 0x28e   : > { %v2320_v47 = vmul.f32 %v2288_v43, %v2097_v46 }
 0x28f   : > { %v2112_v49 = vpop.f32.mrf.mxu0 }
 0x290   : > { %2352 = vst [vmem:[%s5082_s23 + $0x90] sm:$0xff] %v2320_v47 }
 0x292   : > { %v2086_v50 = vpop.f32.mrf.mxu2 }
 0x295   : > { %v2099_v51 = vpop.f32.mrf.mxu3 }
 0x2a4   : > { %v2123_v54 = vpop.f32.mrf.mxu1 }
 0x2a5   : > { %v2322_v55 = vmul.f32 %v2290_v52, %v2123_v54 }
 0x2a7   : > { %v2162_v56 = vpop.f32.mrf.mxu0  ;;  %2354 = vst [vmem:[%s5082_s23 + $0xa0] sm:$0xff] %v2322_v55 }
 0x2a8   : > { %v2325_v58 = vmul.f32 %v2293_v53, %v2162_v56 }
 0x2aa   : > { %2357 = vst [vmem:[%s5082_s23 + $0xb8] sm:$0xff] %v2325_v58  ;;  %v2136_v61 = vpop.f32.mrf.mxu2 }
 0x2ab   : > { %v2323_v62 = vmul.f32 %v2291_v59, %v2136_v61 }
 0x2ac   : > { %v2125_v1 = vpop.f32.mrf.mxu1 }
 0x2ad   : > { %v2149_v63 = vpop.f32.mrf.mxu3  ;;  %2355 = vst [vmem:[%s5082_s23 + $0xa8] sm:$0xff] %v2323_v62 }
 0x2ae   : > { %v2324_v0 = vmul.f32 %v2292_v60, %v2149_v63 }
 0x2af   : > { %v2164_v2 = vpop.f32.mrf.mxu0 }
 0x2b0   : > { %2356 = vst [vmem:[%s5082_s23 + $0xb0] sm:$0xff] %v2324_v0 }
 0x2b2   : > { %v2138_v3 = vpop.f32.mrf.mxu2 }
 0x2b5   : > { %v2151_v4 = vpop.f32.mrf.mxu3 }
 0x2c4   : > { %v2175_v7 = vpop.f32.mrf.mxu1 }
 0x2c5   : > { %v2326_v9 = vmul.f32 %v2294_v5, %v2175_v7 }
 0x2c7   : > { %v2214_v10 = vpop.f32.mrf.mxu0  ;;  %2358 = vst [vmem:[%s5082_s23 + $0xc0] sm:$0xff] %v2326_v9 }
 0x2c8   : > { %v2329_v11 = vmul.f32 %v2297_v6, %v2214_v10 }
 0x2ca   : > { %2361 = vst [vmem:[%s5082_s23 + $0xd8] sm:$0xff] %v2329_v11  ;;  %v2188_v14 = vpop.f32.mrf.mxu2 }
 0x2cb   : > { %v2327_v15 = vmul.f32 %v2295_v12, %v2188_v14 }
 0x2cc   : > { %v2177_v18 = vpop.f32.mrf.mxu1 }
 0x2cd   : > { %v2201_v16 = vpop.f32.mrf.mxu3  ;;  %2359 = vst [vmem:[%s5082_s23 + $0xc8] sm:$0xff] %v2327_v15 }
 0x2ce   : > { %v2328_v17 = vmul.f32 %v2296_v13, %v2201_v16 }
 0x2cf   : > { %v2216_v19 = vpop.f32.mrf.mxu0 }
 0x2d0   : > { %2360 = vst [vmem:[%s5082_s23 + $0xd0] sm:$0xff] %v2328_v17 }
 0x2d2   : > { %v2190_v20 = vpop.f32.mrf.mxu2 }
 0x2d5   : > { %v2203_v21 = vpop.f32.mrf.mxu3 }
 0x2e4   : > { %v2227_v24 = vpop.f32.mrf.mxu1 }
 0x2e5   : > { %v2330_v25 = vmul.f32 %v2298_v22, %v2227_v24  ;;  %v2266_v26 = vpop.f32.mrf.mxu0 }
 0x2e6   : > { %v2333_v27 = vmul.f32 %v2301_v23, %v2266_v26 }
 0x2e7   : > { %2362 = vst [vmem:[%s5082_s23 + $0xe0] sm:$0xff] %v2330_v25 }
 0x2e8   : > { %2365 = vst [vmem:[%s5082_s23 + $0xf8] sm:$0xff] %v2333_v27 }
 0x2ea   : > { %v2240_v28 = vpop.f32.mrf.mxu2 }
 0x2eb   : > { %v2331_v29 = vmul.f32 %v2299_v35, %v2240_v28  ;;  %v2253_v30 = vpop.f32.mrf.mxu3 }
 0x2ec   : > { %v2332_v31 = vmul.f32 %v2300_v8, %v2253_v30  ;;  %v2229_v32 = vpop.f32.mrf.mxu1 }
 0x2ed   : > { %2363 = vst [vmem:[%s5082_s23 + $0xe8] sm:$0xff] %v2331_v29  ;;  %v2268_v33 = vpop.f32.mrf.mxu0 }
 0x2ee   : > { %2364 = vst [vmem:[%s5082_s23 + $0xf0] sm:$0xff] %v2332_v31 }
 0x2f2   : > { %v2242_v34 = vpop.f32.mrf.mxu2 }
 0x2f3   : > { %v2255_v36 = vpop.f32.mrf.mxu3 }
 0x2f4 PF: > { %s15_s18 = sadd.s32 1, %s3763_s18  }
 0x2f5   : > { %p12_p4 = scmp.ge.s32.totalorder %s15_s18, 6  }
 0x2f7   :  { %14 = sbr.rel (!%p12_p4) target bundleno = 1 (0x1), region = 73 }

// kernel: reverse.15
= control target key start
LH: loop header
LB: loop body
LE: loop exit
PB: predicated region body
PF: predicated region fallthrough
CT: control target
= control target key end

     0   :  { %v2_v0 = vlaneseq  ;;  %s380_s0 = inlined_call_operand.vmem [shape: f32[4,8,4096], index: 0, kind: input, shape index: {}]   ;;  %s381_s1 = inlined_call_operand.vmem [shape: f32[4,8,4096], index: 1, kind: output, shape index: {}]  }
   0x2   :  { %v336_v1 = vsub.s32 127, %v2_v0 }
   0x4   :  { %4 = vset.pattern.permute.xlu0 %v336_v1 }
   0x5   :  { %s339_s6 = smov 0   ;;  %s341_s7 = smov 0  }
   0x6   :  { %s343_s8 = smov 0  }
   0x7 LB: > { %s259_s9 = sadd.s32 4294967295, %s324_s8   ;;  %s22_s10 = sadd.s32 1, %s320_s7  ;;  %s324_s8 = sphi %s343_s8, %s10_s8   ;;  %s320_s7 = sphi %s341_s7, %s383_s7   ;;  %s316_s6 = sphi %s339_s6, %s382_s6  }
   0x8   : > { %p23_p0 = scmp.ge.s32.totalorder %s22_s10, 32  ;;  %p261_p1 = scmp.ge.s32.totalorder %s324_s8, 32 }
   0x9   : > { %s45_s11 = sand.u32 (!%p261_p1), 1, %s324_s8   ;;  %s48_s12 = ssub.s32 (!%p261_p1), 31, %s320_s7 }
   0xa   : > { %s385_s10 = smov (%p23_p0, %s22_s10), 0  ;;  %43 = sbr.rel (%p261_p1) target bundleno = 20 (0x14), region = 16 }
   0xb   : > { %s262_s13 = sshll.u32 (!%p261_p1), %s45_s11, 5  ;;  %s263_s14 = sshll.u32 (!%p261_p1), %s48_s12, 3 }
   0xc   : > { %s55_s17 = scalar_lea.vmem (!%p261_p1), %s380_s0, %s263_s14  ;;  %s47_s18 = scalar_lea.vmem (!%p261_p1), [#allocation0], %s262_s13 }
   0xf   : > { %v90_v2 = vld [vmem:[%s55_s17] sm:$0xff] }
  0x10   : > { %v92_v3 = vld [vmem:[%s55_s17 + $0x100] sm:$0xff]  ;;  %91 = vst [vmem:[%s47_s18] sm:$0xff] %v90_v2 }
  0x11   : > { %v94_v4 = vld [vmem:[%s55_s17 + $0x200] sm:$0xff]  ;;  %93 = vst [vmem:[%s47_s18 + $0x8] sm:$0xff] %v92_v3 }
  0x12   : > { %v96_v5 = vld [vmem:[%s55_s17 + $0x300] sm:$0xff]  ;;  %95 = vst [vmem:[%s47_s18 + $0x10] sm:$0xff] %v94_v4 }
  0x13   : > { %97 = vst [vmem:[%s47_s18 + $0x18] sm:$0xff] %v96_v5 }
  0x14 PF: > { %p264_p2 = scmp.ge.s32.totalorder %s324_s8, 1  ;;  %p102_p3 = scmp.lt.s32.totalorder %s324_s8, 33 }
  0x16   : > { %p103_p4 = pnand %p264_p2, %p102_p3 }
  0x17   : > { %s109_s19 = sand.u32 (!%p103_p4), 1, %s259_s9   ;;  %s274_s22 = sshll.u32 (!%p103_p4), %s316_s6, 3 }
  0x18   : > { %106 = sbr.rel (%p103_p4) target bundleno = 155 (0x9b), region = 54  ;;  %s265_s20 = sshll.u32 (!%p103_p4), %s109_s19, 5 }
  0x19   : > { %s111_s21 = scalar_lea.vmem (!%p103_p4), [#allocation0], %s265_s20  ;;  %s155_s25 = scalar_lea.vmem (!%p103_p4), %s381_s1, %s274_s22 }
  0x1d   : > { %301 = vset.pattern.permute.xlu1 %v336_v1  ;;  %v269_v6 = vld [vmem:[%s111_s21 + $0x10] sm:$0xff]  ;;  %v123_v7 = vld [vmem:[%s111_s21] sm:$0xff]  ;;  %v271_v8 = vld [vmem:[%s111_s21 + $0x18] sm:$0xff] }
  0x1e   : > { %136 = vperm.xlu1 %301, %v269_v6   ;;  %124 = vperm.xlu0 %4, %v123_v7   ;;  %v267_v9 = vld [vmem:[%s111_s21 + $0x8] sm:$0xff] }
  0x26   : > { %142 = vperm.xlu1 %301, %v271_v8   ;;  %130 = vperm.xlu0 %4, %v267_v9  }
  0x90   : > { %v137_v10 = vpop.permute.xlu1 %136  ;;  %v125_v11 = vpop.permute.xlu0 %124 }
  0x91   : > { %195 = vst [vmem:[%s155_s25 + $0x200] sm:$0xff] %v137_v10 }
  0x92   : > { %191 = vst [vmem:[%s155_s25] sm:$0xff] %v125_v11 }
  0x98   : > { %v143_v12 = vpop.permute.xlu1 %142  ;;  %v131_v13 = vpop.permute.xlu0 %130 }
  0x99   : > { %197 = vst [vmem:[%s155_s25 + $0x300] sm:$0xff] %v143_v12 }
  0x9a   : > { %193 = vst [vmem:[%s155_s25 + $0x100] sm:$0xff] %v131_v13 }
  0x9b PF: > { %s10_s8 = sadd.s32 1, %s324_s8   ;;  %s382_s6 = smov %s320_s7 }
  0x9c   : > { %p7_p5 = scmp.ge.s32.totalorder %s10_s8, 34   ;;  %s383_s7 = smov %s385_s10 }
  0x9e   :  { %9 = sbr.rel (!%p7_p5) target bundleno = 7 (0x7), region = 124 }

// kernel: model_forward.33
= control target key start
LH: loop header
LB: loop body
LE: loop exit
PB: predicated region body
PF: predicated region fallthrough
CT: control target
= control target key end

     0   :  { %s1464_s0 = inlined_call_operand.vmem [shape: f32[128,512], index: 0, kind: input, shape index: {}]   ;;  %s1465_s1 = inlined_call_operand.vmem [shape: f32[128,512], index: 1, kind: output, shape index: {}]  }
   0x1   :  { %v569_v0 = vld [vmem:[%s1464_s0 + $0x80] sm:$0xff]  ;;  %v574_v1 = vld [vmem:[%s1464_s0 + $0x88] sm:$0xff]  ;;  %v579_v2 = vld [vmem:[%s1464_s0 + $0x90] sm:$0xff] }
   0x2   :  { %v584_v3 = vld [vmem:[%s1464_s0 + $0x98] sm:$0xff]  ;;  %v88_v4 = vmul.f32 %v569_v0, %v569_v0  ;;  %v89_v5 = vmul.f32 %v574_v1, %v574_v1  ;;  %v90_v6 = vmul.f32 %v579_v2, %v579_v2  ;;  %v595_v7 = vld [vmem:[%s1464_s0 + $0x40] sm:$0xff]  ;;  %v600_v8 = vld [vmem:[%s1464_s0 + $0x48] sm:$0xff] }
   0x3   :  { %v91_v9 = vmul.f32 %v584_v3, %v584_v3  ;;  %v607_v10 = vld [vmem:[%s1464_s0 + $0x50] sm:$0xff]  ;;  %v612_v11 = vld [vmem:[%s1464_s0 + $0x58] sm:$0xff]  ;;  %v80_v12 = vmul.f32 %v595_v7, %v595_v7  ;;  %v81_v13 = vmul.f32 %v600_v8, %v600_v8  ;;  %v621_v14 = vld [vmem:[%s1464_s0] sm:$0xff] }
   0x4   :  { %v156_v15 = vadd.f32 %v89_v5, %v88_v4  ;;  %v82_v16 = vmul.f32 %v607_v10, %v607_v10  ;;  %v83_v17 = vmul.f32 %v612_v11, %v612_v11  ;;  %v630_v18 = vld [vmem:[%s1464_s0 + $0x8] sm:$0xff]  ;;  %v635_v19 = vld [vmem:[%s1464_s0 + $0x10] sm:$0xff]  ;;  %v640_v20 = vld [vmem:[%s1464_s0 + $0x18] sm:$0xff]  ;;  %v72_v21 = vmul.f32 %v621_v14, %v621_v14 }
   0x5   :  { %v146_v22 = vadd.f32 %v81_v13, %v80_v12  ;;  %v73_v23 = vmul.f32 %v630_v18, %v630_v18  ;;  %v74_v24 = vmul.f32 %v635_v19, %v635_v19  ;;  %v75_v25 = vmul.f32 %v640_v20, %v640_v20  ;;  %v653_v26 = vld [vmem:[%s1464_s0 + $0xa0] sm:$0xff]  ;;  %v658_v27 = vld [vmem:[%s1464_s0 + $0xa8] sm:$0xff]  ;;  %v663_v28 = vld [vmem:[%s1464_s0 + $0xb0] sm:$0xff] }
   0x6   :  { %v157_v29 = vadd.f32 %v156_v15, %v90_v6  ;;  %v668_v30 = vld [vmem:[%s1464_s0 + $0xb8] sm:$0xff]  ;;  %v92_v31 = vmul.f32 %v653_v26, %v653_v26  ;;  %v93_v32 = vmul.f32 %v658_v27, %v658_v27  ;;  %v94_v33 = vmul.f32 %v663_v28, %v663_v28  ;;  %v679_v34 = vld [vmem:[%s1464_s0 + $0x60] sm:$0xff]  ;;  %v684_v35 = vld [vmem:[%s1464_s0 + $0x68] sm:$0xff] }
   0x7   :  { %v147_v36 = vadd.f32 %v146_v22, %v82_v16  ;;  %v136_v37 = vadd.f32 %v73_v23, %v72_v21  ;;  %v95_v38 = vmul.f32 %v668_v30, %v668_v30  ;;  %v691_v39 = vld [vmem:[%s1464_s0 + $0x70] sm:$0xff]  ;;  %v696_v40 = vld [vmem:[%s1464_s0 + $0x78] sm:$0xff]  ;;  %v84_v41 = vmul.f32 %v679_v34, %v679_v34  ;;  %v703_v42 = vld [vmem:[%s1464_s0 + $0x20] sm:$0xff] }
   0x8   :  { %v158_v43 = vadd.f32 %v157_v29, %v91_v9  ;;  %v161_v44 = vadd.f32 %v93_v32, %v92_v31  ;;  %v85_v45 = vmul.f32 %v684_v35, %v684_v35  ;;  %v86_v46 = vmul.f32 %v691_v39, %v691_v39  ;;  %v712_v47 = vld [vmem:[%s1464_s0 + $0x28] sm:$0xff]  ;;  %v717_v48 = vld [vmem:[%s1464_s0 + $0x30] sm:$0xff]  ;;  %v726_v53 = vld [vmem:[%s1464_s0 + $0x100] sm:$0xff] }
   0x9   :  { %v148_v49 = vadd.f32 %v147_v36, %v83_v17  ;;  %v137_v50 = vadd.f32 %v136_v37, %v74_v24  ;;  %v87_v51 = vmul.f32 %v696_v40, %v696_v40  ;;  %v76_v52 = vmul.f32 %v703_v42, %v703_v42  ;;  %v731_v54 = vld [vmem:[%s1464_s0 + $0x108] sm:$0xff]  ;;  %v736_v57 = vld [vmem:[%s1464_s0 + $0x38] sm:$0xff]  ;;  %v745_v60 = vld [vmem:[%s1464_s0 + $0xe0] sm:$0xff] }
   0xa   :  { %159 = vadd.xlane.f32.xlu2 %v158_v43  ;;  %v162_v55 = vadd.f32 %v161_v44, %v94_v33  ;;  %v151_v56 = vadd.f32 %v85_v45, %v84_v41  ;;  %v77_v58 = vmul.f32 %v712_v47, %v712_v47  ;;  %v78_v59 = vmul.f32 %v717_v48, %v717_v48  ;;  %v750_v61 = vld [vmem:[%s1464_s0 + $0xe8] sm:$0xff]  ;;  %v755_v63 = vld [vmem:[%s1464_s0 + $0x110] sm:$0xff]  ;;  %v769_v13 = vld [vmem:[%s1464_s0 + $0xc0] sm:$0xff] }
   0xb   :  { %149 = vadd.xlane.f32.xlu1 %v148_v49  ;;  %v138_v62 = vadd.f32 %v137_v50, %v75_v25  ;;  %v104_v4 = vmul.f32 %v726_v53, %v726_v53  ;;  %v105_v5 = vmul.f32 %v731_v54, %v731_v54  ;;  %v764_v12 = vld [vmem:[%s1464_s0 + $0xf0] sm:$0xff]  ;;  %v774_v15 = vld [vmem:[%s1464_s0 + $0xc8] sm:$0xff]  ;;  %v79_v17 = vmul.f32 %v736_v57, %v736_v57  ;;  %v792_v32 = vld [vmem:[%s1464_s0 + $0x118] sm:$0xff] }
   0xc   :  { %v152_v6 = vadd.f32 %v151_v56, %v86_v46  ;;  %v141_v9 = vadd.f32 %v77_v58, %v76_v52  ;;  %v163_v16 = vadd.f32 %v162_v55, %v95_v38  ;;  %v100_v21 = vmul.f32 %v745_v60, %v745_v60  ;;  %v787_v31 = vld [vmem:[%s1464_s0 + $0xd0] sm:$0xff]  ;;  %v803_v41 = vld [vmem:[%s1464_s0 + $0x160] sm:$0xff]  ;;  %v808_v43 = vld [vmem:[%s1464_s0 + $0x168] sm:$0xff] }
   0xd   :  { %139 = vadd.xlane.f32.xlu0 %v138_v62  ;;  %v101_v22 = vmul.f32 %v750_v61, %v750_v61  ;;  %v106_v25 = vmul.f32 %v755_v63, %v755_v63  ;;  %v176_v29 = vadd.f32 %v105_v5, %v104_v4  ;;  %v102_v33 = vmul.f32 %v764_v12, %v764_v12  ;;  %v813_v44 = vld [vmem:[%s1464_s0 + $0xf8] sm:$0xff]  ;;  %v818_v45 = vld [vmem:[%s1464_s0 + $0x140] sm:$0xff]  ;;  %v823_v46 = vld [vmem:[%s1464_s0 + $0x148] sm:$0xff] }
   0xe   :  { %v153_v23 = vadd.f32 %v152_v6, %v87_v51  ;;  %v142_v24 = vadd.f32 %v141_v9, %v78_v59  ;;  %v96_v37 = vmul.f32 %v769_v13, %v769_v13  ;;  %v97_v38 = vmul.f32 %v774_v15, %v774_v15  ;;  %1492 = vst [vmem:[#allocation2_spill] sm:$0xff] %v818_v45  ;;  %v832_v56 = vld [vmem:[%s1464_s0 + $0xd8] sm:$0xff]  ;;  %v841_v62 = vld [vmem:[%s1464_s0 + $0x120] sm:$0xff]  ;;  %v846_v4 = vld [vmem:[%s1464_s0 + $0x128] sm:$0xff] }
   0xf   :  { %v171_v36 = vadd.f32 %v101_v22, %v100_v21  ;;  %1493 = vst [vmem:[#allocation3_spill] sm:$0xff] %v823_v46  ;;  %v98_v50 = vmul.f32 %v787_v31, %v787_v31  ;;  %v107_v52 = vmul.f32 %v792_v32, %v792_v32  ;;  %v177_v55 = vadd.f32 %v176_v29, %v106_v25  ;;  %v853_v9 = vld [vmem:[%s1464_s0 + $0x170] sm:$0xff] }
  0x10   :  { %v143_v49 = vadd.f32 %v142_v24, %v79_v17  ;;  %v166_v51 = vadd.f32 %v97_v38, %v96_v37  ;;  %v116_v58 = vmul.f32 %v803_v41, %v803_v41  ;;  %v117_v59 = vmul.f32 %v808_v43, %v808_v43  ;;  %1494 = vst [vmem:[#allocation4_spill] sm:$0xff] %v841_v62  ;;  %v862_v21 = vld [vmem:[%s1464_s0 + $0x150] sm:$0xff] }
  0x11   :  { %1495 = vst [vmem:[#allocation5_spill] sm:$0xff] %v846_v4  ;;  %v103_v5 = vmul.f32 %v813_v44, %v813_v44  ;;  %v172_v6 = vadd.f32 %v171_v36, %v102_v33  ;;  %v113_v17 = vmul.f32 %v823_v46, %v823_v46  ;;  %v99_v22 = vmul.f32 %v832_v56, %v832_v56  ;;  %v875_v37 = vld [vmem:[%s1464_s0 + $0x130] sm:$0xff] }
  0x12   :  { %164 = vadd.xlane.f32.xlu2 %v163_v16  ;;  %1496 = vst [vmem:[#allocation6_spill] sm:$0xff] %v853_v9  ;;  %v112_v16 = vmul.f32 %v818_v45, %v818_v45  ;;  %v108_v24 = vmul.f32 %v841_v62, %v841_v62  ;;  %v109_v25 = vmul.f32 %v846_v4, %v846_v4  ;;  %v959_v45 = vld [vmem:[%s1464_s0 + $0x190] sm:$0xff] }
  0x13   :  { %154 = vadd.xlane.f32.xlu1 %v153_v23  ;;  %1497 = vst [vmem:[#allocation7_spill] sm:$0xff] %v862_v21  ;;  %v167_v23 = vadd.f32 %v166_v51, %v98_v50  ;;  %v178_v29 = vadd.f32 %v177_v55, %v107_v52  ;;  %v118_v33 = vmul.f32 %v853_v9, %v853_v9  ;;  %v887_v52 = vld [vmem:[%s1464_s0 + $0x1c0] sm:$0xff]  ;;  %v892_v55 = vld [vmem:[%s1464_s0 + $0x1c8] sm:$0xff] }
  0x14   :  { %v191_v36 = vadd.f32 %v117_v59, %v116_v58  ;;  %1498 = vst [vmem:[#allocation8_spill] sm:$0xff] %v875_v37  ;;  %v173_v38 = vadd.f32 %v172_v6, %v103_v5  ;;  %v114_v50 = vmul.f32 %v862_v21, %v862_v21  ;;  %v186_v51 = vadd.f32 %v113_v17, %v112_v16  ;;  %v897_v58 = vld [vmem:[%s1464_s0 + $0x158] sm:$0xff]  ;;  %v902_v59 = vld [vmem:[%s1464_s0 + $0x1a0] sm:$0xff]  ;;  %v907_v5 = vld [vmem:[%s1464_s0 + $0x1a8] sm:$0xff] }
  0x15   :  { %144 = vadd.xlane.f32.xlu0 %v143_v49  ;;  %v880_v49 = vld [vmem:[%s1464_s0 + $0x178] sm:$0xff]  ;;  %1500 = vst [vmem:[#allocation10_spill] sm:$0xff] %v887_v52  ;;  %v168_v6 = vadd.f32 %v167_v23, %v99_v22  ;;  %v110_v16 = vmul.f32 %v875_v37, %v875_v37  ;;  %v181_v17 = vadd.f32 %v109_v25, %v108_v24  ;;  %v925_v23 = vld [vmem:[%s1464_s0 + $0x180] sm:$0xff]  ;;  %v930_v24 = vld [vmem:[%s1464_s0 + $0x188] sm:$0xff] }
  0x16   :  { %1499 = vst [vmem:[#allocation9_spill] sm:$0xff] %v880_v49  ;;  %v119_v4 = vmul.f32 %v880_v49, %v880_v49  ;;  %v192_v62 = vadd.f32 %v191_v36, %v118_v33  ;;  %v916_v21 = vld [vmem:[%s1464_s0 + $0x138] sm:$0xff]  ;;  %v128_v46 = vmul.f32 %v887_v52, %v887_v52  ;;  %v129_v22 = vmul.f32 %v892_v55, %v892_v55  ;;  %v937_v33 = vld [vmem:[%s1464_s0 + $0x1d0] sm:$0xff] }
  0x17   :  { %1501 = vst [vmem:[#allocation11_spill] sm:$0xff] %v892_v55  ;;  %v115_v25 = vmul.f32 %v897_v58, %v897_v58  ;;  %v124_v36 = vmul.f32 %v902_v59, %v902_v59  ;;  %v125_v55 = vmul.f32 %v907_v5, %v907_v5  ;;  %v946_v52 = vld [vmem:[%s1464_s0 + $0x1b0] sm:$0xff]  ;;  %v121_v37 = vmul.f32 %v930_v24, %v930_v24 }
  0x18   :  { %1502 = vst [vmem:[#allocation12_spill] sm:$0xff] %v897_v58  ;;  %v206_v58 = vadd.f32 %v129_v22, %v128_v46 }
  0x19   :  { %1503 = vst [vmem:[#allocation13_spill] sm:$0xff] %v902_v59  ;;  %v193_v59 = vadd.f32 %v192_v62, %v119_v4  ;;  %v971_v62 = vld [vmem:[%s1464_s0 + $0x1b8] sm:$0xff]  ;;  %v122_v4 = vmul.f32 %v959_v45, %v959_v45 }
  0x1a   :  { %1504 = vst [vmem:[#allocation14_spill] sm:$0xff] %v907_v5  ;;  %179 = vadd.xlane.f32.xlu2 %v178_v29  ;;  %v187_v29 = vadd.f32 %v186_v51, %v114_v50  ;;  %v182_v50 = vadd.f32 %v181_v17, %v110_v16  ;;  %v120_v51 = vmul.f32 %v925_v23, %v925_v23  ;;  %v964_v16 = vld [vmem:[%s1464_s0 + $0x1d8] sm:$0xff] }
  0x1b   :  { %1505 = vst [vmem:[#allocation15_spill] sm:$0xff] %v916_v21  ;;  %174 = vadd.xlane.f32.xlu1 %v173_v38  ;;  %v111_v38 = vmul.f32 %v916_v21, %v916_v21  ;;  %v130_v5 = vmul.f32 %v937_v33, %v937_v33  ;;  %v126_v17 = vmul.f32 %v946_v52, %v946_v52 }
  0x1c   :  { %1506 = vst [vmem:[#allocation16_spill] sm:$0xff] %v925_v23  ;;  %v196_v22 = vadd.f32 %v121_v37, %v120_v51  ;;  %v980_v23 = vld [vmem:[%s1464_s0 + $0x198] sm:$0xff]  ;;  %v127_v37 = vmul.f32 %v971_v62, %v971_v62 }
  0x1d   :  { %1507 = vst [vmem:[#allocation17_spill] sm:$0xff] %v930_v24  ;;  %169 = vadd.xlane.f32.xlu0 %v168_v6  ;;  %v188_v6 = vadd.f32 %v187_v29, %v115_v25  ;;  %v201_v24 = vadd.f32 %v125_v55, %v124_v36  ;;  %v183_v46 = vadd.f32 %v182_v50, %v111_v38  ;;  %v985_v55 = vld [vmem:[%s1464_s0 + $0x1e0] sm:$0xff]  ;;  %v990_v36 = vld [vmem:[%s1464_s0 + $0x1e8] sm:$0xff] }
  0x1e   :  { %1508 = vst [vmem:[#allocation18_spill] sm:$0xff] %v937_v33  ;;  %v131_v25 = vmul.f32 %v964_v16, %v964_v16  ;;  %v207_v29 = vadd.f32 %v206_v58, %v130_v5  ;;  %v197_v5 = vadd.f32 %v196_v22, %v122_v4  ;;  %v132_v38 = vmul.f32 %v985_v55, %v985_v55 }
  0x1f   :  { %1509 = vst [vmem:[#allocation19_spill] sm:$0xff] %v946_v52  ;;  %v202_v58 = vadd.f32 %v201_v24, %v126_v17  ;;  %v133_v50 = vmul.f32 %v990_v36, %v990_v36 }
  0x20   :  { %1510 = vst [vmem:[#allocation20_spill] sm:$0xff] %v959_v45  ;;  %v208_v51 = vadd.f32 %v207_v29, %v131_v25 }
  0x21   :  { %1511 = vst [vmem:[#allocation21_spill] sm:$0xff] %v964_v16  ;;  %v203_v45 = vadd.f32 %v202_v58, %v127_v37  ;;  %v211_v17 = vadd.f32 %v133_v50, %v132_v38 }
  0x22   :  { %1512 = vst [vmem:[#allocation22_spill] sm:$0xff] %v971_v62  ;;  %194 = vadd.xlane.f32.xlu2 %v193_v59  ;;  %v123_v59 = vmul.f32 %v980_v23, %v980_v23 }
  0x23   :  { %1513 = vst [vmem:[#allocation23_spill] sm:$0xff] %v980_v23  ;;  %189 = vadd.xlane.f32.xlu1 %v188_v6  ;;  %v1003_v6 = vld [vmem:[%s1464_s0 + $0x1f0] sm:$0xff] }
  0x24   :  { %1514 = vst [vmem:[#allocation24_spill] sm:$0xff] %v985_v55  ;;  %v198_v62 = vadd.f32 %v197_v5, %v123_v59  ;;  %v134_v24 = vmul.f32 %v1003_v6, %v1003_v6 }
  0x25   :  { %1515 = vst [vmem:[#allocation25_spill] sm:$0xff] %v990_v36  ;;  %184 = vadd.xlane.f32.xlu0 %v183_v46  ;;  %v1010_v46 = vld [vmem:[%s1464_s0 + $0x1f8] sm:$0xff] }
  0x26   :  { %1516 = vst [vmem:[#allocation26_spill] sm:$0xff] %v1003_v6  ;;  %v135_v4 = vmul.f32 %v1010_v46, %v1010_v46  ;;  %v212_v22 = vadd.f32 %v211_v17, %v134_v24 }
  0x27   :  { %1517 = vst [vmem:[#allocation27_spill] sm:$0xff] %v1010_v46 }
  0x28   :  { %v213_v25 = vadd.f32 %v212_v22, %v135_v4 }
  0x2a   :  { %209 = vadd.xlane.f32.xlu2 %v208_v51 }
  0x2b   :  { %204 = vadd.xlane.f32.xlu1 %v203_v45 }
  0x2d   :  { %199 = vadd.xlane.f32.xlu0 %v198_v62 }
  0x35   :  { %214 = vadd.xlane.f32.xlu0 %v213_v25 }
  0x7d   :  { %v160_v29 = vpop.xlane.xlu2 %159 }
  0x7e   :  { %v220_v37 = vmax.f32 %v160_v29, 1e-12  ;;  %v150_v58 = vpop.xlane.xlu1 %149 }
  0x7f   :  { %v218_v59 = vmax.f32 %v150_v58, 1e-12 }
  0x80   :  { %524 = vrsqrt.f32 %v220_v37  ;;  %v140_v5 = vpop.xlane.xlu0 %139  ;;  %vm278_vm0 = vweird.f32 %v220_v37 }
  0x81   :  { %526 = vrsqrt.f32 %v218_v59  ;;  %v216_v38 = vmax.f32 %v140_v5, 1e-12  ;;  %vm258_vm2 = vweird.f32 %v218_v59 }
  0x83   :  { %528 = vrsqrt.f32 %v216_v38  ;;  %vm238_vm4 = vweird.f32 %v216_v38 }
  0x85   :  { %v165_v50 = vpop.xlane.xlu2 %164 }
  0x86   :  { %v525_v51 = vpop.eup %524  ;;  %v1014_v6 = vmax.f32 %v165_v50, 1e-12  ;;  %v155_v45 = vpop.xlane.xlu1 %154 }
  0x87   :  { %v527_v62 = vpop.eup %526  ;;  %v273_v36 = vmul.f32 %v525_v51, %v220_v37  ;;  %v1016_v46 = vmax.f32 %v155_v45, 1e-12  ;;  %vm279_vm1 = vweird.f32 %v525_v51 }
  0x88   :  { %v253_v24 = vmul.f32 %v527_v62, %v218_v59  ;;  %530 = vrsqrt.f32 %v1014_v6  ;;  %v145_v17 = vpop.xlane.xlu0 %144  ;;  %vm259_vm3 = vweird.f32 %v527_v62  ;;  %vm280_vm5 = vmor %vm278_vm0, %vm279_vm1  ;;  %vm288_vm6 = vweird.f32 %v1014_v6 }
  0x89   :  { %v529_v4 = vpop.eup %528  ;;  %v274_v22 = vmul.f32 %v525_v51, %v273_v36  ;;  %532 = vrsqrt.f32 %v1016_v46  ;;  %v1020_v25 = vmax.f32 %v145_v17, 1e-12  ;;  %vm260_vm8 = vmor %vm258_vm2, %vm259_vm3  ;;  %vm268_vm11 = vweird.f32 %v1016_v46 }
  0x8a   :  { %v254_v29 = vmul.f32 %v527_v62, %v253_v24  ;;  %v233_v58 = vmul.f32 %v529_v4, %v216_v38  ;;  %vm239_vm7 = vweird.f32 %v529_v4 }
  0x8b   :  { %v275_v5 = vmul.f32 0.5, %v274_v22  ;;  %534 = vrsqrt.f32 %v1020_v25  ;;  %vm240_vm9 = vmor %vm238_vm4, %vm239_vm7  ;;  %vm248_vm0 = vweird.f32 %v1020_v25 }
  0x8c   :  { %v255_v50 = vmul.f32 0.5, %v254_v29  ;;  %v234_v55 = vmul.f32 %v529_v4, %v233_v58 }
  0x8d   :  { %v276_v23 = vsub.f32 1.5, %v275_v5  ;;  %v180_v45 = vpop.xlane.xlu2 %179 }
  0x8e   :  { %v1023_v52 = vpop.eup %530  ;;  %v256_v16 = vsub.f32 1.5, %v255_v50  ;;  %v235_v36 = vmul.f32 0.5, %v234_v55  ;;  %v1025_v33 = vmax.f32 %v180_v45, 1e-12  ;;  %v175_v17 = vpop.xlane.xlu1 %174 }
  0x8f   :  { %v1027_v21 = vpop.eup %532  ;;  %v277_v24 = vmul.f32 %v525_v51, %v276_v23  ;;  %v283_v22 = vmul.f32 %v1023_v52, %v1014_v6  ;;  %vm289_vm10 = vweird.f32 %v1023_v52 }
  0x90   :  { %v257_v37 = vmul.f32 %v527_v62, %v256_v16  ;;  %v236_v29 = vsub.f32 1.5, %v235_v36  ;;  %v263_v58 = vmul.f32 %v1027_v21, %v1016_v46  ;;  %v170_v55 = vpop.xlane.xlu0 %169  ;;  %536 = vrsqrt.f32 %v1025_v33  ;;  %vm290_vm13 = vmor %vm288_vm6, %vm289_vm10 }
  0x91   :  { %v281_v5 = vsel %vm280_vm5, %v525_v51, %v277_v24  ;;  %v284_v50 = vmul.f32 %v1023_v52, %v283_v22  ;;  %v1036_v23 = vpop.eup %534  ;;  %vm269_vm12 = vweird.f32 %v1027_v21  ;;  %vm318_vm2 = vweird.f32 %v1025_v33 }
  0x92   :  { %v408_v45 = vmul.f32 %v281_v5, %v569_v0  ;;  %v409_v49 = vmul.f32 %v281_v5, %v574_v1  ;;  %v410_v16 = vmul.f32 %v281_v5, %v579_v2  ;;  %v411_v36 = vmul.f32 %v281_v5, %v584_v3  ;;  %vm270_vm14 = vmor %vm268_vm11, %vm269_vm12 }
  0x93   :  { %v261_v9 = vsel %vm260_vm8, %v527_v62, %v257_v37  ;;  %v237_v51 = vmul.f32 %v529_v4, %v236_v29  ;;  %v285_v24 = vmul.f32 0.5, %v284_v50  ;;  %v264_v22 = vmul.f32 %v1027_v21, %v263_v58 }
  0x94   :  { %472 = vst [vmem:[%s1465_s1 + $0x80] sm:$0xff] %v408_v45  ;;  %v400_v0 = vmul.f32 %v261_v9, %v595_v7  ;;  %v401_v1 = vmul.f32 %v261_v9, %v600_v8  ;;  %v1053_v2 = vmax.f32 %v175_v17, 1e-12  ;;  %v243_v37 = vmul.f32 %v1036_v23, %v1020_v25 }
  0x95   :  { %473 = vst [vmem:[%s1465_s1 + $0x88] sm:$0xff] %v409_v49  ;;  %v241_v3 = vsel %vm240_vm9, %v529_v4, %v237_v51  ;;  %v286_v59 = vsub.f32 1.5, %v285_v24  ;;  %v265_v62 = vmul.f32 0.5, %v264_v22  ;;  %v402_v7 = vmul.f32 %v261_v9, %v607_v10  ;;  %v195_v29 = vpop.xlane.xlu2 %194 }
  0x96   :  { %474 = vst [vmem:[%s1465_s1 + $0x90] sm:$0xff] %v410_v16  ;;  %v1066_v8 = vpop.eup %536  ;;  %v403_v49 = vmul.f32 %v261_v9, %v612_v11  ;;  %v244_v17 = vmul.f32 %v1036_v23, %v243_v37  ;;  %v392_v10 = vmul.f32 %v241_v3, %v621_v14  ;;  %v393_v58 = vmul.f32 %v241_v3, %v630_v18  ;;  %v190_v9 = vpop.xlane.xlu1 %189 }
  0x97   :  { %475 = vst [vmem:[%s1465_s1 + $0x98] sm:$0xff] %v411_v36  ;;  %v287_v38 = vmul.f32 %v1023_v52, %v286_v59  ;;  %v266_v4 = vsub.f32 1.5, %v265_v62  ;;  %v313_v11 = vmul.f32 %v1066_v8, %v1025_v33  ;;  %538 = vrsqrt.f32 %v1053_v2 }
  0x98   :  { %464 = vst [vmem:[%s1465_s1 + $0x40] sm:$0xff] %v400_v0  ;;  %v185_v5 = vpop.xlane.xlu0 %184  ;;  %v245_v50 = vmul.f32 0.5, %v244_v17  ;;  %v1091_v45 = vmax.f32 %v170_v55, 1e-12  ;;  %v394_v6 = vmul.f32 %v241_v3, %v635_v19  ;;  %v395_v16 = vmul.f32 %v241_v3, %v640_v20 }
  0x99   :  { %465 = vst [vmem:[%s1465_s1 + $0x48] sm:$0xff] %v401_v1  ;;  %v291_v14 = vsel %vm290_vm13, %v1023_v52, %v287_v38  ;;  %v267_v18 = vmul.f32 %v1027_v21, %v266_v4  ;;  %v314_v52 = vmul.f32 %v1066_v8, %v313_v11  ;;  %vm249_vm15 = vweird.f32 %v1036_v23 }
  0x9a   :  { %466 = vst [vmem:[%s1465_s1 + $0x50] sm:$0xff] %v402_v7  ;;  %v246_v36 = vsub.f32 1.5, %v245_v50  ;;  %540 = vrsqrt.f32 %v1091_v45  ;;  %v412_v55 = vmul.f32 %v291_v14, %v653_v26  ;;  %v413_v51 = vmul.f32 %v291_v14, %v658_v27  ;;  %vm250_vm1 = vmor %vm248_vm0, %vm249_vm15 }
  0x9b   :  { %467 = vst [vmem:[%s1465_s1 + $0x58] sm:$0xff] %v403_v49  ;;  %v271_v19 = vsel %vm270_vm14, %v1027_v21, %v267_v18  ;;  %v315_v24 = vmul.f32 0.5, %v314_v52  ;;  %v1118_v22 = vmax.f32 %v195_v29, 1e-12  ;;  %v414_v27 = vmul.f32 %v291_v14, %v663_v28 }
  0x9c   :  { %456 = vst [vmem:[%s1465_s1] sm:$0xff] %v392_v10  ;;  %v247_v20 = vmul.f32 %v1036_v23, %v246_v36  ;;  %v1127_v46 = vmax.f32 %v190_v9, 1e-12  ;;  %v415_v21 = vmul.f32 %v291_v14, %v668_v30  ;;  %v1135_v3 = vmax.f32 %v185_v5, 1e-12 }
  0x9d   :  { %457 = vst [vmem:[%s1465_s1 + $0x8] sm:$0xff] %v393_v58  ;;  %v1120_v26 = vpop.eup %538  ;;  %v316_v0 = vsub.f32 1.5, %v315_v24  ;;  %v404_v28 = vmul.f32 %v271_v19, %v679_v34  ;;  %v405_v25 = vmul.f32 %v271_v19, %v684_v35  ;;  %vm319_vm3 = vweird.f32 %v1066_v8  ;;  %v210_v49 = vpop.xlane.xlu2 %209 }
  0x9e   :  { %458 = vst [vmem:[%s1465_s1 + $0x10] sm:$0xff] %v394_v6  ;;  %v303_v1 = vmul.f32 %v1120_v26, %v1053_v2  ;;  %v251_v62 = vsel %vm250_vm1, %v1036_v23, %v247_v20  ;;  %542 = vrsqrt.f32 %v1118_v22  ;;  %v406_v37 = vmul.f32 %v271_v19, %v691_v39  ;;  %v205_v38 = vpop.xlane.xlu1 %204  ;;  %vm320_vm4 = vmor %vm318_vm2, %vm319_vm3 }
  0x9f   :  { %459 = vst [vmem:[%s1465_s1 + $0x18] sm:$0xff] %v395_v16  ;;  %v317_v34 = vmul.f32 %v1066_v8, %v316_v0  ;;  %544 = vrsqrt.f32 %v1127_v46  ;;  %v407_v23 = vmul.f32 %v271_v19, %v696_v40  ;;  %vm308_vm5 = vweird.f32 %v1053_v2 }
  0xa0   :  { %476 = vst [vmem:[%s1465_s1 + $0xa0] sm:$0xff] %v412_v55  ;;  %v200_v30 = vpop.xlane.xlu0 %199  ;;  %v1146_v59 = vpop.eup %540  ;;  %v304_v35 = vmul.f32 %v1120_v26, %v303_v1  ;;  %546 = vrsqrt.f32 %v1135_v3  ;;  %v396_v39 = vmul.f32 %v251_v62, %v703_v42  ;;  %v397_v17 = vmul.f32 %v251_v62, %v712_v47 }
  0xa1   :  { %477 = vst [vmem:[%s1465_s1 + $0xa8] sm:$0xff] %v413_v51  ;;  %v293_v7 = vmul.f32 %v1146_v59, %v1091_v45  ;;  %v321_v40 = vsel %vm320_vm4, %v1066_v8, %v317_v34  ;;  %vm309_vm6 = vweird.f32 %v1120_v26  ;;  %v1183_v10 = vmax.f32 %v210_v49, 1e-12 }
  0xa2   :  { %478 = vst [vmem:[%s1465_s1 + $0xb0] sm:$0xff] %v414_v27  ;;  %v305_v4 = vmul.f32 0.5, %v304_v35  ;;  %v1185_v58 = vmax.f32 %v205_v38, 1e-12  ;;  %v398_v42 = vmul.f32 %v251_v62, %v717_v48  ;;  %v399_v47 = vmul.f32 %v251_v62, %v736_v57  ;;  %vm310_vm9 = vmor %vm308_vm5, %vm309_vm6 }
  0xa3   :  { %479 = vst [vmem:[%s1465_s1 + $0xb8] sm:$0xff] %v415_v21  ;;  %v294_v29 = vmul.f32 %v1146_v59, %v293_v7  ;;  %vm298_vm7 = vweird.f32 %v1091_v45  ;;  %vm299_vm8 = vweird.f32 %v1146_v59  ;;  %548 = vrsqrt.f32 %v1183_v10 }
  0xa4   :  { %468 = vst [vmem:[%s1465_s1 + $0x60] sm:$0xff] %v404_v28  ;;  %v306_v33 = vsub.f32 1.5, %v305_v4  ;;  %v1193_v8 = vpop.eup %542  ;;  %v424_v48 = vmul.f32 %v321_v40, %v726_v53  ;;  %550 = vrsqrt.f32 %v1185_v58  ;;  %v1214_v14 = vmax.f32 %v200_v30, 1e-12  ;;  %vm300_vm12 = vmor %vm298_vm7, %vm299_vm8 }
  0xa5   :  { %469 = vst [vmem:[%s1465_s1 + $0x68] sm:$0xff] %v405_v25  ;;  %v295_v9 = vmul.f32 0.5, %v294_v29  ;;  %v1201_v5 = vpop.eup %544  ;;  %v343_v57 = vmul.f32 %v1193_v8, %v1118_v22  ;;  %v425_v53 = vmul.f32 %v321_v40, %v731_v54  ;;  %v426_v36 = vmul.f32 %v321_v40, %v755_v63 }
  0xa6   :  { %470 = vst [vmem:[%s1465_s1 + $0x70] sm:$0xff] %v406_v37  ;;  %v307_v11 = vmul.f32 %v1120_v26, %v306_v33  ;;  %v1216_v18 = vpop.eup %546  ;;  %v333_v2 = vmul.f32 %v1201_v5, %v1127_v46  ;;  %v427_v52 = vmul.f32 %v321_v40, %v792_v32  ;;  %vm348_vm10 = vweird.f32 %v1118_v22 }
  0xa7   :  { %471 = vst [vmem:[%s1465_s1 + $0x78] sm:$0xff] %v407_v23  ;;  %v296_v6 = vsub.f32 1.5, %v295_v9  ;;  %vm338_vm11 = vweird.f32 %v1127_v46  ;;  %v344_v55 = vmul.f32 %v1193_v8, %v343_v57  ;;  %v323_v19 = vmul.f32 %v1216_v18, %v1135_v3 }
  0xa8   :  { %460 = vst [vmem:[%s1465_s1 + $0x20] sm:$0xff] %v396_v39  ;;  %v311_v50 = vsel %vm310_vm9, %v1120_v26, %v307_v11  ;;  %v215_v16 = vpop.xlane.xlu0 %214  ;;  %v334_v51 = vmul.f32 %v1201_v5, %v333_v2  ;;  %552 = vrsqrt.f32 %v1214_v14  ;;  %vm349_vm13 = vweird.f32 %v1193_v8  ;;  %v1523_v2 = vld [vmem:[#allocation12_spill] sm:$0xff] }
  0xa9   :  { %461 = vst [vmem:[%s1465_s1 + $0x28] sm:$0xff] %v397_v17  ;;  %v297_v54 = vmul.f32 %v1146_v59, %v296_v6  ;;  %v420_v63 = vmul.f32 %v311_v50, %v745_v60  ;;  %v421_v32 = vmul.f32 %v311_v50, %v750_v61  ;;  %v1250_v20 = vmax.f32 %v215_v16, 1e-12  ;;  %v1252_v24 = vpop.eup %548  ;;  %vm350_vm15 = vmor %vm348_vm10, %vm349_vm13 }
  0xaa   :  { %462 = vst [vmem:[%s1465_s1 + $0x30] sm:$0xff] %v398_v42  ;;  %v345_v60 = vmul.f32 0.5, %v344_v55  ;;  %v335_v27 = vmul.f32 0.5, %v334_v51  ;;  %v324_v61 = vmul.f32 %v1216_v18, %v323_v19  ;;  %v1259_v21 = vpop.eup %550  ;;  %v422_v45 = vmul.f32 %v311_v50, %v764_v12  ;;  %v1520_v42 = vld [vmem:[#allocation2_spill] sm:$0xff] }
  0xab   :  { %463 = vst [vmem:[%s1465_s1 + $0x38] sm:$0xff] %v399_v47  ;;  %v301_v26 = vsel %vm300_vm12, %v1146_v59, %v297_v54  ;;  %v423_v0 = vmul.f32 %v311_v50, %v813_v44  ;;  %vm339_vm14 = vweird.f32 %v1201_v5  ;;  %v373_v30 = vmul.f32 %v1252_v24, %v1183_v10  ;;  %v1525_v54 = vld [vmem:[#allocation5_spill] sm:$0xff] }
  0xac   :  { %488 = vst [vmem:[%s1465_s1 + $0x100] sm:$0xff] %v424_v48  ;;  %v346_v1 = vsub.f32 1.5, %v345_v60  ;;  %v336_v28 = vsub.f32 1.5, %v335_v27  ;;  %v325_v25 = vmul.f32 0.5, %v324_v61  ;;  %v416_v12 = vmul.f32 %v301_v26, %v769_v13  ;;  %vm340_vm0 = vmor %vm338_vm11, %vm339_vm14  ;;  %v1527_v60 = vld [vmem:[#allocation15_spill] sm:$0xff] }
  0xad   :  { %489 = vst [vmem:[%s1465_s1 + $0x108] sm:$0xff] %v425_v53  ;;  %v417_v44 = vmul.f32 %v301_v26, %v774_v15  ;;  %v363_v59 = vmul.f32 %v1259_v21, %v1185_v58  ;;  %554 = vrsqrt.f32 %v1250_v20  ;;  %v374_v37 = vmul.f32 %v1252_v24, %v373_v30  ;;  %v1522_v53 = vld [vmem:[#allocation7_spill] sm:$0xff]  ;;  %v1530_v30 = vld [vmem:[#allocation18_spill] sm:$0xff] }
  0xae   :  { %490 = vst [vmem:[%s1465_s1 + $0x110] sm:$0xff] %v426_v36  ;;  %v347_v62 = vmul.f32 %v1193_v8, %v346_v1  ;;  %v337_v34 = vmul.f32 %v1201_v5, %v336_v28  ;;  %v326_v35 = vsub.f32 1.5, %v325_v25  ;;  %v1287_v7 = vpop.eup %552  ;;  %v418_v13 = vmul.f32 %v301_v26, %v787_v31 }
  0xaf   :  { %491 = vst [vmem:[%s1465_s1 + $0x118] sm:$0xff] %v427_v52  ;;  %v364_v15 = vmul.f32 %v1259_v21, %v363_v59  ;;  %v419_v49 = vmul.f32 %v301_v26, %v832_v56  ;;  %v375_v23 = vmul.f32 0.5, %v374_v37  ;;  %vm329_vm1 = vweird.f32 %v1216_v18 }
  0xb0   :  { %484 = vst [vmem:[%s1465_s1 + $0xe0] sm:$0xff] %v420_v63  ;;  %v351_v38 = vsel %vm350_vm15, %v1193_v8, %v347_v62  ;;  %v341_v22 = vsel %vm340_vm0, %v1201_v5, %v337_v34  ;;  %v327_v4 = vmul.f32 %v1216_v18, %v326_v35  ;;  %v353_v33 = vmul.f32 %v1287_v7, %v1214_v14  ;;  %v1521_v8 = vld [vmem:[#allocation3_spill] sm:$0xff]  ;;  %v1533_v62 = vld [vmem:[#allocation14_spill] sm:$0xff] }
  0xb1   :  { %485 = vst [vmem:[%s1465_s1 + $0xe8] sm:$0xff] %v421_v32  ;;  %v436_v31 = vmul.f32 %v351_v38, %v803_v41  ;;  %v437_v56 = vmul.f32 %v351_v38, %v808_v43  ;;  %v1518_v41 = vld [vmem:[#allocation6_spill] sm:$0xff]  ;;  %v376_v17 = vsub.f32 1.5, %v375_v23  ;;  %v365_v40 = vmul.f32 0.5, %v364_v15  ;;  %v1519_v43 = vld [vmem:[#allocation9_spill] sm:$0xff] }
  0xb2   :  { %486 = vst [vmem:[%s1465_s1 + $0xf0] sm:$0xff] %v422_v45  ;;  %v438_v46 = vmul.f32 %v351_v38, %v1518_v41  ;;  %v439_v29 = vmul.f32 %v351_v38, %v1519_v43  ;;  %vm328_vm2 = vweird.f32 %v1135_v3  ;;  %vm378_vm3 = vweird.f32 %v1183_v10  ;;  %v1526_v10 = vld [vmem:[#allocation8_spill] sm:$0xff]  ;;  %v1529_v45 = vld [vmem:[#allocation11_spill] sm:$0xff]  ;;  %v1535_v15 = vld [vmem:[#allocation22_spill] sm:$0xff] }
  0xb3   :  { %487 = vst [vmem:[%s1465_s1 + $0xf8] sm:$0xff] %v423_v0  ;;  %v1318_v39 = vpop.eup %554  ;;  %v432_v47 = vmul.f32 %v341_v22, %v1520_v42  ;;  %v433_v11 = vmul.f32 %v341_v22, %v1521_v8  ;;  %vm330_vm4 = vmor %vm328_vm2, %vm329_vm1  ;;  %vm379_vm5 = vweird.f32 %v1252_v24  ;;  %v354_v9 = vmul.f32 %v1287_v7, %v353_v33  ;;  %v1537_v23 = vld [vmem:[#allocation17_spill] sm:$0xff]  ;;  %v1542_v33 = vld [vmem:[#allocation26_spill] sm:$0xff] }
  0xb4   :  { %480 = vst [vmem:[%s1465_s1 + $0xc0] sm:$0xff] %v416_v12  ;;  %v331_v3 = vsel %vm330_vm4, %v1216_v18, %v327_v4  ;;  %v377_v5 = vmul.f32 %v1252_v24, %v376_v17  ;;  %v366_v48 = vsub.f32 1.5, %v365_v40  ;;  %v383_v57 = vmul.f32 %v1318_v39, %v1250_v20  ;;  %v1524_v18 = vld [vmem:[#allocation4_spill] sm:$0xff]  ;;  %vm380_vm6 = vmor %vm378_vm3, %vm379_vm5  ;;  %v1531_v12 = vld [vmem:[#allocation21_spill] sm:$0xff] }
  0xb5   :  { %481 = vst [vmem:[%s1465_s1 + $0xc8] sm:$0xff] %v417_v44  ;;  %v434_v50 = vmul.f32 %v341_v22, %v1522_v53  ;;  %v355_v6 = vmul.f32 0.5, %v354_v9  ;;  %v435_v16 = vmul.f32 %v341_v22, %v1523_v2  ;;  %v428_v36 = vmul.f32 %v331_v3, %v1524_v18  ;;  %v1539_v4 = vld [vmem:[#allocation23_spill] sm:$0xff] }
  0xb6   :  { %482 = vst [vmem:[%s1465_s1 + $0xd0] sm:$0xff] %v418_v13  ;;  %vm368_vm7 = vweird.f32 %v1185_v58  ;;  %vm369_vm8 = vweird.f32 %v1259_v21  ;;  %v384_v52 = vmul.f32 %v1318_v39, %v383_v57  ;;  %v429_v55 = vmul.f32 %v331_v3, %v1525_v54 }
  0xb7   :  { %483 = vst [vmem:[%s1465_s1 + $0xd8] sm:$0xff] %v419_v49  ;;  %v381_v51 = vsel %vm380_vm6, %v1252_v24, %v377_v5  ;;  %v367_v19 = vmul.f32 %v1259_v21, %v366_v48  ;;  %v356_v63 = vsub.f32 1.5, %v355_v6  ;;  %v430_v32 = vmul.f32 %v331_v3, %v1526_v10  ;;  %v1528_v24 = vld [vmem:[#allocation10_spill] sm:$0xff]  ;;  %vm370_vm9 = vmor %vm368_vm7, %vm369_vm8 }
  0xb8   :  { %500 = vst [vmem:[%s1465_s1 + $0x160] sm:$0xff] %v436_v31  ;;  %v385_v26 = vmul.f32 0.5, %v384_v52  ;;  %v431_v27 = vmul.f32 %v331_v3, %v1527_v60  ;;  %v448_v61 = vmul.f32 %v381_v51, %v1528_v24  ;;  %vm359_vm10 = vweird.f32 %v1287_v7 }
  0xb9   :  { %501 = vst [vmem:[%s1465_s1 + $0x168] sm:$0xff] %v437_v56  ;;  %v449_v0 = vmul.f32 %v381_v51, %v1529_v45  ;;  %v371_v1 = vsel %vm370_vm9, %v1259_v21, %v367_v19  ;;  %v357_v28 = vmul.f32 %v1287_v7, %v356_v63  ;;  %v450_v58 = vmul.f32 %v381_v51, %v1530_v30  ;;  %v1532_v21 = vld [vmem:[#allocation13_spill] sm:$0xff] }
  0xba   :  { %502 = vst [vmem:[%s1465_s1 + $0x170] sm:$0xff] %v438_v46  ;;  %v386_v25 = vsub.f32 1.5, %v385_v26  ;;  %v451_v44 = vmul.f32 %v381_v51, %v1531_v12  ;;  %vm358_vm11 = vweird.f32 %v1214_v14  ;;  %v444_v59 = vmul.f32 %v371_v1, %v1532_v21  ;;  %v1534_v14 = vld [vmem:[#allocation19_spill] sm:$0xff]  ;;  %v1540_v46 = vld [vmem:[#allocation24_spill] sm:$0xff] }
  0xbb   :  { %503 = vst [vmem:[%s1465_s1 + $0x178] sm:$0xff] %v439_v29  ;;  %vm360_vm12 = vmor %vm358_vm11, %vm359_vm10  ;;  %v445_v34 = vmul.f32 %v371_v1, %v1533_v62  ;;  %vm389_vm13 = vweird.f32 %v1318_v39  ;;  %v446_v13 = vmul.f32 %v371_v1, %v1534_v14  ;;  %v447_v49 = vmul.f32 %v371_v1, %v1535_v15  ;;  %v1543_v29 = vld [vmem:[#allocation27_spill] sm:$0xff] }
  0xbc   :  { %496 = vst [vmem:[%s1465_s1 + $0x140] sm:$0xff] %v432_v47  ;;  %v361_v35 = vsel %vm360_vm12, %v1287_v7, %v357_v28  ;;  %v387_v37 = vmul.f32 %v1318_v39, %v386_v25  ;;  %vm388_vm14 = vweird.f32 %v1250_v20  ;;  %v1536_v7 = vld [vmem:[#allocation16_spill] sm:$0xff] }
  0xbd   :  { %497 = vst [vmem:[%s1465_s1 + $0x148] sm:$0xff] %v433_v11  ;;  %v440_v38 = vmul.f32 %v361_v35, %v1536_v7  ;;  %vm390_vm15 = vmor %vm388_vm14, %vm389_vm13  ;;  %v441_v31 = vmul.f32 %v361_v35, %v1537_v23  ;;  %v1538_v20 = vld [vmem:[#allocation20_spill] sm:$0xff]  ;;  %v443_v41 = vmul.f32 %v361_v35, %v1539_v4 }
  0xbe   :  { %498 = vst [vmem:[%s1465_s1 + $0x150] sm:$0xff] %v434_v50  ;;  %v391_v56 = vsel %vm390_vm15, %v1318_v39, %v387_v37  ;;  %v442_v22 = vmul.f32 %v361_v35, %v1538_v20  ;;  %v1541_v39 = vld [vmem:[#allocation25_spill] sm:$0xff] }
  0xbf   :  { %499 = vst [vmem:[%s1465_s1 + $0x158] sm:$0xff] %v435_v16  ;;  %v452_v17 = vmul.f32 %v391_v56, %v1540_v46  ;;  %v453_v40 = vmul.f32 %v391_v56, %v1541_v39  ;;  %v454_v43 = vmul.f32 %v391_v56, %v1542_v33  ;;  %v455_v42 = vmul.f32 %v391_v56, %v1543_v29 }
  0xc0   :  { %492 = vst [vmem:[%s1465_s1 + $0x120] sm:$0xff] %v428_v36 }
  0xc1   :  { %493 = vst [vmem:[%s1465_s1 + $0x128] sm:$0xff] %v429_v55 }
  0xc2   :  { %494 = vst [vmem:[%s1465_s1 + $0x130] sm:$0xff] %v430_v32 }
  0xc3   :  { %495 = vst [vmem:[%s1465_s1 + $0x138] sm:$0xff] %v431_v27 }
  0xc4   :  { %512 = vst [vmem:[%s1465_s1 + $0x1c0] sm:$0xff] %v448_v61 }
  0xc5   :  { %513 = vst [vmem:[%s1465_s1 + $0x1c8] sm:$0xff] %v449_v0 }
  0xc6   :  { %514 = vst [vmem:[%s1465_s1 + $0x1d0] sm:$0xff] %v450_v58 }
  0xc7   :  { %515 = vst [vmem:[%s1465_s1 + $0x1d8] sm:$0xff] %v451_v44 }
  0xc8   :  { %508 = vst [vmem:[%s1465_s1 + $0x1a0] sm:$0xff] %v444_v59 }
  0xc9   :  { %509 = vst [vmem:[%s1465_s1 + $0x1a8] sm:$0xff] %v445_v34 }
  0xca   :  { %510 = vst [vmem:[%s1465_s1 + $0x1b0] sm:$0xff] %v446_v13 }
  0xcb   :  { %511 = vst [vmem:[%s1465_s1 + $0x1b8] sm:$0xff] %v447_v49 }
  0xcc   :  { %504 = vst [vmem:[%s1465_s1 + $0x180] sm:$0xff] %v440_v38 }
  0xcd   :  { %505 = vst [vmem:[%s1465_s1 + $0x188] sm:$0xff] %v441_v31 }
  0xce   :  { %506 = vst [vmem:[%s1465_s1 + $0x190] sm:$0xff] %v442_v22 }
  0xcf   :  { %507 = vst [vmem:[%s1465_s1 + $0x198] sm:$0xff] %v443_v41 }
  0xd0   :  { %516 = vst [vmem:[%s1465_s1 + $0x1e0] sm:$0xff] %v452_v17 }
  0xd1   :  { %517 = vst [vmem:[%s1465_s1 + $0x1e8] sm:$0xff] %v453_v40 }
  0xd2   :  { %518 = vst [vmem:[%s1465_s1 + $0x1f0] sm:$0xff] %v454_v43 }
  0xd3   :  { %519 = vst [vmem:[%s1465_s1 + $0x1f8] sm:$0xff] %v455_v42 }

// kernel: model_forward.34
= control target key start
LH: loop header
LB: loop body
LE: loop exit
PB: predicated region body
PF: predicated region fallthrough
CT: control target
= control target key end

     0   :  { %s718_s12 = smov 0   ;;  %s720_s13 = smov 0   ;;  %s832_s0 = inlined_call_operand.vmem [shape: f32[8,64], index: 0, kind: input, shape index: {}]   ;;  %s833_s1 = inlined_call_operand.vmem [shape: bf16[64,4608], index: 1, kind: input, shape index: {}]   ;;  %s834_s2 = inlined_call_operand.vmem [shape: f32[3,4608], index: 2, kind: input, shape index: {}]   ;;  %s835_s3 = inlined_call_operand.vmem [shape: f32[8,4608], index: 3, kind: output, shape index: {}]  }
   0x1   :  { %s722_s14 = smov 0  }
   0x2 LB: > { %s542_s15 = sadd.s32 4294967295, %s696_s14   ;;  %s735_s16 = sadd.s32 1, %s696_s14   ;;  %s696_s14 = sphi %s722_s14, %s838_s14   ;;  %s692_s13 = sphi %s720_s13, %s837_s13   ;;  %s688_s12 = sphi %s718_s12, %s836_s12  }
   0x3   : > { %s38_s17 = ssub.s32 %s696_s14, %s735_s16  ;;  %s41_s18 = sadd.s32 1, %s692_s13 }
   0x4   : > { %p39_p0 = scmp.eq.s32.totalorder %s38_s17, 0  ;;  %p48_p1 = scmp.ne.s32.totalorder %s692_s13, %s688_s12 }
   0x5   : > { %p49_p2 = scmp.eq.s32.totalorder %s696_s14, 0  ;;  %p545_p4 = scmp.ge.s32.totalorder %s696_s14, 9 }
   0x6   : > { %s744_s19 = scalar_select %p39_p0, %s692_s13, %s41_s18  }
   0x7   : > { %p50_p3 = por %p49_p2, %p48_p1  ;;  %129 = sbr.rel (%p545_p4) target bundleno = 32 (0x20), region = 20 }
   0xc   : > { %132 = sbr.rel (!%p50_p3) target bundleno = 32 (0x20), region = 24  ;;  %s134_s20 = sand.u32 (%p50_p3), 1, %s692_s13  }
   0xd   : > { %s625_s21 = sshll.u32 (%p50_p3), %s696_s14, 4  ;;  %s546_s22 = sshll.u32 (%p50_p3), %s134_s20, 7 }
   0xe   : > { %s752_s25 = scalar_lea.vmem (%p50_p3), %s833_s1, %s625_s21  ;;  %s136_s26 = scalar_lea.vmem (%p50_p3), [#allocation2], %s546_s22 }
   0xf   : > { %v152_v0 = vld [vmem:[%s752_s25] sm:$0xff] (%p50_p3)  ;;  %v154_v1 = vld [vmem:[%s752_s25 + $0x8] sm:$0xff] (%p50_p3)  ;;  %v156_v2 = vld [vmem:[%s752_s25 + $0x90] sm:$0xff] (%p50_p3) }
  0x10   : > { %153 = vst [vmem:[%s136_s26] sm:$0xff] (%p50_p3), %v152_v0  ;;  %v158_v3 = vld [vmem:[%s752_s25 + $0x98] sm:$0xff] (%p50_p3)  ;;  %v160_v4 = vld [vmem:[%s752_s25 + $0x120] sm:$0xff] (%p50_p3)  ;;  %v162_v5 = vld [vmem:[%s752_s25 + $0x128] sm:$0xff] (%p50_p3) }
  0x11   : > { %155 = vst [vmem:[%s136_s26 + $0x8] sm:$0xff] %v154_v1  ;;  %v164_v6 = vld [vmem:[%s752_s25 + $0x1b0] sm:$0xff]  ;;  %v166_v7 = vld [vmem:[%s752_s25 + $0x1b8] sm:$0xff]  ;;  %v168_v8 = vld [vmem:[%s752_s25 + $0x240] sm:$0xff] }
  0x12   : > { %157 = vst [vmem:[%s136_s26 + $0x10] sm:$0xff] %v156_v2  ;;  %v170_v9 = vld [vmem:[%s752_s25 + $0x248] sm:$0xff]  ;;  %v172_v10 = vld [vmem:[%s752_s25 + $0x2d0] sm:$0xff]  ;;  %v174_v11 = vld [vmem:[%s752_s25 + $0x2d8] sm:$0xff] }
  0x13   : > { %159 = vst [vmem:[%s136_s26 + $0x18] sm:$0xff] %v158_v3  ;;  %v176_v12 = vld [vmem:[%s752_s25 + $0x360] sm:$0xff]  ;;  %v178_v13 = vld [vmem:[%s752_s25 + $0x368] sm:$0xff]  ;;  %v180_v14 = vld [vmem:[%s752_s25 + $0x3f0] sm:$0xff] }
  0x14   : > { %161 = vst [vmem:[%s136_s26 + $0x20] sm:$0xff] %v160_v4  ;;  %v182_v15 = vld [vmem:[%s752_s25 + $0x3f8] sm:$0xff] }
  0x15   : > { %163 = vst [vmem:[%s136_s26 + $0x28] sm:$0xff] %v162_v5 }
  0x16   : > { %165 = vst [vmem:[%s136_s26 + $0x30] sm:$0xff] %v164_v6 }
  0x17   : > { %167 = vst [vmem:[%s136_s26 + $0x38] sm:$0xff] %v166_v7 }
  0x18   : > { %169 = vst [vmem:[%s136_s26 + $0x40] sm:$0xff] %v168_v8 }
  0x19   : > { %171 = vst [vmem:[%s136_s26 + $0x48] sm:$0xff] %v170_v9 }
  0x1a   : > { %173 = vst [vmem:[%s136_s26 + $0x50] sm:$0xff] %v172_v10 }
  0x1b   : > { %175 = vst [vmem:[%s136_s26 + $0x58] sm:$0xff] %v174_v11 }
  0x1c   : > { %177 = vst [vmem:[%s136_s26 + $0x60] sm:$0xff] %v176_v12 }
  0x1d   : > { %179 = vst [vmem:[%s136_s26 + $0x68] sm:$0xff] %v178_v13 }
  0x1e   : > { %181 = vst [vmem:[%s136_s26 + $0x70] sm:$0xff] %v180_v14 }
  0x1f   : > { %183 = vst [vmem:[%s136_s26 + $0x78] sm:$0xff] %v182_v15 }
  0x20 PF: > { %p549_p5 = scmp.ge.s32.totalorder %s696_s14, 1  ;;  %p197_p6 = scmp.lt.s32.totalorder %s696_s14, 10 }
  0x22   : > { %p198_p7 = pnand %p549_p5, %p197_p6 }
  0x23   : > { %s204_s27 = sand.u32 (!%p198_p7), 1, %s688_s12   ;;  %s551_s5 = sshll.u32 (!%p198_p7), %s542_s15, 2 }
  0x24   : > { %201 = sbr.rel (%p198_p7) target bundleno = 213 (0xd5), region = 51  ;;  %s550_s28 = sshll.u32 (!%p198_p7), %s204_s27, 7 }
  0x25   : > { %s773_s29 = scalar_lea.vmem (!%p198_p7), [#allocation2], %s550_s28  ;;  %p234_p8 = scmp.lt.s32.totalorder (!%p198_p7), %s551_s5, 35 }
  0x29   : > { %v605_v16 = vld [vmem:[%s773_s29 + $0x60] sm:$0xf]  ;;  %v640_v17 = vld [vmem:[%s773_s29 + $0x6c] sm:$0xf0]  ;;  %v638_v18 = vld [vmem:[%s773_s29 + $0x64] sm:$0xf] }
  0x2a   : > { %v606_v19 = vor.u32 %v640_v17, %v605_v16  ;;  %v607_v20 = vld [vmem:[%s773_s29 + $0x70] sm:$0xf0]  ;;  %v613_v21 = vld [vmem:[%s773_s29 + $0x68] sm:$0xf]  ;;  %v641_v22 = vld [vmem:[%s773_s29 + $0x74] sm:$0xf0] }
  0x2b   : > { %v610_v23 = vor.u32 %v638_v18, %v607_v20  ;;  %v614_v24 = vor.u32 %v641_v22, %v613_v21  ;;  %v639_v25 = vld [vmem:[%s773_s29 + $0x6c] sm:$0xf]  ;;  %v615_v26 = vld [vmem:[%s773_s29 + $0x78] sm:$0xf0]  ;;  %v589_v27 = vld [vmem:[%s773_s29 + $0x40] sm:$0xf] }
  0x2c   : > { %368 = vmatpush.bf16.msra.mxu0 %v606_v19  ;;  %v618_v28 = vor.u32 %v639_v25, %v615_v26  ;;  %v636_v29 = vld [vmem:[%s773_s29 + $0x4c] sm:$0xf0]  ;;  %v634_v30 = vld [vmem:[%s773_s29 + $0x44] sm:$0xf]  ;;  %v591_v31 = vld [vmem:[%s773_s29 + $0x50] sm:$0xf0] }
  0x2d   : > { %381 = vmatpush.bf16.msra.mxu1 %v610_v23  ;;  %394 = vmatpush.bf16.msra.mxu2 %v614_v24  ;;  %v590_v32 = vor.u32 %v636_v29, %v589_v27  ;;  %v594_v33 = vor.u32 %v634_v30, %v591_v31  ;;  %v597_v34 = vld [vmem:[%s773_s29 + $0x48] sm:$0xf]  ;;  %v637_v35 = vld [vmem:[%s773_s29 + $0x54] sm:$0xf0]  ;;  %v635_v36 = vld [vmem:[%s773_s29 + $0x4c] sm:$0xf] }
  0x2e   : > { %407 = vmatpush.bf16.msra.mxu3 %v618_v28  ;;  %v598_v37 = vor.u32 %v637_v35, %v597_v34  ;;  %v599_v38 = vld [vmem:[%s773_s29 + $0x58] sm:$0xf0]  ;;  %v573_v39 = vld [vmem:[%s773_s29 + $0x20] sm:$0xf]  ;;  %v632_v40 = vld [vmem:[%s773_s29 + $0x2c] sm:$0xf0] }
  0x2f   : > { %v602_v41 = vor.u32 %v635_v36, %v599_v38  ;;  %v630_v42 = vld [vmem:[%s773_s29 + $0x24] sm:$0xf]  ;;  %v575_v43 = vld [vmem:[%s773_s29 + $0x30] sm:$0xf0]  ;;  %v581_v44 = vld [vmem:[%s773_s29 + $0x28] sm:$0xf]  ;;  %v574_v45 = vor.u32 %v632_v40, %v573_v39 }
  0x30   : > { %369 = vmatpush.bf16.msra.mxu0 %v590_v32  ;;  %v633_v46 = vld [vmem:[%s773_s29 + $0x34] sm:$0xf0]  ;;  %v631_v47 = vld [vmem:[%s773_s29 + $0x2c] sm:$0xf]  ;;  %v583_v48 = vld [vmem:[%s773_s29 + $0x38] sm:$0xf0]  ;;  %v578_v49 = vor.u32 %v630_v42, %v575_v43 }
  0x31   : > { %382 = vmatpush.bf16.msra.mxu1 %v594_v33  ;;  %395 = vmatpush.bf16.msra.mxu2 %v598_v37  ;;  %v582_v50 = vor.u32 %v633_v46, %v581_v44  ;;  %v557_v51 = vld [vmem:[%s773_s29] sm:$0xf]  ;;  %v628_v52 = vld [vmem:[%s773_s29 + $0xc] sm:$0xf0]  ;;  %v626_v53 = vld [vmem:[%s773_s29 + $0x4] sm:$0xf]  ;;  %v586_v54 = vor.u32 %v631_v47, %v583_v48 }
  0x32   : > { %408 = vmatpush.bf16.msra.mxu3 %v602_v41  ;;  %v559_v55 = vld [vmem:[%s773_s29 + $0x10] sm:$0xf0]  ;;  %v565_v56 = vld [vmem:[%s773_s29 + $0x8] sm:$0xf]  ;;  %v629_v57 = vld [vmem:[%s773_s29 + $0x14] sm:$0xf0]  ;;  %v558_v60 = vor.u32 %v628_v52, %v557_v51 }
  0x33   : > { %v627_v58 = vld [vmem:[%s773_s29 + $0xc] sm:$0xf]  ;;  %v567_v59 = vld [vmem:[%s773_s29 + $0x18] sm:$0xf0]  ;;  %v246_v61 = vld [vmem:[%s832_s0] sm:$0xff]  ;;  %v562_v62 = vor.u32 %v626_v53, %v559_v55  ;;  %v566_v63 = vor.u32 %v629_v57, %v565_v56  ;;  %vm360_vm0 = vcmask 523264  }
  0x34   : > { %370 = vmatpush.bf16.msra.mxu0 %v574_v45  ;;  %v570_v0 = vor.u32 %v627_v58, %v567_v59  ;;  %v247_v1 = vpack.c.bf16 %v246_v61, %v246_v61  ;;  %s840_s5 = smov (!%p234_p8, %s551_s5), 35 }
  0x35   : > { %383 = vmatpush.bf16.msra.mxu1 %v578_v49  ;;  %396 = vmatpush.bf16.msra.mxu2 %v582_v50  ;;  %s552_s6 = sshll.u32 %s840_s5, 2  ;;  %s554_s10 = sshll.u32 %s840_s5, 3 }
  0x36   : > { %409 = vmatpush.bf16.msra.mxu3 %v586_v54  ;;  %s237_s9 = scalar_lea.vmem %s834_s2, %s552_s6  ;;  %s243_s14 = scalar_lea.vmem %s835_s3, %s554_s10 }
  0x37   : > { %v264_v2 = vld [vmem:[%s237_s9] sm:$0x77]  ;;  %v265_v6 = vld [vmem:[%s237_s9 + $0x8] sm:$0x77] }
  0x38   : > { %371 = vmatpush.bf16.msra.mxu0 %v558_v60  ;;  %v268_v3 = vperm.slane %v264_v2, 0  ;;  %v269_v4 = vperm.slane %v264_v2, 4  ;;  %v270_v9 = vperm.slane %v265_v6, 0  ;;  %v271_v12 = vperm.slane %v265_v6, 4 }
  0x39   : > { %384 = vmatpush.bf16.msra.mxu1 %v562_v62  ;;  %397 = vmatpush.bf16.msra.mxu2 %v566_v63  ;;  %v432_v19 = vperm.slane %v264_v2, 1  ;;  %v433_v23 = vperm.slane %v264_v2, 5  ;;  %v448_v26 = vperm.slane %v264_v2, 2  ;;  %v449_v29 = vperm.slane %v264_v2, 6 }
  0x3a   : > { %410 = vmatpush.bf16.msra.mxu3 %v570_v0  ;;  %v276_v5 = vperm.slane %v268_v3, 0  ;;  %v277_v7 = vperm.slane %v269_v4, 0  ;;  %v278_v16 = vperm.slane %v270_v9, 0  ;;  %v279_v17 = vperm.slane %v271_v12, 0 }
  0x3b   : > { %619 = vmatmul.msk.bf16.vlgmr.msra.gmra.mxu0 %vm360_vm0, %v247_v1  ;;  %v440_v33 = vperm.slane %v432_v19, 1  ;;  %v441_v35 = vperm.slane %v433_v23, 1  ;;  %v456_v37 = vperm.slane %v448_v26, 2  ;;  %v457_v39 = vperm.slane %v449_v29, 2 }
  0x3c   : > { %620 = vmatmul.msk.bf16.vlgmr.msra.gmra.mxu1 %vm360_vm0, %v247_v1  ;;  %621 = vmatmul.msk.bf16.vlgmr.msra.gmra.mxu2 %vm360_vm0, %v247_v1  ;;  %v434_v40 = vperm.slane %v265_v6, 1  ;;  %v435_v43 = vperm.slane %v265_v6, 5  ;;  %v450_v46 = vperm.slane %v265_v6, 2  ;;  %v451_v49 = vperm.slane %v265_v6, 6 }
  0x3d   : > { %622 = vmatmul.msk.bf16.vlgmr.msra.gmra.mxu3 %vm360_vm0, %v247_v1 }
  0x3e   : > { %v442_v53 = vperm.slane %v434_v40, 1  ;;  %v443_v55 = vperm.slane %v435_v43, 1  ;;  %v458_v57 = vperm.slane %v450_v46, 2  ;;  %v459_v59 = vperm.slane %v451_v49, 2 }
  0xb8   : > { %v373_v8 = vpop.f32.mrf.mxu0 }
  0xb9   : > { %v374_v10 = vadd.f32 %v373_v8, %v276_v5  ;;  %v386_v11 = vpop.f32.mrf.mxu1 }
  0xba   : > { %v387_v13 = vadd.f32 %v386_v11, %v277_v7 }
  0xbb   : > { %v416_v14 = vmul.f32 0.5, %v374_v10 }
  0xbc   : > { %v417_v15 = vmul.f32 0.5, %v387_v13 }
  0xbd   : > { %666 = vtanh.f32 %v416_v14 }
  0xbe   : > { %668 = vtanh.f32 %v417_v15 }
  0xbf   : > { %v399_v18 = vpop.f32.mrf.mxu2 }
  0xc0   : > { %v400_v20 = vadd.f32 %v399_v18, %v278_v16  ;;  %v412_v21 = vpop.f32.mrf.mxu3  ;;  %v375_v22 = vpop.f32.mrf.mxu0 }
  0xc1   : > { %v413_v24 = vadd.f32 %v412_v21, %v279_v17  ;;  %v388_v25 = vpop.f32.mrf.mxu1 }
  0xc2   : > { %v418_v27 = vmul.f32 0.5, %v400_v20 }
  0xc3   : > { %v667_v28 = vpop.eup %666  ;;  %v419_v30 = vmul.f32 0.5, %v413_v24 }
  0xc4   : > { %v669_v31 = vpop.eup %668  ;;  %v424_v32 = vadd.f32 1.0, %v667_v28  ;;  %670 = vtanh.f32 %v418_v27 }
  0xc5   : > { %v425_v34 = vadd.f32 1.0, %v669_v31  ;;  %672 = vtanh.f32 %v419_v30 }
  0xc6   : > { %v428_v36 = vmul.f32 0.5, %v424_v32 }
  0xc7   : > { %v429_v38 = vmul.f32 0.5, %v425_v34  ;;  %v401_v41 = vpop.f32.mrf.mxu2 }
  0xc8   : > { %v444_v42 = vmul.f32 %v440_v33, %v428_v36  ;;  %v414_v44 = vpop.f32.mrf.mxu3 }
  0xc9   : > { %v445_v45 = vmul.f32 %v441_v35, %v429_v38 }
  0xca   : > { %v671_v47 = vpop.eup %670  ;;  %v460_v48 = vadd.f32 %v456_v37, %v444_v42 }
  0xcb   : > { %v673_v50 = vpop.eup %672  ;;  %v461_v51 = vadd.f32 %v457_v39, %v445_v45  ;;  %v426_v52 = vadd.f32 1.0, %v671_v47 }
  0xcc   : > { %464 = vst [vmem:[%s243_s14] sm:$0xff] %v460_v48  ;;  %v427_v54 = vadd.f32 1.0, %v673_v50 }
  0xcd   : > { %465 = vst [vmem:[%s243_s14 + $0x8] sm:$0xff] %v461_v51  ;;  %v430_v56 = vmul.f32 0.5, %v426_v52 }
  0xce   : > { %v431_v58 = vmul.f32 0.5, %v427_v54 }
  0xcf   : > { %v446_v60 = vmul.f32 %v442_v53, %v430_v56 }
  0xd0   : > { %v447_v61 = vmul.f32 %v443_v55, %v431_v58 }
  0xd1   : > { %v462_v62 = vadd.f32 %v458_v57, %v446_v60 }
  0xd2   : > { %v463_v63 = vadd.f32 %v459_v59, %v447_v61 }
  0xd3   : > { %466 = vst [vmem:[%s243_s14 + $0x10] sm:$0xff] %v462_v62 }
  0xd4   : > { %467 = vst [vmem:[%s243_s14 + $0x18] sm:$0xff] %v463_v63 }
  0xd5 PF: > { %p10_p9 = scmp.ge.s32.totalorder %s735_s16, 11   ;;  %s836_s12 = smov %s692_s13 }
  0xd6   : > { %s837_s13 = smov %s744_s19  ;;  %s838_s14 = smov %s735_s16 }
  0xd7   :  { %12 = sbr.rel (!%p10_p9) target bundleno = 2 (0x2), region = 93 }

// kernel: reverse.17
= control target key start
LH: loop header
LB: loop body
LE: loop exit
PB: predicated region body
PF: predicated region fallthrough
CT: control target
= control target key end

     0   :  { %v2_v0 = vlaneseq  ;;  %s648_s0 = inlined_call_operand.vmem [shape: f32[8,16,256], index: 0, kind: input, shape index: {}]   ;;  %s649_s1 = inlined_call_operand.vmem [shape: f32[8,16,256], index: 1, kind: output, shape index: {}]  }
   0x2   :  { %v547_v1 = vsub.s32 127, %v2_v0 }
   0x4   :  { %4 = vset.pattern.permute.xlu0 %v547_v1 }
   0x5   :  { %s550_s6 = smov 0   ;;  %s552_s7 = smov 0  }
   0x6   :  { %s554_s8 = smov 0  }
   0x7 LB: > { %s445_s9 = sadd.s32 4294967295, %s535_s8   ;;  %s22_s10 = sadd.s32 1, %s531_s7  ;;  %s535_s8 = sphi %s554_s8, %s10_s8   ;;  %s531_s7 = sphi %s552_s7, %s651_s7   ;;  %s527_s6 = sphi %s550_s6, %s650_s6  }
   0x8   : > { %p23_p0 = scmp.ge.s32.totalorder %s22_s10, 2  ;;  %p447_p1 = scmp.ge.s32.totalorder %s535_s8, 2 }
   0x9   : > { %s45_s11 = sand.u32 (!%p447_p1), 1, %s535_s8   ;;  %s48_s12 = ssub.s32 (!%p447_p1), 1, %s531_s7 }
   0xa   : > { %s653_s10 = smov (%p23_p0, %s22_s10), 0  ;;  %43 = sbr.rel (%p447_p1) target bundleno = 32 (0x20), region = 16 }
   0xb   : > { %s448_s13 = sshll.u32 (!%p447_p1), %s45_s11, 7  ;;  %s449_s14 = sshll.u32 (!%p447_p1), %s48_s12, 3 }
   0xc   : > { %s575_s17 = scalar_lea.vmem (!%p447_p1), %s648_s0, %s449_s14  ;;  %s47_s18 = scalar_lea.vmem (!%p447_p1), [#allocation0], %s448_s13 }
   0xf   : > { %v115_v2 = vld [vmem:[%s575_s17] sm:$0xff]  ;;  %v117_v3 = vld [vmem:[%s575_s17 + $0x10] sm:$0xff] }
  0x10   : > { %v119_v4 = vld [vmem:[%s575_s17 + $0x20] sm:$0xff]  ;;  %116 = vst [vmem:[%s47_s18] sm:$0xff] %v115_v2  ;;  %v121_v5 = vld [vmem:[%s575_s17 + $0x30] sm:$0xff] }
  0x11   : > { %118 = vst [vmem:[%s47_s18 + $0x8] sm:$0xff] %v117_v3  ;;  %v123_v6 = vld [vmem:[%s575_s17 + $0x40] sm:$0xff]  ;;  %v125_v7 = vld [vmem:[%s575_s17 + $0x50] sm:$0xff] }
  0x12   : > { %120 = vst [vmem:[%s47_s18 + $0x10] sm:$0xff] %v119_v4  ;;  %v127_v8 = vld [vmem:[%s575_s17 + $0x60] sm:$0xff]  ;;  %v129_v9 = vld [vmem:[%s575_s17 + $0x70] sm:$0xff] }
  0x13   : > { %122 = vst [vmem:[%s47_s18 + $0x18] sm:$0xff] %v121_v5  ;;  %v131_v10 = vld [vmem:[%s575_s17 + $0x80] sm:$0xff]  ;;  %v133_v11 = vld [vmem:[%s575_s17 + $0x90] sm:$0xff] }
  0x14   : > { %124 = vst [vmem:[%s47_s18 + $0x20] sm:$0xff] %v123_v6  ;;  %v135_v12 = vld [vmem:[%s575_s17 + $0xa0] sm:$0xff]  ;;  %v137_v13 = vld [vmem:[%s575_s17 + $0xb0] sm:$0xff] }
  0x15   : > { %126 = vst [vmem:[%s47_s18 + $0x28] sm:$0xff] %v125_v7  ;;  %v139_v14 = vld [vmem:[%s575_s17 + $0xc0] sm:$0xff]  ;;  %v141_v15 = vld [vmem:[%s575_s17 + $0xd0] sm:$0xff] }
  0x16   : > { %128 = vst [vmem:[%s47_s18 + $0x30] sm:$0xff] %v127_v8  ;;  %v143_v16 = vld [vmem:[%s575_s17 + $0xe0] sm:$0xff]  ;;  %v145_v17 = vld [vmem:[%s575_s17 + $0xf0] sm:$0xff] }
  0x17   : > { %130 = vst [vmem:[%s47_s18 + $0x38] sm:$0xff] %v129_v9 }
  0x18   : > { %132 = vst [vmem:[%s47_s18 + $0x40] sm:$0xff] %v131_v10 }
  0x19   : > { %134 = vst [vmem:[%s47_s18 + $0x48] sm:$0xff] %v133_v11 }
  0x1a   : > { %136 = vst [vmem:[%s47_s18 + $0x50] sm:$0xff] %v135_v12 }
  0x1b   : > { %138 = vst [vmem:[%s47_s18 + $0x58] sm:$0xff] %v137_v13 }
  0x1c   : > { %140 = vst [vmem:[%s47_s18 + $0x60] sm:$0xff] %v139_v14 }
  0x1d   : > { %142 = vst [vmem:[%s47_s18 + $0x68] sm:$0xff] %v141_v15 }
  0x1e   : > { %144 = vst [vmem:[%s47_s18 + $0x70] sm:$0xff] %v143_v16 }
  0x1f   : > { %146 = vst [vmem:[%s47_s18 + $0x78] sm:$0xff] %v145_v17 }
  0x20 PF: > { %p450_p2 = scmp.ge.s32.totalorder %s535_s8, 1  ;;  %p151_p3 = scmp.lt.s32.totalorder %s535_s8, 3 }
  0x22   : > { %p152_p4 = pnand %p450_p2, %p151_p3 }
  0x23   : > { %s158_s19 = sand.u32 (!%p152_p4), 1, %s445_s9   ;;  %s484_s22 = sshll.u32 (!%p152_p4), %s527_s6, 3 }
  0x24   : > { %155 = sbr.rel (%p152_p4) target bundleno = 199 (0xc7), region = 54  ;;  %s451_s20 = sshll.u32 (!%p152_p4), %s158_s19, 7 }
  0x25   : > { %s599_s21 = scalar_lea.vmem (!%p152_p4), [#allocation0], %s451_s20  ;;  %s621_s25 = scalar_lea.vmem (!%p152_p4), %s649_s1, %s484_s22 }
  0x29   : > { %512 = vset.pattern.permute.xlu2 %v547_v1  ;;  %511 = vset.pattern.permute.xlu1 %v547_v1  ;;  %v459_v18 = vld [vmem:[%s599_s21 + $0x20] sm:$0xff]  ;;  %v455_v19 = vld [vmem:[%s599_s21 + $0x10] sm:$0xff]  ;;  %v461_v21 = vld [vmem:[%s599_s21 + $0x28] sm:$0xff] }
  0x2a   : > { %v174_v20 = vld [vmem:[%s599_s21] sm:$0xff]  ;;  %199 = vperm.xlu2 %512, %v459_v18   ;;  %187 = vperm.xlu1 %511, %v455_v19   ;;  %v457_v22 = vld [vmem:[%s599_s21 + $0x18] sm:$0xff]  ;;  %v453_v23 = vld [vmem:[%s599_s21 + $0x8] sm:$0xff] }
  0x2b   : > { %175 = vperm.xlu0 %4, %v174_v20   ;;  %v467_v24 = vld [vmem:[%s599_s21 + $0x40] sm:$0xff]  ;;  %v465_v25 = vld [vmem:[%s599_s21 + $0x38] sm:$0xff]  ;;  %v463_v26 = vld [vmem:[%s599_s21 + $0x30] sm:$0xff] }
  0x2c   : > { %v473_v27 = vld [vmem:[%s599_s21 + $0x58] sm:$0xff]  ;;  %v471_v28 = vld [vmem:[%s599_s21 + $0x50] sm:$0xff]  ;;  %v469_v29 = vld [vmem:[%s599_s21 + $0x48] sm:$0xff] }
  0x2d   : > { %v479_v30 = vld [vmem:[%s599_s21 + $0x70] sm:$0xff]  ;;  %v477_v31 = vld [vmem:[%s599_s21 + $0x68] sm:$0xff]  ;;  %v475_v32 = vld [vmem:[%s599_s21 + $0x60] sm:$0xff] }
  0x2e   : > { %v481_v33 = vld [vmem:[%s599_s21 + $0x78] sm:$0xff] }
  0x32   : > { %205 = vperm.xlu2 %512, %v461_v21   ;;  %193 = vperm.xlu1 %511, %v457_v22  }
  0x33   : > { %181 = vperm.xlu0 %4, %v453_v23  }
  0x3a   : > { %223 = vperm.xlu2 %512, %v467_v24   ;;  %217 = vperm.xlu1 %511, %v465_v25  }
  0x3b   : > { %211 = vperm.xlu0 %4, %v463_v26  }
  0x42   : > { %241 = vperm.xlu2 %512, %v473_v27   ;;  %235 = vperm.xlu1 %511, %v471_v28  }
  0x43   : > { %229 = vperm.xlu0 %4, %v469_v29  }
  0x4a   : > { %259 = vperm.xlu2 %512, %v479_v30   ;;  %253 = vperm.xlu1 %511, %v477_v31  }
  0x4b   : > { %247 = vperm.xlu0 %4, %v475_v32  }
  0x53   : > { %265 = vperm.xlu0 %4, %v481_v33  }
  0x84   : > { %v200_v34 = vpop.permute.xlu2 %199 }
  0x85   : > { %347 = vst [vmem:[%s621_s25 + $0x40] sm:$0xff] %v200_v34 }
  0x8c   : > { %v206_v35 = vpop.permute.xlu2 %205 }
  0x8d   : > { %349 = vst [vmem:[%s621_s25 + $0x50] sm:$0xff] %v206_v35 }
  0x94   : > { %v224_v36 = vpop.permute.xlu2 %223 }
  0x95   : > { %355 = vst [vmem:[%s621_s25 + $0x80] sm:$0xff] %v224_v36 }
  0x9c   : > { %v242_v37 = vpop.permute.xlu2 %241  ;;  %v188_v38 = vpop.permute.xlu1 %187 }
  0x9d   : > { %v176_v39 = vpop.permute.xlu0 %175  ;;  %361 = vst [vmem:[%s621_s25 + $0xb0] sm:$0xff] %v242_v37 }
  0x9e   : > { %343 = vst [vmem:[%s621_s25 + $0x20] sm:$0xff] %v188_v38 }
  0x9f   : > { %339 = vst [vmem:[%s621_s25] sm:$0xff] %v176_v39 }
  0xa4   : > { %v260_v40 = vpop.permute.xlu2 %259  ;;  %v194_v41 = vpop.permute.xlu1 %193 }
  0xa5   : > { %v182_v42 = vpop.permute.xlu0 %181  ;;  %367 = vst [vmem:[%s621_s25 + $0xe0] sm:$0xff] %v260_v40 }
  0xa6   : > { %345 = vst [vmem:[%s621_s25 + $0x30] sm:$0xff] %v194_v41 }
  0xa7   : > { %341 = vst [vmem:[%s621_s25 + $0x10] sm:$0xff] %v182_v42 }
  0xac   : > { %v218_v43 = vpop.permute.xlu1 %217 }
  0xad   : > { %v212_v44 = vpop.permute.xlu0 %211  ;;  %353 = vst [vmem:[%s621_s25 + $0x70] sm:$0xff] %v218_v43 }
  0xae   : > { %351 = vst [vmem:[%s621_s25 + $0x60] sm:$0xff] %v212_v44 }
  0xb4   : > { %v236_v45 = vpop.permute.xlu1 %235 }
  0xb5   : > { %v230_v46 = vpop.permute.xlu0 %229  ;;  %359 = vst [vmem:[%s621_s25 + $0xa0] sm:$0xff] %v236_v45 }
  0xb6   : > { %357 = vst [vmem:[%s621_s25 + $0x90] sm:$0xff] %v230_v46 }
  0xbc   : > { %v254_v47 = vpop.permute.xlu1 %253 }
  0xbd   : > { %v248_v48 = vpop.permute.xlu0 %247  ;;  %365 = vst [vmem:[%s621_s25 + $0xd0] sm:$0xff] %v254_v47 }
  0xbe   : > { %363 = vst [vmem:[%s621_s25 + $0xc0] sm:$0xff] %v248_v48 }
  0xc5   : > { %v266_v49 = vpop.permute.xlu0 %265 }
  0xc6   : > { %369 = vst [vmem:[%s621_s25 + $0xf0] sm:$0xff] %v266_v49 }
  0xc7 PF: > { %s10_s8 = sadd.s32 1, %s535_s8   ;;  %s650_s6 = smov %s531_s7 }
  0xc8   : > { %p7_p5 = scmp.ge.s32.totalorder %s10_s8, 4   ;;  %s651_s7 = smov %s653_s10 }
  0xca   :  { %9 = sbr.rel (!%p7_p5) target bundleno = 7 (0x7), region = 148 }

// kernel: model_forward.35
= control target key start
LH: loop header
LB: loop body
LE: loop exit
PB: predicated region body
PF: predicated region fallthrough
CT: control target
= control target key end

     0   :  { %s548_s0 = inlined_call_operand.vmem [shape: f32[8,4096], index: 0, kind: input, shape index: {}]   ;;  %s549_s1 = inlined_call_operand.vmem [shape: f32[8,4096], index: 1, kind: output, shape index: {}]  }
   0x1   :  { %v199_v0 = vld [vmem:[%s548_s0] sm:$0xff]  ;;  %v204_v1 = vld [vmem:[%s548_s0 + $0x8] sm:$0xff]  ;;  %v209_v2 = vld [vmem:[%s548_s0 + $0x10] sm:$0xff] }
   0x2   :  { %v214_v3 = vld [vmem:[%s548_s0 + $0x18] sm:$0xff]  ;;  %v40_v4 = vmul.f32 %v199_v0, %v199_v0  ;;  %v41_v5 = vmul.f32 %v204_v1, %v204_v1  ;;  %v42_v6 = vmul.f32 %v209_v2, %v209_v2  ;;  %v225_v7 = vld [vmem:[%s548_s0 + $0x20] sm:$0xff]  ;;  %v232_v10 = vld [vmem:[%s548_s0 + $0x28] sm:$0xff] }
   0x3   :  { %v43_v8 = vmul.f32 %v214_v3, %v214_v3  ;;  %v44_v11 = vmul.f32 %v225_v7, %v225_v7  ;;  %v239_v13 = vld [vmem:[%s548_s0 + $0x30] sm:$0xff]  ;;  %v45_v14 = vmul.f32 %v232_v10, %v232_v10  ;;  %v246_v16 = vld [vmem:[%s548_s0 + $0x38] sm:$0xff]  ;;  %v253_v19 = vld [vmem:[%s548_s0 + $0x40] sm:$0xff] }
   0x4   :  { %v72_v9 = vadd.f32 %v41_v5, %v40_v4  ;;  %v46_v17 = vmul.f32 %v239_v13, %v239_v13  ;;  %v47_v20 = vmul.f32 %v246_v16, %v246_v16  ;;  %v260_v22 = vld [vmem:[%s548_s0 + $0x48] sm:$0xff]  ;;  %v48_v23 = vmul.f32 %v253_v19, %v253_v19  ;;  %v267_v25 = vld [vmem:[%s548_s0 + $0x50] sm:$0xff]  ;;  %v274_v28 = vld [vmem:[%s548_s0 + $0x58] sm:$0xff] }
   0x5   :  { %v49_v26 = vmul.f32 %v260_v22, %v260_v22  ;;  %v50_v29 = vmul.f32 %v267_v25, %v267_v25  ;;  %v281_v31 = vld [vmem:[%s548_s0 + $0x60] sm:$0xff]  ;;  %v51_v32 = vmul.f32 %v274_v28, %v274_v28  ;;  %v288_v34 = vld [vmem:[%s548_s0 + $0x68] sm:$0xff]  ;;  %v295_v37 = vld [vmem:[%s548_s0 + $0x70] sm:$0xff] }
   0x6   :  { %v73_v12 = vadd.f32 %v72_v9, %v42_v6  ;;  %v52_v35 = vmul.f32 %v281_v31, %v281_v31  ;;  %v53_v38 = vmul.f32 %v288_v34, %v288_v34  ;;  %v302_v40 = vld [vmem:[%s548_s0 + $0x78] sm:$0xff]  ;;  %v54_v41 = vmul.f32 %v295_v37, %v295_v37  ;;  %v309_v43 = vld [vmem:[%s548_s0 + $0x80] sm:$0xff]  ;;  %v316_v46 = vld [vmem:[%s548_s0 + $0x88] sm:$0xff] }
   0x7   :  { %v55_v44 = vmul.f32 %v302_v40, %v302_v40  ;;  %v56_v47 = vmul.f32 %v309_v43, %v309_v43  ;;  %v323_v49 = vld [vmem:[%s548_s0 + $0x90] sm:$0xff]  ;;  %v57_v50 = vmul.f32 %v316_v46, %v316_v46  ;;  %v330_v52 = vld [vmem:[%s548_s0 + $0x98] sm:$0xff]  ;;  %v337_v55 = vld [vmem:[%s548_s0 + $0xa0] sm:$0xff] }
   0x8   :  { %v74_v15 = vadd.f32 %v73_v12, %v43_v8  ;;  %v58_v53 = vmul.f32 %v323_v49, %v323_v49  ;;  %v59_v56 = vmul.f32 %v330_v52, %v330_v52  ;;  %v344_v58 = vld [vmem:[%s548_s0 + $0xa8] sm:$0xff]  ;;  %v60_v59 = vmul.f32 %v337_v55, %v337_v55  ;;  %v351_v61 = vld [vmem:[%s548_s0 + $0xb0] sm:$0xff]  ;;  %v358_v4 = vld [vmem:[%s548_s0 + $0xb8] sm:$0xff] }
   0x9   :  { %v61_v62 = vmul.f32 %v344_v58, %v344_v58  ;;  %v62_v5 = vmul.f32 %v351_v61, %v351_v61  ;;  %v365_v8 = vld [vmem:[%s548_s0 + $0xc0] sm:$0xff]  ;;  %v63_v9 = vmul.f32 %v358_v4, %v358_v4  ;;  %v372_v12 = vld [vmem:[%s548_s0 + $0xc8] sm:$0xff] }
   0xa   :  { %v75_v18 = vadd.f32 %v74_v15, %v44_v11 }
   0xc   :  { %v76_v21 = vadd.f32 %v75_v18, %v45_v14  ;;  %v64_v14 = vmul.f32 %v365_v8, %v365_v8  ;;  %v65_v18 = vmul.f32 %v372_v12, %v372_v12 }
   0xe   :  { %v77_v24 = vadd.f32 %v76_v21, %v46_v17  ;;  %v379_v17 = vld [vmem:[%s548_s0 + $0xd0] sm:$0xff]  ;;  %v386_v21 = vld [vmem:[%s548_s0 + $0xd8] sm:$0xff] }
  0x10   :  { %v78_v27 = vadd.f32 %v77_v24, %v47_v20 }
  0x12   :  { %v79_v30 = vadd.f32 %v78_v27, %v48_v23  ;;  %v66_v23 = vmul.f32 %v379_v17, %v379_v17  ;;  %v67_v27 = vmul.f32 %v386_v21, %v386_v21 }
  0x14   :  { %v80_v33 = vadd.f32 %v79_v30, %v49_v26  ;;  %v393_v26 = vld [vmem:[%s548_s0 + $0xe0] sm:$0xff]  ;;  %v400_v30 = vld [vmem:[%s548_s0 + $0xe8] sm:$0xff] }
  0x16   :  { %v81_v36 = vadd.f32 %v80_v33, %v50_v29 }
  0x18   :  { %v82_v39 = vadd.f32 %v81_v36, %v51_v32  ;;  %v68_v32 = vmul.f32 %v393_v26, %v393_v26  ;;  %v69_v36 = vmul.f32 %v400_v30, %v400_v30 }
  0x1a   :  { %v83_v42 = vadd.f32 %v82_v39, %v52_v35  ;;  %v407_v35 = vld [vmem:[%s548_s0 + $0xf0] sm:$0xff]  ;;  %v414_v39 = vld [vmem:[%s548_s0 + $0xf8] sm:$0xff] }
  0x1c   :  { %v84_v45 = vadd.f32 %v83_v42, %v53_v38 }
  0x1e   :  { %v85_v48 = vadd.f32 %v84_v45, %v54_v41  ;;  %v70_v41 = vmul.f32 %v407_v35, %v407_v35 }
  0x20   :  { %v86_v51 = vadd.f32 %v85_v48, %v55_v44  ;;  %v71_v44 = vmul.f32 %v414_v39, %v414_v39 }
  0x22   :  { %v87_v54 = vadd.f32 %v86_v51, %v56_v47 }
  0x24   :  { %v88_v57 = vadd.f32 %v87_v54, %v57_v50 }
  0x26   :  { %v89_v60 = vadd.f32 %v88_v57, %v58_v53 }
  0x28   :  { %v90_v63 = vadd.f32 %v89_v60, %v59_v56 }
  0x2a   :  { %v91_v6 = vadd.f32 %v90_v63, %v60_v59 }
  0x2c   :  { %v92_v11 = vadd.f32 %v91_v6, %v61_v62 }
  0x2e   :  { %v93_v15 = vadd.f32 %v92_v11, %v62_v5 }
  0x30   :  { %v94_v20 = vadd.f32 %v93_v15, %v63_v9 }
  0x32   :  { %v95_v24 = vadd.f32 %v94_v20, %v64_v14 }
  0x34   :  { %v96_v29 = vadd.f32 %v95_v24, %v65_v18 }
  0x36   :  { %v97_v33 = vadd.f32 %v96_v29, %v66_v23 }
  0x38   :  { %v98_v38 = vadd.f32 %v97_v33, %v67_v27 }
  0x3a   :  { %v99_v42 = vadd.f32 %v98_v38, %v68_v32 }
  0x3c   :  { %v100_v45 = vadd.f32 %v99_v42, %v69_v36 }
  0x3e   :  { %v101_v47 = vadd.f32 %v100_v45, %v70_v41 }
  0x40   :  { %v102_v48 = vadd.f32 %v101_v47, %v71_v44 }
  0x42   :  { %103 = vadd.xlane.f32.xlu0 %v102_v48 }
  0xb5   :  { %v104_v50 = vpop.xlane.xlu0 %103 }
  0xb6   :  { %v105_v51 = vmax.f32 %v104_v50, 1e-12 }
  0xb8   :  { %184 = vrsqrt.f32 %v105_v51  ;;  %vm112_vm1 = vweird.f32 %v105_v51 }
  0xbe   :  { %v185_v53 = vpop.eup %184 }
  0xbf   :  { %v107_v54 = vmul.f32 %v185_v53, %v105_v51  ;;  %vm113_vm0 = vweird.f32 %v185_v53 }
  0xc0   :  { %vm114_vm2 = vmor %vm112_vm1, %vm113_vm0 }
  0xc1   :  { %v108_v56 = vmul.f32 %v185_v53, %v107_v54 }
  0xc3   :  { %v109_v57 = vmul.f32 0.5, %v108_v56 }
  0xc5   :  { %v110_v59 = vsub.f32 1.5, %v109_v57 }
  0xc7   :  { %v111_v60 = vmul.f32 %v185_v53, %v110_v59 }
  0xc9   :  { %v115_v62 = vsel %vm114_vm2, %v185_v53, %v111_v60 }
  0xca   :  { %v116_v63 = vmul.f32 %v115_v62, %v199_v0  ;;  %v117_v5 = vmul.f32 %v115_v62, %v204_v1  ;;  %v118_v6 = vmul.f32 %v115_v62, %v209_v2  ;;  %v119_v9 = vmul.f32 %v115_v62, %v214_v3 }
  0xcb   :  { %v120_v11 = vmul.f32 %v115_v62, %v225_v7  ;;  %v121_v14 = vmul.f32 %v115_v62, %v232_v10  ;;  %v122_v0 = vmul.f32 %v115_v62, %v239_v13  ;;  %v123_v1 = vmul.f32 %v115_v62, %v246_v16 }
  0xcc   :  { %148 = vst [vmem:[%s549_s1] sm:$0xff] %v116_v63  ;;  %v124_v2 = vmul.f32 %v115_v62, %v253_v19  ;;  %v125_v3 = vmul.f32 %v115_v62, %v260_v22  ;;  %v126_v7 = vmul.f32 %v115_v62, %v267_v25  ;;  %v127_v10 = vmul.f32 %v115_v62, %v274_v28 }
  0xcd   :  { %149 = vst [vmem:[%s549_s1 + $0x8] sm:$0xff] %v117_v5  ;;  %v128_v13 = vmul.f32 %v115_v62, %v281_v31  ;;  %v129_v16 = vmul.f32 %v115_v62, %v288_v34  ;;  %v130_v19 = vmul.f32 %v115_v62, %v295_v37  ;;  %v131_v22 = vmul.f32 %v115_v62, %v302_v40 }
  0xce   :  { %150 = vst [vmem:[%s549_s1 + $0x10] sm:$0xff] %v118_v6  ;;  %v132_v25 = vmul.f32 %v115_v62, %v309_v43  ;;  %v133_v28 = vmul.f32 %v115_v62, %v316_v46  ;;  %v134_v31 = vmul.f32 %v115_v62, %v323_v49  ;;  %v135_v34 = vmul.f32 %v115_v62, %v330_v52 }
  0xcf   :  { %151 = vst [vmem:[%s549_s1 + $0x18] sm:$0xff] %v119_v9  ;;  %v136_v37 = vmul.f32 %v115_v62, %v337_v55  ;;  %v137_v40 = vmul.f32 %v115_v62, %v344_v58  ;;  %v138_v43 = vmul.f32 %v115_v62, %v351_v61  ;;  %v139_v46 = vmul.f32 %v115_v62, %v358_v4 }
  0xd0   :  { %152 = vst [vmem:[%s549_s1 + $0x20] sm:$0xff] %v120_v11  ;;  %v140_v49 = vmul.f32 %v115_v62, %v365_v8  ;;  %v141_v52 = vmul.f32 %v115_v62, %v372_v12  ;;  %v142_v55 = vmul.f32 %v115_v62, %v379_v17  ;;  %v143_v58 = vmul.f32 %v115_v62, %v386_v21 }
  0xd1   :  { %153 = vst [vmem:[%s549_s1 + $0x28] sm:$0xff] %v121_v14  ;;  %v144_v61 = vmul.f32 %v115_v62, %v393_v26  ;;  %v145_v4 = vmul.f32 %v115_v62, %v400_v30  ;;  %v146_v8 = vmul.f32 %v115_v62, %v407_v35  ;;  %v147_v12 = vmul.f32 %v115_v62, %v414_v39 }
  0xd2   :  { %154 = vst [vmem:[%s549_s1 + $0x30] sm:$0xff] %v122_v0 }
  0xd3   :  { %155 = vst [vmem:[%s549_s1 + $0x38] sm:$0xff] %v123_v1 }
  0xd4   :  { %156 = vst [vmem:[%s549_s1 + $0x40] sm:$0xff] %v124_v2 }
  0xd5   :  { %157 = vst [vmem:[%s549_s1 + $0x48] sm:$0xff] %v125_v3 }
  0xd6   :  { %158 = vst [vmem:[%s549_s1 + $0x50] sm:$0xff] %v126_v7 }
  0xd7   :  { %159 = vst [vmem:[%s549_s1 + $0x58] sm:$0xff] %v127_v10 }
  0xd8   :  { %160 = vst [vmem:[%s549_s1 + $0x60] sm:$0xff] %v128_v13 }
  0xd9   :  { %161 = vst [vmem:[%s549_s1 + $0x68] sm:$0xff] %v129_v16 }
  0xda   :  { %162 = vst [vmem:[%s549_s1 + $0x70] sm:$0xff] %v130_v19 }
  0xdb   :  { %163 = vst [vmem:[%s549_s1 + $0x78] sm:$0xff] %v131_v22 }
  0xdc   :  { %164 = vst [vmem:[%s549_s1 + $0x80] sm:$0xff] %v132_v25 }
  0xdd   :  { %165 = vst [vmem:[%s549_s1 + $0x88] sm:$0xff] %v133_v28 }
  0xde   :  { %166 = vst [vmem:[%s549_s1 + $0x90] sm:$0xff] %v134_v31 }
  0xdf   :  { %167 = vst [vmem:[%s549_s1 + $0x98] sm:$0xff] %v135_v34 }
  0xe0   :  { %168 = vst [vmem:[%s549_s1 + $0xa0] sm:$0xff] %v136_v37 }
  0xe1   :  { %169 = vst [vmem:[%s549_s1 + $0xa8] sm:$0xff] %v137_v40 }
  0xe2   :  { %170 = vst [vmem:[%s549_s1 + $0xb0] sm:$0xff] %v138_v43 }
  0xe3   :  { %171 = vst [vmem:[%s549_s1 + $0xb8] sm:$0xff] %v139_v46 }
  0xe4   :  { %172 = vst [vmem:[%s549_s1 + $0xc0] sm:$0xff] %v140_v49 }
  0xe5   :  { %173 = vst [vmem:[%s549_s1 + $0xc8] sm:$0xff] %v141_v52 }
  0xe6   :  { %174 = vst [vmem:[%s549_s1 + $0xd0] sm:$0xff] %v142_v55 }
  0xe7   :  { %175 = vst [vmem:[%s549_s1 + $0xd8] sm:$0xff] %v143_v58 }
  0xe8   :  { %176 = vst [vmem:[%s549_s1 + $0xe0] sm:$0xff] %v144_v61 }
  0xe9   :  { %177 = vst [vmem:[%s549_s1 + $0xe8] sm:$0xff] %v145_v4 }
  0xea   :  { %178 = vst [vmem:[%s549_s1 + $0xf0] sm:$0xff] %v146_v8 }
  0xeb   :  { %179 = vst [vmem:[%s549_s1 + $0xf8] sm:$0xff] %v147_v12 }

// kernel: reverse.19
= control target key start
LH: loop header
LB: loop body
LE: loop exit
PB: predicated region body
PF: predicated region fallthrough
CT: control target
= control target key end

     0   :  { %v2_v0 = vlaneseq  ;;  %s379_s0 = inlined_call_operand.vmem [shape: f32[2,4,4096], index: 0, kind: input, shape index: {}]   ;;  %s380_s1 = inlined_call_operand.vmem [shape: f32[2,4,4096], index: 1, kind: output, shape index: {}]  }
   0x2   :  { %v3_v1 = vsub.s32 127, %v2_v0 }
   0x4   :  { %4 = vset.pattern.permute.xlu0 %v3_v1 }
   0x5   :  { %s339_s6 = smov 0   ;;  %s341_s7 = smov 0  }
   0x6   :  { %s343_s8 = smov 0  }
   0x7 LB: > { %s267_s9 = sadd.s32 4294967295, %s327_s8   ;;  %s22_s10 = sadd.s32 1, %s323_s7  ;;  %s327_s8 = sphi %s343_s8, %s10_s8   ;;  %s323_s7 = sphi %s341_s7, %s382_s7   ;;  %s319_s6 = sphi %s339_s6, %s381_s6  }
   0x8   : > { %p23_p0 = scmp.ge.s32.totalorder %s22_s10, 32  ;;  %p269_p1 = scmp.ge.s32.totalorder %s327_s8, 32 }
   0x9   : > { %s45_s11 = sand.u32 (!%p269_p1), 1, %s327_s8   ;;  %s48_s12 = ssub.s32 (!%p269_p1), 31, %s323_s7 }
   0xa   : > { %s384_s10 = smov (%p23_p0, %s22_s10), 0  ;;  %43 = sbr.rel (%p269_p1) target bundleno = 18 (0x12), region = 16 }
   0xb   : > { %s270_s13 = sshll.u32 (!%p269_p1), %s45_s11, 3  ;;  %s271_s14 = sshll.u32 (!%p269_p1), %s48_s12, 2 }
   0xc   : > { %s55_s17 = scalar_lea.vmem (!%p269_p1), %s379_s0, %s271_s14  ;;  %s47_s18 = scalar_lea.vmem (!%p269_p1), [#allocation1], %s270_s13 }
   0xf   : > { %v72_v2 = vld [vmem:[%s55_s17] sm:$0xf] }
  0x10   : > { %v74_v3 = vld [vmem:[%s55_s17 + $0x80] sm:$0xf]  ;;  %73 = vst [vmem:[%s47_s18] sm:$0xf] %v72_v2 }
  0x11   : > { %75 = vst [vmem:[%s47_s18 + $0x4] sm:$0xf] %v74_v3 }
  0x12 PF: > { %p272_p2 = scmp.ge.s32.totalorder %s327_s8, 1  ;;  %p102_p3 = scmp.lt.s32.totalorder %s327_s8, 33 }
  0x14   : > { %p103_p4 = pnand %p272_p2, %p102_p3 }
  0x15   : > { %s113_s19 = sand.u32 (!%p103_p4), 1, %s267_s9   ;;  %s278_s23 = sshll.u32 (!%p103_p4), %s319_s6, 2 }
  0x16   : > { %106 = sbr.rel (%p103_p4) target bundleno = 177 (0xb1), region = 57  ;;  %s273_s20 = sshll.u32 (!%p103_p4), %s113_s19, 3 }
  0x17   : > { %s115_s21 = scalar_lea.vmem (!%p103_p4), [#allocation1], %s273_s20  ;;  %s119_s22 = scalar_lea.vmem (!%p103_p4), [#allocation3], %s273_s20 }
  0x18   : > { %s163_s26 = scalar_lea.vmem (!%p103_p4), %s380_s1, %s278_s23 }
  0x1b   : > { %v126_v4 = vld [vmem:[%s115_s21] sm:$0xf]  ;;  %v275_v5 = vld [vmem:[%s115_s21 + $0x4] sm:$0xf] }
  0x1c   : > { %127 = vst [vmem:[#allocation0] sm:$0xf] %v126_v4 }
  0x1d   : > { %125 = vst [vmem:[#allocation0 + $0x8] sm:$0xf] %v275_v5 }
  0x23   : > { %v131_v6 = vld [vmem:[#allocation0] sm:$0xff] }
  0x24   : > { %132 = vperm.xlu0 %4, %v131_v6   ;;  %v137_v7 = vld [vmem:[#allocation0 + $0x8] sm:$0xff] }
  0x2c   : > { %138 = vperm.xlu0 %4, %v137_v7  }
  0x96   : > { %v133_v8 = vpop.permute.xlu0 %132 }
  0x97   : > { %134 = vst [vmem:[#allocation2 + $0x8] sm:$0xff] %v133_v8 }
  0x9e   : > { %v143_v9 = vld [vmem:[#allocation2 + $0x8] sm:$0xf]  ;;  %v139_v10 = vpop.permute.xlu0 %138 }
  0x9f   : > { %146 = vst [vmem:[%s119_s22] sm:$0xf] %v143_v9 }
  0xa0   : > { %140 = vst [vmem:[#allocation2] sm:$0xff] %v139_v10 }
  0xa6   : > { %v180_v11 = vld [vmem:[%s119_s22] sm:$0xf] }
  0xa7   : > { %v148_v12 = vld [vmem:[#allocation2] sm:$0xf]  ;;  %181 = vst [vmem:[%s163_s26] sm:$0xf] %v180_v11 }
  0xa8   : > { %276 = vst [vmem:[%s119_s22 + $0x4] sm:$0xf] %v148_v12 }
  0xaf   : > { %v182_v13 = vld [vmem:[%s119_s22 + $0x4] sm:$0xf] }
  0xb0   : > { %183 = vst [vmem:[%s163_s26 + $0x80] sm:$0xf] %v182_v13 }
  0xb1 PF: > { %s10_s8 = sadd.s32 1, %s327_s8   ;;  %s381_s6 = smov %s323_s7 }
  0xb2   : > { %p7_p5 = scmp.ge.s32.totalorder %s10_s8, 34   ;;  %s382_s7 = smov %s384_s10 }
  0xb4   :  { %9 = sbr.rel (!%p7_p5) target bundleno = 7 (0x7), region = 130 }

</bundles_post_ra>
